<compile_context>
chip_gen: v7x
topology: tpu7x:2x2x1
jax: 0.10.0
libtpu: 0.0.40
codegen_flags: <defaults>
</compile_context>

<pallas_src>
import jax
import jax.numpy as jnp
from jax.experimental import pallas as pl
from jax.experimental.pallas import tpu as pltpu

EPS = 1e-5
LANE = 128
PADL = 8          # left halo width (sublane-aligned interior store offset)

# Conv matmul operand dtype.  For production shapes on v5e/v6e/v7x set this to
# jnp.bfloat16 (native MXU rate, half the VMEM/HBM traffic for activations,
# pad scratch and weights); accumulation stays f32 via preferred_element_type
# and BN statistics stay f32 either way.  Kept f32 here so the toy-shape check
# matches the f32 reference to 1e-3.
CONV_DTYPE = jnp.float32


def _round_up(v, m):
    return (v + m - 1) // m * m


def _vmem_limit_bytes():
    # Per-generation VMEM cap with headroom for the compiler:
    # ~96 MiB on v5e/v6e (128 MiB physical), ~48 MiB on v7x (64 MiB physical).
    cap = 64 * 1024 * 1024
    try:
        cap = int(getattr(pltpu.get_tpu_info(), "vmem_capacity_bytes", cap))
    except Exception:
        pass
    return min(cap * 3 // 4, 112 * 1024 * 1024)


def residual_block_kernel(x_ref, w1_ref, g1_ref, be1_ref,
                          w2_ref, g2_ref, be2_ref,
                          out_ref, pad_ref):
    N, H, W, CP = x_ref.shape
    _, _, WPAD, _ = pad_ref.shape
    M = N * H * W
    zdt = pad_ref.dtype
    inv_m = jnp.float32(1.0 / M)

    # --- hoist parameter loads once -----------------------------------------
    w1 = w1_ref[...]                      # (9, CP, CP), CONV_DTYPE
    w2 = w2_ref[...]
    g1, be1 = g1_ref[...], be1_ref[...]   # (1, CP), f32
    g2, be2 = g2_ref[...], be2_ref[...]

    # --- zero only the halo of the padded scratch, once ---------------------
    pad_ref[:, 0:1, :, :] = jnp.zeros((N, 1, WPAD, CP), zdt)
    pad_ref[:, H + 1:H + 2, :, :] = jnp.zeros((N, 1, WPAD, CP), zdt)
    pad_ref[:, :, PADL - 1:PADL, :] = jnp.zeros((N, H + 2, 1, CP), zdt)
    pad_ref[:, :, PADL + W:PADL + W + 1, :] = jnp.zeros((N, H + 2, 1, CP), zdt)

    def store_interior(act_nhwc):
        # Interior starts at sublane-aligned offset PADL=8 and spans a multiple
        # of 8 columns -> unmasked vst.
        pad_ref[:, 1:H + 1, PADL:PADL + W, :] = act_nhwc.astype(zdt)

    def conv3x3(w):
        """3x3 SAME conv of the activation currently in pad_ref's interior.

        Split-K accumulation over the 9 taps: each tap is a (M, CP) x (CP, CP)
        MXU matmul accumulated in f32.  No (M, 9*CP) im2col buffer.
        TODO(synk): with bf16 operands on v6e/v7x, pair adjacent taps
        (concatenate two windows / weight blocks) so each dot contracts
        K = 2*CP = 256 and fills the 256-deep MXU; K = CP is already native
        on v5e's 128-deep MXU, so keep 9 taps there.
        """
        acc = jnp.zeros((M, CP), jnp.float32)
        for kh in range(3):
            for kw in range(3):
                c0 = PADL - 1 + kw
                win = pad_ref[:, kh:kh + H, c0:c0 + W, :]
                acc = acc + jnp.dot(win.reshape(M, CP), w[kh * 3 + kw],
                                    preferred_element_type=jnp.float32)
        return acc

    def bn_affine(y, g, be):
        """Training-mode BN folded into one FMA pass: y * s + t.

        Moments are plain VPU/XLU reductions (no MXU gemvs); biased variance,
        eps = 1e-5, statistics over all N*H*W rows, kept in f32.
        """
        mean = jnp.sum(y, axis=0, keepdims=True) * inv_m
        var = jnp.sum(y * y, axis=0, keepdims=True) * inv_m - mean * mean
        s = g * jax.lax.rsqrt(var + EPS)
        t = be - mean * s
        return y * s + t

    # conv1 -> BN1 -> ReLU  (conv bias is exactly cancelled by training-mode BN)
    store_interior(x_ref[...])
    a1 = jnp.maximum(bn_affine(conv3x3(w1), g1, be1), 0.0)

    # conv2 -> BN2 -> +residual -> ReLU  (BN1+ReLU written straight back into
    # the padded scratch; residual re-read from x_ref to keep live ranges short)
    store_interior(a1.reshape(N, H, W, CP))
    y2 = bn_affine(conv3x3(w2), g2, be2)
    res = x_ref[...].astype(jnp.float32).reshape(M, CP)
    out = jnp.maximum(y2 + res, 0.0)
    out_ref[...] = out.reshape(N, H, W, CP).astype(out_ref.dtype)


def residual_block(x_nchw, params):
    """PyTorch-layout wrapper: NCHW in / NCHW out."""
    # Conv biases (params[1], params[5]) are NOT passed to the kernel: under
    # training-mode BatchNorm they are exactly cancelled by the mean
    # subtraction, so adding them is dead per-element work.
    w1, _b1, g1, be1, w2, _b2, g2, be2 = params
    # TODO(synk): keep activations NHWC + channel-padded (and bf16) end-to-end
    # across layers to avoid these boundary transposes / pad / slice, which are
    # pure HBM traffic at real ResNet sizes.
    x = jnp.transpose(x_nchw, (0, 2, 3, 1)).astype(jnp.float32)   # NHWC
    N, H, W, C = x.shape
    CP = _round_up(max(C, LANE), LANE)         # lane-dense channel padding
    WPAD = _round_up(W + PADL + 1, 8)          # 8-col left halo + 1-col right

    def pad_last(a, fill=0.0):
        return jnp.pad(a, [(0, 0)] * (a.ndim - 1) + [(0, CP - a.shape[-1])],
                       constant_values=fill)

    xp = pad_last(x)                           # (N, H, W, CP) f32

    def prep_w(w):                             # HWIO (3,3,C,C) -> (9, CP, CP)
        wp = jnp.pad(w, ((0, 0), (0, 0), (0, CP - C), (0, CP - C)))
        return wp.reshape(9, CP, CP).astype(CONV_DTYPE)

    def prep_v(v, fill=0.0):                   # (1,1,1,C) -> (1, CP) f32
        return pad_last(v.reshape(1, C).astype(jnp.float32), fill)

    w1p, w2p = prep_w(w1), prep_w(w2)
    g1p, g2p = prep_v(g1, 1.0), prep_v(g2, 1.0)
    be1p, be2p = prep_v(be1), prep_v(be2)

    def full_spec(shape):
        n = len(shape)
        return pl.BlockSpec(shape, lambda i, _n=n: (0,) * _n)

    # TODO(synk): for production ResNet shapes, tile the grid over N / H row
    # blocks (1-row halo), mark that axis "parallel" (v7x has 2 TensorCores),
    # restructure BN as a two-phase partial-stats + normalize reduction, and
    # rely on BlockSpec double-buffering (pl.Buffered(3) if DMA stays exposed).
    # grid=(1,) is only appropriate while the whole activation fits in VMEM
    # (it does comfortably at this toy size).
    out = pl.pallas_call(
        residual_block_kernel,
        out_shape=jax.ShapeDtypeStruct((N, H, W, CP), jnp.float32),
        grid=(1,),
        in_specs=[full_spec((N, H, W, CP)),
                  full_spec(w1p.shape), full_spec(g1p.shape),
                  full_spec(be1p.shape),
                  full_spec(w2p.shape), full_spec(g2p.shape),
                  full_spec(be2p.shape)],
        out_specs=full_spec((N, H, W, CP)),
        scratch_shapes=[pltpu.VMEM((N, H + 2, WPAD, CP), CONV_DTYPE)],
        compiler_params=pltpu.CompilerParams(
            dimension_semantics=("arbitrary",),
            vmem_limit_bytes=_vmem_limit_bytes()),
    )(xp, w1p, g1p, be1p, w2p, g2p, be2p)

    out = out[..., :C]                         # drop channel padding
    return jnp.transpose(out, (0, 3, 1, 2))    # NHWC -> NCHW


def residual_block_reference(x_nchw, params):
    # pure-JAX reference for validation (keeps the conv bias, like PyTorch)
    w1, b1, g1, be1, w2, b2, g2, be2 = params
    x = jnp.transpose(x_nchw, (0, 2, 3, 1)).astype(jnp.float32)

    def conv(inp, w, b):
        y = jax.lax.conv_general_dilated(
            inp, w, window_strides=(1, 1), padding='SAME',
            dimension_numbers=('NHWC', 'HWIO', 'NHWC'))
        return y + b.reshape(1, 1, 1, -1)

    def bn(y, g, be):
        mean = jnp.mean(y, axis=(0, 1, 2), keepdims=True)
        var = jnp.mean((y - mean) ** 2, axis=(0, 1, 2), keepdims=True)
        return (y - mean) * jax.lax.rsqrt(var + EPS) * g + be

    out = jax.nn.relu(bn(conv(x, w1, b1), g1, be1))
    out = bn(conv(out, w2, b2), g2, be2)
    out = jax.nn.relu(out + x)
    return jnp.transpose(out, (0, 3, 1, 2))


def init_params(key, channels):
    ks = jax.random.split(key, 6)
    c = channels
    w1 = 0.1 * jax.random.normal(ks[0], (3, 3, c, c), jnp.float32)   # HWIO
    b1 = 0.05 * jax.random.normal(ks[1], (1, 1, 1, c), jnp.float32)
    g1 = 1.0 + 0.1 * jax.random.normal(ks[2], (1, 1, 1, c), jnp.float32)
    be1 = 0.1 * jax.random.normal(ks[3], (1, 1, 1, c), jnp.float32)
    w2 = 0.1 * jax.random.normal(ks[4], (3, 3, c, c), jnp.float32)
    b2 = 0.05 * jax.random.normal(ks[5], (1, 1, 1, c), jnp.float32)
    g2 = jnp.ones((1, 1, 1, c), jnp.float32)
    be2 = jnp.zeros((1, 1, 1, c), jnp.float32)
    return (w1, b1, g1, be1, w2, b2, g2, be2)


if __name__ == "__main__":
    key = jax.random.PRNGKey(0)
    k_x, k_p = jax.random.split(key)

    N, C, H, W = 2, 4, 16, 16               # NCHW, PyTorch convention
    x = jax.random.normal(k_x, (N, C, H, W), jnp.float32)
    params = init_params(k_p, C)

    out = jax.block_until_ready(residual_block(x, params))
    ref = jax.block_until_ready(residual_block_reference(x, params))

    assert out.shape == (N, C, H, W)
    assert jnp.allclose(out, ref, atol=1e-3, rtol=1e-3), \
        f"max abs err {jnp.max(jnp.abs(out - ref))}"

    print("KERNEL_OK")
</pallas_src>

<mosaic_0001>
module attributes {stable_mosaic.version = 11 : i64} {
  func.func @residual_block_kernel(%arg0: i32, %arg1: memref<2x16x16x128xf32, #tpu.memory_space<vmem>>, %arg2: memref<9x128x128xf32, #tpu.memory_space<vmem>>, %arg3: memref<1x128xf32, #tpu.memory_space<vmem>>, %arg4: memref<1x128xf32, #tpu.memory_space<vmem>>, %arg5: memref<9x128x128xf32, #tpu.memory_space<vmem>>, %arg6: memref<1x128xf32, #tpu.memory_space<vmem>>, %arg7: memref<1x128xf32, #tpu.memory_space<vmem>>, %arg8: memref<2x16x16x128xf32, #tpu.memory_space<vmem>>, %arg9: memref<2x18x32x128xf32, #tpu.memory_space<vmem>>) attributes {dimension_semantics = [#tpu.dimension_semantics<arbitrary>], iteration_bounds = array<i64: 1>, scalar_prefetch = 0 : i64, scratch_operands = 1 : i64, tpu.core_type = #tpu.core_type<tc>, window_params = [{pipeline_mode = #tpu.pipeline_mode<synchronous>, transform_indices = @transform_0, window_bounds = array<i64: 2, 16, 16, 128>}, {pipeline_mode = #tpu.pipeline_mode<synchronous>, transform_indices = @transform_1, window_bounds = array<i64: 9, 128, 128>}, {pipeline_mode = #tpu.pipeline_mode<synchronous>, transform_indices = @transform_2, window_bounds = array<i64: 1, 128>}, {pipeline_mode = #tpu.pipeline_mode<synchronous>, transform_indices = @transform_3, window_bounds = array<i64: 1, 128>}, {pipeline_mode = #tpu.pipeline_mode<synchronous>, transform_indices = @transform_4, window_bounds = array<i64: 9, 128, 128>}, {pipeline_mode = #tpu.pipeline_mode<synchronous>, transform_indices = @transform_5, window_bounds = array<i64: 1, 128>}, {pipeline_mode = #tpu.pipeline_mode<synchronous>, transform_indices = @transform_6, window_bounds = array<i64: 1, 128>}, {pipeline_mode = #tpu.pipeline_mode<synchronous>, transform_indices = @transform_7, window_bounds = array<i64: 2, 16, 16, 128>}]} {
    %c0 = arith.constant 0 : index
    %c0_0 = arith.constant 0 : index
    %c0_1 = arith.constant 0 : index
    %0 = vector.load %arg2[%c0, %c0_0, %c0_1] : memref<9x128x128xf32, #tpu.memory_space<vmem>>, vector<9x128x128xf32>
    %c0_2 = arith.constant 0 : index
    %c0_3 = arith.constant 0 : index
    %c0_4 = arith.constant 0 : index
    %1 = vector.load %arg5[%c0_2, %c0_3, %c0_4] : memref<9x128x128xf32, #tpu.memory_space<vmem>>, vector<9x128x128xf32>
    %c0_5 = arith.constant 0 : index
    %c0_6 = arith.constant 0 : index
    %2 = vector.load %arg3[%c0_5, %c0_6] : memref<1x128xf32, #tpu.memory_space<vmem>>, vector<1x128xf32>
    %c0_7 = arith.constant 0 : index
    %c0_8 = arith.constant 0 : index
    %3 = vector.load %arg4[%c0_7, %c0_8] : memref<1x128xf32, #tpu.memory_space<vmem>>, vector<1x128xf32>
    %c0_9 = arith.constant 0 : index
    %c0_10 = arith.constant 0 : index
    %4 = vector.load %arg6[%c0_9, %c0_10] : memref<1x128xf32, #tpu.memory_space<vmem>>, vector<1x128xf32>
    %c0_11 = arith.constant 0 : index
    %c0_12 = arith.constant 0 : index
    %5 = vector.load %arg7[%c0_11, %c0_12] : memref<1x128xf32, #tpu.memory_space<vmem>>, vector<1x128xf32>
    %cst = arith.constant 0.000000e+00 : f32
    %6 = vector.broadcast %cst : f32 to vector<2x1x32x128xf32>
    %c0_13 = arith.constant 0 : index
    %c0_14 = arith.constant 0 : index
    %c0_15 = arith.constant 0 : index
    %c0_16 = arith.constant 0 : index
    %7 = vector.load %arg9[%c0_13, %c0_14, %c0_15, %c0_16] : memref<2x18x32x128xf32, #tpu.memory_space<vmem>>, vector<2x1x32x128xf32>
    tpu.vector_store %arg9[%c0_13, %c0_14, %c0_15, %c0_16], %6 {strides = array<i32>} : memref<2x18x32x128xf32, #tpu.memory_space<vmem>>, vector<2x1x32x128xf32>,
    %cst_17 = arith.constant 0.000000e+00 : f32
    %8 = vector.broadcast %cst_17 : f32 to vector<2x1x32x128xf32>
    %c0_18 = arith.constant 0 : index
    %c17 = arith.constant 17 : index
    %c0_19 = arith.constant 0 : index
    %c0_20 = arith.constant 0 : index
    %9 = vector.load %arg9[%c0_18, %c17, %c0_19, %c0_20] : memref<2x18x32x128xf32, #tpu.memory_space<vmem>>, vector<2x1x32x128xf32>
    tpu.vector_store %arg9[%c0_18, %c17, %c0_19, %c0_20], %8 {strides = array<i32>} : memref<2x18x32x128xf32, #tpu.memory_space<vmem>>, vector<2x1x32x128xf32>,
    %cst_21 = arith.constant 0.000000e+00 : f32
    %10 = vector.broadcast %cst_21 : f32 to vector<2x18x1x128xf32>
    %c0_22 = arith.constant 0 : index
    %c0_23 = arith.constant 0 : index
    %c7 = arith.constant 7 : index
    %c0_24 = arith.constant 0 : index
    %11 = vector.load %arg9[%c0_22, %c0_23, %c7, %c0_24] : memref<2x18x32x128xf32, #tpu.memory_space<vmem>>, vector<2x18x1x128xf32>
    tpu.vector_store %arg9[%c0_22, %c0_23, %c7, %c0_24], %10 {strides = array<i32>} : memref<2x18x32x128xf32, #tpu.memory_space<vmem>>, vector<2x18x1x128xf32>,
    %cst_25 = arith.constant 0.000000e+00 : f32
    %12 = vector.broadcast %cst_25 : f32 to vector<2x18x1x128xf32>
    %c0_26 = arith.constant 0 : index
    %c0_27 = arith.constant 0 : index
    %c24 = arith.constant 24 : index
    %c0_28 = arith.constant 0 : index
    %13 = vector.load %arg9[%c0_26, %c0_27, %c24, %c0_28] : memref<2x18x32x128xf32, #tpu.memory_space<vmem>>, vector<2x18x1x128xf32>
    tpu.vector_store %arg9[%c0_26, %c0_27, %c24, %c0_28], %12 {strides = array<i32>} : memref<2x18x32x128xf32, #tpu.memory_space<vmem>>, vector<2x18x1x128xf32>,
    %c0_29 = arith.constant 0 : index
    %c0_30 = arith.constant 0 : index
    %c0_31 = arith.constant 0 : index
    %c0_32 = arith.constant 0 : index
    %14 = vector.load %arg1[%c0_29, %c0_30, %c0_31, %c0_32] : memref<2x16x16x128xf32, #tpu.memory_space<vmem>>, vector<2x16x16x128xf32>
    %c0_33 = arith.constant 0 : index
    %c1 = arith.constant 1 : index
    %c8 = arith.constant 8 : index
    %c0_34 = arith.constant 0 : index
    %15 = vector.load %arg9[%c0_33, %c1, %c8, %c0_34] : memref<2x18x32x128xf32, #tpu.memory_space<vmem>>, vector<2x16x16x128xf32>
    tpu.vector_store %arg9[%c0_33, %c1, %c8, %c0_34], %14 {strides = array<i32>} : memref<2x18x32x128xf32, #tpu.memory_space<vmem>>, vector<2x16x16x128xf32>,
    %cst_35 = arith.constant 0.000000e+00 : f32
    %16 = vector.broadcast %cst_35 : f32 to vector<512x128xf32>
    %c0_36 = arith.constant 0 : index
    %c0_37 = arith.constant 0 : index
    %c7_38 = arith.constant 7 : index
    %c0_39 = arith.constant 0 : index
    %17 = vector.load %arg9[%c0_36, %c0_37, %c7_38, %c0_39] : memref<2x18x32x128xf32, #tpu.memory_space<vmem>>, vector<2x16x16x128xf32>
    %18 = vector.shape_cast %17 : vector<2x16x16x128xf32> to vector<512x128xf32>
    %19 = vector.extract_strided_slice %0 {offsets = [0, 0, 0], sizes = [1, 128, 128], strides = [1, 1, 1]} : vector<9x128x128xf32> to vector<1x128x128xf32>
    %20 = vector.shape_cast %19 : vector<1x128x128xf32> to vector<128x128xf32>
    %cst_40 = arith.constant dense<0.000000e+00> : vector<512x128xf32>
    %21 = tpu.matmul %18, %20, %cst_40 {dimension_numbers = #tpu.dot_dimension_numbers<[1], [0], [0], [1], [0, 0, 1, 1], [], []>} : vector<512x128xf32>, vector<128x128xf32>, vector<512x128xf32> -> vector<512x128xf32>
    %22 = arith.addf %16, %21 : vector<512x128xf32>
    %c0_41 = arith.constant 0 : index
    %c0_42 = arith.constant 0 : index
    %c8_43 = arith.constant 8 : index
    %c0_44 = arith.constant 0 : index
    %23 = vector.load %arg9[%c0_41, %c0_42, %c8_43, %c0_44] : memref<2x18x32x128xf32, #tpu.memory_space<vmem>>, vector<2x16x16x128xf32>
    %24 = vector.shape_cast %23 : vector<2x16x16x128xf32> to vector<512x128xf32>
    %25 = vector.extract_strided_slice %0 {offsets = [1, 0, 0], sizes = [1, 128, 128], strides = [1, 1, 1]} : vector<9x128x128xf32> to vector<1x128x128xf32>
    %26 = vector.shape_cast %25 : vector<1x128x128xf32> to vector<128x128xf32>
    %cst_45 = arith.constant dense<0.000000e+00> : vector<512x128xf32>
    %27 = tpu.matmul %24, %26, %cst_45 {dimension_numbers = #tpu.dot_dimension_numbers<[1], [0], [0], [1], [0, 0, 1, 1], [], []>} : vector<512x128xf32>, vector<128x128xf32>, vector<512x128xf32> -> vector<512x128xf32>
    %28 = arith.addf %22, %27 : vector<512x128xf32>
    %c0_46 = arith.constant 0 : index
    %c0_47 = arith.constant 0 : index
    %c9 = arith.constant 9 : index
    %c0_48 = arith.constant 0 : index
    %29 = vector.load %arg9[%c0_46, %c0_47, %c9, %c0_48] : memref<2x18x32x128xf32, #tpu.memory_space<vmem>>, vector<2x16x16x128xf32>
    %30 = vector.shape_cast %29 : vector<2x16x16x128xf32> to vector<512x128xf32>
    %31 = vector.extract_strided_slice %0 {offsets = [2, 0, 0], sizes = [1, 128, 128], strides = [1, 1, 1]} : vector<9x128x128xf32> to vector<1x128x128xf32>
    %32 = vector.shape_cast %31 : vector<1x128x128xf32> to vector<128x128xf32>
    %cst_49 = arith.constant dense<0.000000e+00> : vector<512x128xf32>
    %33 = tpu.matmul %30, %32, %cst_49 {dimension_numbers = #tpu.dot_dimension_numbers<[1], [0], [0], [1], [0, 0, 1, 1], [], []>} : vector<512x128xf32>, vector<128x128xf32>, vector<512x128xf32> -> vector<512x128xf32>
    %34 = arith.addf %28, %33 : vector<512x128xf32>
    %c0_50 = arith.constant 0 : index
    %c1_51 = arith.constant 1 : index
    %c7_52 = arith.constant 7 : index
    %c0_53 = arith.constant 0 : index
    %35 = vector.load %arg9[%c0_50, %c1_51, %c7_52, %c0_53] : memref<2x18x32x128xf32, #tpu.memory_space<vmem>>, vector<2x16x16x128xf32>
    %36 = vector.shape_cast %35 : vector<2x16x16x128xf32> to vector<512x128xf32>
    %37 = vector.extract_strided_slice %0 {offsets = [3, 0, 0], sizes = [1, 128, 128], strides = [1, 1, 1]} : vector<9x128x128xf32> to vector<1x128x128xf32>
    %38 = vector.shape_cast %37 : vector<1x128x128xf32> to vector<128x128xf32>
    %cst_54 = arith.constant dense<0.000000e+00> : vector<512x128xf32>
    %39 = tpu.matmul %36, %38, %cst_54 {dimension_numbers = #tpu.dot_dimension_numbers<[1], [0], [0], [1], [0, 0, 1, 1], [], []>} : vector<512x128xf32>, vector<128x128xf32>, vector<512x128xf32> -> vector<512x128xf32>
    %40 = arith.addf %34, %39 : vector<512x128xf32>
    %c0_55 = arith.constant 0 : index
    %c1_56 = arith.constant 1 : index
    %c8_57 = arith.constant 8 : index
    %c0_58 = arith.constant 0 : index
    %41 = vector.load %arg9[%c0_55, %c1_56, %c8_57, %c0_58] : memref<2x18x32x128xf32, #tpu.memory_space<vmem>>, vector<2x16x16x128xf32>
    %42 = vector.shape_cast %41 : vector<2x16x16x128xf32> to vector<512x128xf32>
    %43 = vector.extract_strided_slice %0 {offsets = [4, 0, 0], sizes = [1, 128, 128], strides = [1, 1, 1]} : vector<9x128x128xf32> to vector<1x128x128xf32>
    %44 = vector.shape_cast %43 : vector<1x128x128xf32> to vector<128x128xf32>
    %cst_59 = arith.constant dense<0.000000e+00> : vector<512x128xf32>
    %45 = tpu.matmul %42, %44, %cst_59 {dimension_numbers = #tpu.dot_dimension_numbers<[1], [0], [0], [1], [0, 0, 1, 1], [], []>} : vector<512x128xf32>, vector<128x128xf32>, vector<512x128xf32> -> vector<512x128xf32>
    %46 = arith.addf %40, %45 : vector<512x128xf32>
    %c0_60 = arith.constant 0 : index
    %c1_61 = arith.constant 1 : index
    %c9_62 = arith.constant 9 : index
    %c0_63 = arith.constant 0 : index
    %47 = vector.load %arg9[%c0_60, %c1_61, %c9_62, %c0_63] : memref<2x18x32x128xf32, #tpu.memory_space<vmem>>, vector<2x16x16x128xf32>
    %48 = vector.shape_cast %47 : vector<2x16x16x128xf32> to vector<512x128xf32>
    %49 = vector.extract_strided_slice %0 {offsets = [5, 0, 0], sizes = [1, 128, 128], strides = [1, 1, 1]} : vector<9x128x128xf32> to vector<1x128x128xf32>
    %50 = vector.shape_cast %49 : vector<1x128x128xf32> to vector<128x128xf32>
    %cst_64 = arith.constant dense<0.000000e+00> : vector<512x128xf32>
    %51 = tpu.matmul %48, %50, %cst_64 {dimension_numbers = #tpu.dot_dimension_numbers<[1], [0], [0], [1], [0, 0, 1, 1], [], []>} : vector<512x128xf32>, vector<128x128xf32>, vector<512x128xf32> -> vector<512x128xf32>
    %52 = arith.addf %46, %51 : vector<512x128xf32>
    %c0_65 = arith.constant 0 : index
    %c2 = arith.constant 2 : index
    %c7_66 = arith.constant 7 : index
    %c0_67 = arith.constant 0 : index
    %53 = vector.load %arg9[%c0_65, %c2, %c7_66, %c0_67] : memref<2x18x32x128xf32, #tpu.memory_space<vmem>>, vector<2x16x16x128xf32>
    %54 = vector.shape_cast %53 : vector<2x16x16x128xf32> to vector<512x128xf32>
    %55 = vector.extract_strided_slice %0 {offsets = [6, 0, 0], sizes = [1, 128, 128], strides = [1, 1, 1]} : vector<9x128x128xf32> to vector<1x128x128xf32>
    %56 = vector.shape_cast %55 : vector<1x128x128xf32> to vector<128x128xf32>
    %cst_68 = arith.constant dense<0.000000e+00> : vector<512x128xf32>
    %57 = tpu.matmul %54, %56, %cst_68 {dimension_numbers = #tpu.dot_dimension_numbers<[1], [0], [0], [1], [0, 0, 1, 1], [], []>} : vector<512x128xf32>, vector<128x128xf32>, vector<512x128xf32> -> vector<512x128xf32>
    %58 = arith.addf %52, %57 : vector<512x128xf32>
    %c0_69 = arith.constant 0 : index
    %c2_70 = arith.constant 2 : index
    %c8_71 = arith.constant 8 : index
    %c0_72 = arith.constant 0 : index
    %59 = vector.load %arg9[%c0_69, %c2_70, %c8_71, %c0_72] : memref<2x18x32x128xf32, #tpu.memory_space<vmem>>, vector<2x16x16x128xf32>
    %60 = vector.shape_cast %59 : vector<2x16x16x128xf32> to vector<512x128xf32>
    %61 = vector.extract_strided_slice %0 {offsets = [7, 0, 0], sizes = [1, 128, 128], strides = [1, 1, 1]} : vector<9x128x128xf32> to vector<1x128x128xf32>
    %62 = vector.shape_cast %61 : vector<1x128x128xf32> to vector<128x128xf32>
    %cst_73 = arith.constant dense<0.000000e+00> : vector<512x128xf32>
    %63 = tpu.matmul %60, %62, %cst_73 {dimension_numbers = #tpu.dot_dimension_numbers<[1], [0], [0], [1], [0, 0, 1, 1], [], []>} : vector<512x128xf32>, vector<128x128xf32>, vector<512x128xf32> -> vector<512x128xf32>
    %64 = arith.addf %58, %63 : vector<512x128xf32>
    %c0_74 = arith.constant 0 : index
    %c2_75 = arith.constant 2 : index
    %c9_76 = arith.constant 9 : index
    %c0_77 = arith.constant 0 : index
    %65 = vector.load %arg9[%c0_74, %c2_75, %c9_76, %c0_77] : memref<2x18x32x128xf32, #tpu.memory_space<vmem>>, vector<2x16x16x128xf32>
    %66 = vector.shape_cast %65 : vector<2x16x16x128xf32> to vector<512x128xf32>
    %67 = vector.extract_strided_slice %0 {offsets = [8, 0, 0], sizes = [1, 128, 128], strides = [1, 1, 1]} : vector<9x128x128xf32> to vector<1x128x128xf32>
    %68 = vector.shape_cast %67 : vector<1x128x128xf32> to vector<128x128xf32>
    %cst_78 = arith.constant dense<0.000000e+00> : vector<512x128xf32>
    %69 = tpu.matmul %66, %68, %cst_78 {dimension_numbers = #tpu.dot_dimension_numbers<[1], [0], [0], [1], [0, 0, 1, 1], [], []>} : vector<512x128xf32>, vector<128x128xf32>, vector<512x128xf32> -> vector<512x128xf32>
    %70 = arith.addf %64, %69 : vector<512x128xf32>
    %cst_79 = arith.constant dense<0.000000e+00> : vector<128xf32>
    %71 = vector.multi_reduction <add>, %70, %cst_79 [0] : vector<512x128xf32> to vector<128xf32>
    %72 = vector.shape_cast %71 : vector<128xf32> to vector<1x128xf32>
    %cst_80 = arith.constant 0.001953125 : f32
    %73 = vector.broadcast %cst_80 : f32 to vector<1x128xf32>
    %74 = arith.mulf %72, %73 : vector<1x128xf32>
    %75 = arith.mulf %70, %70 : vector<512x128xf32>
    %cst_81 = arith.constant dense<0.000000e+00> : vector<128xf32>
    %76 = vector.multi_reduction <add>, %75, %cst_81 [0] : vector<512x128xf32> to vector<128xf32>
    %77 = vector.shape_cast %76 : vector<128xf32> to vector<1x128xf32>
    %cst_82 = arith.constant 0.001953125 : f32
    %78 = vector.broadcast %cst_82 : f32 to vector<1x128xf32>
    %79 = arith.mulf %77, %78 : vector<1x128xf32>
    %80 = arith.mulf %74, %74 : vector<1x128xf32>
    %81 = arith.subf %79, %80 : vector<1x128xf32>
    %cst_83 = arith.constant 9.99999974E-6 : f32
    %82 = vector.broadcast %cst_83 : f32 to vector<1x128xf32>
    %83 = arith.addf %81, %82 : vector<1x128xf32>
    %84 = math.rsqrt %83 : vector<1x128xf32>
    %85 = arith.mulf %2, %84 : vector<1x128xf32>
    %86 = arith.mulf %74, %85 : vector<1x128xf32>
    %87 = arith.subf %3, %86 : vector<1x128xf32>
    %88 = vector.broadcast %85 : vector<1x128xf32> to vector<512x128xf32>
    %89 = arith.mulf %70, %88 : vector<512x128xf32>
    %90 = vector.broadcast %87 : vector<1x128xf32> to vector<512x128xf32>
    %91 = arith.addf %89, %90 : vector<512x128xf32>
    %cst_84 = arith.constant 0.000000e+00 : f32
    %92 = vector.broadcast %cst_84 : f32 to vector<512x128xf32>
    %93 = arith.maximumf %91, %92 : vector<512x128xf32>
    %94 = vector.shape_cast %93 : vector<512x128xf32> to vector<2x16x16x128xf32>
    %c0_85 = arith.constant 0 : index
    %c1_86 = arith.constant 1 : index
    %c8_87 = arith.constant 8 : index
    %c0_88 = arith.constant 0 : index
    %95 = vector.load %arg9[%c0_85, %c1_86, %c8_87, %c0_88] : memref<2x18x32x128xf32, #tpu.memory_space<vmem>>, vector<2x16x16x128xf32>
    tpu.vector_store %arg9[%c0_85, %c1_86, %c8_87, %c0_88], %94 {strides = array<i32>} : memref<2x18x32x128xf32, #tpu.memory_space<vmem>>, vector<2x16x16x128xf32>,
    %cst_89 = arith.constant 0.000000e+00 : f32
    %96 = vector.broadcast %cst_89 : f32 to vector<512x128xf32>
    %c0_90 = arith.constant 0 : index
    %c0_91 = arith.constant 0 : index
    %c7_92 = arith.constant 7 : index
    %c0_93 = arith.constant 0 : index
    %97 = vector.load %arg9[%c0_90, %c0_91, %c7_92, %c0_93] : memref<2x18x32x128xf32, #tpu.memory_space<vmem>>, vector<2x16x16x128xf32>
    %98 = vector.shape_cast %97 : vector<2x16x16x128xf32> to vector<512x128xf32>
    %99 = vector.extract_strided_slice %1 {offsets = [0, 0, 0], sizes = [1, 128, 128], strides = [1, 1, 1]} : vector<9x128x128xf32> to vector<1x128x128xf32>
    %100 = vector.shape_cast %99 : vector<1x128x128xf32> to vector<128x128xf32>
    %cst_94 = arith.constant dense<0.000000e+00> : vector<512x128xf32>
    %101 = tpu.matmul %98, %100, %cst_94 {dimension_numbers = #tpu.dot_dimension_numbers<[1], [0], [0], [1], [0, 0, 1, 1], [], []>} : vector<512x128xf32>, vector<128x128xf32>, vector<512x128xf32> -> vector<512x128xf32>
    %102 = arith.addf %96, %101 : vector<512x128xf32>
    %c0_95 = arith.constant 0 : index
    %c0_96 = arith.constant 0 : index
    %c8_97 = arith.constant 8 : index
    %c0_98 = arith.constant 0 : index
    %103 = vector.load %arg9[%c0_95, %c0_96, %c8_97, %c0_98] : memref<2x18x32x128xf32, #tpu.memory_space<vmem>>, vector<2x16x16x128xf32>
    %104 = vector.shape_cast %103 : vector<2x16x16x128xf32> to vector<512x128xf32>
    %105 = vector.extract_strided_slice %1 {offsets = [1, 0, 0], sizes = [1, 128, 128], strides = [1, 1, 1]} : vector<9x128x128xf32> to vector<1x128x128xf32>
    %106 = vector.shape_cast %105 : vector<1x128x128xf32> to vector<128x128xf32>
    %cst_99 = arith.constant dense<0.000000e+00> : vector<512x128xf32>
    %107 = tpu.matmul %104, %106, %cst_99 {dimension_numbers = #tpu.dot_dimension_numbers<[1], [0], [0], [1], [0, 0, 1, 1], [], []>} : vector<512x128xf32>, vector<128x128xf32>, vector<512x128xf32> -> vector<512x128xf32>
    %108 = arith.addf %102, %107 : vector<512x128xf32>
    %c0_100 = arith.constant 0 : index
    %c0_101 = arith.constant 0 : index
    %c9_102 = arith.constant 9 : index
    %c0_103 = arith.constant 0 : index
    %109 = vector.load %arg9[%c0_100, %c0_101, %c9_102, %c0_103] : memref<2x18x32x128xf32, #tpu.memory_space<vmem>>, vector<2x16x16x128xf32>
    %110 = vector.shape_cast %109 : vector<2x16x16x128xf32> to vector<512x128xf32>
    %111 = vector.extract_strided_slice %1 {offsets = [2, 0, 0], sizes = [1, 128, 128], strides = [1, 1, 1]} : vector<9x128x128xf32> to vector<1x128x128xf32>
    %112 = vector.shape_cast %111 : vector<1x128x128xf32> to vector<128x128xf32>
    %cst_104 = arith.constant dense<0.000000e+00> : vector<512x128xf32>
    %113 = tpu.matmul %110, %112, %cst_104 {dimension_numbers = #tpu.dot_dimension_numbers<[1], [0], [0], [1], [0, 0, 1, 1], [], []>} : vector<512x128xf32>, vector<128x128xf32>, vector<512x128xf32> -> vector<512x128xf32>
    %114 = arith.addf %108, %113 : vector<512x128xf32>
    %c0_105 = arith.constant 0 : index
    %c1_106 = arith.constant 1 : index
    %c7_107 = arith.constant 7 : index
    %c0_108 = arith.constant 0 : index
    %115 = vector.load %arg9[%c0_105, %c1_106, %c7_107, %c0_108] : memref<2x18x32x128xf32, #tpu.memory_space<vmem>>, vector<2x16x16x128xf32>
    %116 = vector.shape_cast %115 : vector<2x16x16x128xf32> to vector<512x128xf32>
    %117 = vector.extract_strided_slice %1 {offsets = [3, 0, 0], sizes = [1, 128, 128], strides = [1, 1, 1]} : vector<9x128x128xf32> to vector<1x128x128xf32>
    %118 = vector.shape_cast %117 : vector<1x128x128xf32> to vector<128x128xf32>
    %cst_109 = arith.constant dense<0.000000e+00> : vector<512x128xf32>
    %119 = tpu.matmul %116, %118, %cst_109 {dimension_numbers = #tpu.dot_dimension_numbers<[1], [0], [0], [1], [0, 0, 1, 1], [], []>} : vector<512x128xf32>, vector<128x128xf32>, vector<512x128xf32> -> vector<512x128xf32>
    %120 = arith.addf %114, %119 : vector<512x128xf32>
    %c0_110 = arith.constant 0 : index
    %c1_111 = arith.constant 1 : index
    %c8_112 = arith.constant 8 : index
    %c0_113 = arith.constant 0 : index
    %121 = vector.load %arg9[%c0_110, %c1_111, %c8_112, %c0_113] : memref<2x18x32x128xf32, #tpu.memory_space<vmem>>, vector<2x16x16x128xf32>
    %122 = vector.shape_cast %121 : vector<2x16x16x128xf32> to vector<512x128xf32>
    %123 = vector.extract_strided_slice %1 {offsets = [4, 0, 0], sizes = [1, 128, 128], strides = [1, 1, 1]} : vector<9x128x128xf32> to vector<1x128x128xf32>
    %124 = vector.shape_cast %123 : vector<1x128x128xf32> to vector<128x128xf32>
    %cst_114 = arith.constant dense<0.000000e+00> : vector<512x128xf32>
    %125 = tpu.matmul %122, %124, %cst_114 {dimension_numbers = #tpu.dot_dimension_numbers<[1], [0], [0], [1], [0, 0, 1, 1], [], []>} : vector<512x128xf32>, vector<128x128xf32>, vector<512x128xf32> -> vector<512x128xf32>
    %126 = arith.addf %120, %125 : vector<512x128xf32>
    %c0_115 = arith.constant 0 : index
    %c1_116 = arith.constant 1 : index
    %c9_117 = arith.constant 9 : index
    %c0_118 = arith.constant 0 : index
    %127 = vector.load %arg9[%c0_115, %c1_116, %c9_117, %c0_118] : memref<2x18x32x128xf32, #tpu.memory_space<vmem>>, vector<2x16x16x128xf32>
    %128 = vector.shape_cast %127 : vector<2x16x16x128xf32> to vector<512x128xf32>
    %129 = vector.extract_strided_slice %1 {offsets = [5, 0, 0], sizes = [1, 128, 128], strides = [1, 1, 1]} : vector<9x128x128xf32> to vector<1x128x128xf32>
    %130 = vector.shape_cast %129 : vector<1x128x128xf32> to vector<128x128xf32>
    %cst_119 = arith.constant dense<0.000000e+00> : vector<512x128xf32>
    %131 = tpu.matmul %128, %130, %cst_119 {dimension_numbers = #tpu.dot_dimension_numbers<[1], [0], [0], [1], [0, 0, 1, 1], [], []>} : vector<512x128xf32>, vector<128x128xf32>, vector<512x128xf32> -> vector<512x128xf32>
    %132 = arith.addf %126, %131 : vector<512x128xf32>
    %c0_120 = arith.constant 0 : index
    %c2_121 = arith.constant 2 : index
    %c7_122 = arith.constant 7 : index
    %c0_123 = arith.constant 0 : index
    %133 = vector.load %arg9[%c0_120, %c2_121, %c7_122, %c0_123] : memref<2x18x32x128xf32, #tpu.memory_space<vmem>>, vector<2x16x16x128xf32>
    %134 = vector.shape_cast %133 : vector<2x16x16x128xf32> to vector<512x128xf32>
    %135 = vector.extract_strided_slice %1 {offsets = [6, 0, 0], sizes = [1, 128, 128], strides = [1, 1, 1]} : vector<9x128x128xf32> to vector<1x128x128xf32>
    %136 = vector.shape_cast %135 : vector<1x128x128xf32> to vector<128x128xf32>
    %cst_124 = arith.constant dense<0.000000e+00> : vector<512x128xf32>
    %137 = tpu.matmul %134, %136, %cst_124 {dimension_numbers = #tpu.dot_dimension_numbers<[1], [0], [0], [1], [0, 0, 1, 1], [], []>} : vector<512x128xf32>, vector<128x128xf32>, vector<512x128xf32> -> vector<512x128xf32>
    %138 = arith.addf %132, %137 : vector<512x128xf32>
    %c0_125 = arith.constant 0 : index
    %c2_126 = arith.constant 2 : index
    %c8_127 = arith.constant 8 : index
    %c0_128 = arith.constant 0 : index
    %139 = vector.load %arg9[%c0_125, %c2_126, %c8_127, %c0_128] : memref<2x18x32x128xf32, #tpu.memory_space<vmem>>, vector<2x16x16x128xf32>
    %140 = vector.shape_cast %139 : vector<2x16x16x128xf32> to vector<512x128xf32>
    %141 = vector.extract_strided_slice %1 {offsets = [7, 0, 0], sizes = [1, 128, 128], strides = [1, 1, 1]} : vector<9x128x128xf32> to vector<1x128x128xf32>
    %142 = vector.shape_cast %141 : vector<1x128x128xf32> to vector<128x128xf32>
    %cst_129 = arith.constant dense<0.000000e+00> : vector<512x128xf32>
    %143 = tpu.matmul %140, %142, %cst_129 {dimension_numbers = #tpu.dot_dimension_numbers<[1], [0], [0], [1], [0, 0, 1, 1], [], []>} : vector<512x128xf32>, vector<128x128xf32>, vector<512x128xf32> -> vector<512x128xf32>
    %144 = arith.addf %138, %143 : vector<512x128xf32>
    %c0_130 = arith.constant 0 : index
    %c2_131 = arith.constant 2 : index
    %c9_132 = arith.constant 9 : index
    %c0_133 = arith.constant 0 : index
    %145 = vector.load %arg9[%c0_130, %c2_131, %c9_132, %c0_133] : memref<2x18x32x128xf32, #tpu.memory_space<vmem>>, vector<2x16x16x128xf32>
    %146 = vector.shape_cast %145 : vector<2x16x16x128xf32> to vector<512x128xf32>
    %147 = vector.extract_strided_slice %1 {offsets = [8, 0, 0], sizes = [1, 128, 128], strides = [1, 1, 1]} : vector<9x128x128xf32> to vector<1x128x128xf32>
    %148 = vector.shape_cast %147 : vector<1x128x128xf32> to vector<128x128xf32>
    %cst_134 = arith.constant dense<0.000000e+00> : vector<512x128xf32>
    %149 = tpu.matmul %146, %148, %cst_134 {dimension_numbers = #tpu.dot_dimension_numbers<[1], [0], [0], [1], [0, 0, 1, 1], [], []>} : vector<512x128xf32>, vector<128x128xf32>, vector<512x128xf32> -> vector<512x128xf32>
    %150 = arith.addf %144, %149 : vector<512x128xf32>
    %cst_135 = arith.constant dense<0.000000e+00> : vector<128xf32>
    %151 = vector.multi_reduction <add>, %150, %cst_135 [0] : vector<512x128xf32> to vector<128xf32>
    %152 = vector.shape_cast %151 : vector<128xf32> to vector<1x128xf32>
    %cst_136 = arith.constant 0.001953125 : f32
    %153 = vector.broadcast %cst_136 : f32 to vector<1x128xf32>
    %154 = arith.mulf %152, %153 : vector<1x128xf32>
    %155 = arith.mulf %150, %150 : vector<512x128xf32>
    %cst_137 = arith.constant dense<0.000000e+00> : vector<128xf32>
    %156 = vector.multi_reduction <add>, %155, %cst_137 [0] : vector<512x128xf32> to vector<128xf32>
    %157 = vector.shape_cast %156 : vector<128xf32> to vector<1x128xf32>
    %cst_138 = arith.constant 0.001953125 : f32
    %158 = vector.broadcast %cst_138 : f32 to vector<1x128xf32>
    %159 = arith.mulf %157, %158 : vector<1x128xf32>
    %160 = arith.mulf %154, %154 : vector<1x128xf32>
    %161 = arith.subf %159, %160 : vector<1x128xf32>
    %cst_139 = arith.constant 9.99999974E-6 : f32
    %162 = vector.broadcast %cst_139 : f32 to vector<1x128xf32>
    %163 = arith.addf %161, %162 : vector<1x128xf32>
    %164 = math.rsqrt %163 : vector<1x128xf32>
    %165 = arith.mulf %4, %164 : vector<1x128xf32>
    %166 = arith.mulf %154, %165 : vector<1x128xf32>
    %167 = arith.subf %5, %166 : vector<1x128xf32>
    %168 = vector.broadcast %165 : vector<1x128xf32> to vector<512x128xf32>
    %169 = arith.mulf %150, %168 : vector<512x128xf32>
    %170 = vector.broadcast %167 : vector<1x128xf32> to vector<512x128xf32>
    %171 = arith.addf %169, %170 : vector<512x128xf32>
    %c0_140 = arith.constant 0 : index
    %c0_141 = arith.constant 0 : index
    %c0_142 = arith.constant 0 : index
    %c0_143 = arith.constant 0 : index
    %172 = vector.load %arg1[%c0_140, %c0_141, %c0_142, %c0_143] : memref<2x16x16x128xf32, #tpu.memory_space<vmem>>, vector<2x16x16x128xf32>
    %173 = vector.shape_cast %172 : vector<2x16x16x128xf32> to vector<512x128xf32>
    %174 = arith.addf %171, %173 : vector<512x128xf32>
    %cst_144 = arith.constant 0.000000e+00 : f32
    %175 = vector.broadcast %cst_144 : f32 to vector<512x128xf32>
    %176 = arith.maximumf %174, %175 : vector<512x128xf32>
    %177 = vector.shape_cast %176 : vector<512x128xf32> to vector<2x16x16x128xf32>
    %c0_145 = arith.constant 0 : index
    %c0_146 = arith.constant 0 : index
    %c0_147 = arith.constant 0 : index
    %c0_148 = arith.constant 0 : index
    %178 = vector.load %arg8[%c0_145, %c0_146, %c0_147, %c0_148] : memref<2x16x16x128xf32, #tpu.memory_space<vmem>>, vector<2x16x16x128xf32>
    tpu.vector_store %arg8[%c0_145, %c0_146, %c0_147, %c0_148], %177 {strides = array<i32>} : memref<2x16x16x128xf32, #tpu.memory_space<vmem>>, vector<2x16x16x128xf32>,
    return
  }
  func.func @transform_0(%arg0: i32) -> (i32, i32, i32, i32) {
    %c0_i32 = arith.constant 0 : i32
    %c0_i32_0 = arith.constant 0 : i32
    %c0_i32_1 = arith.constant 0 : i32
    %c0_i32_2 = arith.constant 0 : i32
    %c0_i32_3 = arith.constant 0 : i32
    return %c0_i32, %c0_i32_0, %c0_i32_1, %c0_i32_2 : i32, i32, i32, i32
  }
  func.func @transform_1(%arg0: i32) -> (i32, i32, i32) {
    %c0_i32 = arith.constant 0 : i32
    %c0_i32_0 = arith.constant 0 : i32
    %c0_i32_1 = arith.constant 0 : i32
    %c0_i32_2 = arith.constant 0 : i32
    return %c0_i32, %c0_i32_0, %c0_i32_1 : i32, i32, i32
  }
  func.func @transform_2(%arg0: i32) -> (i32, i32) {
    %c0_i32 = arith.constant 0 : i32
    %c0_i32_0 = arith.constant 0 : i32
    %c0_i32_1 = arith.constant 0 : i32
    return %c0_i32, %c0_i32_0 : i32, i32
  }
  func.func @transform_3(%arg0: i32) -> (i32, i32) {
    %c0_i32 = arith.constant 0 : i32
    %c0_i32_0 = arith.constant 0 : i32
    %c0_i32_1 = arith.constant 0 : i32
    return %c0_i32, %c0_i32_0 : i32, i32
  }
  func.func @transform_4(%arg0: i32) -> (i32, i32, i32) {
    %c0_i32 = arith.constant 0 : i32
    %c0_i32_0 = arith.constant 0 : i32
    %c0_i32_1 = arith.constant 0 : i32
    %c0_i32_2 = arith.constant 0 : i32
    return %c0_i32, %c0_i32_0, %c0_i32_1 : i32, i32, i32
  }
  func.func @transform_5(%arg0: i32) -> (i32, i32) {
    %c0_i32 = arith.constant 0 : i32
    %c0_i32_0 = arith.constant 0 : i32
    %c0_i32_1 = arith.constant 0 : i32
    return %c0_i32, %c0_i32_0 : i32, i32
  }
  func.func @transform_6(%arg0: i32) -> (i32, i32) {
    %c0_i32 = arith.constant 0 : i32
    %c0_i32_0 = arith.constant 0 : i32
    %c0_i32_1 = arith.constant 0 : i32
    return %c0_i32, %c0_i32_0 : i32, i32
  }
  func.func @transform_7(%arg0: i32) -> (i32, i32, i32, i32) {
    %c0_i32 = arith.constant 0 : i32
    %c0_i32_0 = arith.constant 0 : i32
    %c0_i32_1 = arith.constant 0 : i32
    %c0_i32_2 = arith.constant 0 : i32
    %c0_i32_3 = arith.constant 0 : i32
    return %c0_i32, %c0_i32_0, %c0_i32_1, %c0_i32_2 : i32, i32, i32, i32
  }
}

</mosaic_0001>

<bundles_post_ra>
// kernel: tpu_custom_call.1
= control target key start
LH: loop header
LB: loop body
LE: loop exit
PB: predicated region body
PF: predicated region fallthrough
CT: control target
= control target key end

     0   :  { %12 = vsyncpa [#allocation4], 0  ;;  %s20326_s0 = inlined_call_operand.hbm [shape: f32[2,16,16,128], index: 0, kind: input, shape index: {}]   ;;  %s20327_s1 = inlined_call_operand.hbm [shape: f32[9,128,128], index: 1, kind: input, shape index: {}]   ;;  %s20328_s2 = inlined_call_operand.vmem [shape: f32[1,128], index: 2, kind: input, shape index: {}]   ;;  %s20329_s3 = inlined_call_operand.vmem [shape: f32[1,128], index: 3, kind: input, shape index: {}]   ;;  %s20330_s4 = inlined_call_operand.hbm [shape: f32[9,128,128], index: 4, kind: input, shape index: {}]   ;;  %s20331_s5 = inlined_call_operand.vmem [shape: f32[1,128], index: 5, kind: input, shape index: {}]   ;;  %s20332_s6 = inlined_call_operand.vmem [shape: f32[1,128], index: 6, kind: input, shape index: {}]   ;;  %s20333_s7 = inlined_call_operand.hbm [shape: f32[2,16,16,128], index: 7, kind: output, shape index: {}]  }
   0x1   :  { %13 = vsyncpa [#allocation7], 0 }
   0x2   :  { %14 = vsyncpa [#allocation5], 0  ;;  %s16113_s24 = smov [#allocation6]   ;;  %s16114_s26 = smov [#allocation3]  }
   0x3   :  { %s32_s25 = sshll.u32 %s16113_s24, 4  ;;  %s20_s27 = sshll.u32 %s16114_s26, 4  ;;  %s33_s25 = int_to_ptr.vmem [resolvable:$true] %s32_s25  ;;  %s16160_s27 = int_to_ptr.vmem [resolvable:$true] %s20_s27 }
   0x4   :  { %s16019_s30 = scalar_lea.hbm %s20327_s1, 18432 }
   0x5   :  { %p16020_p0 = scmp.ne.s32.totalorder %s20327_s1, %s16019_s30  ;;  %p16023_p1 = scmp.lt.u32.totalorder %s16019_s30, %s20327_s1 }
   0x7   :  { %p16025_p2 = pnand %p16023_p1, %p16020_p0 }
   0x9   :  { %16028 = shalt.err (!%p16025_p2)
}
   0xa   :  { %s16029_s12 = scalar_lea.vmem %s33_s25, 18432  ;;  %p16034_p4 = scmp.lt.s32.totalorder %s33_s25, %s33_s25 }
   0xb   :  { %p16030_p3 = scmp.ne.s32.totalorder %s33_s25, %s16029_s12  ;;  %p16035_p5 = scmp.lt.s32.totalorder %s16029_s12, %s16029_s12 }
   0xd   :  { %p16036_p6 = por %p16035_p5, %p16034_p4 }
   0xf   :  { %p16037_p7 = pnand %p16036_p6, %p16030_p3 }
  0x11   :  { %16040 = shalt.err (!%p16037_p7)
}
  0x12   :  { %s16115_s13 = smov 128   ;;  %s16116_s14 = smov 8  }
  0x13   :  { %38 = dma.hbm_to_vmem [thread:$0]  %s20327_s1, 18432, %s33_s25, [#allocation7], %s16115_s13, %s16115_s13, %s16116_s14  }
  0x14   :  { %s16041_s19 = scalar_lea.hbm %s20326_s0, 8192 }
  0x15   :  { %p16042_p8 = scmp.ne.s32.totalorder %s20326_s0, %s16041_s19  ;;  %p16045_p9 = scmp.lt.u32.totalorder %s16041_s19, %s20326_s0 }
  0x17   :  { %p16047_p10 = pnand %p16045_p9, %p16042_p8 }
  0x19   :  { %16050 = shalt.err (!%p16047_p10)
}
  0x1a   :  { %s16051_s24 = scalar_lea.vmem %s16160_s27, 8192  ;;  %p16056_p12 = scmp.lt.s32.totalorder %s16160_s27, %s16160_s27 }
  0x1b   :  { %p16052_p11 = scmp.ne.s32.totalorder %s16160_s27, %s16051_s24  ;;  %p16057_p13 = scmp.lt.s32.totalorder %s16051_s24, %s16051_s24 }
  0x1d   :  { %p16058_p0 = por %p16057_p13, %p16056_p12 }
  0x1f   :  { %p16059_p1 = pnand %p16058_p0, %p16052_p11 }
  0x21   :  { %16062 = shalt.err (!%p16059_p1)
}
  0x22   :  { %26 = dma.hbm_to_vmem [thread:$0]  %s20326_s0, 8192, %s16160_s27, [#allocation4], %s16115_s13, %s16115_s13, %s16116_s14  }
  0x23   :  { %s16117_s26 = smov [#allocation8]   ;;  %s16063_s8 = scalar_lea.hbm %s20330_s4, 18432 }
  0x24   :  { %s48_s28 = sshll.u32 %s16117_s26, 4  ;;  %p16064_p2 = scmp.ne.s32.totalorder %s20330_s4, %s16063_s8  ;;  %s49_s28 = int_to_ptr.vmem [resolvable:$true] %s48_s28 }
  0x25   :  { %p16067_p3 = scmp.lt.u32.totalorder %s16063_s8, %s20330_s4 }
  0x27   :  { %p16069_p4 = pnand %p16067_p3, %p16064_p2 }
  0x29   :  { %16072 = shalt.err (!%p16069_p4)
}
  0x2a   :  { %s16073_s15 = scalar_lea.vmem %s49_s28, 18432  ;;  %p16078_p6 = scmp.lt.s32.totalorder %s49_s28, %s49_s28 }
  0x2b   :  { %p16074_p5 = scmp.ne.s32.totalorder %s49_s28, %s16073_s15  ;;  %p16079_p7 = scmp.lt.s32.totalorder %s16073_s15, %s16073_s15 }
  0x2d   :  { %p16080_p8 = por %p16079_p7, %p16078_p6 }
  0x2f   :  { %p16081_p9 = pnand %p16080_p8, %p16074_p5 }
  0x31   :  { %16084 = shalt.err (!%p16081_p9)
}
  0x32   :  { %54 = dma.hbm_to_vmem [thread:$0]  %s20330_s4, 18432, %s49_s28, [#allocation7], %s16115_s13, %s16115_s13, %s16116_s14  }
  0x33   :  { %16107 = dma.done.wait [#allocation4], 8192  }
  0x34   :  { %16108 = vsyncadd [#allocation4], 4294959104 }
  0x35   :  { %16109 = dma.done.wait [#allocation7], 36864  }
  0x36   :  { %16110 = vsyncadd [#allocation7], 4294930432  ;;  %v20334_v0 = vmov 0.0   ;;  %v84_v1 = vld [vmem:[#allocation6 + $0x80] sm:$0xff]  ;;  %v85_v2 = vld [vmem:[#allocation6 + $0x88] sm:$0xff] }
  0x37   :  { %361 = vst [vmem:[#allocation2 + $0x8] sm:$0xff] %v20334_v0  ;;  %12133 = vmatprep.mubr.f32.mxu0 %v20334_v0  ;;  %360 = vst [vmem:[#allocation2] sm:$0xff] %v20334_v0  ;;  %13285 = vmatprep.mubr.f32.mxu1 %v20334_v0  ;;  %v86_v3 = vld [vmem:[#allocation6 + $0x90] sm:$0xff]  ;;  %v14405_v4 = vpack.c.bf16 %v85_v2, %v84_v1  ;;  %v87_v5 = vld [vmem:[#allocation6 + $0x98] sm:$0xff] }
  0x38   :  { %362 = vst [vmem:[#allocation2 + $0x10] sm:$0xff] %v20334_v0  ;;  %363 = vst [vmem:[#allocation2 + $0x18] sm:$0xff] %v20334_v0  ;;  %v14409_v6 = vpack.c.bf16 %v87_v5, %v86_v3  ;;  %v88_v7 = vld [vmem:[#allocation6 + $0xa0] sm:$0xff]  ;;  %v89_v8 = vld [vmem:[#allocation6 + $0xa8] sm:$0xff] }
  0x39   :  { %364 = vst [vmem:[#allocation2 + $0x240] sm:$0xff] %v20334_v0  ;;  %365 = vst [vmem:[#allocation2 + $0x248] sm:$0xff] %v20334_v0  ;;  %14406 = vmatprep.subr.bf16.mxu0 %v14405_v4  ;;  %v14413_v9 = vpack.c.bf16 %v89_v8, %v88_v7  ;;  %v90_v10 = vld [vmem:[#allocation6 + $0xb0] sm:$0xff]  ;;  %v91_v11 = vld [vmem:[#allocation6 + $0xb8] sm:$0xff] }
  0x3a   :  { %366 = vst [vmem:[#allocation2 + $0x250] sm:$0xff] %v20334_v0  ;;  %367 = vst [vmem:[#allocation2 + $0x258] sm:$0xff] %v20334_v0  ;;  %14408 = vmatpush3.bf16.msra.mxu0 %v14405_v4  ;;  %v16302_v12 = vld [vmem:[#allocation3] sm:$0xff]  ;;  %v16304_v13 = vld [vmem:[#allocation3 + $0x8] sm:$0xff]  ;;  %v14417_v21 = vpack.c.bf16 %v91_v11, %v90_v10 }
  0x3b   :  { %369 = vst [vmem:[#allocation2 + $0x220] sm:$0xff] %v20334_v0  ;;  %370 = vst [vmem:[#allocation2 + $0x228] sm:$0xff] %v20334_v0  ;;  %14410 = vmatprep.subr.bf16.mxu0 %v14409_v6  ;;  %v16306_v14 = vld [vmem:[#allocation3 + $0x10] sm:$0xff]  ;;  %v16311_v15 = vld [vmem:[#allocation3 + $0x18] sm:$0xff] }
  0x3c   :  { %371 = vst [vmem:[#allocation2 + $0x230] sm:$0xff] %v20334_v0  ;;  %372 = vst [vmem:[#allocation2 + $0x238] sm:$0xff] %v20334_v0  ;;  %v16313_v16 = vld [vmem:[#allocation3 + $0x20] sm:$0xff]  ;;  %v16315_v17 = vld [vmem:[#allocation3 + $0x28] sm:$0xff] }
  0x3d   :  { %373 = vst [vmem:[#allocation2 + $0x460] sm:$0xff] %v20334_v0  ;;  %374 = vst [vmem:[#allocation2 + $0x468] sm:$0xff] %v20334_v0  ;;  %v92_v18 = vld [vmem:[#allocation6 + $0xc0] sm:$0xff]  ;;  %v16320_v19 = vld [vmem:[#allocation3 + $0x30] sm:$0xff] }
  0x3e   :  { %375 = vst [vmem:[#allocation2 + $0x470] sm:$0xff] %v20334_v0  ;;  %376 = vst [vmem:[#allocation2 + $0x478] sm:$0xff] %v20334_v0  ;;  %14412 = vmatpush3.bf16.msra.mxu0 %v14409_v6  ;;  %v16322_v20 = vld [vmem:[#allocation3 + $0x38] sm:$0xff]  ;;  %v93_v22 = vld [vmem:[#allocation6 + $0xc8] sm:$0xff] }
  0x3f   :  { %378 = vst [vmem:[#allocation2 + $0x27] sm:$0x1] %v20334_v0  ;;  %379 = vst [vmem:[#allocation2 + $0x47] sm:$0x1] %v20334_v0  ;;  %14414 = vmatprep.subr.bf16.mxu0 %v14413_v9  ;;  %v16326_v23 = vld [vmem:[#allocation3 + $0x40] sm:$0xff]  ;;  %v16328_v24 = vld [vmem:[#allocation3 + $0x48] sm:$0xff]  ;;  %v14421_v34 = vpack.c.bf16 %v93_v22, %v92_v18 }
  0x40   :  { %380 = vst [vmem:[#allocation2 + $0x67] sm:$0x1] %v20334_v0  ;;  %381 = vst [vmem:[#allocation2 + $0x87] sm:$0x1] %v20334_v0  ;;  %v16332_v25 = vld [vmem:[#allocation3 + $0x50] sm:$0xff]  ;;  %v16334_v26 = vld [vmem:[#allocation3 + $0x58] sm:$0xff] }
  0x41   :  { %382 = vst [vmem:[#allocation2 + $0xa7] sm:$0x1] %v20334_v0  ;;  %383 = vst [vmem:[#allocation2 + $0xc7] sm:$0x1] %v20334_v0  ;;  %v16336_v27 = vld [vmem:[#allocation3 + $0x60] sm:$0xff]  ;;  %v16341_v28 = vld [vmem:[#allocation3 + $0x68] sm:$0xff] }
  0x42   :  { %384 = vst [vmem:[#allocation2 + $0xe7] sm:$0x1] %v20334_v0  ;;  %385 = vst [vmem:[#allocation2 + $0x107] sm:$0x1] %v20334_v0  ;;  %v16343_v29 = vld [vmem:[#allocation3 + $0x70] sm:$0xff]  ;;  %v16345_v30 = vld [vmem:[#allocation3 + $0x78] sm:$0xff]  ;;  %14416 = vmatpush3.bf16.msra.mxu0 %v14413_v9 }
  0x43   :  { %386 = vst [vmem:[#allocation2 + $0x127] sm:$0x1] %v20334_v0  ;;  %387 = vst [vmem:[#allocation2 + $0x147] sm:$0x1] %v20334_v0  ;;  %v94_v31 = vld [vmem:[#allocation6 + $0xd0] sm:$0xff]  ;;  %v95_v32 = vld [vmem:[#allocation6 + $0xd8] sm:$0xff]  ;;  %14418 = vmatprep.subr.bf16.mxu0 %v14417_v21 }
  0x44   :  { %388 = vst [vmem:[#allocation2 + $0x167] sm:$0x1] %v20334_v0  ;;  %389 = vst [vmem:[#allocation2 + $0x187] sm:$0x1] %v20334_v0  ;;  %v16350_v33 = vld [vmem:[#allocation3 + $0x80] sm:$0xff]  ;;  %v16353_v35 = vld [vmem:[#allocation3 + $0x88] sm:$0xff]  ;;  %v14425_v45 = vpack.c.bf16 %v95_v32, %v94_v31 }
  0x45   :  { %390 = vst [vmem:[#allocation2 + $0x1a7] sm:$0x1] %v20334_v0  ;;  %391 = vst [vmem:[#allocation2 + $0x1c7] sm:$0x1] %v20334_v0  ;;  %v16355_v36 = vld [vmem:[#allocation3 + $0x90] sm:$0xff]  ;;  %v16357_v37 = vld [vmem:[#allocation3 + $0x98] sm:$0xff] }
  0x46   :  { %392 = vst [vmem:[#allocation2 + $0x1e7] sm:$0x1] %v20334_v0  ;;  %393 = vst [vmem:[#allocation2 + $0x207] sm:$0x1] %v20334_v0  ;;  %v16362_v38 = vld [vmem:[#allocation3 + $0xa0] sm:$0xff]  ;;  %v16364_v39 = vld [vmem:[#allocation3 + $0xa8] sm:$0xff]  ;;  %14420 = vmatpush3.bf16.msra.mxu0 %v14417_v21 }
  0x47   :  { %396 = vst [vmem:[#allocation2 + $0x267] sm:$0x1] %v20334_v0  ;;  %397 = vst [vmem:[#allocation2 + $0x287] sm:$0x1] %v20334_v0  ;;  %v16366_v40 = vld [vmem:[#allocation3 + $0xb0] sm:$0xff]  ;;  %v16371_v41 = vld [vmem:[#allocation3 + $0xb8] sm:$0xff]  ;;  %14422 = vmatprep.subr.bf16.mxu0 %v14421_v34 }
  0x48   :  { %398 = vst [vmem:[#allocation2 + $0x2a7] sm:$0x1] %v20334_v0  ;;  %399 = vst [vmem:[#allocation2 + $0x2c7] sm:$0x1] %v20334_v0  ;;  %v16374_v42 = vld [vmem:[#allocation3 + $0xc0] sm:$0xff]  ;;  %v16376_v43 = vld [vmem:[#allocation3 + $0xc8] sm:$0xff] }
  0x49   :  { %400 = vst [vmem:[#allocation2 + $0x2e7] sm:$0x1] %v20334_v0  ;;  %401 = vst [vmem:[#allocation2 + $0x307] sm:$0x1] %v20334_v0  ;;  %v16378_v44 = vld [vmem:[#allocation3 + $0xd0] sm:$0xff]  ;;  %v16383_v46 = vld [vmem:[#allocation3 + $0xd8] sm:$0xff] }
  0x4a   :  { %402 = vst [vmem:[#allocation2 + $0x327] sm:$0x1] %v20334_v0  ;;  %403 = vst [vmem:[#allocation2 + $0x347] sm:$0x1] %v20334_v0  ;;  %v16385_v47 = vld [vmem:[#allocation3 + $0xe0] sm:$0xff]  ;;  %v16387_v48 = vld [vmem:[#allocation3 + $0xe8] sm:$0xff]  ;;  %14424 = vmatpush3.bf16.msra.mxu0 %v14421_v34 }
  0x4b   :  { %404 = vst [vmem:[#allocation2 + $0x367] sm:$0x1] %v20334_v0  ;;  %405 = vst [vmem:[#allocation2 + $0x387] sm:$0x1] %v20334_v0  ;;  %v96_v49 = vld [vmem:[#allocation6 + $0xe0] sm:$0xff]  ;;  %v97_v50 = vld [vmem:[#allocation6 + $0xe8] sm:$0xff]  ;;  %14426 = vmatprep.subr.bf16.mxu0 %v14425_v45 }
  0x4c   :  { %406 = vst [vmem:[#allocation2 + $0x3a7] sm:$0x1] %v20334_v0  ;;  %407 = vst [vmem:[#allocation2 + $0x3c7] sm:$0x1] %v20334_v0  ;;  %v16392_v51 = vld [vmem:[#allocation3 + $0x100] sm:$0xff]  ;;  %v16395_v52 = vld [vmem:[#allocation3 + $0x108] sm:$0xff]  ;;  %v14429_v58 = vpack.c.bf16 %v97_v50, %v96_v49 }
  0x4d   :  { %408 = vst [vmem:[#allocation2 + $0x3e7] sm:$0x1] %v20334_v0  ;;  %409 = vst [vmem:[#allocation2 + $0x407] sm:$0x1] %v20334_v0  ;;  %v16397_v53 = vld [vmem:[#allocation3 + $0x110] sm:$0xff]  ;;  %v16399_v54 = vld [vmem:[#allocation3 + $0x118] sm:$0xff] }
  0x4e   :  { %410 = vst [vmem:[#allocation2 + $0x427] sm:$0x1] %v20334_v0  ;;  %411 = vst [vmem:[#allocation2 + $0x447] sm:$0x1] %v20334_v0  ;;  %v16404_v55 = vld [vmem:[#allocation3 + $0x120] sm:$0xff]  ;;  %v16406_v56 = vld [vmem:[#allocation3 + $0x128] sm:$0xff]  ;;  %14428 = vmatpush3.bf16.msra.mxu0 %v14425_v45 }
  0x4f   :  { %414 = vst [vmem:[#allocation2 + $0x38] sm:$0x1] %v20334_v0  ;;  %415 = vst [vmem:[#allocation2 + $0x58] sm:$0x1] %v20334_v0  ;;  %v16408_v57 = vld [vmem:[#allocation3 + $0x130] sm:$0xff]  ;;  %v99_v60 = vld [vmem:[#allocation6 + $0xf8] sm:$0xff]  ;;  %14430 = vmatprep.subr.bf16.mxu0 %v14429_v58 }
  0x50   :  { %416 = vst [vmem:[#allocation2 + $0x78] sm:$0x1] %v20334_v0  ;;  %417 = vst [vmem:[#allocation2 + $0x98] sm:$0x1] %v20334_v0  ;;  %v98_v59 = vld [vmem:[#allocation6 + $0xf0] sm:$0xff]  ;;  %v16413_v61 = vld [vmem:[#allocation3 + $0x138] sm:$0xff] }
  0x51   :  { %418 = vst [vmem:[#allocation2 + $0xb8] sm:$0x1] %v20334_v0  ;;  %419 = vst [vmem:[#allocation2 + $0xd8] sm:$0x1] %v20334_v0  ;;  %v16416_v62 = vld [vmem:[#allocation3 + $0x140] sm:$0xff]  ;;  %v16418_v63 = vld [vmem:[#allocation3 + $0x148] sm:$0xff]  ;;  %v14433_v8 = vpack.c.bf16 %v99_v60, %v98_v59 }
  0x52   :  { %420 = vst [vmem:[#allocation2 + $0xf8] sm:$0x1] %v20334_v0  ;;  %421 = vst [vmem:[#allocation2 + $0x118] sm:$0x1] %v20334_v0  ;;  %v16420_v1 = vld [vmem:[#allocation3 + $0x150] sm:$0xff]  ;;  %v16425_v2 = vld [vmem:[#allocation3 + $0x158] sm:$0xff]  ;;  %14432 = vmatpush3.bf16.msra.mxu0 %v14429_v58 }
  0x53   :  { %422 = vst [vmem:[#allocation2 + $0x138] sm:$0x1] %v20334_v0  ;;  %423 = vst [vmem:[#allocation2 + $0x158] sm:$0x1] %v20334_v0  ;;  %v16427_v3 = vld [vmem:[#allocation3 + $0x160] sm:$0xff]  ;;  %v16429_v4 = vld [vmem:[#allocation3 + $0x168] sm:$0xff]  ;;  %14434 = vmatprep.subr.bf16.mxu0 %v14433_v8 }
  0x54   :  { %424 = vst [vmem:[#allocation2 + $0x178] sm:$0x1] %v20334_v0  ;;  %425 = vst [vmem:[#allocation2 + $0x198] sm:$0x1] %v20334_v0  ;;  %v68_v5 = vld [vmem:[#allocation6] sm:$0xff]  ;;  %v16434_v6 = vld [vmem:[#allocation3 + $0x170] sm:$0xff] }
  0x55   :  { %426 = vst [vmem:[#allocation2 + $0x1b8] sm:$0x1] %v20334_v0  ;;  %427 = vst [vmem:[#allocation2 + $0x1d8] sm:$0x1] %v20334_v0  ;;  %v16436_v7 = vld [vmem:[#allocation3 + $0x178] sm:$0xff]  ;;  %v69_v9 = vld [vmem:[#allocation6 + $0x8] sm:$0xff] }
  0x56   :  { %428 = vst [vmem:[#allocation2 + $0x1f8] sm:$0x1] %v20334_v0  ;;  %429 = vst [vmem:[#allocation2 + $0x218] sm:$0x1] %v20334_v0  ;;  %v16440_v10 = vld [vmem:[#allocation3 + $0x180] sm:$0xff]  ;;  %v16442_v11 = vld [vmem:[#allocation3 + $0x188] sm:$0xff]  ;;  %v14437_v50 = vpack.c.bf16 %v69_v9, %v68_v5  ;;  %14436 = vmatpush3.bf16.msra.mxu0 %v14433_v8 }
  0x57   :  { %432 = vst [vmem:[#allocation2 + $0x278] sm:$0x1] %v20334_v0  ;;  %433 = vst [vmem:[#allocation2 + $0x298] sm:$0x1] %v20334_v0  ;;  %v16446_v18 = vld [vmem:[#allocation3 + $0x190] sm:$0xff]  ;;  %v16448_v21 = vld [vmem:[#allocation3 + $0x198] sm:$0xff] }
  0x58   :  { %434 = vst [vmem:[#allocation2 + $0x2b8] sm:$0x1] %v20334_v0  ;;  %435 = vst [vmem:[#allocation2 + $0x2d8] sm:$0x1] %v20334_v0  ;;  %v16450_v22 = vld [vmem:[#allocation3 + $0x1a0] sm:$0xff]  ;;  %v16455_v31 = vld [vmem:[#allocation3 + $0x1a8] sm:$0xff]  ;;  %14438 = vmatprep.subr.bf16.mxu0 %v14437_v50 }
  0x59   :  { %436 = vst [vmem:[#allocation2 + $0x2f8] sm:$0x1] %v20334_v0  ;;  %437 = vst [vmem:[#allocation2 + $0x318] sm:$0x1] %v20334_v0  ;;  %v16457_v32 = vld [vmem:[#allocation3 + $0x1b0] sm:$0xff]  ;;  %v16459_v34 = vld [vmem:[#allocation3 + $0x1b8] sm:$0xff] }
  0x5a   :  { %438 = vst [vmem:[#allocation2 + $0x338] sm:$0x1] %v20334_v0  ;;  %439 = vst [vmem:[#allocation2 + $0x358] sm:$0x1] %v20334_v0  ;;  %v70_v45 = vld [vmem:[#allocation6 + $0x10] sm:$0xff]  ;;  %v16464_v49 = vld [vmem:[#allocation3 + $0x1c0] sm:$0xff] }
  0x5b   :  { %440 = vst [vmem:[#allocation2 + $0x378] sm:$0x1] %v20334_v0  ;;  %441 = vst [vmem:[#allocation2 + $0x398] sm:$0x1] %v20334_v0  ;;  %v16467_v59 = vld [vmem:[#allocation3 + $0x1c8] sm:$0xff]  ;;  %v16469_v60 = vld [vmem:[#allocation3 + $0x1d0] sm:$0xff] }
  0x5c   :  { %442 = vst [vmem:[#allocation2 + $0x3b8] sm:$0x1] %v20334_v0  ;;  %443 = vst [vmem:[#allocation2 + $0x3d8] sm:$0x1] %v20334_v0  ;;  %v71_v58 = vld [vmem:[#allocation6 + $0x18] sm:$0xff]  ;;  %v72_v9 = vld [vmem:[#allocation6 + $0x20] sm:$0xff] }
  0x5d   :  { %444 = vst [vmem:[#allocation2 + $0x3f8] sm:$0x1] %v20334_v0  ;;  %445 = vst [vmem:[#allocation2 + $0x418] sm:$0x1] %v20334_v0  ;;  %v14441_v5 = vpack.c.bf16 %v71_v58, %v70_v45  ;;  %v77_v45 = vld [vmem:[#allocation6 + $0x48] sm:$0xff] }
  0x5e   :  { %446 = vst [vmem:[#allocation2 + $0x438] sm:$0x1] %v20334_v0  ;;  %447 = vst [vmem:[#allocation2 + $0x458] sm:$0x1] %v20334_v0 }
  0x5f   :  { %377 = vst [vmem:[#allocation2 + $0x7] sm:$0x1] %v20334_v0  ;;  %394 = vst [vmem:[#allocation2 + $0x227] sm:$0x1] %v20334_v0 }
  0x60   :  { %395 = vst [vmem:[#allocation2 + $0x247] sm:$0x1] %v20334_v0  ;;  %412 = vst [vmem:[#allocation2 + $0x467] sm:$0x1] %v20334_v0 }
  0x61   :  { %413 = vst [vmem:[#allocation2 + $0x18] sm:$0x1] %v20334_v0  ;;  %430 = vst [vmem:[#allocation2 + $0x238] sm:$0x1] %v20334_v0 }
  0x62   :  { %431 = vst [vmem:[#allocation2 + $0x258] sm:$0x1] %v20334_v0  ;;  %448 = vst [vmem:[#allocation2 + $0x478] sm:$0x1] %v20334_v0  ;;  %v16471_v0 = vld [vmem:[#allocation3 + $0x1d8] sm:$0xff] }
  0x63   :  { %514 = vst [vmem:[#allocation2 + $0x28] sm:$0xff] %v16302_v12  ;;  %515 = vst [vmem:[#allocation2 + $0x30] sm:$0xff] %v16304_v13 }
  0x64   :  { %516 = vst [vmem:[#allocation2 + $0x48] sm:$0xff] %v16306_v14  ;;  %517 = vst [vmem:[#allocation2 + $0x50] sm:$0xff] %v16311_v15 }
  0x65   :  { %518 = vst [vmem:[#allocation2 + $0x68] sm:$0xff] %v16313_v16  ;;  %519 = vst [vmem:[#allocation2 + $0x70] sm:$0xff] %v16315_v17 }
  0x66   :  { %520 = vst [vmem:[#allocation2 + $0x88] sm:$0xff] %v16320_v19  ;;  %521 = vst [vmem:[#allocation2 + $0x90] sm:$0xff] %v16322_v20 }
  0x67   :  { %522 = vst [vmem:[#allocation2 + $0xa8] sm:$0xff] %v16326_v23  ;;  %523 = vst [vmem:[#allocation2 + $0xb0] sm:$0xff] %v16328_v24 }
  0x68   :  { %524 = vst [vmem:[#allocation2 + $0xc8] sm:$0xff] %v16332_v25  ;;  %525 = vst [vmem:[#allocation2 + $0xd0] sm:$0xff] %v16334_v26 }
  0x69   :  { %526 = vst [vmem:[#allocation2 + $0xe8] sm:$0xff] %v16336_v27  ;;  %527 = vst [vmem:[#allocation2 + $0xf0] sm:$0xff] %v16341_v28 }
  0x6a   :  { %528 = vst [vmem:[#allocation2 + $0x108] sm:$0xff] %v16343_v29  ;;  %529 = vst [vmem:[#allocation2 + $0x110] sm:$0xff] %v16345_v30 }
  0x6b   :  { %530 = vst [vmem:[#allocation2 + $0x128] sm:$0xff] %v16350_v33  ;;  %531 = vst [vmem:[#allocation2 + $0x130] sm:$0xff] %v16353_v35 }
  0x6c   :  { %532 = vst [vmem:[#allocation2 + $0x148] sm:$0xff] %v16355_v36  ;;  %533 = vst [vmem:[#allocation2 + $0x150] sm:$0xff] %v16357_v37 }
  0x6d   :  { %534 = vst [vmem:[#allocation2 + $0x168] sm:$0xff] %v16362_v38  ;;  %535 = vst [vmem:[#allocation2 + $0x170] sm:$0xff] %v16364_v39 }
  0x6e   :  { %536 = vst [vmem:[#allocation2 + $0x188] sm:$0xff] %v16366_v40  ;;  %537 = vst [vmem:[#allocation2 + $0x190] sm:$0xff] %v16371_v41 }
  0x6f   :  { %538 = vst [vmem:[#allocation2 + $0x1a8] sm:$0xff] %v16374_v42  ;;  %539 = vst [vmem:[#allocation2 + $0x1b0] sm:$0xff] %v16376_v43 }
  0x70   :  { %540 = vst [vmem:[#allocation2 + $0x1c8] sm:$0xff] %v16378_v44  ;;  %541 = vst [vmem:[#allocation2 + $0x1d0] sm:$0xff] %v16383_v46  ;;  %v16584_v58 = vld [vmem:[#allocation2 + $0xef] sm:$0xff] }
  0x71   :  { %542 = vst [vmem:[#allocation2 + $0x1e8] sm:$0xff] %v16385_v47  ;;  %543 = vst [vmem:[#allocation2 + $0x1f0] sm:$0xff] %v16387_v48 }
  0x72   :  { %546 = vst [vmem:[#allocation2 + $0x268] sm:$0xff] %v16392_v51  ;;  %547 = vst [vmem:[#allocation2 + $0x270] sm:$0xff] %v16395_v52 }
  0x73   :  { %548 = vst [vmem:[#allocation2 + $0x288] sm:$0xff] %v16397_v53  ;;  %549 = vst [vmem:[#allocation2 + $0x290] sm:$0xff] %v16399_v54 }
  0x74   :  { %550 = vst [vmem:[#allocation2 + $0x2a8] sm:$0xff] %v16404_v55  ;;  %551 = vst [vmem:[#allocation2 + $0x2b0] sm:$0xff] %v16406_v56 }
  0x75   :  { %552 = vst [vmem:[#allocation2 + $0x2c8] sm:$0xff] %v16408_v57  ;;  %553 = vst [vmem:[#allocation2 + $0x2d0] sm:$0xff] %v16413_v61 }
  0x76   :  { %554 = vst [vmem:[#allocation2 + $0x2e8] sm:$0xff] %v16416_v62  ;;  %555 = vst [vmem:[#allocation2 + $0x2f0] sm:$0xff] %v16418_v63 }
  0x77   :  { %556 = vst [vmem:[#allocation2 + $0x308] sm:$0xff] %v16420_v1  ;;  %557 = vst [vmem:[#allocation2 + $0x310] sm:$0xff] %v16425_v2 }
  0x78   :  { %558 = vst [vmem:[#allocation2 + $0x328] sm:$0xff] %v16427_v3  ;;  %559 = vst [vmem:[#allocation2 + $0x330] sm:$0xff] %v16429_v4 }
  0x79   :  { %560 = vst [vmem:[#allocation2 + $0x348] sm:$0xff] %v16434_v6  ;;  %561 = vst [vmem:[#allocation2 + $0x350] sm:$0xff] %v16436_v7 }
  0x7a   :  { %562 = vst [vmem:[#allocation2 + $0x368] sm:$0xff] %v16440_v10  ;;  %563 = vst [vmem:[#allocation2 + $0x370] sm:$0xff] %v16442_v11 }
  0x7b   :  { %564 = vst [vmem:[#allocation2 + $0x388] sm:$0xff] %v16446_v18  ;;  %565 = vst [vmem:[#allocation2 + $0x390] sm:$0xff] %v16448_v21 }
  0x7c   :  { %566 = vst [vmem:[#allocation2 + $0x3a8] sm:$0xff] %v16450_v22  ;;  %20611 = vst [vmem:[#allocation13_spill] sm:$0xff] %v16455_v31 }
  0x7d   :  { %20612 = vst [vmem:[#allocation14_spill] sm:$0xff] %v16457_v32  ;;  %20613 = vst [vmem:[#allocation15_spill] sm:$0xff] %v16459_v34 }
  0x7e   :  { %567 = vst [vmem:[#allocation2 + $0x3b0] sm:$0xff] %v16455_v31  ;;  %568 = vst [vmem:[#allocation2 + $0x3c8] sm:$0xff] %v16457_v32  ;;  %v16478_v32 = vld [vmem:[#allocation3 + $0x1e8] sm:$0xff]  ;;  %v20619_v31 = vmov 0.0  }
  0x7f   :  { %569 = vst [vmem:[#allocation2 + $0x3d0] sm:$0xff] %v16459_v34  ;;  %20614 = vst [vmem:[#allocation16_spill] sm:$0xff] %v16464_v49  ;;  %v16476_v34 = vld [vmem:[#allocation3 + $0x1e0] sm:$0xff]  ;;  %12134 = vmatmul.mubr.f32.vlgmr.msra.gmra.mrb[0].mxu0 %v20619_v31 }
  0x80   :  { %570 = vst [vmem:[#allocation2 + $0x3e8] sm:$0xff] %v16464_v49  ;;  %20615 = vst [vmem:[#allocation17_spill] sm:$0xff] %v16467_v59  ;;  %v73_v49 = vld [vmem:[#allocation6 + $0x28] sm:$0xff]  ;;  %14440 = vmatpush3.bf16.msra.mxu0 %v14437_v50  ;;  %12136 = vmatprep.mubr.f32.mxu0 %v16302_v12  ;;  %v78_v50 = vld [vmem:[#allocation6 + $0x50] sm:$0xff] }
  0x81   :  { %20616 = vst [vmem:[#allocation18_spill] sm:$0xff] %v16469_v60  ;;  %20617 = vst [vmem:[#allocation19_spill] sm:$0xff] %v16471_v0  ;;  %14442 = vmatprep.subr.bf16.mxu0 %v14441_v5 }
  0x82   :  { %571 = vst [vmem:[#allocation2 + $0x3f0] sm:$0xff] %v16467_v59  ;;  %572 = vst [vmem:[#allocation2 + $0x408] sm:$0xff] %v16469_v60  ;;  %v74_v60 = vld [vmem:[#allocation6 + $0x30] sm:$0xff]  ;;  %v75_v59 = vld [vmem:[#allocation6 + $0x38] sm:$0xff] }
  0x83   :  { %573 = vst [vmem:[#allocation2 + $0x410] sm:$0xff] %v16471_v0  ;;  %20618 = vst [vmem:[#allocation20_spill] sm:$0xff] %v16478_v32  ;;  %v14445_v0 = vpack.c.bf16 %v73_v49, %v72_v9  ;;  %12137 = vmatmul.mubr.f32.gmra.mrb[2].mxu0 %v16304_v13  ;;  %v14449_v8 = vpack.c.bf16 %v75_v59, %v74_v60  ;;  %v79_v49 = vld [vmem:[#allocation6 + $0x58] sm:$0xff]  ;;  %v81_v59 = vld [vmem:[#allocation6 + $0x68] sm:$0xff] }
  0x84   :  { %574 = vst [vmem:[#allocation2 + $0x428] sm:$0xff] %v16476_v34  ;;  %575 = vst [vmem:[#allocation2 + $0x430] sm:$0xff] %v16478_v32  ;;  %12139 = vmatprep.mubr.f32.mxu0 %v16306_v14  ;;  %14444 = vmatpush3.bf16.msra.mxu0 %v14441_v5  ;;  %v76_v32 = vld [vmem:[#allocation6 + $0x40] sm:$0xff]  ;;  %v14457_v13 = vpack.c.bf16 %v79_v49, %v78_v50  ;;  %v117_v60 = vld [vmem:[#allocation6 + $0x188] sm:$0xff] }
  0x85   :  { %14446 = vmatprep.subr.bf16.mxu0 %v14445_v0  ;;  %v14453_v12 = vpack.c.bf16 %v77_v45, %v76_v32  ;;  %v80_v14 = vld [vmem:[#allocation6 + $0x60] sm:$0xff]  ;;  %v101_v32 = vld [vmem:[#allocation6 + $0x108] sm:$0xff] }
  0x86   :  { %v16586_v5 = vld [vmem:[#allocation2 + $0x107] sm:$0xff]  ;;  %v16605_v49 = vld [vmem:[#allocation2 + $0x14f] sm:$0xff] }
  0x87   :  { %12140 = vmatmul.mubr.f32.gmra.mrb[4].mxu0 %v16311_v15  ;;  %v82_v15 = vld [vmem:[#allocation6 + $0x70] sm:$0xff]  ;;  %v16594_v45 = vld [vmem:[#allocation2 + $0x127] sm:$0xff] }
  0x88   :  { %12142 = vmatprep.mubr.f32.mxu0 %v16313_v16  ;;  %14448 = vmatpush3.bf16.msra.mxu0 %v14445_v0  ;;  %v14461_v0 = vpack.c.bf16 %v81_v59, %v80_v14  ;;  %v83_v16 = vld [vmem:[#allocation6 + $0x78] sm:$0xff]  ;;  %v16601_v50 = vld [vmem:[#allocation2 + $0x147] sm:$0xff]  ;;  %v16611_v14 = vld [vmem:[#allocation2 + $0x16f] sm:$0xff] }
  0x89   :  { %14450 = vmatprep.subr.bf16.mxu0 %v14449_v8  ;;  %v16613_v59 = vld [vmem:[#allocation2 + $0x187] sm:$0xff] }
  0x8b   :  { %12143 = vmatmul.mubr.f32.gmra.mrb[6].mxu0 %v16315_v17  ;;  %v14465_v17 = vpack.c.bf16 %v83_v16, %v82_v15  ;;  %v16619_v15 = vld [vmem:[#allocation2 + $0x1a7] sm:$0xff]  ;;  %v16623_v16 = vld [vmem:[#allocation2 + $0x1af] sm:$0xff] }
  0x8c   :  { %12145 = vmatprep.mubr.f32.mxu0 %v16320_v19  ;;  %14452 = vmatpush3.bf16.msra.mxu0 %v14449_v8  ;;  %v100_v19 = vld [vmem:[#allocation6 + $0x100] sm:$0xff]  ;;  %v16592_v8 = vld [vmem:[#allocation2 + $0x10f] sm:$0xff] }
  0x8d   :  { %14454 = vmatprep.subr.bf16.mxu0 %v14453_v12 }
  0x8f   :  { %12146 = vmatmul.mubr.f32.gmra.mrb[8].mxu0 %v16322_v20  ;;  %v14469_v20 = vpack.c.bf16 %v101_v32, %v100_v19  ;;  %v16629_v19 = vld [vmem:[#allocation2 + $0x1cf] sm:$0xff]  ;;  %v16631_v32 = vld [vmem:[#allocation2 + $0x1e7] sm:$0xff] }
  0x90   :  { %12148 = vmatprep.mubr.f32.mxu0 %v16326_v23  ;;  %14456 = vmatpush3.bf16.msra.mxu0 %v14453_v12  ;;  %v20620_v23 = vld [vmem:[#allocation13_spill] sm:$0xff]  ;;  %v16599_v12 = vld [vmem:[#allocation2 + $0x12f] sm:$0xff] }
  0x91   :  { %14458 = vmatprep.subr.bf16.mxu0 %v14457_v13 }
  0x93   :  { %12149 = vmatmul.mubr.f32.gmra.mrb[10].mxu0 %v16328_v24  ;;  %v20621_v24 = vld [vmem:[#allocation14_spill] sm:$0xff] }
  0x94   :  { %12151 = vmatprep.mubr.f32.mxu0 %v16332_v25  ;;  %14460 = vmatpush3.bf16.msra.mxu0 %v14457_v13  ;;  %v20622_v25 = vld [vmem:[#allocation15_spill] sm:$0xff]  ;;  %v16607_v13 = vld [vmem:[#allocation2 + $0x167] sm:$0xff] }
  0x95   :  { %14462 = vmatprep.subr.bf16.mxu0 %v14461_v0 }
  0x97   :  { %12152 = vmatmul.mubr.f32.gmra.mrb[12].mxu0 %v16334_v26  ;;  %v20623_v26 = vld [vmem:[#allocation16_spill] sm:$0xff] }
  0x98   :  { %12154 = vmatprep.mubr.f32.mxu0 %v16336_v27  ;;  %14464 = vmatpush3.bf16.msra.mxu0 %v14461_v0  ;;  %v20624_v27 = vld [vmem:[#allocation17_spill] sm:$0xff]  ;;  %v16617_v0 = vld [vmem:[#allocation2 + $0x18f] sm:$0xff] }
  0x99   :  { %14466 = vmatprep.subr.bf16.mxu0 %v14465_v17 }
  0x9b   :  { %12155 = vmatmul.mubr.f32.gmra.mrb[14].mxu0 %v16341_v28  ;;  %v20625_v28 = vld [vmem:[#allocation18_spill] sm:$0xff] }
  0x9c   :  { %12157 = vmatprep.mubr.f32.mxu0 %v16343_v29  ;;  %14468 = vmatpush3.bf16.msra.mxu0 %v14465_v17  ;;  %v20626_v29 = vld [vmem:[#allocation19_spill] sm:$0xff]  ;;  %v16625_v17 = vld [vmem:[#allocation2 + $0x1c7] sm:$0xff] }
  0x9d   :  { %14470 = vmatprep.subr.bf16.mxu0 %v14469_v20 }
  0x9f   :  { %12158 = vmatmul.mubr.f32.gmra.mrb[16].mxu0 %v16345_v30  ;;  %v578_v30 = vld [vmem:[#allocation2 + $0x7] sm:$0xff] }
  0xa0   :  { %12160 = vmatprep.mubr.f32.mxu0 %v16350_v33  ;;  %v102_v33 = vld [vmem:[#allocation6 + $0x110] sm:$0xff] }
  0xa3   :  { %12161 = vmatmul.mubr.f32.gmra.mrb[18].mxu0 %v16353_v35  ;;  %v103_v35 = vld [vmem:[#allocation6 + $0x118] sm:$0xff] }
  0xa4   :  { %12163 = vmatprep.mubr.f32.mxu0 %v16355_v36  ;;  %v20627_v36 = vld [vmem:[#allocation20_spill] sm:$0xff] }
  0xa7   :  { %12164 = vmatmul.mubr.f32.gmra.mrb[20].mxu0 %v16357_v37  ;;  %v579_v37 = vld [vmem:[#allocation2 + $0xf] sm:$0xff] }
  0xa8   :  { %12166 = vmatprep.mubr.f32.mxu0 %v16362_v38  ;;  %v16545_v38 = vld [vmem:[#allocation2 + $0x27] sm:$0xff] }
  0xab   :  { %12167 = vmatmul.mubr.f32.gmra.mrb[22].mxu0 %v16364_v39  ;;  %v14473_v39 = vpack.c.bf16 %v103_v35, %v102_v33  ;;  %v16655_v33 = vld [vmem:[#allocation2 + $0x2c7] sm:$0xff]  ;;  %v16659_v35 = vld [vmem:[#allocation2 + $0x2cf] sm:$0xff] }
  0xac   :  { %12169 = vmatprep.mubr.f32.mxu0 %v16366_v40  ;;  %v104_v40 = vld [vmem:[#allocation6 + $0x120] sm:$0xff] }
  0xaf   :  { %12170 = vmatmul.mubr.f32.gmra.mrb[24].mxu0 %v16371_v41  ;;  %v105_v41 = vld [vmem:[#allocation6 + $0x128] sm:$0xff] }
  0xb0   :  { %12172 = vmatprep.mubr.f32.mxu0 %v16374_v42  ;;  %v16548_v42 = vld [vmem:[#allocation2 + $0x2f] sm:$0xff] }
  0xb3   :  { %12173 = vmatmul.mubr.f32.gmra.mrb[26].mxu0 %v16376_v43  ;;  %v16550_v43 = vld [vmem:[#allocation2 + $0x47] sm:$0xff] }
  0xb4   :  { %12175 = vmatprep.mubr.f32.mxu0 %v16378_v44  ;;  %v14477_v44 = vpack.c.bf16 %v105_v41, %v104_v40  ;;  %v16671_v40 = vld [vmem:[#allocation2 + $0x30f] sm:$0xff]  ;;  %v16673_v41 = vld [vmem:[#allocation2 + $0x327] sm:$0xff] }
  0xb7   :  { %12176 = vmatmul.mubr.f32.gmra.mrb[28].mxu0 %v16383_v46  ;;  %v106_v46 = vld [vmem:[#allocation6 + $0x130] sm:$0xff] }
  0xb8   :  { %12178 = vmatprep.mubr.f32.mxu0 %v16385_v47  ;;  %v107_v47 = vld [vmem:[#allocation6 + $0x138] sm:$0xff] }
  0xbb   :  { %12179 = vmatmul.mubr.f32.gmra.mrb[30].mxu0 %v16387_v48  ;;  %v16554_v48 = vld [vmem:[#allocation2 + $0x4f] sm:$0xff] }
  0xbc   :  { %12181 = vmatprep.mubr.f32.mxu0 %v20619_v31 }
  0xbf   :  { %12182 = vmatmul.mubr.f32.gmra.mrb[32].mxu0 %v20619_v31 }
  0xc0   :  { %12184 = vmatprep.mubr.f32.mxu0 %v16392_v51  ;;  %v16556_v51 = vld [vmem:[#allocation2 + $0x67] sm:$0xff] }
  0xc3   :  { %12185 = vmatmul.mubr.f32.gmra.mrb[34].mxu0 %v16395_v52  ;;  %v14481_v52 = vpack.c.bf16 %v107_v47, %v106_v46  ;;  %v16679_v46 = vld [vmem:[#allocation2 + $0x347] sm:$0xff]  ;;  %v16683_v47 = vld [vmem:[#allocation2 + $0x34f] sm:$0xff] }
  0xc4   :  { %12187 = vmatprep.mubr.f32.mxu0 %v16397_v53  ;;  %v108_v53 = vld [vmem:[#allocation6 + $0x140] sm:$0xff] }
  0xc7   :  { %12188 = vmatmul.mubr.f32.gmra.mrb[36].mxu0 %v16399_v54  ;;  %v109_v54 = vld [vmem:[#allocation6 + $0x148] sm:$0xff] }
  0xc8   :  { %12190 = vmatprep.mubr.f32.mxu0 %v16404_v55  ;;  %v16560_v55 = vld [vmem:[#allocation2 + $0x6f] sm:$0xff] }
  0xcb   :  { %12191 = vmatmul.mubr.f32.gmra.mrb[38].mxu0 %v16406_v56  ;;  %v16562_v56 = vld [vmem:[#allocation2 + $0x87] sm:$0xff] }
  0xcc   :  { %12193 = vmatprep.mubr.f32.mxu0 %v16408_v57  ;;  %v14485_v57 = vpack.c.bf16 %v109_v54, %v108_v53  ;;  %v16689_v53 = vld [vmem:[#allocation2 + $0x36f] sm:$0xff]  ;;  %v16691_v54 = vld [vmem:[#allocation2 + $0x387] sm:$0xff] }
  0xcf   :  { %12194 = vmatmul.mubr.f32.gmra.mrb[40].mxu0 %v16413_v61  ;;  %v110_v61 = vld [vmem:[#allocation6 + $0x150] sm:$0xff] }
  0xd0   :  { %12196 = vmatprep.mubr.f32.mxu0 %v16416_v62  ;;  %v111_v62 = vld [vmem:[#allocation6 + $0x158] sm:$0xff] }
  0xd3   :  { %12197 = vmatmul.mubr.f32.gmra.mrb[42].mxu0 %v16418_v63  ;;  %v16566_v63 = vld [vmem:[#allocation2 + $0x8f] sm:$0xff] }
  0xd4   :  { %12199 = vmatprep.mubr.f32.mxu0 %v16420_v1  ;;  %v16568_v1 = vld [vmem:[#allocation2 + $0xa7] sm:$0xff] }
  0xd7   :  { %12200 = vmatmul.mubr.f32.gmra.mrb[44].mxu0 %v16425_v2  ;;  %v14489_v2 = vpack.c.bf16 %v111_v62, %v110_v61  ;;  %v16697_v61 = vld [vmem:[#allocation2 + $0x3a7] sm:$0xff]  ;;  %v16701_v62 = vld [vmem:[#allocation2 + $0x3af] sm:$0xff] }
  0xd8   :  { %12202 = vmatprep.mubr.f32.mxu0 %v16427_v3  ;;  %v112_v3 = vld [vmem:[#allocation6 + $0x160] sm:$0xff]  ;;  %20628 = vst [vmem:[#allocation13_spill] sm:$0xff] %v16697_v61  ;;  %20629 = vst [vmem:[#allocation14_spill] sm:$0xff] %v16701_v62 }
  0xdb   :  { %12203 = vmatmul.mubr.f32.gmra.mrb[46].mxu0 %v16429_v4  ;;  %v113_v4 = vld [vmem:[#allocation6 + $0x168] sm:$0xff] }
  0xdc   :  { %12205 = vmatprep.mubr.f32.mxu0 %v16434_v6  ;;  %v16572_v6 = vld [vmem:[#allocation2 + $0xaf] sm:$0xff] }
  0xdf   :  { %12206 = vmatmul.mubr.f32.gmra.mrb[48].mxu0 %v16436_v7  ;;  %v16574_v7 = vld [vmem:[#allocation2 + $0xc7] sm:$0xff] }
  0xe0   :  { %12208 = vmatprep.mubr.f32.mxu0 %v16440_v10  ;;  %v14493_v10 = vpack.c.bf16 %v113_v4, %v112_v3  ;;  %v16707_v3 = vld [vmem:[#allocation2 + $0x3cf] sm:$0xff]  ;;  %v16709_v4 = vld [vmem:[#allocation2 + $0x3e7] sm:$0xff] }
  0xe1   :  { %20631 = vst [vmem:[#allocation16_spill] sm:$0xff] %v16707_v3  ;;  %20632 = vst [vmem:[#allocation17_spill] sm:$0xff] %v16709_v4 }
  0xe3   :  { %12209 = vmatmul.mubr.f32.gmra.mrb[50].mxu0 %v16442_v11  ;;  %v114_v11 = vld [vmem:[#allocation6 + $0x170] sm:$0xff] }
  0xe4   :  { %12211 = vmatprep.mubr.f32.mxu0 %v16446_v18  ;;  %v115_v18 = vld [vmem:[#allocation6 + $0x178] sm:$0xff] }
  0xe5   :  { %v14497_v31 = vpack.c.bf16 %v115_v18, %v114_v11  ;;  %v16715_v11 = vld [vmem:[#allocation2 + $0x407] sm:$0xff]  ;;  %v16719_v18 = vld [vmem:[#allocation2 + $0x40f] sm:$0xff] }
  0xe6   :  { %20634 = vst [vmem:[#allocation19_spill] sm:$0xff] %v16715_v11  ;;  %20635 = vst [vmem:[#allocation20_spill] sm:$0xff] %v16719_v18 }
  0xe7   :  { %12212 = vmatmul.mubr.f32.gmra.mrb[52].mxu0 %v16448_v21  ;;  %v16578_v21 = vld [vmem:[#allocation2 + $0xcf] sm:$0xff] }
  0xe8   :  { %12214 = vmatprep.mubr.f32.mxu0 %v16450_v22  ;;  %v16580_v22 = vld [vmem:[#allocation2 + $0xe7] sm:$0xff] }
  0xeb   :  { %12215 = vmatmul.mubr.f32.gmra.mrb[54].mxu0 %v20620_v23  ;;  %v610_v23 = vld [vmem:[#allocation2 + $0x247] sm:$0xff] }
  0xec   :  { %12217 = vmatprep.mubr.f32.mxu0 %v20621_v24  ;;  %v611_v24 = vld [vmem:[#allocation2 + $0x24f] sm:$0xff] }
  0xef   :  { %12218 = vmatmul.mubr.f32.gmra.mrb[56].mxu0 %v20622_v25  ;;  %v16638_v25 = vld [vmem:[#allocation2 + $0x267] sm:$0xff] }
  0xf0   :  { %12220 = vmatprep.mubr.f32.mxu0 %v20623_v26  ;;  %v16641_v26 = vld [vmem:[#allocation2 + $0x26f] sm:$0xff] }
  0xf3   :  { %12221 = vmatmul.mubr.f32.gmra.mrb[58].mxu0 %v20624_v27  ;;  %v16643_v27 = vld [vmem:[#allocation2 + $0x287] sm:$0xff] }
  0xf4   :  { %12223 = vmatprep.mubr.f32.mxu0 %v20625_v28  ;;  %v16647_v28 = vld [vmem:[#allocation2 + $0x28f] sm:$0xff] }
  0xf7   :  { %12224 = vmatmul.mubr.f32.gmra.mrb[60].mxu0 %v20626_v29  ;;  %v16649_v29 = vld [vmem:[#allocation2 + $0x2a7] sm:$0xff] }
  0xf8   :  { %12226 = vmatprep.mubr.f32.mxu0 %v16476_v34  ;;  %v116_v34 = vld [vmem:[#allocation6 + $0x180] sm:$0xff] }
  0xf9   :  { %v16588_v9 = vpack.c.bf16 %v117_v60, %v116_v34  ;;  %v16725_v34 = vld [vmem:[#allocation2 + $0x42f] sm:$0xff] }
  0xfa   :  { %20637 = vst [vmem:[#allocation22_spill] sm:$0xff] %v16725_v34  ;;  %v1476_v60 = vld [vmem:[#allocation2 + $0x9] sm:$0xff] }
  0xfb   :  { %12227 = vmatmul.mubr.f32.gmra.mrb[62].mxu0 %v20627_v36  ;;  %v16661_v36 = vld [vmem:[#allocation2 + $0x2e7] sm:$0xff] }
  0xfc   :  { %12261 = vmatprep.mubr.f32.mxu0 %v578_v30  ;;  %v16653_v30 = vld [vmem:[#allocation2 + $0x2af] sm:$0xff] }
  0xff   :  { %12262 = vmatmul.mubr.f32.vlgmr.msra.gmra.mrb[0].mxu0 %v579_v37  ;;  %v16665_v37 = vld [vmem:[#allocation2 + $0x2ef] sm:$0xff] }
 0x100   :  { %14472 = vmatpush3.bf16.msra.mxu0 %v14469_v20  ;;  %12264 = vmatprep.mubr.f32.mxu0 %v16545_v38  ;;  %v16635_v20 = vld [vmem:[#allocation2 + $0x1ef] sm:$0xff] }
 0x101   :  { %14474 = vmatprep.subr.bf16.mxu0 %v14473_v39 }
 0x103   :  { %12265 = vmatmul.mubr.f32.gmra.mrb[2].mxu0 %v16548_v42 }
 0x104   :  { %12267 = vmatprep.mubr.f32.mxu0 %v16550_v43  ;;  %14476 = vmatpush3.bf16.msra.mxu0 %v14473_v39  ;;  %v16667_v39 = vld [vmem:[#allocation2 + $0x307] sm:$0xff] }
 0x105   :  { %14478 = vmatprep.subr.bf16.mxu0 %v14477_v44 }
 0x107   :  { %12268 = vmatmul.mubr.f32.gmra.mrb[4].mxu0 %v16554_v48 }
 0x108   :  { %12270 = vmatprep.mubr.f32.mxu0 %v16556_v51  ;;  %14480 = vmatpush3.bf16.msra.mxu0 %v14477_v44  ;;  %v16677_v44 = vld [vmem:[#allocation2 + $0x32f] sm:$0xff] }
 0x109   :  { %14482 = vmatprep.subr.bf16.mxu0 %v14481_v52 }
 0x10b   :  { %12271 = vmatmul.mubr.f32.gmra.mrb[6].mxu0 %v16560_v55 }
 0x10c   :  { %12273 = vmatprep.mubr.f32.mxu0 %v16562_v56  ;;  %14484 = vmatpush3.bf16.msra.mxu0 %v14481_v52  ;;  %v16685_v52 = vld [vmem:[#allocation2 + $0x367] sm:$0xff] }
 0x10d   :  { %14486 = vmatprep.subr.bf16.mxu0 %v14485_v57 }
 0x10f   :  { %12274 = vmatmul.mubr.f32.gmra.mrb[8].mxu0 %v16566_v63 }
 0x110   :  { %12276 = vmatprep.mubr.f32.mxu0 %v16568_v1  ;;  %14488 = vmatpush3.bf16.msra.mxu0 %v14485_v57  ;;  %v16695_v57 = vld [vmem:[#allocation2 + $0x38f] sm:$0xff] }
 0x111   :  { %14490 = vmatprep.subr.bf16.mxu0 %v14489_v2 }
 0x113   :  { %12277 = vmatmul.mubr.f32.gmra.mrb[10].mxu0 %v16572_v6 }
 0x114   :  { %12279 = vmatprep.mubr.f32.mxu0 %v16574_v7  ;;  %14492 = vmatpush3.bf16.msra.mxu0 %v14489_v2  ;;  %v16703_v2 = vld [vmem:[#allocation2 + $0x3c7] sm:$0xff] }
 0x115   :  { %14494 = vmatprep.subr.bf16.mxu0 %v14493_v10  ;;  %20630 = vst [vmem:[#allocation15_spill] sm:$0xff] %v16703_v2 }
 0x117   :  { %12280 = vmatmul.mubr.f32.gmra.mrb[12].mxu0 %v16578_v21 }
 0x118   :  { %12282 = vmatprep.mubr.f32.mxu0 %v16580_v22  ;;  %14496 = vmatpush3.bf16.msra.mxu0 %v14493_v10  ;;  %v16713_v10 = vld [vmem:[#allocation2 + $0x3ef] sm:$0xff] }
 0x119   :  { %14498 = vmatprep.subr.bf16.mxu0 %v14497_v31  ;;  %20633 = vst [vmem:[#allocation18_spill] sm:$0xff] %v16713_v10 }
 0x11b   :  { %12283 = vmatmul.mubr.f32.gmra.mrb[14].mxu0 %v16584_v58 }
 0x11c   :  { %12285 = vmatprep.mubr.f32.mxu0 %v16586_v5  ;;  %14500 = vmatpush3.bf16.msra.mxu0 %v14497_v31  ;;  %v16721_v31 = vld [vmem:[#allocation2 + $0x427] sm:$0xff] }
 0x11d   :  { %14502 = vmatprep.subr.bf16.mxu0 %v16588_v9  ;;  %20636 = vst [vmem:[#allocation21_spill] sm:$0xff] %v16721_v31 }
 0x11f   :  { %12286 = vmatmul.mubr.f32.gmra.mrb[16].mxu0 %v16592_v8 }
 0x120   :  { %12288 = vmatprep.mubr.f32.mxu0 %v16594_v45 }
 0x123   :  { %12289 = vmatmul.mubr.f32.gmra.mrb[18].mxu0 %v16599_v12 }
 0x124   :  { %12291 = vmatprep.mubr.f32.mxu0 %v16601_v50 }
 0x127   :  { %12292 = vmatmul.mubr.f32.gmra.mrb[20].mxu0 %v16605_v49 }
 0x128   :  { %12294 = vmatprep.mubr.f32.mxu0 %v16607_v13 }
 0x12b   :  { %12295 = vmatmul.mubr.f32.gmra.mrb[22].mxu0 %v16611_v14 }
 0x12c   :  { %12297 = vmatprep.mubr.f32.mxu0 %v16613_v59 }
 0x12f   :  { %12298 = vmatmul.mubr.f32.gmra.mrb[24].mxu0 %v16617_v0 }
 0x130   :  { %12300 = vmatprep.mubr.f32.mxu0 %v16619_v15 }
 0x133   :  { %12301 = vmatmul.mubr.f32.gmra.mrb[26].mxu0 %v16623_v16 }
 0x134   :  { %12303 = vmatprep.mubr.f32.mxu0 %v16625_v17 }
 0x137   :  { %12304 = vmatmul.mubr.f32.gmra.mrb[28].mxu0 %v16629_v19 }
 0x138   :  { %12306 = vmatprep.mubr.f32.mxu0 %v16631_v32 }
 0x13b   :  { %12307 = vmatmul.mubr.f32.gmra.mrb[30].mxu0 %v16635_v20 }
 0x13c   :  { %12309 = vmatprep.mubr.f32.mxu0 %v610_v23  ;;  %v118_v23 = vld [vmem:[#allocation6 + $0x190] sm:$0xff] }
 0x13f   :  { %12310 = vmatmul.mubr.f32.gmra.mrb[32].mxu0 %v611_v24  ;;  %v119_v24 = vld [vmem:[#allocation6 + $0x198] sm:$0xff] }
 0x140   :  { %12312 = vmatprep.mubr.f32.mxu0 %v16638_v25 }
 0x143   :  { %12313 = vmatmul.mubr.f32.gmra.mrb[34].mxu0 %v16641_v26 }
 0x144   :  { %12315 = vmatprep.mubr.f32.mxu0 %v16643_v27 }
 0x147   :  { %12316 = vmatmul.mubr.f32.gmra.mrb[36].mxu0 %v16647_v28 }
 0x148   :  { %12318 = vmatprep.mubr.f32.mxu0 %v16649_v29 }
 0x14b   :  { %12319 = vmatmul.mubr.f32.gmra.mrb[38].mxu0 %v16653_v30 }
 0x14c   :  { %12321 = vmatprep.mubr.f32.mxu0 %v16655_v33 }
 0x14f   :  { %12322 = vmatmul.mubr.f32.gmra.mrb[40].mxu0 %v16659_v35 }
 0x150   :  { %12324 = vmatprep.mubr.f32.mxu0 %v16661_v36 }
 0x153   :  { %12325 = vmatmul.mubr.f32.gmra.mrb[42].mxu0 %v16665_v37 }
 0x154   :  { %12327 = vmatprep.mubr.f32.mxu0 %v16667_v39 }
 0x157   :  { %12328 = vmatmul.mubr.f32.gmra.mrb[44].mxu0 %v16671_v40 }
 0x158   :  { %12330 = vmatprep.mubr.f32.mxu0 %v16673_v41 }
 0x15b   :  { %12331 = vmatmul.mubr.f32.gmra.mrb[46].mxu0 %v16677_v44 }
 0x15c   :  { %12333 = vmatprep.mubr.f32.mxu0 %v16679_v46 }
 0x15f   :  { %12334 = vmatmul.mubr.f32.gmra.mrb[48].mxu0 %v16683_v47 }
 0x160   :  { %12336 = vmatprep.mubr.f32.mxu0 %v16685_v52 }
 0x163   :  { %12337 = vmatmul.mubr.f32.gmra.mrb[50].mxu0 %v16689_v53 }
 0x164   :  { %12339 = vmatprep.mubr.f32.mxu0 %v16691_v54 }
 0x167   :  { %12340 = vmatmul.mubr.f32.gmra.mrb[52].mxu0 %v16695_v57 }
 0x168   :  { %12342 = vmatprep.mubr.f32.mxu0 %v16697_v61  ;;  %v122_v61 = vld [vmem:[#allocation6 + $0x1b0] sm:$0xff] }
 0x16b   :  { %12343 = vmatmul.mubr.f32.gmra.mrb[54].mxu0 %v16701_v62 }
 0x16c   :  { %12345 = vmatprep.mubr.f32.mxu0 %v16703_v2  ;;  %v121_v2 = vld [vmem:[#allocation6 + $0x1a8] sm:$0xff] }
 0x16f   :  { %12346 = vmatmul.mubr.f32.gmra.mrb[56].mxu0 %v16707_v3  ;;  %v120_v3 = vld [vmem:[#allocation6 + $0x1a0] sm:$0xff] }
 0x170   :  { %12348 = vmatprep.mubr.f32.mxu0 %v16709_v4  ;;  %v1477_v4 = vld [vmem:[#allocation2 + $0x11] sm:$0xff]  ;;  %v14509_v62 = vpack.c.bf16 %v121_v2, %v120_v3  ;;  %v16746_v3 = vld [vmem:[#allocation2 + $0x89] sm:$0xff] }
 0x171   :  { %v16744_v2 = vld [vmem:[#allocation2 + $0x71] sm:$0xff]  ;;  %20644 = vst [vmem:[#allocation29_spill] sm:$0xff] %v16746_v3 }
 0x172   :  { %20643 = vst [vmem:[#allocation28_spill] sm:$0xff] %v16744_v2 }
 0x173   :  { %12349 = vmatmul.mubr.f32.gmra.mrb[58].mxu0 %v16713_v10  ;;  %v16728_v10 = vld [vmem:[#allocation2 + $0x29] sm:$0xff] }
 0x174   :  { %12351 = vmatprep.mubr.f32.mxu0 %v16715_v11  ;;  %20638 = vst [vmem:[#allocation23_spill] sm:$0xff] %v16728_v10  ;;  %v14505_v11 = vpack.c.bf16 %v119_v24, %v118_v23  ;;  %v124_v23 = vld [vmem:[#allocation6 + $0x1c0] sm:$0xff]  ;;  %v125_v24 = vld [vmem:[#allocation6 + $0x1c8] sm:$0xff] }
 0x177   :  { %12352 = vmatmul.mubr.f32.gmra.mrb[60].mxu0 %v16719_v18  ;;  %v16734_v18 = vld [vmem:[#allocation2 + $0x49] sm:$0xff] }
 0x178   :  { %12354 = vmatprep.mubr.f32.mxu0 %v16721_v31  ;;  %v16732_v31 = vld [vmem:[#allocation2 + $0x31] sm:$0xff]  ;;  %20640 = vst [vmem:[#allocation25_spill] sm:$0xff] %v16734_v18 }
 0x179   :  { %20639 = vst [vmem:[#allocation24_spill] sm:$0xff] %v16732_v31 }
 0x17b   :  { %12355 = vmatmul.mubr.f32.gmra.mrb[62].mxu0 %v16725_v34  ;;  %v123_v34 = vld [vmem:[#allocation6 + $0x1b8] sm:$0xff] }
 0x17c   :  { %12389 = vmatprep.mubr.f32.mxu0 %v1476_v60  ;;  %v16738_v60 = vld [vmem:[#allocation2 + $0x51] sm:$0xff] }
 0x17d   :  { %20641 = vst [vmem:[#allocation26_spill] sm:$0xff] %v16738_v60 }
 0x17f   :  { %12390 = vmatmul.mubr.f32.vlgmr.msra.gmra.mrb[0].mxu0 %v1477_v4  ;;  %v16740_v4 = vld [vmem:[#allocation2 + $0x69] sm:$0xff] }
 0x180   :  { %14504 = vmatpush3.bf16.msra.mxu0 %v16588_v9  ;;  %12392 = vmatprep.mubr.f32.mxu0 %v16728_v10  ;;  %20642 = vst [vmem:[#allocation27_spill] sm:$0xff] %v16740_v4  ;;  %v14513_v9 = vpack.c.bf16 %v123_v34, %v122_v61  ;;  %v127_v10 = vld [vmem:[#allocation6 + $0x1d8] sm:$0xff] }
 0x181   :  { %14506 = vmatprep.subr.bf16.mxu0 %v14505_v11  ;;  %v16750_v61 = vld [vmem:[#allocation2 + $0x91] sm:$0xff] }
 0x182   :  { %20645 = vst [vmem:[#allocation30_spill] sm:$0xff] %v16750_v61 }
 0x183   :  { %12393 = vmatmul.mubr.f32.gmra.mrb[2].mxu0 %v16732_v31  ;;  %v126_v31 = vld [vmem:[#allocation6 + $0x1d0] sm:$0xff] }
 0x184   :  { %12395 = vmatprep.mubr.f32.mxu0 %v16734_v18  ;;  %14508 = vmatpush3.bf16.msra.mxu0 %v14505_v11  ;;  %v14517_v18 = vpack.c.bf16 %v125_v24, %v124_v23  ;;  %v16752_v11 = vld [vmem:[#allocation2 + $0xa9] sm:$0xff]  ;;  %v14521_v34 = vpack.c.bf16 %v127_v10, %v126_v31  ;;  %v16762_v10 = vld [vmem:[#allocation2 + $0xd1] sm:$0xff] }
 0x185   :  { %14510 = vmatprep.subr.bf16.mxu0 %v14509_v62  ;;  %20646 = vst [vmem:[#allocation31_spill] sm:$0xff] %v16752_v11  ;;  %v16758_v23 = vld [vmem:[#allocation2 + $0xc9] sm:$0xff]  ;;  %20649 = vst [vmem:[#allocation34_spill] sm:$0xff] %v16762_v10 }
 0x186   :  { %20648 = vst [vmem:[#allocation33_spill] sm:$0xff] %v16758_v23  ;;  %v16764_v31 = vld [vmem:[#allocation2 + $0xe9] sm:$0xff] }
 0x187   :  { %12396 = vmatmul.mubr.f32.gmra.mrb[4].mxu0 %v16738_v60  ;;  %v129_v60 = vld [vmem:[#allocation6 + $0x1e8] sm:$0xff]  ;;  %20650 = vst [vmem:[#allocation35_spill] sm:$0xff] %v16764_v31 }
 0x188   :  { %12398 = vmatprep.mubr.f32.mxu0 %v16740_v4  ;;  %14512 = vmatpush3.bf16.msra.mxu0 %v14509_v62  ;;  %v128_v4 = vld [vmem:[#allocation6 + $0x1e0] sm:$0xff]  ;;  %v16756_v62 = vld [vmem:[#allocation2 + $0xb1] sm:$0xff] }
 0x189   :  { %14514 = vmatprep.subr.bf16.mxu0 %v14513_v9  ;;  %20647 = vst [vmem:[#allocation32_spill] sm:$0xff] %v16756_v62  ;;  %v14525_v24 = vpack.c.bf16 %v129_v60, %v128_v4  ;;  %v16770_v60 = vld [vmem:[#allocation2 + $0x109] sm:$0xff] }
 0x18a   :  { %20652 = vst [vmem:[#allocation37_spill] sm:$0xff] %v16770_v60 }
 0x18b   :  { %12399 = vmatmul.mubr.f32.gmra.mrb[6].mxu0 %v16744_v2  ;;  %v131_v2 = vld [vmem:[#allocation6 + $0x1f8] sm:$0xff] }
 0x18c   :  { %12401 = vmatprep.mubr.f32.mxu0 %v16746_v3  ;;  %14516 = vmatpush3.bf16.msra.mxu0 %v14513_v9  ;;  %v130_v3 = vld [vmem:[#allocation6 + $0x1f0] sm:$0xff] }
 0x18d   :  { %14518 = vmatprep.subr.bf16.mxu0 %v14517_v18  ;;  %v14529_v9 = vpack.c.bf16 %v131_v2, %v130_v3  ;;  %v16778_v2 = vld [vmem:[#allocation2 + $0x129] sm:$0xff]  ;;  %v16783_v3 = vld [vmem:[#allocation2 + $0x131] sm:$0xff] }
 0x18e   :  { %20654 = vst [vmem:[#allocation39_spill] sm:$0xff] %v16778_v2  ;;  %20655 = vst [vmem:[#allocation40_spill] sm:$0xff] %v16783_v3 }
 0x18f   :  { %12402 = vmatmul.mubr.f32.gmra.mrb[8].mxu0 %v16750_v61  ;;  %v133_v61 = vld [vmem:[#allocation6 + $0x208] sm:$0xff] }
 0x190   :  { %12404 = vmatprep.mubr.f32.mxu0 %v16752_v11  ;;  %14520 = vmatpush3.bf16.msra.mxu0 %v14517_v18  ;;  %v132_v11 = vld [vmem:[#allocation6 + $0x200] sm:$0xff]  ;;  %v16768_v18 = vld [vmem:[#allocation2 + $0xf1] sm:$0xff] }
 0x191   :  { %14522 = vmatprep.subr.bf16.mxu0 %v14521_v34  ;;  %20651 = vst [vmem:[#allocation36_spill] sm:$0xff] %v16768_v18  ;;  %v16772_v4 = vpack.c.bf16 %v133_v61, %v132_v11  ;;  %v16789_v61 = vld [vmem:[#allocation2 + $0x151] sm:$0xff]  ;;  %v16791_v11 = vld [vmem:[#allocation2 + $0x169] sm:$0xff] }
 0x192   :  { %20657 = vst [vmem:[#allocation42_spill] sm:$0xff] %v16789_v61  ;;  %20658 = vst [vmem:[#allocation43_spill] sm:$0xff] %v16791_v11 }
 0x193   :  { %12405 = vmatmul.mubr.f32.gmra.mrb[10].mxu0 %v16756_v62  ;;  %v137_v62 = vld [vmem:[#allocation6 + $0x228] sm:$0xff] }
 0x194   :  { %12407 = vmatprep.mubr.f32.mxu0 %v16758_v23  ;;  %14524 = vmatpush3.bf16.msra.mxu0 %v14521_v34  ;;  %v16776_v34 = vld [vmem:[#allocation2 + $0x111] sm:$0xff]  ;;  %v136_v23 = vld [vmem:[#allocation6 + $0x220] sm:$0xff] }
 0x195   :  { %14526 = vmatprep.subr.bf16.mxu0 %v14525_v24  ;;  %20653 = vst [vmem:[#allocation38_spill] sm:$0xff] %v16776_v34 }
 0x197   :  { %12408 = vmatmul.mubr.f32.gmra.mrb[12].mxu0 %v16762_v10  ;;  %v135_v10 = vld [vmem:[#allocation6 + $0x218] sm:$0xff] }
 0x198   :  { %12410 = vmatprep.mubr.f32.mxu0 %v16764_v31  ;;  %14528 = vmatpush3.bf16.msra.mxu0 %v14525_v24  ;;  %v16785_v24 = vld [vmem:[#allocation2 + $0x149] sm:$0xff] }
 0x199   :  { %14530 = vmatprep.subr.bf16.mxu0 %v14529_v9  ;;  %20656 = vst [vmem:[#allocation41_spill] sm:$0xff] %v16785_v24  ;;  %v16833_v31 = vld [vmem:[#allocation2 + $0x289] sm:$0xff] }
 0x19a   :  { %20670 = vst [vmem:[#allocation55_spill] sm:$0xff] %v16833_v31 }
 0x19b   :  { %12411 = vmatmul.mubr.f32.gmra.mrb[14].mxu0 %v16768_v18  ;;  %v1509_v18 = vld [vmem:[#allocation2 + $0x251] sm:$0xff] }
 0x19c   :  { %12413 = vmatprep.mubr.f32.mxu0 %v16770_v60  ;;  %14532 = vmatpush3.bf16.msra.mxu0 %v14529_v9  ;;  %v16795_v9 = vld [vmem:[#allocation2 + $0x171] sm:$0xff] }
 0x19d   :  { %14534 = vmatprep.subr.bf16.mxu0 %v16772_v4  ;;  %20659 = vst [vmem:[#allocation44_spill] sm:$0xff] %v16795_v9  ;;  %v16814_v60 = vld [vmem:[#allocation3 + $0xf8] sm:$0xff] }
 0x19e   :  { %545 = vst [vmem:[#allocation2 + $0x210] sm:$0xff] %v16814_v60 }
 0x19f   :  { %12414 = vmatmul.mubr.f32.gmra.mrb[16].mxu0 %v16776_v34  ;;  %v16797_v34 = vld [vmem:[#allocation2 + $0x189] sm:$0xff] }
 0x1a0   :  { %12416 = vmatprep.mubr.f32.mxu0 %v16778_v2  ;;  %20660 = vst [vmem:[#allocation45_spill] sm:$0xff] %v16797_v34  ;;  %v16801_v2 = vld [vmem:[#allocation2 + $0x191] sm:$0xff] }
 0x1a1   :  { %20661 = vst [vmem:[#allocation46_spill] sm:$0xff] %v16801_v2 }
 0x1a3   :  { %12417 = vmatmul.mubr.f32.gmra.mrb[18].mxu0 %v16783_v3  ;;  %v16803_v3 = vld [vmem:[#allocation2 + $0x1a9] sm:$0xff] }
 0x1a4   :  { %12419 = vmatprep.mubr.f32.mxu0 %v16785_v24  ;;  %20662 = vst [vmem:[#allocation47_spill] sm:$0xff] %v16803_v3  ;;  %v16807_v24 = vld [vmem:[#allocation2 + $0x1b1] sm:$0xff] }
 0x1a5   :  { %20663 = vst [vmem:[#allocation48_spill] sm:$0xff] %v16807_v24 }
 0x1a7   :  { %12420 = vmatmul.mubr.f32.gmra.mrb[20].mxu0 %v16789_v61  ;;  %v16809_v61 = vld [vmem:[#allocation2 + $0x1c9] sm:$0xff] }
 0x1a8   :  { %12422 = vmatprep.mubr.f32.mxu0 %v16791_v11  ;;  %20664 = vst [vmem:[#allocation49_spill] sm:$0xff] %v16809_v61  ;;  %v16811_v11 = vld [vmem:[#allocation3 + $0xf0] sm:$0xff] }
 0x1a9   :  { %544 = vst [vmem:[#allocation2 + $0x208] sm:$0xff] %v16811_v11 }
 0x1ab   :  { %12423 = vmatmul.mubr.f32.gmra.mrb[22].mxu0 %v16795_v9  ;;  %v1508_v9 = vld [vmem:[#allocation2 + $0x249] sm:$0xff] }
 0x1ac   :  { %12425 = vmatprep.mubr.f32.mxu0 %v16797_v34  ;;  %v16819_v34 = vld [vmem:[#allocation2 + $0x1d1] sm:$0xff] }
 0x1ad   :  { %20665 = vst [vmem:[#allocation50_spill] sm:$0xff] %v16819_v34 }
 0x1af   :  { %12426 = vmatmul.mubr.f32.gmra.mrb[24].mxu0 %v16801_v2  ;;  %v16821_v2 = vld [vmem:[#allocation2 + $0x1e9] sm:$0xff] }
 0x1b0   :  { %12428 = vmatprep.mubr.f32.mxu0 %v16803_v3  ;;  %20666 = vst [vmem:[#allocation51_spill] sm:$0xff] %v16821_v2  ;;  %v16825_v3 = vld [vmem:[#allocation2 + $0x1f1] sm:$0xff] }
 0x1b1   :  { %20667 = vst [vmem:[#allocation52_spill] sm:$0xff] %v16825_v3 }
 0x1b3   :  { %12429 = vmatmul.mubr.f32.gmra.mrb[26].mxu0 %v16807_v24  ;;  %v16828_v24 = vld [vmem:[#allocation2 + $0x269] sm:$0xff] }
 0x1b4   :  { %12431 = vmatprep.mubr.f32.mxu0 %v16809_v61  ;;  %20668 = vst [vmem:[#allocation53_spill] sm:$0xff] %v16828_v24  ;;  %v16831_v61 = vld [vmem:[#allocation2 + $0x271] sm:$0xff] }
 0x1b5   :  { %20669 = vst [vmem:[#allocation54_spill] sm:$0xff] %v16831_v61 }
 0x1b7   :  { %12432 = vmatmul.mubr.f32.gmra.mrb[28].mxu0 %v16819_v34  ;;  %v16839_v34 = vld [vmem:[#allocation2 + $0x2a9] sm:$0xff] }
 0x1b8   :  { %12434 = vmatprep.mubr.f32.mxu0 %v16821_v2  ;;  %v16837_v2 = vld [vmem:[#allocation2 + $0x291] sm:$0xff]  ;;  %20672 = vst [vmem:[#allocation57_spill] sm:$0xff] %v16839_v34 }
 0x1b9   :  { %20671 = vst [vmem:[#allocation56_spill] sm:$0xff] %v16837_v2 }
 0x1bb   :  { %12435 = vmatmul.mubr.f32.gmra.mrb[30].mxu0 %v16825_v3  ;;  %v16910_v3 = vld [vmem:[#allocation3 + $0x1f8] sm:$0xff] }
 0x1bc   :  { %12437 = vmatprep.mubr.f32.mxu0 %v1508_v9  ;;  %v16843_v9 = vld [vmem:[#allocation2 + $0x2b1] sm:$0xff]  ;;  %577 = vst [vmem:[#allocation2 + $0x450] sm:$0xff] %v16910_v3 }
 0x1bd   :  { %20673 = vst [vmem:[#allocation58_spill] sm:$0xff] %v16843_v9 }
 0x1bf   :  { %12438 = vmatmul.mubr.f32.gmra.mrb[32].mxu0 %v1509_v18  ;;  %v16845_v18 = vld [vmem:[#allocation2 + $0x2c9] sm:$0xff] }
 0x1c0   :  { %12440 = vmatprep.mubr.f32.mxu0 %v16828_v24  ;;  %20674 = vst [vmem:[#allocation59_spill] sm:$0xff] %v16845_v18  ;;  %v16849_v24 = vld [vmem:[#allocation2 + $0x2d1] sm:$0xff] }
 0x1c1   :  { %20675 = vst [vmem:[#allocation60_spill] sm:$0xff] %v16849_v24 }
 0x1c3   :  { %12441 = vmatmul.mubr.f32.gmra.mrb[34].mxu0 %v16831_v61  ;;  %v16851_v61 = vld [vmem:[#allocation2 + $0x2e9] sm:$0xff] }
 0x1c4   :  { %12443 = vmatprep.mubr.f32.mxu0 %v16833_v31  ;;  %20676 = vst [vmem:[#allocation61_spill] sm:$0xff] %v16851_v61  ;;  %v16855_v31 = vld [vmem:[#allocation2 + $0x2f1] sm:$0xff] }
 0x1c5   :  { %20677 = vst [vmem:[#allocation62_spill] sm:$0xff] %v16855_v31 }
 0x1c7   :  { %12444 = vmatmul.mubr.f32.gmra.mrb[36].mxu0 %v16837_v2  ;;  %v16857_v2 = vld [vmem:[#allocation2 + $0x309] sm:$0xff] }
 0x1c8   :  { %12446 = vmatprep.mubr.f32.mxu0 %v16839_v34  ;;  %20678 = vst [vmem:[#allocation63_spill] sm:$0xff] %v16857_v2  ;;  %v16861_v34 = vld [vmem:[#allocation2 + $0x311] sm:$0xff] }
 0x1c9   :  { %20679 = vst [vmem:[#allocation64_spill] sm:$0xff] %v16861_v34 }
 0x1cb   :  { %12447 = vmatmul.mubr.f32.gmra.mrb[38].mxu0 %v16843_v9  ;;  %v16863_v9 = vld [vmem:[#allocation2 + $0x329] sm:$0xff] }
 0x1cc   :  { %12449 = vmatprep.mubr.f32.mxu0 %v16845_v18  ;;  %20680 = vst [vmem:[#allocation65_spill] sm:$0xff] %v16863_v9  ;;  %v16867_v18 = vld [vmem:[#allocation2 + $0x331] sm:$0xff] }
 0x1cd   :  { %20681 = vst [vmem:[#allocation66_spill] sm:$0xff] %v16867_v18 }
 0x1cf   :  { %12450 = vmatmul.mubr.f32.gmra.mrb[40].mxu0 %v16849_v24  ;;  %v16869_v24 = vld [vmem:[#allocation2 + $0x349] sm:$0xff] }
 0x1d0   :  { %12452 = vmatprep.mubr.f32.mxu0 %v16851_v61  ;;  %20682 = vst [vmem:[#allocation67_spill] sm:$0xff] %v16869_v24  ;;  %v16873_v61 = vld [vmem:[#allocation2 + $0x351] sm:$0xff] }
 0x1d1   :  { %20683 = vst [vmem:[#allocation68_spill] sm:$0xff] %v16873_v61 }
 0x1d3   :  { %12453 = vmatmul.mubr.f32.gmra.mrb[42].mxu0 %v16855_v31  ;;  %v16875_v31 = vld [vmem:[#allocation2 + $0x369] sm:$0xff] }
 0x1d4   :  { %12455 = vmatprep.mubr.f32.mxu0 %v16857_v2  ;;  %20684 = vst [vmem:[#allocation69_spill] sm:$0xff] %v16875_v31  ;;  %v16879_v2 = vld [vmem:[#allocation2 + $0x371] sm:$0xff] }
 0x1d5   :  { %20685 = vst [vmem:[#allocation70_spill] sm:$0xff] %v16879_v2 }
 0x1d7   :  { %12456 = vmatmul.mubr.f32.gmra.mrb[44].mxu0 %v16861_v34  ;;  %v16881_v34 = vld [vmem:[#allocation2 + $0x389] sm:$0xff] }
 0x1d8   :  { %12458 = vmatprep.mubr.f32.mxu0 %v16863_v9  ;;  %20686 = vst [vmem:[#allocation71_spill] sm:$0xff] %v16881_v34  ;;  %v16885_v9 = vld [vmem:[#allocation2 + $0x391] sm:$0xff] }
 0x1d9   :  { %20687 = vst [vmem:[#allocation72_spill] sm:$0xff] %v16885_v9 }
 0x1db   :  { %12459 = vmatmul.mubr.f32.gmra.mrb[46].mxu0 %v16867_v18  ;;  %v16887_v18 = vld [vmem:[#allocation2 + $0x3a9] sm:$0xff] }
 0x1dc   :  { %12461 = vmatprep.mubr.f32.mxu0 %v16869_v24  ;;  %20688 = vst [vmem:[#allocation73_spill] sm:$0xff] %v16887_v18  ;;  %v16891_v24 = vld [vmem:[#allocation2 + $0x3b1] sm:$0xff] }
 0x1dd   :  { %20689 = vst [vmem:[#allocation74_spill] sm:$0xff] %v16891_v24 }
 0x1df   :  { %12462 = vmatmul.mubr.f32.gmra.mrb[48].mxu0 %v16873_v61  ;;  %v16893_v61 = vld [vmem:[#allocation2 + $0x3c9] sm:$0xff] }
 0x1e0   :  { %12464 = vmatprep.mubr.f32.mxu0 %v16875_v31  ;;  %20690 = vst [vmem:[#allocation75_spill] sm:$0xff] %v16893_v61  ;;  %v16897_v31 = vld [vmem:[#allocation2 + $0x3d1] sm:$0xff] }
 0x1e1   :  { %20691 = vst [vmem:[#allocation76_spill] sm:$0xff] %v16897_v31 }
 0x1e3   :  { %12465 = vmatmul.mubr.f32.gmra.mrb[50].mxu0 %v16879_v2  ;;  %v16899_v2 = vld [vmem:[#allocation2 + $0x3e9] sm:$0xff] }
 0x1e4   :  { %12467 = vmatprep.mubr.f32.mxu0 %v16881_v34  ;;  %20692 = vst [vmem:[#allocation77_spill] sm:$0xff] %v16899_v2  ;;  %v16903_v34 = vld [vmem:[#allocation2 + $0x3f1] sm:$0xff] }
 0x1e5   :  { %20693 = vst [vmem:[#allocation78_spill] sm:$0xff] %v16903_v34 }
 0x1e7   :  { %12468 = vmatmul.mubr.f32.gmra.mrb[52].mxu0 %v16885_v9  ;;  %v16905_v9 = vld [vmem:[#allocation2 + $0x409] sm:$0xff] }
 0x1e8   :  { %12470 = vmatprep.mubr.f32.mxu0 %v16887_v18  ;;  %20694 = vst [vmem:[#allocation79_spill] sm:$0xff] %v16905_v9  ;;  %v16907_v18 = vld [vmem:[#allocation3 + $0x1f0] sm:$0xff] }
 0x1e9   :  { %576 = vst [vmem:[#allocation2 + $0x448] sm:$0xff] %v16907_v18 }
 0x1eb   :  { %12471 = vmatmul.mubr.f32.gmra.mrb[54].mxu0 %v16891_v24  ;;  %v134_v24 = vld [vmem:[#allocation6 + $0x210] sm:$0xff] }
 0x1ec   :  { %12473 = vmatprep.mubr.f32.mxu0 %v16893_v61  ;;  %v16915_v61 = vld [vmem:[#allocation2 + $0x411] sm:$0xff] }
 0x1ed   :  { %20695 = vst [vmem:[#allocation80_spill] sm:$0xff] %v16915_v61 }
 0x1ef   :  { %12474 = vmatmul.mubr.f32.gmra.mrb[56].mxu0 %v16897_v31  ;;  %v16917_v31 = vld [vmem:[#allocation2 + $0x429] sm:$0xff] }
 0x1f0   :  { %12476 = vmatprep.mubr.f32.mxu0 %v16899_v2  ;;  %20696 = vst [vmem:[#allocation81_spill] sm:$0xff] %v16917_v31  ;;  %v16921_v2 = vld [vmem:[#allocation2 + $0x431] sm:$0xff] }
 0x1f3   :  { %12477 = vmatmul.mubr.f32.gmra.mrb[58].mxu0 %v16903_v34  ;;  %v14537_v34 = vpack.c.bf16 %v135_v10, %v134_v24  ;;  %v140_v10 = vld [vmem:[#allocation6 + $0x240] sm:$0xff]  ;;  %v141_v24 = vld [vmem:[#allocation6 + $0x248] sm:$0xff] }
 0x1f4   :  { %12479 = vmatprep.mubr.f32.mxu0 %v16905_v9  ;;  %v139_v9 = vld [vmem:[#allocation6 + $0x238] sm:$0xff] }
 0x1f7   :  { %12480 = vmatmul.mubr.f32.gmra.mrb[60].mxu0 %v16915_v61  ;;  %v14541_v61 = vpack.c.bf16 %v137_v62, %v136_v23  ;;  %v143_v62 = vld [vmem:[#allocation6 + $0x258] sm:$0xff]  ;;  %v145_v23 = vld [vmem:[#allocation6 + $0x268] sm:$0xff] }
 0x1f8   :  { %12482 = vmatprep.mubr.f32.mxu0 %v16917_v31  ;;  %v138_v31 = vld [vmem:[#allocation6 + $0x230] sm:$0xff] }
 0x1fb   :  { %12483 = vmatmul.mubr.f32.gmra.mrb[62].mxu0 %v16921_v2 }
 0x1fc   :  { %12517 = vmatprep.mubr.f32.mxu0 %v16545_v38  ;;  %v14545_v38 = vpack.c.bf16 %v139_v9, %v138_v31  ;;  %v147_v31 = vld [vmem:[#allocation6 + $0x278] sm:$0xff]  ;;  %v17028_v9 = vld [vmem:[#allocation2 + $0xd0] sm:$0xff] }
 0x1ff   :  { %12518 = vmatmul.mubr.f32.vlgmr.msra.gmra.mrb[0].mxu0 %v16548_v42  ;;  %v14549_v42 = vpack.c.bf16 %v141_v24, %v140_v10  ;;  %v162_v24 = vld [vmem:[#allocation6 + $0x2f0] sm:$0xff] }
 0x200   :  { %14536 = vmatpush3.bf16.msra.mxu0 %v16772_v4  ;;  %12520 = vmatprep.mubr.f32.mxu0 %v16550_v43  ;;  %v142_v43 = vld [vmem:[#allocation6 + $0x250] sm:$0xff]  ;;  %v149_v4 = vld [vmem:[#allocation6 + $0x288] sm:$0xff] }
 0x201   :  { %14538 = vmatprep.subr.bf16.mxu0 %v14537_v34 }
 0x203   :  { %12521 = vmatmul.mubr.f32.gmra.mrb[2].mxu0 %v16554_v48  ;;  %v14553_v48 = vpack.c.bf16 %v143_v62, %v142_v43  ;;  %v17034_v43 = vld [vmem:[#allocation2 + $0xf0] sm:$0xff]  ;;  %v17036_v62 = vld [vmem:[#allocation2 + $0x108] sm:$0xff] }
 0x204   :  { %12523 = vmatprep.mubr.f32.mxu0 %v16556_v51  ;;  %14540 = vmatpush3.bf16.msra.mxu0 %v14537_v34  ;;  %v144_v51 = vld [vmem:[#allocation6 + $0x260] sm:$0xff] }
 0x205   :  { %14542 = vmatprep.subr.bf16.mxu0 %v14541_v61  ;;  %v160_v34 = vld [vmem:[#allocation6 + $0x2e0] sm:$0xff] }
 0x207   :  { %12524 = vmatmul.mubr.f32.gmra.mrb[4].mxu0 %v16560_v55  ;;  %v14557_v55 = vpack.c.bf16 %v145_v23, %v144_v51  ;;  %v164_v51 = vld [vmem:[#allocation6 + $0x300] sm:$0xff]  ;;  %v165_v23 = vld [vmem:[#allocation6 + $0x308] sm:$0xff] }
 0x208   :  { %12526 = vmatprep.mubr.f32.mxu0 %v16562_v56  ;;  %14544 = vmatpush3.bf16.msra.mxu0 %v14541_v61  ;;  %v146_v56 = vld [vmem:[#allocation6 + $0x270] sm:$0xff]  ;;  %v161_v61 = vld [vmem:[#allocation6 + $0x2e8] sm:$0xff] }
 0x209   :  { %14546 = vmatprep.subr.bf16.mxu0 %v14545_v38  ;;  %v14589_v10 = vpack.c.bf16 %v161_v61, %v160_v34  ;;  %v17143_v34 = vld [vmem:[#allocation2 + $0x3a8] sm:$0xff]  ;;  %v17147_v61 = vld [vmem:[#allocation2 + $0x3b0] sm:$0xff] }
 0x20b   :  { %12527 = vmatmul.mubr.f32.gmra.mrb[6].mxu0 %v16566_v63  ;;  %v14561_v63 = vpack.c.bf16 %v147_v31, %v146_v56  ;;  %v17042_v56 = vld [vmem:[#allocation2 + $0x128] sm:$0xff]  ;;  %v17044_v31 = vpack.c.bf16 %v165_v23, %v164_v51  ;;  %v17165_v23 = vld [vmem:[#allocation2 + $0x410] sm:$0xff] }
 0x20c   :  { %12529 = vmatprep.mubr.f32.mxu0 %v16568_v1  ;;  %14548 = vmatpush3.bf16.msra.mxu0 %v14545_v38  ;;  %v148_v1 = vld [vmem:[#allocation6 + $0x280] sm:$0xff]  ;;  %v17030_v38 = vld [vmem:[#allocation2 + $0xe8] sm:$0xff]  ;;  %20717 = vst [vmem:[#allocation82_spill] sm:$0xff] %v17165_v23 }
 0x20d   :  { %14550 = vmatprep.subr.bf16.mxu0 %v14549_v42  ;;  %v17161_v51 = vld [vmem:[#allocation2 + $0x408] sm:$0xff] }
 0x20f   :  { %12530 = vmatmul.mubr.f32.gmra.mrb[8].mxu0 %v16572_v6  ;;  %v16940_v6 = vpack.c.bf16 %v149_v4, %v148_v1  ;;  %v17050_v1 = vld [vmem:[#allocation2 + $0x148] sm:$0xff]  ;;  %v17055_v4 = vld [vmem:[#allocation2 + $0x150] sm:$0xff] }
 0x210   :  { %12532 = vmatprep.mubr.f32.mxu0 %v16574_v7  ;;  %14552 = vmatpush3.bf16.msra.mxu0 %v14549_v42  ;;  %v16957_v7 = vld [vmem:[#allocation2 + $0x207] sm:$0xff]  ;;  %v163_v42 = vld [vmem:[#allocation6 + $0x2f8] sm:$0xff] }
 0x211   :  { %14554 = vmatprep.subr.bf16.mxu0 %v14553_v48 }
 0x213   :  { %12533 = vmatmul.mubr.f32.gmra.mrb[10].mxu0 %v16578_v21  ;;  %v16961_v21 = vld [vmem:[#allocation2 + $0x20f] sm:$0xff] }
 0x214   :  { %12535 = vmatprep.mubr.f32.mxu0 %v16580_v22  ;;  %14556 = vmatpush3.bf16.msra.mxu0 %v14553_v48  ;;  %v20697_v22 = vld [vmem:[#allocation13_spill] sm:$0xff]  ;;  %v14593_v48 = vpack.c.bf16 %v163_v42, %v162_v24  ;;  %v17153_v24 = vld [vmem:[#allocation2 + $0x3d0] sm:$0xff]  ;;  %v17155_v42 = vld [vmem:[#allocation2 + $0x3e8] sm:$0xff] }
 0x215   :  { %14558 = vmatprep.subr.bf16.mxu0 %v14557_v55 }
 0x217   :  { %12536 = vmatmul.mubr.f32.gmra.mrb[12].mxu0 %v16584_v58  ;;  %v20698_v58 = vld [vmem:[#allocation14_spill] sm:$0xff] }
 0x218   :  { %12538 = vmatprep.mubr.f32.mxu0 %v16586_v5  ;;  %14560 = vmatpush3.bf16.msra.mxu0 %v14557_v55  ;;  %v20699_v5 = vld [vmem:[#allocation15_spill] sm:$0xff] }
 0x219   :  { %14562 = vmatprep.subr.bf16.mxu0 %v14561_v63  ;;  %v17040_v55 = vld [vmem:[#allocation2 + $0x110] sm:$0xff] }
 0x21b   :  { %12539 = vmatmul.mubr.f32.gmra.mrb[14].mxu0 %v16592_v8  ;;  %v20700_v8 = vld [vmem:[#allocation16_spill] sm:$0xff] }
 0x21c   :  { %12541 = vmatprep.mubr.f32.mxu0 %v16594_v45  ;;  %14564 = vmatpush3.bf16.msra.mxu0 %v14561_v63  ;;  %v20701_v45 = vld [vmem:[#allocation17_spill] sm:$0xff]  ;;  %v17048_v63 = vld [vmem:[#allocation2 + $0x130] sm:$0xff]  ;;  %20710 = vst [vmem:[#allocation16_spill] sm:$0xff] %v17143_v34 }
 0x21d   :  { %14566 = vmatprep.subr.bf16.mxu0 %v16940_v6  ;;  %20711 = vst [vmem:[#allocation17_spill] sm:$0xff] %v17147_v61 }
 0x21f   :  { %12542 = vmatmul.mubr.f32.gmra.mrb[16].mxu0 %v16599_v12  ;;  %v20702_v12 = vld [vmem:[#allocation18_spill] sm:$0xff] }
 0x220   :  { %12544 = vmatprep.mubr.f32.mxu0 %v16601_v50  ;;  %v20703_v50 = vld [vmem:[#allocation19_spill] sm:$0xff] }
 0x221   :  { %20713 = vst [vmem:[#allocation19_spill] sm:$0xff] %v17153_v24 }
 0x223   :  { %12545 = vmatmul.mubr.f32.gmra.mrb[18].mxu0 %v16605_v49  ;;  %v20704_v49 = vld [vmem:[#allocation20_spill] sm:$0xff] }
 0x224   :  { %12547 = vmatprep.mubr.f32.mxu0 %v16607_v13  ;;  %v20705_v13 = vld [vmem:[#allocation21_spill] sm:$0xff]  ;;  %20714 = vst [vmem:[#allocation20_spill] sm:$0xff] %v17155_v42 }
 0x227   :  { %12548 = vmatmul.mubr.f32.gmra.mrb[20].mxu0 %v16611_v14  ;;  %v16993_v14 = vld [vmem:[#allocation2 + $0x447] sm:$0xff] }
 0x228   :  { %12550 = vmatprep.mubr.f32.mxu0 %v16613_v59  ;;  %v20706_v59 = vld [vmem:[#allocation22_spill] sm:$0xff] }
 0x229   :  { %20716 = vst [vmem:[#allocation22_spill] sm:$0xff] %v17161_v51 }
 0x22b   :  { %12551 = vmatmul.mubr.f32.gmra.mrb[22].mxu0 %v16617_v0  ;;  %v16997_v0 = vld [vmem:[#allocation2 + $0x44f] sm:$0xff] }
 0x22c   :  { %12553 = vmatprep.mubr.f32.mxu0 %v16619_v15  ;;  %v2502_v15 = vld [vmem:[#allocation2 + $0x28] sm:$0xff] }
 0x22f   :  { %12554 = vmatmul.mubr.f32.gmra.mrb[24].mxu0 %v16623_v16  ;;  %v150_v16 = vld [vmem:[#allocation6 + $0x290] sm:$0xff] }
 0x230   :  { %12556 = vmatprep.mubr.f32.mxu0 %v16625_v17  ;;  %v151_v17 = vld [vmem:[#allocation6 + $0x298] sm:$0xff] }
 0x233   :  { %12557 = vmatmul.mubr.f32.gmra.mrb[26].mxu0 %v16629_v19  ;;  %v2503_v19 = vld [vmem:[#allocation2 + $0x30] sm:$0xff] }
 0x234   :  { %12559 = vmatprep.mubr.f32.mxu0 %v16631_v32  ;;  %v17000_v32 = vld [vmem:[#allocation2 + $0x48] sm:$0xff] }
 0x237   :  { %12560 = vmatmul.mubr.f32.gmra.mrb[28].mxu0 %v16635_v20  ;;  %v14569_v20 = vpack.c.bf16 %v151_v17, %v150_v16  ;;  %v17090_v16 = vld [vmem:[#allocation2 + $0x288] sm:$0xff]  ;;  %v17093_v17 = vld [vmem:[#allocation2 + $0x290] sm:$0xff] }
 0x238   :  { %12562 = vmatprep.mubr.f32.mxu0 %v16957_v7 }
 0x23b   :  { %12563 = vmatmul.mubr.f32.gmra.mrb[30].mxu0 %v16961_v21 }
 0x23c   :  { %12565 = vmatprep.mubr.f32.mxu0 %v16638_v25  ;;  %v152_v25 = vld [vmem:[#allocation6 + $0x2a0] sm:$0xff] }
 0x23f   :  { %12566 = vmatmul.mubr.f32.gmra.mrb[32].mxu0 %v16641_v26  ;;  %v153_v26 = vld [vmem:[#allocation6 + $0x2a8] sm:$0xff] }
 0x240   :  { %12568 = vmatprep.mubr.f32.mxu0 %v16643_v27  ;;  %v17004_v27 = vld [vmem:[#allocation2 + $0x50] sm:$0xff] }
 0x243   :  { %12569 = vmatmul.mubr.f32.gmra.mrb[34].mxu0 %v16647_v28  ;;  %v17006_v28 = vld [vmem:[#allocation2 + $0x68] sm:$0xff] }
 0x244   :  { %12571 = vmatprep.mubr.f32.mxu0 %v16649_v29  ;;  %v14573_v29 = vpack.c.bf16 %v153_v26, %v152_v25  ;;  %v17107_v25 = vld [vmem:[#allocation2 + $0x2e8] sm:$0xff]  ;;  %v17111_v26 = vld [vmem:[#allocation2 + $0x2f0] sm:$0xff] }
 0x247   :  { %12572 = vmatmul.mubr.f32.gmra.mrb[36].mxu0 %v16653_v30  ;;  %v154_v30 = vld [vmem:[#allocation6 + $0x2b0] sm:$0xff] }
 0x248   :  { %12574 = vmatprep.mubr.f32.mxu0 %v16655_v33  ;;  %v155_v33 = vld [vmem:[#allocation6 + $0x2b8] sm:$0xff] }
 0x24b   :  { %12575 = vmatmul.mubr.f32.gmra.mrb[38].mxu0 %v16659_v35  ;;  %v17010_v35 = vld [vmem:[#allocation2 + $0x70] sm:$0xff] }
 0x24c   :  { %12577 = vmatprep.mubr.f32.mxu0 %v16661_v36  ;;  %v17012_v36 = vld [vmem:[#allocation2 + $0x88] sm:$0xff] }
 0x24f   :  { %12578 = vmatmul.mubr.f32.gmra.mrb[40].mxu0 %v16665_v37  ;;  %v14577_v37 = vpack.c.bf16 %v155_v33, %v154_v30  ;;  %v17117_v30 = vld [vmem:[#allocation2 + $0x310] sm:$0xff]  ;;  %v17119_v33 = vld [vmem:[#allocation2 + $0x328] sm:$0xff] }
 0x250   :  { %12580 = vmatprep.mubr.f32.mxu0 %v16667_v39  ;;  %v156_v39 = vld [vmem:[#allocation6 + $0x2c0] sm:$0xff] }
 0x253   :  { %12581 = vmatmul.mubr.f32.gmra.mrb[42].mxu0 %v16671_v40  ;;  %v157_v40 = vld [vmem:[#allocation6 + $0x2c8] sm:$0xff] }
 0x254   :  { %12583 = vmatprep.mubr.f32.mxu0 %v16673_v41  ;;  %v17016_v41 = vld [vmem:[#allocation2 + $0x90] sm:$0xff] }
 0x257   :  { %12584 = vmatmul.mubr.f32.gmra.mrb[44].mxu0 %v16677_v44  ;;  %v17018_v44 = vld [vmem:[#allocation2 + $0xa8] sm:$0xff] }
 0x258   :  { %12586 = vmatprep.mubr.f32.mxu0 %v16679_v46  ;;  %v14581_v46 = vpack.c.bf16 %v157_v40, %v156_v39  ;;  %v17125_v39 = vld [vmem:[#allocation2 + $0x348] sm:$0xff]  ;;  %v17129_v40 = vld [vmem:[#allocation2 + $0x350] sm:$0xff] }
 0x25b   :  { %12587 = vmatmul.mubr.f32.gmra.mrb[46].mxu0 %v16683_v47  ;;  %v158_v47 = vld [vmem:[#allocation6 + $0x2d0] sm:$0xff] }
 0x25c   :  { %12589 = vmatprep.mubr.f32.mxu0 %v16685_v52  ;;  %v159_v52 = vld [vmem:[#allocation6 + $0x2d8] sm:$0xff] }
 0x25f   :  { %12590 = vmatmul.mubr.f32.gmra.mrb[48].mxu0 %v16689_v53  ;;  %v17022_v53 = vld [vmem:[#allocation2 + $0xb0] sm:$0xff] }
 0x260   :  { %12592 = vmatprep.mubr.f32.mxu0 %v16691_v54  ;;  %v17024_v54 = vld [vmem:[#allocation2 + $0xc8] sm:$0xff] }
 0x263   :  { %12593 = vmatmul.mubr.f32.gmra.mrb[50].mxu0 %v16695_v57  ;;  %v14585_v57 = vpack.c.bf16 %v159_v52, %v158_v47  ;;  %v17135_v47 = vld [vmem:[#allocation2 + $0x370] sm:$0xff]  ;;  %v17137_v52 = vld [vmem:[#allocation2 + $0x388] sm:$0xff] }
 0x264   :  { %12595 = vmatprep.mubr.f32.mxu0 %v20697_v22  ;;  %v17061_v22 = vld [vmem:[#allocation2 + $0x170] sm:$0xff]  ;;  %20707 = vst [vmem:[#allocation13_spill] sm:$0xff] %v17135_v47  ;;  %20708 = vst [vmem:[#allocation14_spill] sm:$0xff] %v17137_v52 }
 0x267   :  { %12596 = vmatmul.mubr.f32.gmra.mrb[52].mxu0 %v20698_v58  ;;  %v17063_v58 = vld [vmem:[#allocation2 + $0x188] sm:$0xff] }
 0x268   :  { %12598 = vmatprep.mubr.f32.mxu0 %v20699_v5  ;;  %v17067_v5 = vld [vmem:[#allocation2 + $0x190] sm:$0xff] }
 0x26b   :  { %12599 = vmatmul.mubr.f32.gmra.mrb[54].mxu0 %v20700_v8  ;;  %v17069_v8 = vld [vmem:[#allocation2 + $0x1a8] sm:$0xff] }
 0x26c   :  { %12601 = vmatprep.mubr.f32.mxu0 %v20701_v45  ;;  %v17073_v45 = vld [vmem:[#allocation2 + $0x1b0] sm:$0xff] }
 0x26f   :  { %12602 = vmatmul.mubr.f32.gmra.mrb[56].mxu0 %v20702_v12  ;;  %v17075_v12 = vld [vmem:[#allocation2 + $0x1c8] sm:$0xff] }
 0x270   :  { %12604 = vmatprep.mubr.f32.mxu0 %v20703_v50  ;;  %v17079_v50 = vld [vmem:[#allocation2 + $0x1d0] sm:$0xff] }
 0x273   :  { %12605 = vmatmul.mubr.f32.gmra.mrb[58].mxu0 %v20704_v49  ;;  %v17081_v49 = vld [vmem:[#allocation2 + $0x1e8] sm:$0xff] }
 0x274   :  { %12607 = vmatprep.mubr.f32.mxu0 %v20705_v13  ;;  %v17085_v13 = vld [vmem:[#allocation2 + $0x1f0] sm:$0xff] }
 0x277   :  { %12608 = vmatmul.mubr.f32.gmra.mrb[60].mxu0 %v20706_v59  ;;  %v2534_v59 = vld [vmem:[#allocation2 + $0x268] sm:$0xff] }
 0x278   :  { %12610 = vmatprep.mubr.f32.mxu0 %v16993_v14 }
 0x27b   :  { %12611 = vmatmul.mubr.f32.gmra.mrb[62].mxu0 %v16997_v0 }
 0x27c   :  { %12645 = vmatprep.mubr.f32.mxu0 %v2502_v15  ;;  %v2535_v15 = vld [vmem:[#allocation2 + $0x270] sm:$0xff] }
 0x27f   :  { %12646 = vmatmul.mubr.f32.vlgmr.msra.gmra.mrb[0].mxu0 %v2503_v19  ;;  %v17095_v19 = vld [vmem:[#allocation2 + $0x2a8] sm:$0xff] }
 0x280   :  { %14568 = vmatpush3.bf16.msra.mxu0 %v16940_v6  ;;  %12648 = vmatprep.mubr.f32.mxu0 %v17000_v32  ;;  %v17057_v6 = vld [vmem:[#allocation2 + $0x168] sm:$0xff] }
 0x281   :  { %14570 = vmatprep.subr.bf16.mxu0 %v14569_v20 }
 0x283   :  { %12649 = vmatmul.mubr.f32.gmra.mrb[2].mxu0 %v17004_v27 }
 0x284   :  { %12651 = vmatprep.mubr.f32.mxu0 %v17006_v28  ;;  %14572 = vmatpush3.bf16.msra.mxu0 %v14569_v20  ;;  %v17099_v20 = vld [vmem:[#allocation2 + $0x2b0] sm:$0xff] }
 0x285   :  { %14574 = vmatprep.subr.bf16.mxu0 %v14573_v29 }
 0x287   :  { %12652 = vmatmul.mubr.f32.gmra.mrb[4].mxu0 %v17010_v35 }
 0x288   :  { %12654 = vmatprep.mubr.f32.mxu0 %v17012_v36  ;;  %14576 = vmatpush3.bf16.msra.mxu0 %v14573_v29  ;;  %v17113_v29 = vld [vmem:[#allocation2 + $0x308] sm:$0xff] }
 0x289   :  { %14578 = vmatprep.subr.bf16.mxu0 %v14577_v37 }
 0x28b   :  { %12655 = vmatmul.mubr.f32.gmra.mrb[6].mxu0 %v17016_v41 }
 0x28c   :  { %12657 = vmatprep.mubr.f32.mxu0 %v17018_v44  ;;  %14580 = vmatpush3.bf16.msra.mxu0 %v14577_v37  ;;  %v17123_v37 = vld [vmem:[#allocation2 + $0x330] sm:$0xff] }
 0x28d   :  { %14582 = vmatprep.subr.bf16.mxu0 %v14581_v46 }
 0x28f   :  { %12658 = vmatmul.mubr.f32.gmra.mrb[8].mxu0 %v17022_v53 }
 0x290   :  { %12660 = vmatprep.mubr.f32.mxu0 %v17024_v54  ;;  %14584 = vmatpush3.bf16.msra.mxu0 %v14581_v46  ;;  %v17131_v46 = vld [vmem:[#allocation2 + $0x368] sm:$0xff] }
 0x291   :  { %14586 = vmatprep.subr.bf16.mxu0 %v14585_v57 }
 0x293   :  { %12661 = vmatmul.mubr.f32.gmra.mrb[10].mxu0 %v17028_v9 }
 0x294   :  { %12663 = vmatprep.mubr.f32.mxu0 %v17030_v38  ;;  %14588 = vmatpush3.bf16.msra.mxu0 %v14585_v57  ;;  %v17141_v57 = vld [vmem:[#allocation2 + $0x390] sm:$0xff] }
 0x295   :  { %14590 = vmatprep.subr.bf16.mxu0 %v14589_v10  ;;  %20709 = vst [vmem:[#allocation15_spill] sm:$0xff] %v17141_v57 }
 0x297   :  { %12664 = vmatmul.mubr.f32.gmra.mrb[12].mxu0 %v17034_v43 }
 0x298   :  { %12666 = vmatprep.mubr.f32.mxu0 %v17036_v62  ;;  %14592 = vmatpush3.bf16.msra.mxu0 %v14589_v10  ;;  %v17149_v10 = vld [vmem:[#allocation2 + $0x3c8] sm:$0xff] }
 0x299   :  { %14594 = vmatprep.subr.bf16.mxu0 %v14593_v48  ;;  %20712 = vst [vmem:[#allocation18_spill] sm:$0xff] %v17149_v10 }
 0x29b   :  { %12667 = vmatmul.mubr.f32.gmra.mrb[14].mxu0 %v17040_v55 }
 0x29c   :  { %12669 = vmatprep.mubr.f32.mxu0 %v17042_v56  ;;  %14596 = vmatpush3.bf16.msra.mxu0 %v14593_v48  ;;  %v17159_v48 = vld [vmem:[#allocation2 + $0x3f0] sm:$0xff] }
 0x29d   :  { %14598 = vmatprep.subr.bf16.mxu0 %v17044_v31  ;;  %20715 = vst [vmem:[#allocation21_spill] sm:$0xff] %v17159_v48 }
 0x29f   :  { %12670 = vmatmul.mubr.f32.gmra.mrb[16].mxu0 %v17048_v63 }
 0x2a0   :  { %12672 = vmatprep.mubr.f32.mxu0 %v17050_v1 }
 0x2a3   :  { %12673 = vmatmul.mubr.f32.gmra.mrb[18].mxu0 %v17055_v4 }
 0x2a4   :  { %12675 = vmatprep.mubr.f32.mxu0 %v17057_v6 }
 0x2a7   :  { %12676 = vmatmul.mubr.f32.gmra.mrb[20].mxu0 %v17061_v22 }
 0x2a8   :  { %12678 = vmatprep.mubr.f32.mxu0 %v17063_v58 }
 0x2ab   :  { %12679 = vmatmul.mubr.f32.gmra.mrb[22].mxu0 %v17067_v5 }
 0x2ac   :  { %12681 = vmatprep.mubr.f32.mxu0 %v17069_v8 }
 0x2af   :  { %12682 = vmatmul.mubr.f32.gmra.mrb[24].mxu0 %v17073_v45 }
 0x2b0   :  { %12684 = vmatprep.mubr.f32.mxu0 %v17075_v12 }
 0x2b3   :  { %12685 = vmatmul.mubr.f32.gmra.mrb[26].mxu0 %v17079_v50 }
 0x2b4   :  { %12687 = vmatprep.mubr.f32.mxu0 %v17081_v49 }
 0x2b7   :  { %12688 = vmatmul.mubr.f32.gmra.mrb[28].mxu0 %v17085_v13 }
 0x2b8   :  { %12690 = vmatprep.mubr.f32.mxu0 %v16811_v11  ;;  %v17101_v11 = vld [vmem:[#allocation2 + $0x2c8] sm:$0xff] }
 0x2bb   :  { %12691 = vmatmul.mubr.f32.gmra.mrb[30].mxu0 %v16814_v60  ;;  %v17105_v60 = vld [vmem:[#allocation2 + $0x2d0] sm:$0xff] }
 0x2bc   :  { %12693 = vmatprep.mubr.f32.mxu0 %v2534_v59  ;;  %v17167_v59 = vld [vmem:[#allocation2 + $0x428] sm:$0xff] }
 0x2bd   :  { %20718 = vst [vmem:[#allocation83_spill] sm:$0xff] %v17167_v59 }
 0x2bf   :  { %12694 = vmatmul.mubr.f32.gmra.mrb[32].mxu0 %v2535_v15  ;;  %v17171_v15 = vld [vmem:[#allocation2 + $0x430] sm:$0xff] }
 0x2c0   :  { %12696 = vmatprep.mubr.f32.mxu0 %v17090_v16  ;;  %20719 = vst [vmem:[#allocation84_spill] sm:$0xff] %v17171_v15 }
 0x2c3   :  { %12697 = vmatmul.mubr.f32.gmra.mrb[34].mxu0 %v17093_v17 }
 0x2c4   :  { %12699 = vmatprep.mubr.f32.mxu0 %v17095_v19 }
 0x2c7   :  { %12700 = vmatmul.mubr.f32.gmra.mrb[36].mxu0 %v17099_v20 }
 0x2c8   :  { %12702 = vmatprep.mubr.f32.mxu0 %v17101_v11 }
 0x2cb   :  { %12703 = vmatmul.mubr.f32.gmra.mrb[38].mxu0 %v17105_v60 }
 0x2cc   :  { %12705 = vmatprep.mubr.f32.mxu0 %v17107_v25 }
 0x2cf   :  { %12706 = vmatmul.mubr.f32.gmra.mrb[40].mxu0 %v17111_v26 }
 0x2d0   :  { %12708 = vmatprep.mubr.f32.mxu0 %v17113_v29 }
 0x2d3   :  { %12709 = vmatmul.mubr.f32.gmra.mrb[42].mxu0 %v17117_v30 }
 0x2d4   :  { %12711 = vmatprep.mubr.f32.mxu0 %v17119_v33 }
 0x2d7   :  { %12712 = vmatmul.mubr.f32.gmra.mrb[44].mxu0 %v17123_v37 }
 0x2d8   :  { %12714 = vmatprep.mubr.f32.mxu0 %v17125_v39 }
 0x2db   :  { %12715 = vmatmul.mubr.f32.gmra.mrb[46].mxu0 %v17129_v40 }
 0x2dc   :  { %12717 = vmatprep.mubr.f32.mxu0 %v17131_v46 }
 0x2df   :  { %12718 = vmatmul.mubr.f32.gmra.mrb[48].mxu0 %v17135_v47  ;;  %v20728_v47 = vld [vmem:[#allocation31_spill] sm:$0xff] }
 0x2e0   :  { %12720 = vmatprep.mubr.f32.mxu0 %v17137_v52  ;;  %v20724_v52 = vld [vmem:[#allocation27_spill] sm:$0xff] }
 0x2e3   :  { %12721 = vmatmul.mubr.f32.gmra.mrb[50].mxu0 %v17141_v57  ;;  %v171_v57 = vld [vmem:[#allocation6 + $0x338] sm:$0xff] }
 0x2e4   :  { %12723 = vmatprep.mubr.f32.mxu0 %v17143_v34  ;;  %v20721_v34 = vld [vmem:[#allocation24_spill] sm:$0xff] }
 0x2e7   :  { %12724 = vmatmul.mubr.f32.gmra.mrb[52].mxu0 %v17147_v61  ;;  %v169_v61 = vld [vmem:[#allocation6 + $0x328] sm:$0xff] }
 0x2e8   :  { %12726 = vmatprep.mubr.f32.mxu0 %v17149_v10  ;;  %v168_v10 = vld [vmem:[#allocation6 + $0x320] sm:$0xff] }
 0x2eb   :  { %12727 = vmatmul.mubr.f32.gmra.mrb[54].mxu0 %v17153_v24  ;;  %v167_v24 = vld [vmem:[#allocation6 + $0x318] sm:$0xff] }
 0x2ec   :  { %12729 = vmatprep.mubr.f32.mxu0 %v17155_v42  ;;  %v166_v42 = vld [vmem:[#allocation6 + $0x310] sm:$0xff] }
 0x2ef   :  { %12730 = vmatmul.mubr.f32.gmra.mrb[56].mxu0 %v17159_v48  ;;  %v20720_v48 = vld [vmem:[#allocation23_spill] sm:$0xff] }
 0x2f0   :  { %12732 = vmatprep.mubr.f32.mxu0 %v17161_v51  ;;  %v14601_v51 = vpack.c.bf16 %v167_v24, %v166_v42  ;;  %v172_v24 = vld [vmem:[#allocation6 + $0x340] sm:$0xff]  ;;  %v173_v42 = vld [vmem:[#allocation6 + $0x348] sm:$0xff] }
 0x2f3   :  { %12733 = vmatmul.mubr.f32.gmra.mrb[58].mxu0 %v17165_v23  ;;  %v14605_v23 = vpack.c.bf16 %v169_v61, %v168_v10  ;;  %v175_v61 = vld [vmem:[#allocation6 + $0x358] sm:$0xff]  ;;  %v20727_v10 = vld [vmem:[#allocation30_spill] sm:$0xff] }
 0x2f4   :  { %12735 = vmatprep.mubr.f32.mxu0 %v17167_v59  ;;  %v20722_v59 = vld [vmem:[#allocation25_spill] sm:$0xff] }
 0x2f7   :  { %12736 = vmatmul.mubr.f32.gmra.mrb[60].mxu0 %v17171_v15  ;;  %v170_v15 = vld [vmem:[#allocation6 + $0x330] sm:$0xff] }
 0x2f8   :  { %12738 = vmatprep.mubr.f32.mxu0 %v16907_v18  ;;  %v20723_v18 = vld [vmem:[#allocation26_spill] sm:$0xff] }
 0x2fb   :  { %12739 = vmatmul.mubr.f32.gmra.mrb[62].mxu0 %v16910_v3  ;;  %v14609_v3 = vpack.c.bf16 %v171_v57, %v170_v15  ;;  %v177_v57 = vld [vmem:[#allocation6 + $0x368] sm:$0xff]  ;;  %v20729_v15 = vld [vmem:[#allocation32_spill] sm:$0xff] }
 0x2fc   :  { %12773 = vmatprep.mubr.f32.mxu0 %v20720_v48  ;;  %v20725_v48 = vld [vmem:[#allocation28_spill] sm:$0xff] }
 0x2ff   :  { %12774 = vmatmul.mubr.f32.vlgmr.msra.gmra.mrb[0].mxu0 %v20721_v34  ;;  %v20726_v34 = vld [vmem:[#allocation29_spill] sm:$0xff] }
 0x300   :  { %14600 = vmatpush3.bf16.msra.mxu0 %v17044_v31  ;;  %12776 = vmatprep.mubr.f32.mxu0 %v20722_v59  ;;  %v14613_v31 = vpack.c.bf16 %v173_v42, %v172_v24  ;;  %v174_v59 = vld [vmem:[#allocation6 + $0x350] sm:$0xff]  ;;  %v179_v24 = vld [vmem:[#allocation6 + $0x378] sm:$0xff]  ;;  %v20731_v42 = vld [vmem:[#allocation34_spill] sm:$0xff] }
 0x301   :  { %14602 = vmatprep.subr.bf16.mxu0 %v14601_v51 }
 0x303   :  { %12777 = vmatmul.mubr.f32.gmra.mrb[2].mxu0 %v20723_v18  ;;  %v20730_v18 = vld [vmem:[#allocation33_spill] sm:$0xff] }
 0x304   :  { %12779 = vmatprep.mubr.f32.mxu0 %v20724_v52  ;;  %14604 = vmatpush3.bf16.msra.mxu0 %v14601_v51  ;;  %v14617_v52 = vpack.c.bf16 %v175_v61, %v174_v59  ;;  %v176_v51 = vld [vmem:[#allocation6 + $0x360] sm:$0xff]  ;;  %v181_v59 = vld [vmem:[#allocation6 + $0x388] sm:$0xff]  ;;  %v20733_v61 = vld [vmem:[#allocation36_spill] sm:$0xff] }
 0x305   :  { %14606 = vmatprep.subr.bf16.mxu0 %v14605_v23 }
 0x307   :  { %12780 = vmatmul.mubr.f32.gmra.mrb[4].mxu0 %v20725_v48  ;;  %v178_v48 = vld [vmem:[#allocation6 + $0x370] sm:$0xff] }
 0x308   :  { %12782 = vmatprep.mubr.f32.mxu0 %v20726_v34  ;;  %14608 = vmatpush3.bf16.msra.mxu0 %v14605_v23  ;;  %v14621_v23 = vpack.c.bf16 %v177_v57, %v176_v51  ;;  %v20732_v34 = vld [vmem:[#allocation35_spill] sm:$0xff]  ;;  %v20735_v51 = vld [vmem:[#allocation38_spill] sm:$0xff] }
 0x309   :  { %14610 = vmatprep.subr.bf16.mxu0 %v14609_v3  ;;  %v20736_v57 = vld [vmem:[#allocation39_spill] sm:$0xff] }
 0x30b   :  { %12783 = vmatmul.mubr.f32.gmra.mrb[6].mxu0 %v20727_v10  ;;  %v20734_v10 = vld [vmem:[#allocation37_spill] sm:$0xff] }
 0x30c   :  { %12785 = vmatprep.mubr.f32.mxu0 %v20728_v47  ;;  %14612 = vmatpush3.bf16.msra.mxu0 %v14609_v3  ;;  %v14625_v47 = vpack.c.bf16 %v179_v24, %v178_v48  ;;  %v180_v3 = vld [vmem:[#allocation6 + $0x380] sm:$0xff]  ;;  %v20740_v48 = vld [vmem:[#allocation43_spill] sm:$0xff]  ;;  %v20741_v24 = vld [vmem:[#allocation44_spill] sm:$0xff] }
 0x30d   :  { %14614 = vmatprep.subr.bf16.mxu0 %v14613_v31 }
 0x30f   :  { %12786 = vmatmul.mubr.f32.gmra.mrb[8].mxu0 %v20729_v15  ;;  %v20738_v15 = vld [vmem:[#allocation41_spill] sm:$0xff] }
 0x310   :  { %12788 = vmatprep.mubr.f32.mxu0 %v20730_v18  ;;  %14616 = vmatpush3.bf16.msra.mxu0 %v14613_v31  ;;  %v17192_v31 = vpack.c.bf16 %v181_v59, %v180_v3  ;;  %v20739_v18 = vld [vmem:[#allocation42_spill] sm:$0xff]  ;;  %v20745_v3 = vld [vmem:[#allocation48_spill] sm:$0xff] }
 0x311   :  { %14618 = vmatprep.subr.bf16.mxu0 %v14617_v52  ;;  %v20747_v59 = vld [vmem:[#allocation50_spill] sm:$0xff] }
 0x313   :  { %12789 = vmatmul.mubr.f32.gmra.mrb[10].mxu0 %v20731_v42  ;;  %v20743_v42 = vld [vmem:[#allocation46_spill] sm:$0xff] }
 0x314   :  { %12791 = vmatprep.mubr.f32.mxu0 %v20732_v34  ;;  %14620 = vmatpush3.bf16.msra.mxu0 %v14617_v52  ;;  %v20737_v52 = vld [vmem:[#allocation40_spill] sm:$0xff]  ;;  %v20744_v34 = vld [vmem:[#allocation47_spill] sm:$0xff] }
 0x315   :  { %14622 = vmatprep.subr.bf16.mxu0 %v14621_v23 }
 0x317   :  { %12792 = vmatmul.mubr.f32.gmra.mrb[12].mxu0 %v20733_v61  ;;  %v20748_v61 = vld [vmem:[#allocation51_spill] sm:$0xff] }
 0x318   :  { %12794 = vmatprep.mubr.f32.mxu0 %v20734_v10  ;;  %14624 = vmatpush3.bf16.msra.mxu0 %v14621_v23  ;;  %v20742_v23 = vld [vmem:[#allocation45_spill] sm:$0xff]  ;;  %v17209_v10 = vld [vmem:[#allocation2 + $0x209] sm:$0xff] }
 0x319   :  { %14626 = vmatprep.subr.bf16.mxu0 %v14625_v47  ;;  %20749 = vst [vmem:[#allocation23_spill] sm:$0xff] %v17209_v10 }
 0x31b   :  { %12795 = vmatmul.mubr.f32.gmra.mrb[14].mxu0 %v20735_v51  ;;  %v20750_v51 = vld [vmem:[#allocation52_spill] sm:$0xff] }
 0x31c   :  { %12797 = vmatprep.mubr.f32.mxu0 %v20736_v57  ;;  %14628 = vmatpush3.bf16.msra.mxu0 %v14625_v47  ;;  %v20746_v47 = vld [vmem:[#allocation49_spill] sm:$0xff]  ;;  %v17213_v57 = vld [vmem:[#allocation2 + $0x211] sm:$0xff] }
 0x31d   :  { %14630 = vmatprep.subr.bf16.mxu0 %v17192_v31  ;;  %20751 = vst [vmem:[#allocation24_spill] sm:$0xff] %v17213_v57 }
 0x31f   :  { %12798 = vmatmul.mubr.f32.gmra.mrb[16].mxu0 %v20737_v52  ;;  %v20752_v52 = vld [vmem:[#allocation53_spill] sm:$0xff] }
 0x320   :  { %12800 = vmatprep.mubr.f32.mxu0 %v20738_v15  ;;  %v20753_v15 = vld [vmem:[#allocation54_spill] sm:$0xff] }
 0x323   :  { %12801 = vmatmul.mubr.f32.gmra.mrb[18].mxu0 %v20739_v18  ;;  %v20754_v18 = vld [vmem:[#allocation55_spill] sm:$0xff] }
 0x324   :  { %12803 = vmatprep.mubr.f32.mxu0 %v20740_v48  ;;  %v20755_v48 = vld [vmem:[#allocation56_spill] sm:$0xff] }
 0x327   :  { %12804 = vmatmul.mubr.f32.gmra.mrb[20].mxu0 %v20741_v24  ;;  %v20756_v24 = vld [vmem:[#allocation57_spill] sm:$0xff] }
 0x328   :  { %12806 = vmatprep.mubr.f32.mxu0 %v20742_v23  ;;  %v20757_v23 = vld [vmem:[#allocation58_spill] sm:$0xff] }
 0x32b   :  { %12807 = vmatmul.mubr.f32.gmra.mrb[22].mxu0 %v20743_v42  ;;  %v20758_v42 = vld [vmem:[#allocation59_spill] sm:$0xff] }
 0x32c   :  { %12809 = vmatprep.mubr.f32.mxu0 %v20744_v34  ;;  %v20759_v34 = vld [vmem:[#allocation60_spill] sm:$0xff] }
 0x32f   :  { %12810 = vmatmul.mubr.f32.gmra.mrb[24].mxu0 %v20745_v3  ;;  %v20760_v3 = vld [vmem:[#allocation61_spill] sm:$0xff] }
 0x330   :  { %12812 = vmatprep.mubr.f32.mxu0 %v20746_v47  ;;  %v20761_v47 = vld [vmem:[#allocation62_spill] sm:$0xff] }
 0x333   :  { %12813 = vmatmul.mubr.f32.gmra.mrb[26].mxu0 %v20747_v59  ;;  %v20762_v59 = vld [vmem:[#allocation63_spill] sm:$0xff] }
 0x334   :  { %12815 = vmatprep.mubr.f32.mxu0 %v20748_v61  ;;  %v20763_v61 = vld [vmem:[#allocation64_spill] sm:$0xff] }
 0x337   :  { %12816 = vmatmul.mubr.f32.gmra.mrb[28].mxu0 %v20750_v51  ;;  %v20764_v51 = vld [vmem:[#allocation65_spill] sm:$0xff] }
 0x338   :  { %12818 = vmatprep.mubr.f32.mxu0 %v17209_v10  ;;  %v190_v10 = vld [vmem:[#allocation6 + $0x3d0] sm:$0xff] }
 0x33b   :  { %12819 = vmatmul.mubr.f32.gmra.mrb[30].mxu0 %v17213_v57  ;;  %v3534_v57 = vld [vmem:[#allocation2 + $0x8f] sm:$0xff] }
 0x33c   :  { %12821 = vmatprep.mubr.f32.mxu0 %v20752_v52  ;;  %v20765_v52 = vld [vmem:[#allocation66_spill] sm:$0xff] }
 0x33f   :  { %12822 = vmatmul.mubr.f32.gmra.mrb[32].mxu0 %v20753_v15  ;;  %v20766_v15 = vld [vmem:[#allocation67_spill] sm:$0xff] }
 0x340   :  { %12824 = vmatprep.mubr.f32.mxu0 %v20754_v18  ;;  %v20767_v18 = vld [vmem:[#allocation68_spill] sm:$0xff] }
 0x343   :  { %12825 = vmatmul.mubr.f32.gmra.mrb[34].mxu0 %v20755_v48  ;;  %v20768_v48 = vld [vmem:[#allocation69_spill] sm:$0xff] }
 0x344   :  { %12827 = vmatprep.mubr.f32.mxu0 %v20756_v24  ;;  %v20769_v24 = vld [vmem:[#allocation70_spill] sm:$0xff] }
 0x347   :  { %12828 = vmatmul.mubr.f32.gmra.mrb[36].mxu0 %v20757_v23  ;;  %v20770_v23 = vld [vmem:[#allocation71_spill] sm:$0xff] }
 0x348   :  { %12830 = vmatprep.mubr.f32.mxu0 %v20758_v42  ;;  %v20771_v42 = vld [vmem:[#allocation72_spill] sm:$0xff] }
 0x34b   :  { %12831 = vmatmul.mubr.f32.gmra.mrb[38].mxu0 %v20759_v34  ;;  %v20772_v34 = vld [vmem:[#allocation73_spill] sm:$0xff] }
 0x34c   :  { %12833 = vmatprep.mubr.f32.mxu0 %v20760_v3  ;;  %v20773_v3 = vld [vmem:[#allocation74_spill] sm:$0xff] }
 0x34f   :  { %12834 = vmatmul.mubr.f32.gmra.mrb[40].mxu0 %v20761_v47  ;;  %v20774_v47 = vld [vmem:[#allocation75_spill] sm:$0xff] }
 0x350   :  { %12836 = vmatprep.mubr.f32.mxu0 %v20762_v59  ;;  %v20775_v59 = vld [vmem:[#allocation76_spill] sm:$0xff] }
 0x353   :  { %12837 = vmatmul.mubr.f32.gmra.mrb[42].mxu0 %v20763_v61  ;;  %v20776_v61 = vld [vmem:[#allocation77_spill] sm:$0xff] }
 0x354   :  { %12839 = vmatprep.mubr.f32.mxu0 %v20764_v51  ;;  %v20777_v51 = vld [vmem:[#allocation78_spill] sm:$0xff] }
 0x357   :  { %12840 = vmatmul.mubr.f32.gmra.mrb[44].mxu0 %v20765_v52  ;;  %v20778_v52 = vld [vmem:[#allocation79_spill] sm:$0xff] }
 0x358   :  { %12842 = vmatprep.mubr.f32.mxu0 %v20766_v15  ;;  %v20779_v15 = vld [vmem:[#allocation80_spill] sm:$0xff] }
 0x35b   :  { %12843 = vmatmul.mubr.f32.gmra.mrb[46].mxu0 %v20767_v18  ;;  %v20780_v18 = vld [vmem:[#allocation81_spill] sm:$0xff] }
 0x35c   :  { %12845 = vmatprep.mubr.f32.mxu0 %v20768_v48  ;;  %v17245_v48 = vld [vmem:[#allocation2 + $0x449] sm:$0xff] }
 0x35d   :  { %20781 = vst [vmem:[#allocation25_spill] sm:$0xff] %v17245_v48 }
 0x35f   :  { %12846 = vmatmul.mubr.f32.gmra.mrb[48].mxu0 %v20769_v24  ;;  %v17249_v24 = vld [vmem:[#allocation2 + $0x451] sm:$0xff] }
 0x360   :  { %12848 = vmatprep.mubr.f32.mxu0 %v20770_v23  ;;  %20782 = vst [vmem:[#allocation26_spill] sm:$0xff] %v17249_v24  ;;  %v3529_v23 = vld [vmem:[#allocation2 + $0x47] sm:$0xff] }
 0x363   :  { %12849 = vmatmul.mubr.f32.gmra.mrb[50].mxu0 %v20771_v42  ;;  %v182_v42 = vld [vmem:[#allocation6 + $0x390] sm:$0xff] }
 0x364   :  { %12851 = vmatprep.mubr.f32.mxu0 %v20772_v34  ;;  %v183_v34 = vld [vmem:[#allocation6 + $0x398] sm:$0xff] }
 0x367   :  { %12852 = vmatmul.mubr.f32.gmra.mrb[52].mxu0 %v20773_v3  ;;  %v3530_v3 = vld [vmem:[#allocation2 + $0x4f] sm:$0xff] }
 0x368   :  { %12854 = vmatprep.mubr.f32.mxu0 %v20774_v47  ;;  %v3531_v47 = vld [vmem:[#allocation2 + $0x67] sm:$0xff] }
 0x36b   :  { %12855 = vmatmul.mubr.f32.gmra.mrb[54].mxu0 %v20775_v59  ;;  %v14633_v59 = vpack.c.bf16 %v183_v34, %v182_v42  ;;  %v188_v42 = vld [vmem:[#allocation6 + $0x3c0] sm:$0xff]  ;;  %v189_v34 = vld [vmem:[#allocation6 + $0x3c8] sm:$0xff] }
 0x36c   :  { %12857 = vmatprep.mubr.f32.mxu0 %v20776_v61  ;;  %v184_v61 = vld [vmem:[#allocation6 + $0x3a0] sm:$0xff] }
 0x36f   :  { %12858 = vmatmul.mubr.f32.gmra.mrb[56].mxu0 %v20777_v51  ;;  %v185_v51 = vld [vmem:[#allocation6 + $0x3a8] sm:$0xff] }
 0x370   :  { %12860 = vmatprep.mubr.f32.mxu0 %v20778_v52  ;;  %v3533_v52 = vld [vmem:[#allocation2 + $0x87] sm:$0xff] }
 0x373   :  { %12861 = vmatmul.mubr.f32.gmra.mrb[58].mxu0 %v20779_v15  ;;  %v14637_v15 = vpack.c.bf16 %v185_v51, %v184_v61  ;;  %v191_v61 = vld [vmem:[#allocation6 + $0x3d8] sm:$0xff]  ;;  %v3538_v51 = vld [vmem:[#allocation2 + $0xcf] sm:$0xff] }
 0x374   :  { %12863 = vmatprep.mubr.f32.mxu0 %v20780_v18  ;;  %v186_v18 = vld [vmem:[#allocation6 + $0x3b0] sm:$0xff] }
 0x377   :  { %12864 = vmatmul.mubr.f32.gmra.mrb[60].mxu0 %v16921_v2  ;;  %v3532_v2 = vld [vmem:[#allocation2 + $0x6f] sm:$0xff] }
 0x378   :  { %12866 = vmatprep.mubr.f32.mxu0 %v17245_v48  ;;  %v187_v48 = vld [vmem:[#allocation6 + $0x3b8] sm:$0xff] }
 0x37b   :  { %12867 = vmatmul.mubr.f32.gmra.mrb[62].mxu0 %v17249_v24  ;;  %v14641_v24 = vpack.c.bf16 %v187_v48, %v186_v18  ;;  %v193_v48 = vld [vmem:[#allocation6 + $0x3e8] sm:$0xff] }
 0x37c   :  { %12901 = vmatprep.mubr.f32.mxu0 %v3529_v23  ;;  %v3535_v23 = vld [vmem:[#allocation2 + $0xa7] sm:$0xff] }
 0x37d   :  { %v3541_v18 = vld [vmem:[#allocation2 + $0x107] sm:$0xff] }
 0x37f   :  { %12902 = vmatmul.mubr.f32.vlgmr.msra.gmra.mrb[0].mxu0 %v3530_v3  ;;  %v3536_v3 = vld [vmem:[#allocation2 + $0xaf] sm:$0xff] }
 0x380   :  { %14632 = vmatpush3.bf16.msra.mxu0 %v17192_v31  ;;  %12904 = vmatprep.mubr.f32.mxu0 %v3531_v47  ;;  %v3537_v31 = vld [vmem:[#allocation2 + $0xc7] sm:$0xff]  ;;  %v14645_v47 = vpack.c.bf16 %v189_v34, %v188_v42  ;;  %v195_v42 = vld [vmem:[#allocation6 + $0x3f8] sm:$0xff]  ;;  %v3542_v34 = vld [vmem:[#allocation2 + $0x10f] sm:$0xff] }
 0x381   :  { %14634 = vmatprep.subr.bf16.mxu0 %v14633_v59 }
 0x383   :  { %12905 = vmatmul.mubr.f32.gmra.mrb[2].mxu0 %v3532_v2  ;;  %v3539_v2 = vld [vmem:[#allocation2 + $0xe7] sm:$0xff] }
 0x384   :  { %12907 = vmatprep.mubr.f32.mxu0 %v3533_v52  ;;  %14636 = vmatpush3.bf16.msra.mxu0 %v14633_v59  ;;  %v14649_v59 = vpack.c.bf16 %v191_v61, %v190_v10  ;;  %v192_v52 = vld [vmem:[#allocation6 + $0x3e0] sm:$0xff]  ;;  %v197_v10 = vld [vmem:[#allocation6 + $0x408] sm:$0xff] }
 0x385   :  { %14638 = vmatprep.subr.bf16.mxu0 %v14637_v15  ;;  %v3544_v61 = vld [vmem:[#allocation2 + $0x12f] sm:$0xff] }
 0x387   :  { %12908 = vmatmul.mubr.f32.gmra.mrb[4].mxu0 %v3534_v57  ;;  %v3540_v57 = vld [vmem:[#allocation2 + $0xef] sm:$0xff] }
 0x388   :  { %12910 = vmatprep.mubr.f32.mxu0 %v3535_v23  ;;  %14640 = vmatpush3.bf16.msra.mxu0 %v14637_v15  ;;  %v14653_v15 = vpack.c.bf16 %v193_v48, %v192_v52  ;;  %v194_v23 = vld [vmem:[#allocation6 + $0x3f0] sm:$0xff]  ;;  %v3547_v52 = vld [vmem:[#allocation2 + $0x167] sm:$0xff] }
 0x389   :  { %14642 = vmatprep.subr.bf16.mxu0 %v14641_v24  ;;  %v3549_v48 = vld [vmem:[#allocation2 + $0x187] sm:$0xff] }
 0x38b   :  { %12911 = vmatmul.mubr.f32.gmra.mrb[6].mxu0 %v3536_v3  ;;  %v3543_v3 = vld [vmem:[#allocation2 + $0x127] sm:$0xff] }
 0x38c   :  { %12913 = vmatprep.mubr.f32.mxu0 %v3537_v31  ;;  %14644 = vmatpush3.bf16.msra.mxu0 %v14641_v24  ;;  %v14657_v24 = vpack.c.bf16 %v195_v42, %v194_v23  ;;  %v196_v31 = vld [vmem:[#allocation6 + $0x400] sm:$0xff]  ;;  %v3554_v42 = vld [vmem:[#allocation2 + $0x1cf] sm:$0xff] }
 0x38d   :  { %14646 = vmatprep.subr.bf16.mxu0 %v14645_v47  ;;  %v3553_v23 = vld [vmem:[#allocation2 + $0x1c7] sm:$0xff] }
 0x38f   :  { %12914 = vmatmul.mubr.f32.gmra.mrb[8].mxu0 %v3538_v51  ;;  %v3545_v51 = vld [vmem:[#allocation2 + $0x147] sm:$0xff] }
 0x390   :  { %12916 = vmatprep.mubr.f32.mxu0 %v3539_v2  ;;  %14648 = vmatpush3.bf16.msra.mxu0 %v14645_v47  ;;  %v17253_v47 = vpack.c.bf16 %v197_v10, %v196_v31  ;;  %v3546_v2 = vld [vmem:[#allocation2 + $0x14f] sm:$0xff]  ;;  %v3561_v10 = vld [vmem:[#allocation2 + $0x287] sm:$0xff] }
 0x391   :  { %14650 = vmatprep.subr.bf16.mxu0 %v14649_v59  ;;  %v3560_v31 = vld [vmem:[#allocation2 + $0x22f] sm:$0xff] }
 0x393   :  { %12917 = vmatmul.mubr.f32.gmra.mrb[10].mxu0 %v3540_v57  ;;  %v3550_v57 = vld [vmem:[#allocation2 + $0x18f] sm:$0xff] }
 0x394   :  { %12919 = vmatprep.mubr.f32.mxu0 %v3541_v18  ;;  %14652 = vmatpush3.bf16.msra.mxu0 %v14649_v59  ;;  %v3548_v59 = vld [vmem:[#allocation2 + $0x16f] sm:$0xff]  ;;  %v3551_v18 = vld [vmem:[#allocation2 + $0x1a7] sm:$0xff] }
 0x395   :  { %14654 = vmatprep.subr.bf16.mxu0 %v14653_v15 }
 0x397   :  { %12920 = vmatmul.mubr.f32.gmra.mrb[12].mxu0 %v3542_v34  ;;  %v3555_v34 = vld [vmem:[#allocation2 + $0x1e7] sm:$0xff] }
 0x398   :  { %12922 = vmatprep.mubr.f32.mxu0 %v3543_v3  ;;  %14656 = vmatpush3.bf16.msra.mxu0 %v14653_v15  ;;  %v3552_v15 = vld [vmem:[#allocation2 + $0x1af] sm:$0xff] }
 0x399   :  { %14658 = vmatprep.subr.bf16.mxu0 %v14657_v24  ;;  %v3556_v3 = vld [vmem:[#allocation2 + $0x1ef] sm:$0xff] }
 0x39b   :  { %12923 = vmatmul.mubr.f32.gmra.mrb[14].mxu0 %v3544_v61  ;;  %v3562_v61 = vld [vmem:[#allocation2 + $0x28f] sm:$0xff] }
 0x39c   :  { %12925 = vmatprep.mubr.f32.mxu0 %v3545_v51  ;;  %14660 = vmatpush3.bf16.msra.mxu0 %v14657_v24  ;;  %v3559_v24 = vld [vmem:[#allocation2 + $0x227] sm:$0xff] }
 0x39d   :  { %14662 = vmatprep.subr.bf16.mxu0 %v17253_v47  ;;  %v3563_v51 = vld [vmem:[#allocation2 + $0x2a7] sm:$0xff] }
 0x39f   :  { %12926 = vmatmul.mubr.f32.gmra.mrb[16].mxu0 %v3546_v2  ;;  %v3564_v2 = vld [vmem:[#allocation2 + $0x2af] sm:$0xff] }
 0x3a0   :  { %12928 = vmatprep.mubr.f32.mxu0 %v3547_v52  ;;  %v3565_v52 = vld [vmem:[#allocation2 + $0x2c7] sm:$0xff] }
 0x3a3   :  { %12929 = vmatmul.mubr.f32.gmra.mrb[18].mxu0 %v3548_v59  ;;  %v3566_v59 = vld [vmem:[#allocation2 + $0x2cf] sm:$0xff] }
 0x3a4   :  { %12931 = vmatprep.mubr.f32.mxu0 %v3549_v48  ;;  %v3567_v48 = vld [vmem:[#allocation2 + $0x2e7] sm:$0xff] }
 0x3a7   :  { %12932 = vmatmul.mubr.f32.gmra.mrb[20].mxu0 %v3550_v57  ;;  %v3569_v57 = vld [vmem:[#allocation2 + $0x307] sm:$0xff] }
 0x3a8   :  { %12934 = vmatprep.mubr.f32.mxu0 %v3551_v18  ;;  %v3571_v18 = vld [vmem:[#allocation2 + $0x327] sm:$0xff] }
 0x3ab   :  { %12935 = vmatmul.mubr.f32.gmra.mrb[22].mxu0 %v3552_v15  ;;  %v3572_v15 = vld [vmem:[#allocation2 + $0x32f] sm:$0xff] }
 0x3ac   :  { %12937 = vmatprep.mubr.f32.mxu0 %v3553_v23  ;;  %v3573_v23 = vld [vmem:[#allocation2 + $0x347] sm:$0xff] }
 0x3af   :  { %12938 = vmatmul.mubr.f32.gmra.mrb[24].mxu0 %v3554_v42  ;;  %v3574_v42 = vld [vmem:[#allocation2 + $0x34f] sm:$0xff] }
 0x3b0   :  { %12940 = vmatprep.mubr.f32.mxu0 %v3555_v34  ;;  %v3575_v34 = vld [vmem:[#allocation2 + $0x367] sm:$0xff] }
 0x3b3   :  { %12941 = vmatmul.mubr.f32.gmra.mrb[26].mxu0 %v3556_v3  ;;  %v3576_v3 = vld [vmem:[#allocation2 + $0x36f] sm:$0xff] }
 0x3b4   :  { %12943 = vmatprep.mubr.f32.mxu0 %v16957_v7  ;;  %v3568_v7 = vld [vmem:[#allocation2 + $0x2ef] sm:$0xff] }
 0x3b7   :  { %12944 = vmatmul.mubr.f32.gmra.mrb[28].mxu0 %v16961_v21  ;;  %v3570_v21 = vld [vmem:[#allocation2 + $0x30f] sm:$0xff] }
 0x3b8   :  { %12946 = vmatprep.mubr.f32.mxu0 %v3559_v24  ;;  %v3577_v24 = vld [vmem:[#allocation2 + $0x387] sm:$0xff] }
 0x3bb   :  { %12947 = vmatmul.mubr.f32.gmra.mrb[30].mxu0 %v3560_v31  ;;  %v3578_v31 = vld [vmem:[#allocation2 + $0x38f] sm:$0xff] }
 0x3bc   :  { %12949 = vmatprep.mubr.f32.mxu0 %v3561_v10  ;;  %v3579_v10 = vld [vmem:[#allocation2 + $0x3a7] sm:$0xff] }
 0x3bf   :  { %12950 = vmatmul.mubr.f32.gmra.mrb[32].mxu0 %v3562_v61  ;;  %v3580_v61 = vld [vmem:[#allocation2 + $0x3af] sm:$0xff] }
 0x3c0   :  { %12952 = vmatprep.mubr.f32.mxu0 %v3563_v51  ;;  %v3581_v51 = vld [vmem:[#allocation2 + $0x3c7] sm:$0xff] }
 0x3c3   :  { %12953 = vmatmul.mubr.f32.gmra.mrb[34].mxu0 %v3564_v2  ;;  %v3582_v2 = vld [vmem:[#allocation2 + $0x3cf] sm:$0xff] }
 0x3c4   :  { %12955 = vmatprep.mubr.f32.mxu0 %v3565_v52  ;;  %v3583_v52 = vld [vmem:[#allocation2 + $0x3e7] sm:$0xff] }
 0x3c7   :  { %12956 = vmatmul.mubr.f32.gmra.mrb[36].mxu0 %v3566_v59  ;;  %v3584_v59 = vld [vmem:[#allocation2 + $0x3ef] sm:$0xff] }
 0x3c8   :  { %12958 = vmatprep.mubr.f32.mxu0 %v3567_v48  ;;  %v3585_v48 = vld [vmem:[#allocation2 + $0x407] sm:$0xff] }
 0x3cb   :  { %12959 = vmatmul.mubr.f32.gmra.mrb[38].mxu0 %v3568_v7  ;;  %v3586_v7 = vld [vmem:[#allocation2 + $0x40f] sm:$0xff] }
 0x3cc   :  { %12961 = vmatprep.mubr.f32.mxu0 %v3569_v57  ;;  %v3587_v57 = vld [vmem:[#allocation2 + $0x427] sm:$0xff] }
 0x3cf   :  { %12962 = vmatmul.mubr.f32.gmra.mrb[40].mxu0 %v3570_v21  ;;  %v3588_v21 = vld [vmem:[#allocation2 + $0x42f] sm:$0xff] }
 0x3d0   :  { %12964 = vmatprep.mubr.f32.mxu0 %v3571_v18  ;;  %v3591_v18 = vld [vmem:[#allocation2 + $0x467] sm:$0xff] }
 0x3d3   :  { %12965 = vmatmul.mubr.f32.gmra.mrb[42].mxu0 %v3572_v15  ;;  %v3592_v15 = vld [vmem:[#allocation2 + $0x46f] sm:$0xff] }
 0x3d4   :  { %12967 = vmatprep.mubr.f32.mxu0 %v3573_v23  ;;  %v198_v23 = vld [vmem:[#allocation6 + $0x410] sm:$0xff] }
 0x3d7   :  { %12968 = vmatmul.mubr.f32.gmra.mrb[44].mxu0 %v3574_v42  ;;  %v199_v42 = vld [vmem:[#allocation6 + $0x418] sm:$0xff] }
 0x3d8   :  { %12970 = vmatprep.mubr.f32.mxu0 %v3575_v34  ;;  %v14665_v34 = vpack.c.bf16 %v199_v42, %v198_v23  ;;  %v4580_v23 = vld [vmem:[#allocation2 + $0x1d1] sm:$0xff]  ;;  %v4581_v42 = vld [vmem:[#allocation2 + $0x1e9] sm:$0xff] }
 0x3db   :  { %12971 = vmatmul.mubr.f32.gmra.mrb[46].mxu0 %v3576_v3  ;;  %v200_v3 = vld [vmem:[#allocation6 + $0x420] sm:$0xff] }
 0x3dc   :  { %12973 = vmatprep.mubr.f32.mxu0 %v3577_v24  ;;  %v201_v24 = vld [vmem:[#allocation6 + $0x428] sm:$0xff] }
 0x3df   :  { %12974 = vmatmul.mubr.f32.gmra.mrb[48].mxu0 %v3578_v31  ;;  %v202_v31 = vld [vmem:[#allocation6 + $0x430] sm:$0xff] }
 0x3e0   :  { %12976 = vmatprep.mubr.f32.mxu0 %v3579_v10  ;;  %v204_v10 = vld [vmem:[#allocation6 + $0x440] sm:$0xff] }
 0x3e3   :  { %12977 = vmatmul.mubr.f32.gmra.mrb[50].mxu0 %v3580_v61  ;;  %v205_v61 = vld [vmem:[#allocation6 + $0x448] sm:$0xff] }
 0x3e4   :  { %12979 = vmatprep.mubr.f32.mxu0 %v3581_v51  ;;  %v209_v51 = vld [vmem:[#allocation6 + $0x468] sm:$0xff] }
 0x3e7   :  { %12980 = vmatmul.mubr.f32.gmra.mrb[52].mxu0 %v3582_v2  ;;  %v211_v2 = vld [vmem:[#allocation6 + $0x478] sm:$0xff] }
 0x3e8   :  { %12982 = vmatprep.mubr.f32.mxu0 %v3583_v52  ;;  %v4572_v52 = vld [vmem:[#allocation2 + $0x151] sm:$0xff] }
 0x3eb   :  { %12983 = vmatmul.mubr.f32.gmra.mrb[54].mxu0 %v3584_v59  ;;  %v4573_v59 = vld [vmem:[#allocation2 + $0x169] sm:$0xff] }
 0x3ec   :  { %12985 = vmatprep.mubr.f32.mxu0 %v3585_v48  ;;  %v4574_v48 = vld [vmem:[#allocation2 + $0x171] sm:$0xff] }
 0x3ef   :  { %12986 = vmatmul.mubr.f32.gmra.mrb[56].mxu0 %v3586_v7  ;;  %v4575_v7 = vld [vmem:[#allocation2 + $0x189] sm:$0xff] }
 0x3f0   :  { %12988 = vmatprep.mubr.f32.mxu0 %v3587_v57  ;;  %v4576_v57 = vld [vmem:[#allocation2 + $0x191] sm:$0xff] }
 0x3f3   :  { %12989 = vmatmul.mubr.f32.gmra.mrb[58].mxu0 %v3588_v21  ;;  %v4577_v21 = vld [vmem:[#allocation2 + $0x1a9] sm:$0xff] }
 0x3f4   :  { %12991 = vmatprep.mubr.f32.mxu0 %v16993_v14  ;;  %v14669_v14 = vpack.c.bf16 %v201_v24, %v200_v3  ;;  %v20796_v3 = vld [vmem:[#allocation23_spill] sm:$0xff] }
 0x3f5   :  { %v4585_v24 = vld [vmem:[#allocation2 + $0x229] sm:$0xff] }
 0x3f7   :  { %12992 = vmatmul.mubr.f32.gmra.mrb[60].mxu0 %v16997_v0  ;;  %v203_v0 = vld [vmem:[#allocation6 + $0x438] sm:$0xff] }
 0x3f8   :  { %12994 = vmatprep.mubr.f32.mxu0 %v3591_v18  ;;  %v4578_v18 = vld [vmem:[#allocation2 + $0x1b1] sm:$0xff] }
 0x3fb   :  { %12995 = vmatmul.mubr.f32.gmra.mrb[62].mxu0 %v3592_v15  ;;  %v4579_v15 = vld [vmem:[#allocation2 + $0x1c9] sm:$0xff] }
 0x3fc   :  { %13029 = vmatprep.mubr.f32.mxu0 %v17000_v32  ;;  %v14673_v32 = vpack.c.bf16 %v203_v0, %v202_v31  ;;  %v4586_v31 = vld [vmem:[#allocation2 + $0x231] sm:$0xff]  ;;  %v4587_v0 = vld [vmem:[#allocation2 + $0x289] sm:$0xff] }
 0x3ff   :  { %13030 = vmatmul.mubr.f32.vlgmr.msra.gmra.mrb[0].mxu0 %v17004_v27  ;;  %v14677_v27 = vpack.c.bf16 %v205_v61, %v204_v10  ;;  %v4589_v10 = vld [vmem:[#allocation2 + $0x2a9] sm:$0xff]  ;;  %v4590_v61 = vld [vmem:[#allocation2 + $0x2b1] sm:$0xff] }
 0x400   :  { %14664 = vmatpush3.bf16.msra.mxu0 %v17253_v47  ;;  %13032 = vmatprep.mubr.f32.mxu0 %v17006_v28  ;;  %v206_v28 = vld [vmem:[#allocation6 + $0x450] sm:$0xff]  ;;  %v207_v47 = vld [vmem:[#allocation6 + $0x458] sm:$0xff] }
 0x401   :  { %14666 = vmatprep.subr.bf16.mxu0 %v14665_v34 }
 0x403   :  { %13033 = vmatmul.mubr.f32.gmra.mrb[2].mxu0 %v17010_v35  ;;  %v14681_v35 = vpack.c.bf16 %v207_v47, %v206_v28  ;;  %v4592_v28 = vld [vmem:[#allocation2 + $0x2d1] sm:$0xff]  ;;  %v4593_v47 = vld [vmem:[#allocation2 + $0x2e9] sm:$0xff] }
 0x404   :  { %13035 = vmatprep.mubr.f32.mxu0 %v17012_v36  ;;  %14668 = vmatpush3.bf16.msra.mxu0 %v14665_v34  ;;  %v208_v36 = vld [vmem:[#allocation6 + $0x460] sm:$0xff]  ;;  %v4582_v34 = vld [vmem:[#allocation2 + $0x1f1] sm:$0xff] }
 0x405   :  { %14670 = vmatprep.subr.bf16.mxu0 %v14669_v14 }
 0x407   :  { %13036 = vmatmul.mubr.f32.gmra.mrb[4].mxu0 %v17016_v41  ;;  %v14685_v41 = vpack.c.bf16 %v209_v51, %v208_v36  ;;  %v4595_v36 = vld [vmem:[#allocation2 + $0x309] sm:$0xff]  ;;  %v4596_v51 = vld [vmem:[#allocation2 + $0x311] sm:$0xff] }
 0x408   :  { %13038 = vmatprep.mubr.f32.mxu0 %v17018_v44  ;;  %14672 = vmatpush3.bf16.msra.mxu0 %v14669_v14  ;;  %v210_v44 = vld [vmem:[#allocation6 + $0x470] sm:$0xff]  ;;  %v20797_v14 = vld [vmem:[#allocation24_spill] sm:$0xff] }
 0x409   :  { %14674 = vmatprep.subr.bf16.mxu0 %v14673_v32 }
 0x40b   :  { %13039 = vmatmul.mubr.f32.gmra.mrb[6].mxu0 %v17022_v53  ;;  %v14689_v53 = vpack.c.bf16 %v211_v2, %v210_v44  ;;  %v4598_v44 = vld [vmem:[#allocation2 + $0x331] sm:$0xff]  ;;  %v4599_v2 = vld [vmem:[#allocation2 + $0x349] sm:$0xff] }
 0x40c   :  { %13041 = vmatprep.mubr.f32.mxu0 %v17024_v54  ;;  %14676 = vmatpush3.bf16.msra.mxu0 %v14673_v32  ;;  %v4070_v54 = vld [vmem:[#allocation2 + $0x208] sm:$0xff]  ;;  %v4588_v32 = vld [vmem:[#allocation2 + $0x291] sm:$0xff] }
 0x40d   :  { %14678 = vmatprep.subr.bf16.mxu0 %v14677_v27 }
 0x40f   :  { %13042 = vmatmul.mubr.f32.gmra.mrb[8].mxu0 %v17028_v9  ;;  %v4071_v9 = vld [vmem:[#allocation2 + $0x210] sm:$0xff] }
 0x410   :  { %13044 = vmatprep.mubr.f32.mxu0 %v17030_v38  ;;  %14680 = vmatpush3.bf16.msra.mxu0 %v14677_v27  ;;  %v17289_v38 = vld [vmem:[#allocation2 + $0x8] sm:$0xff] }
 0x411   :  { %14682 = vmatprep.subr.bf16.mxu0 %v14681_v35  ;;  %v4591_v27 = vld [vmem:[#allocation2 + $0x2c9] sm:$0xff] }
 0x413   :  { %13045 = vmatmul.mubr.f32.gmra.mrb[10].mxu0 %v17034_v43  ;;  %v20783_v43 = vld [vmem:[#allocation13_spill] sm:$0xff] }
 0x414   :  { %13047 = vmatprep.mubr.f32.mxu0 %v17036_v62  ;;  %14684 = vmatpush3.bf16.msra.mxu0 %v14681_v35  ;;  %v20784_v62 = vld [vmem:[#allocation14_spill] sm:$0xff]  ;;  %v4594_v35 = vld [vmem:[#allocation2 + $0x2f1] sm:$0xff] }
 0x415   :  { %14686 = vmatprep.subr.bf16.mxu0 %v14685_v41 }
 0x417   :  { %13048 = vmatmul.mubr.f32.gmra.mrb[12].mxu0 %v17040_v55  ;;  %v20785_v55 = vld [vmem:[#allocation15_spill] sm:$0xff] }
 0x418   :  { %13050 = vmatprep.mubr.f32.mxu0 %v17042_v56  ;;  %14688 = vmatpush3.bf16.msra.mxu0 %v14685_v41  ;;  %v20786_v56 = vld [vmem:[#allocation16_spill] sm:$0xff]  ;;  %v4597_v41 = vld [vmem:[#allocation2 + $0x329] sm:$0xff] }
 0x419   :  { %14690 = vmatprep.subr.bf16.mxu0 %v14689_v53 }
 0x41b   :  { %13051 = vmatmul.mubr.f32.gmra.mrb[14].mxu0 %v17048_v63  ;;  %v20787_v63 = vld [vmem:[#allocation17_spill] sm:$0xff] }
 0x41c   :  { %13053 = vmatprep.mubr.f32.mxu0 %v17050_v1  ;;  %14692 = vmatpush3.bf16.msra.mxu0 %v14689_v53  ;;  %v20788_v1 = vld [vmem:[#allocation18_spill] sm:$0xff]  ;;  %v4600_v53 = vld [vmem:[#allocation2 + $0x351] sm:$0xff] }
 0x41f   :  { %13054 = vmatmul.mubr.f32.gmra.mrb[16].mxu0 %v17055_v4  ;;  %v20789_v4 = vld [vmem:[#allocation19_spill] sm:$0xff] }
 0x420   :  { %13056 = vmatprep.mubr.f32.mxu0 %v17057_v6  ;;  %v20790_v6 = vld [vmem:[#allocation20_spill] sm:$0xff] }
 0x423   :  { %13057 = vmatmul.mubr.f32.gmra.mrb[18].mxu0 %v17061_v22  ;;  %v20791_v22 = vld [vmem:[#allocation21_spill] sm:$0xff] }
 0x424   :  { %13059 = vmatprep.mubr.f32.mxu0 %v17063_v58  ;;  %v20792_v58 = vld [vmem:[#allocation22_spill] sm:$0xff] }
 0x427   :  { %13060 = vmatmul.mubr.f32.gmra.mrb[20].mxu0 %v17067_v5  ;;  %v20793_v5 = vld [vmem:[#allocation82_spill] sm:$0xff] }
 0x428   :  { %13062 = vmatprep.mubr.f32.mxu0 %v17069_v8  ;;  %v20794_v8 = vld [vmem:[#allocation83_spill] sm:$0xff] }
 0x42b   :  { %13063 = vmatmul.mubr.f32.gmra.mrb[22].mxu0 %v17073_v45  ;;  %v4102_v45 = vld [vmem:[#allocation2 + $0x448] sm:$0xff] }
 0x42c   :  { %13065 = vmatprep.mubr.f32.mxu0 %v17075_v12  ;;  %v20795_v12 = vld [vmem:[#allocation84_spill] sm:$0xff] }
 0x42f   :  { %13066 = vmatmul.mubr.f32.gmra.mrb[24].mxu0 %v17079_v50  ;;  %v4103_v50 = vld [vmem:[#allocation2 + $0x450] sm:$0xff] }
 0x430   :  { %13068 = vmatprep.mubr.f32.mxu0 %v17081_v49  ;;  %v4555_v49 = vld [vmem:[#allocation2 + $0x49] sm:$0xff] }
 0x433   :  { %13069 = vmatmul.mubr.f32.gmra.mrb[26].mxu0 %v17085_v13  ;;  %v4556_v13 = vld [vmem:[#allocation2 + $0x51] sm:$0xff] }
 0x434   :  { %13071 = vmatprep.mubr.f32.mxu0 %v4070_v54  ;;  %v4601_v54 = vld [vmem:[#allocation2 + $0x369] sm:$0xff] }
 0x437   :  { %13072 = vmatmul.mubr.f32.gmra.mrb[28].mxu0 %v4071_v9  ;;  %v4602_v9 = vld [vmem:[#allocation2 + $0x371] sm:$0xff] }
 0x438   :  { %13074 = vmatprep.mubr.f32.mxu0 %v17289_v38 }
 0x43b   :  { %13075 = vmatmul.mubr.f32.gmra.mrb[30].mxu0 %v17289_v38 }
 0x43c   :  { %13077 = vmatprep.mubr.f32.mxu0 %v17090_v16  ;;  %v4557_v16 = vld [vmem:[#allocation2 + $0x69] sm:$0xff] }
 0x43f   :  { %13078 = vmatmul.mubr.f32.gmra.mrb[32].mxu0 %v17093_v17  ;;  %v4558_v17 = vld [vmem:[#allocation2 + $0x71] sm:$0xff] }
 0x440   :  { %13080 = vmatprep.mubr.f32.mxu0 %v17095_v19  ;;  %v4559_v19 = vld [vmem:[#allocation2 + $0x89] sm:$0xff] }
 0x443   :  { %13081 = vmatmul.mubr.f32.gmra.mrb[34].mxu0 %v17099_v20  ;;  %v4560_v20 = vld [vmem:[#allocation2 + $0x91] sm:$0xff] }
 0x444   :  { %13083 = vmatprep.mubr.f32.mxu0 %v17101_v11  ;;  %v4561_v11 = vld [vmem:[#allocation2 + $0xa9] sm:$0xff] }
 0x447   :  { %13084 = vmatmul.mubr.f32.gmra.mrb[36].mxu0 %v17105_v60  ;;  %v4562_v60 = vld [vmem:[#allocation2 + $0xb1] sm:$0xff] }
 0x448   :  { %13086 = vmatprep.mubr.f32.mxu0 %v17107_v25  ;;  %v4563_v25 = vld [vmem:[#allocation2 + $0xc9] sm:$0xff] }
 0x44b   :  { %13087 = vmatmul.mubr.f32.gmra.mrb[38].mxu0 %v17111_v26  ;;  %v4564_v26 = vld [vmem:[#allocation2 + $0xd1] sm:$0xff] }
 0x44c   :  { %13089 = vmatprep.mubr.f32.mxu0 %v17113_v29  ;;  %v4565_v29 = vld [vmem:[#allocation2 + $0xe9] sm:$0xff] }
 0x44f   :  { %13090 = vmatmul.mubr.f32.gmra.mrb[40].mxu0 %v17117_v30  ;;  %v4566_v30 = vld [vmem:[#allocation2 + $0xf1] sm:$0xff] }
 0x450   :  { %13092 = vmatprep.mubr.f32.mxu0 %v17119_v33  ;;  %v4567_v33 = vld [vmem:[#allocation2 + $0x109] sm:$0xff] }
 0x453   :  { %13093 = vmatmul.mubr.f32.gmra.mrb[42].mxu0 %v17123_v37  ;;  %v4568_v37 = vld [vmem:[#allocation2 + $0x111] sm:$0xff] }
 0x454   :  { %13095 = vmatprep.mubr.f32.mxu0 %v17125_v39  ;;  %v4569_v39 = vld [vmem:[#allocation2 + $0x129] sm:$0xff] }
 0x457   :  { %13096 = vmatmul.mubr.f32.gmra.mrb[44].mxu0 %v17129_v40  ;;  %v4570_v40 = vld [vmem:[#allocation2 + $0x131] sm:$0xff] }
 0x458   :  { %13098 = vmatprep.mubr.f32.mxu0 %v17131_v46  ;;  %v4571_v46 = vld [vmem:[#allocation2 + $0x149] sm:$0xff] }
 0x45b   :  { %13099 = vmatmul.mubr.f32.gmra.mrb[46].mxu0 %v20783_v43  ;;  %v4603_v43 = vld [vmem:[#allocation2 + $0x389] sm:$0xff] }
 0x45c   :  { %13101 = vmatprep.mubr.f32.mxu0 %v20784_v62  ;;  %v4604_v62 = vld [vmem:[#allocation2 + $0x391] sm:$0xff] }
 0x45f   :  { %13102 = vmatmul.mubr.f32.gmra.mrb[48].mxu0 %v20785_v55  ;;  %v4605_v55 = vld [vmem:[#allocation2 + $0x3a9] sm:$0xff] }
 0x460   :  { %13104 = vmatprep.mubr.f32.mxu0 %v20786_v56  ;;  %v4606_v56 = vld [vmem:[#allocation2 + $0x3b1] sm:$0xff] }
 0x463   :  { %13105 = vmatmul.mubr.f32.gmra.mrb[50].mxu0 %v20787_v63  ;;  %v4607_v63 = vld [vmem:[#allocation2 + $0x3c9] sm:$0xff] }
 0x464   :  { %13107 = vmatprep.mubr.f32.mxu0 %v20788_v1  ;;  %v4608_v1 = vld [vmem:[#allocation2 + $0x3d1] sm:$0xff] }
 0x467   :  { %13108 = vmatmul.mubr.f32.gmra.mrb[52].mxu0 %v20789_v4  ;;  %v4609_v4 = vld [vmem:[#allocation2 + $0x3e9] sm:$0xff] }
 0x468   :  { %13110 = vmatprep.mubr.f32.mxu0 %v20790_v6  ;;  %v4610_v6 = vld [vmem:[#allocation2 + $0x3f1] sm:$0xff] }
 0x46b   :  { %13111 = vmatmul.mubr.f32.gmra.mrb[54].mxu0 %v20791_v22  ;;  %v4611_v22 = vld [vmem:[#allocation2 + $0x409] sm:$0xff] }
 0x46c   :  { %13113 = vmatprep.mubr.f32.mxu0 %v20792_v58  ;;  %v4612_v58 = vld [vmem:[#allocation2 + $0x411] sm:$0xff] }
 0x46f   :  { %13114 = vmatmul.mubr.f32.gmra.mrb[56].mxu0 %v20793_v5  ;;  %v4613_v5 = vld [vmem:[#allocation2 + $0x429] sm:$0xff] }
 0x470   :  { %13116 = vmatprep.mubr.f32.mxu0 %v20794_v8  ;;  %v4614_v8 = vld [vmem:[#allocation2 + $0x431] sm:$0xff] }
 0x473   :  { %13117 = vmatmul.mubr.f32.gmra.mrb[58].mxu0 %v20795_v12  ;;  %v4617_v12 = vld [vmem:[#allocation2 + $0x469] sm:$0xff] }
 0x474   :  { %13119 = vmatprep.mubr.f32.mxu0 %v4102_v45  ;;  %v20798_v45 = vld [vmem:[#allocation25_spill] sm:$0xff] }
 0x477   :  { %13120 = vmatmul.mubr.f32.gmra.mrb[60].mxu0 %v4103_v50  ;;  %v20799_v50 = vld [vmem:[#allocation26_spill] sm:$0xff] }
 0x478   :  { %13122 = vmatprep.mubr.f32.mxu0 %v17289_v38 }
 0x47b   :  { %13123 = vmatmul.mubr.f32.gmra.mrb[62].mxu0 %v17289_v38 }
 0x47c   :  { %13157 = vmatprep.mubr.f32.mxu0 %v4555_v49  ;;  %v4618_v49 = vld [vmem:[#allocation2 + $0x471] sm:$0xff] }
 0x47f   :  { %13158 = vmatmul.mubr.f32.vlgmr.msra.gmra.mrb[0].mxu0 %v4556_v13 }
 0x480   :  { %13160 = vmatprep.mubr.f32.mxu0 %v4557_v16 }
 0x483   :  { %13161 = vmatmul.mubr.f32.gmra.mrb[2].mxu0 %v4558_v17 }
 0x484   :  { %13163 = vmatprep.mubr.f32.mxu0 %v4559_v19 }
 0x487   :  { %13164 = vmatmul.mubr.f32.gmra.mrb[4].mxu0 %v4560_v20 }
 0x488   :  { %13166 = vmatprep.mubr.f32.mxu0 %v4561_v11 }
 0x48b   :  { %13167 = vmatmul.mubr.f32.gmra.mrb[6].mxu0 %v4562_v60 }
 0x48c   :  { %13169 = vmatprep.mubr.f32.mxu0 %v4563_v25 }
 0x48f   :  { %13170 = vmatmul.mubr.f32.gmra.mrb[8].mxu0 %v4564_v26 }
 0x490   :  { %13172 = vmatprep.mubr.f32.mxu0 %v4565_v29 }
 0x493   :  { %13173 = vmatmul.mubr.f32.gmra.mrb[10].mxu0 %v4566_v30 }
 0x494   :  { %13175 = vmatprep.mubr.f32.mxu0 %v4567_v33 }
 0x497   :  { %13176 = vmatmul.mubr.f32.gmra.mrb[12].mxu0 %v4568_v37 }
 0x498   :  { %13178 = vmatprep.mubr.f32.mxu0 %v4569_v39 }
 0x49b   :  { %13179 = vmatmul.mubr.f32.gmra.mrb[14].mxu0 %v4570_v40 }
 0x49c   :  { %13181 = vmatprep.mubr.f32.mxu0 %v4571_v46 }
 0x49f   :  { %13182 = vmatmul.mubr.f32.gmra.mrb[16].mxu0 %v4572_v52 }
 0x4a0   :  { %13184 = vmatprep.mubr.f32.mxu0 %v4573_v59 }
 0x4a3   :  { %13185 = vmatmul.mubr.f32.gmra.mrb[18].mxu0 %v4574_v48 }
 0x4a4   :  { %13187 = vmatprep.mubr.f32.mxu0 %v4575_v7 }
 0x4a7   :  { %13188 = vmatmul.mubr.f32.gmra.mrb[20].mxu0 %v4576_v57 }
 0x4a8   :  { %13190 = vmatprep.mubr.f32.mxu0 %v4577_v21 }
 0x4ab   :  { %13191 = vmatmul.mubr.f32.gmra.mrb[22].mxu0 %v4578_v18 }
 0x4ac   :  { %13193 = vmatprep.mubr.f32.mxu0 %v4579_v15 }
 0x4af   :  { %13194 = vmatmul.mubr.f32.gmra.mrb[24].mxu0 %v4580_v23 }
 0x4b0   :  { %13196 = vmatprep.mubr.f32.mxu0 %v4581_v42 }
 0x4b3   :  { %13197 = vmatmul.mubr.f32.gmra.mrb[26].mxu0 %v4582_v34 }
 0x4b4   :  { %13199 = vmatprep.mubr.f32.mxu0 %v20796_v3 }
 0x4b7   :  { %13200 = vmatmul.mubr.f32.gmra.mrb[28].mxu0 %v20797_v14 }
 0x4b8   :  { %13202 = vmatprep.mubr.f32.mxu0 %v4585_v24 }
 0x4bb   :  { %13203 = vmatmul.mubr.f32.gmra.mrb[30].mxu0 %v4586_v31 }
 0x4bc   :  { %13205 = vmatprep.mubr.f32.mxu0 %v4587_v0 }
 0x4bf   :  { %13206 = vmatmul.mubr.f32.gmra.mrb[32].mxu0 %v4588_v32 }
 0x4c0   :  { %13208 = vmatprep.mubr.f32.mxu0 %v4589_v10 }
 0x4c3   :  { %13209 = vmatmul.mubr.f32.gmra.mrb[34].mxu0 %v4590_v61 }
 0x4c4   :  { %13211 = vmatprep.mubr.f32.mxu0 %v4591_v27 }
 0x4c7   :  { %13212 = vmatmul.mubr.f32.gmra.mrb[36].mxu0 %v4592_v28 }
 0x4c8   :  { %13214 = vmatprep.mubr.f32.mxu0 %v4593_v47 }
 0x4cb   :  { %13215 = vmatmul.mubr.f32.gmra.mrb[38].mxu0 %v4594_v35 }
 0x4cc   :  { %13217 = vmatprep.mubr.f32.mxu0 %v4595_v36 }
 0x4cf   :  { %13218 = vmatmul.mubr.f32.gmra.mrb[40].mxu0 %v4596_v51 }
 0x4d0   :  { %13220 = vmatprep.mubr.f32.mxu0 %v4597_v41 }
 0x4d3   :  { %13221 = vmatmul.mubr.f32.gmra.mrb[42].mxu0 %v4598_v44 }
 0x4d4   :  { %13223 = vmatprep.mubr.f32.mxu0 %v4599_v2 }
 0x4d7   :  { %13224 = vmatmul.mubr.f32.gmra.mrb[44].mxu0 %v4600_v53 }
 0x4d8   :  { %13226 = vmatprep.mubr.f32.mxu0 %v4601_v54 }
 0x4db   :  { %13227 = vmatmul.mubr.f32.gmra.mrb[46].mxu0 %v4602_v9 }
 0x4dc   :  { %13229 = vmatprep.mubr.f32.mxu0 %v4603_v43 }
 0x4df   :  { %13230 = vmatmul.mubr.f32.gmra.mrb[48].mxu0 %v4604_v62 }
 0x4e0   :  { %13232 = vmatprep.mubr.f32.mxu0 %v4605_v55 }
 0x4e3   :  { %13233 = vmatmul.mubr.f32.gmra.mrb[50].mxu0 %v4606_v56 }
 0x4e4   :  { %13235 = vmatprep.mubr.f32.mxu0 %v4607_v63 }
 0x4e7   :  { %13236 = vmatmul.mubr.f32.gmra.mrb[52].mxu0 %v4608_v1 }
 0x4e8   :  { %13238 = vmatprep.mubr.f32.mxu0 %v4609_v4 }
 0x4eb   :  { %13239 = vmatmul.mubr.f32.gmra.mrb[54].mxu0 %v4610_v6 }
 0x4ec   :  { %13241 = vmatprep.mubr.f32.mxu0 %v4611_v22 }
 0x4ef   :  { %13242 = vmatmul.mubr.f32.gmra.mrb[56].mxu0 %v4612_v58 }
 0x4f0   :  { %13244 = vmatprep.mubr.f32.mxu0 %v4613_v5 }
 0x4f3   :  { %13245 = vmatmul.mubr.f32.gmra.mrb[58].mxu0 %v4614_v8 }
 0x4f4   :  { %13247 = vmatprep.mubr.f32.mxu0 %v20798_v45 }
 0x4f7   :  { %13248 = vmatmul.mubr.f32.gmra.mrb[60].mxu0 %v20799_v50 }
 0x4f8   :  { %13250 = vmatprep.mubr.f32.mxu0 %v4617_v12 }
 0x4fb   :  { %13251 = vmatmul.mubr.f32.gmra.mrb[62].mxu0 %v4618_v49 }
 0x552   :  { %v17327_v13 = vpop.f32.mrb[0].mxu0 }
 0x553   :  { %v5139_v16 = vmul.f32 %v17327_v13, %v17327_v13  ;;  %v17331_v17 = vpop.f32.mrb[1].mxu0 }
 0x554   :  { %v5068_v19 = vadd.f32 %v17327_v13, %v17331_v17  ;;  %v5138_v20 = vmul.f32 %v17331_v17, %v17331_v17 }
 0x556   :  { %v5202_v11 = vadd.f32 %v5139_v16, %v5138_v20  ;;  %v17337_v60 = vpop.f32.mrb[2].mxu0 }
 0x557   :  { %v17339_v25 = vpop.f32.mrb[3].mxu0  ;;  %v5141_v30 = vmul.f32 %v17337_v60, %v17337_v60 }
 0x558   :  { %v5069_v26 = vadd.f32 %v5068_v19, %v17339_v25  ;;  %v5140_v29 = vmul.f32 %v17339_v25, %v17339_v25 }
 0x55a   :  { %v5070_v33 = vadd.f32 %v17337_v60, %v5069_v26  ;;  %v5203_v37 = vadd.f32 %v5202_v11, %v5140_v29  ;;  %v17347_v39 = vpop.f32.mrb[4].mxu0 }
 0x55b   :  { %v17349_v40 = vpop.f32.mrb[5].mxu0  ;;  %v5143_v48 = vmul.f32 %v17347_v39, %v17347_v39 }
 0x55c   :  { %v5204_v46 = vadd.f32 %v5203_v37, %v5141_v30  ;;  %v5071_v52 = vadd.f32 %v5070_v33, %v17349_v40  ;;  %v5142_v59 = vmul.f32 %v17349_v40, %v17349_v40 }
 0x55e   :  { %v5205_v7 = vadd.f32 %v5204_v46, %v5142_v59  ;;  %v17356_v57 = vpop.f32.mrb[6].mxu0  ;;  %v5072_v21 = vadd.f32 %v17347_v39, %v5071_v52 }
 0x55f   :  { %v17359_v18 = vpop.f32.mrb[7].mxu0  ;;  %v5145_v34 = vmul.f32 %v17356_v57, %v17356_v57 }
 0x560   :  { %v5073_v15 = vadd.f32 %v5072_v21, %v17359_v18  ;;  %v5144_v23 = vmul.f32 %v17359_v18, %v17359_v18  ;;  %v5206_v42 = vadd.f32 %v5205_v7, %v5143_v48 }
 0x562   :  { %v5207_v3 = vadd.f32 %v5206_v42, %v5144_v23  ;;  %v17366_v24 = vpop.f32.mrb[8].mxu0  ;;  %v5074_v14 = vadd.f32 %v17356_v57, %v5073_v15 }
 0x563   :  { %v17369_v31 = vpop.f32.mrb[9].mxu0  ;;  %v5147_v61 = vmul.f32 %v17366_v24, %v17366_v24 }
 0x564   :  { %v5075_v0 = vadd.f32 %v5074_v14, %v17369_v31  ;;  %v5146_v32 = vmul.f32 %v17369_v31, %v17369_v31  ;;  %v5208_v10 = vadd.f32 %v5207_v3, %v5145_v34 }
 0x566   :  { %v5209_v27 = vadd.f32 %v5208_v10, %v5146_v32  ;;  %v17376_v28 = vpop.f32.mrb[10].mxu0  ;;  %v5076_v47 = vadd.f32 %v17366_v24, %v5075_v0 }
 0x567   :  { %v17379_v35 = vpop.f32.mrb[11].mxu0  ;;  %v5149_v44 = vmul.f32 %v17376_v28, %v17376_v28 }
 0x568   :  { %v5077_v36 = vadd.f32 %v5076_v47, %v17379_v35  ;;  %v5148_v51 = vmul.f32 %v17379_v35, %v17379_v35  ;;  %v5210_v41 = vadd.f32 %v5209_v27, %v5147_v61 }
 0x56a   :  { %v5211_v2 = vadd.f32 %v5210_v41, %v5148_v51  ;;  %v17386_v53 = vpop.f32.mrb[12].mxu0  ;;  %v5078_v54 = vadd.f32 %v17376_v28, %v5077_v36  ;;  %v228_v36 = vld [vmem:[#allocation8 + $0x80] sm:$0xff]  ;;  %v229_v51 = vld [vmem:[#allocation8 + $0x88] sm:$0xff] }
 0x56b   :  { %v17389_v9 = vpop.f32.mrb[13].mxu0  ;;  %v5151_v56 = vmul.f32 %v17386_v53, %v17386_v53 }
 0x56c   :  { %v5079_v43 = vadd.f32 %v5078_v54, %v17389_v9  ;;  %v5150_v62 = vmul.f32 %v17389_v9, %v17389_v9  ;;  %v5212_v55 = vadd.f32 %v5211_v2, %v5149_v44 }
 0x56e   :  { %v5213_v63 = vadd.f32 %v5212_v55, %v5150_v62  ;;  %v17396_v1 = vpop.f32.mrb[14].mxu0  ;;  %v5080_v4 = vadd.f32 %v17386_v53, %v5079_v43 }
 0x56f   :  { %v17399_v6 = vpop.f32.mrb[15].mxu0  ;;  %v5153_v8 = vmul.f32 %v17396_v1, %v17396_v1 }
 0x570   :  { %v5081_v22 = vadd.f32 %v5080_v4, %v17399_v6  ;;  %v5152_v58 = vmul.f32 %v17399_v6, %v17399_v6  ;;  %v5214_v5 = vadd.f32 %v5213_v63, %v5151_v56  ;;  %v14693_v63 = vpack.c.bf16 %v229_v51, %v228_v36  ;;  %v235_v36 = vld [vmem:[#allocation8 + $0xb8] sm:$0xff] }
 0x572   :  { %v5215_v45 = vadd.f32 %v5214_v5, %v5152_v58  ;;  %v17406_v12 = vpop.f32.mrb[16].mxu0  ;;  %v5082_v50 = vadd.f32 %v17396_v1, %v5081_v22  ;;  %14694 = vmatprep.subr.bf16.mxu1 %v14693_v63 }
 0x573   :  { %v17409_v49 = vpop.f32.mrb[17].mxu0  ;;  %v5155_v11 = vmul.f32 %v17406_v12, %v17406_v12  ;;  %14696 = vmatpush3.bf16.msra.mxu1 %v14693_v63 }
 0x574   :  { %v5083_v16 = vadd.f32 %v5082_v50, %v17409_v49  ;;  %v5154_v19 = vmul.f32 %v17409_v49, %v17409_v49  ;;  %v5216_v20 = vadd.f32 %v5215_v45, %v5153_v8  ;;  %v230_v45 = vld [vmem:[#allocation8 + $0x90] sm:$0xff]  ;;  %v231_v50 = vld [vmem:[#allocation8 + $0x98] sm:$0xff] }
 0x576   :  { %v5217_v26 = vadd.f32 %v5216_v20, %v5154_v19  ;;  %v17416_v29 = vpop.f32.mrb[18].mxu0  ;;  %v5084_v30 = vadd.f32 %v17406_v12, %v5083_v16 }
 0x577   :  { %v17419_v33 = vpop.f32.mrb[19].mxu0  ;;  %v5157_v59 = vmul.f32 %v17416_v29, %v17416_v29 }
 0x578   :  { %v5085_v37 = vadd.f32 %v5084_v30, %v17419_v33  ;;  %v5156_v46 = vmul.f32 %v17419_v33, %v17419_v33  ;;  %v5218_v52 = vadd.f32 %v5217_v26, %v5155_v11  ;;  %v14697_v11 = vpack.c.bf16 %v231_v50, %v230_v45 }
 0x57a   :  { %v5219_v48 = vadd.f32 %v5218_v52, %v5156_v46  ;;  %v17426_v7 = vpop.f32.mrb[20].mxu0  ;;  %v5086_v21 = vadd.f32 %v17416_v29, %v5085_v37  ;;  %14698 = vmatprep.subr.bf16.mxu1 %v14697_v11 }
 0x57b   :  { %v17429_v15 = vpop.f32.mrb[21].mxu0  ;;  %v5159_v3 = vmul.f32 %v17426_v7, %v17426_v7  ;;  %14700 = vmatpush3.bf16.msra.mxu1 %v14697_v11 }
 0x57c   :  { %v5087_v23 = vadd.f32 %v5086_v21, %v17429_v15  ;;  %v5158_v42 = vmul.f32 %v17429_v15, %v17429_v15  ;;  %v5220_v34 = vadd.f32 %v5219_v48, %v5157_v59  ;;  %v232_v59 = vld [vmem:[#allocation8 + $0xa0] sm:$0xff]  ;;  %v233_v48 = vld [vmem:[#allocation8 + $0xa8] sm:$0xff] }
 0x57e   :  { %v5221_v14 = vadd.f32 %v5220_v34, %v5158_v42  ;;  %v17436_v0 = vpop.f32.mrb[22].mxu0  ;;  %v5088_v32 = vadd.f32 %v17426_v7, %v5087_v23  ;;  %v14701_v34 = vpack.c.bf16 %v233_v48, %v232_v59  ;;  %v238_v59 = vld [vmem:[#allocation8 + $0xd0] sm:$0xff]  ;;  %v239_v48 = vld [vmem:[#allocation8 + $0xd8] sm:$0xff] }
 0x57f   :  { %v17439_v10 = vpop.f32.mrb[23].mxu0  ;;  %v5161_v41 = vmul.f32 %v17436_v0, %v17436_v0 }
 0x580   :  { %v5089_v61 = vadd.f32 %v5088_v32, %v17439_v10  ;;  %v5160_v27 = vmul.f32 %v17439_v10, %v17439_v10  ;;  %v5222_v47 = vadd.f32 %v5221_v14, %v5159_v3  ;;  %14702 = vmatprep.subr.bf16.mxu1 %v14701_v34 }
 0x581   :  { %14704 = vmatpush3.bf16.msra.mxu1 %v14701_v34  ;;  %v14713_v34 = vpack.c.bf16 %v239_v48, %v238_v59 }
 0x582   :  { %v5223_v44 = vadd.f32 %v5222_v47, %v5160_v27  ;;  %v17446_v2 = vpop.f32.mrb[24].mxu0  ;;  %v5090_v54 = vadd.f32 %v17436_v0, %v5089_v61  ;;  %v234_v47 = vld [vmem:[#allocation8 + $0xb0] sm:$0xff] }
 0x583   :  { %v17449_v43 = vpop.f32.mrb[25].mxu0  ;;  %v5163_v4 = vmul.f32 %v17446_v2, %v17446_v2 }
 0x584   :  { %v5091_v62 = vadd.f32 %v5090_v54, %v17449_v43  ;;  %v5162_v55 = vmul.f32 %v17449_v43, %v17449_v43  ;;  %v5224_v56 = vadd.f32 %v5223_v44, %v5161_v41  ;;  %v14705_v54 = vpack.c.bf16 %v235_v36, %v234_v47 }
 0x586   :  { %v5225_v22 = vadd.f32 %v5224_v56, %v5162_v55  ;;  %v17456_v58 = vpop.f32.mrb[26].mxu0  ;;  %v5092_v5 = vadd.f32 %v17446_v2, %v5091_v62  ;;  %14706 = vmatprep.subr.bf16.mxu1 %v14705_v54 }
 0x587   :  { %v17459_v8 = vpop.f32.mrb[27].mxu0  ;;  %v5165_v26 = vmul.f32 %v17456_v58, %v17456_v58  ;;  %14708 = vmatpush3.bf16.msra.mxu1 %v14705_v54 }
 0x588   :  { %v5093_v16 = vadd.f32 %v5092_v5, %v17459_v8  ;;  %v5164_v19 = vmul.f32 %v17459_v8, %v17459_v8  ;;  %v5226_v20 = vadd.f32 %v5225_v22, %v5163_v4  ;;  %v236_v22 = vld [vmem:[#allocation8 + $0xc0] sm:$0xff]  ;;  %v237_v5 = vld [vmem:[#allocation8 + $0xc8] sm:$0xff] }
 0x58a   :  { %v5227_v30 = vadd.f32 %v5226_v20, %v5164_v19  ;;  %v17466_v37 = vpop.f32.mrb[28].mxu0  ;;  %v5094_v46 = vadd.f32 %v17456_v58, %v5093_v16  ;;  %v14709_v19 = vpack.c.bf16 %v237_v5, %v236_v22 }
 0x58b   :  { %v17469_v52 = vpop.f32.mrb[29].mxu0  ;;  %v5167_v3 = vmul.f32 %v17466_v37, %v17466_v37 }
 0x58c   :  { %v5095_v21 = vadd.f32 %v5094_v46, %v17469_v52  ;;  %v5166_v23 = vmul.f32 %v17469_v52, %v17469_v52  ;;  %v5228_v42 = vadd.f32 %v5227_v30, %v5165_v26  ;;  %14710 = vmatprep.subr.bf16.mxu1 %v14709_v19 }
 0x58d   :  { %14712 = vmatpush3.bf16.msra.mxu1 %v14709_v19  ;;  %v243_v19 = vld [vmem:[#allocation8 + $0xf8] sm:$0xff] }
 0x58e   :  { %v5229_v14 = vadd.f32 %v5228_v42, %v5166_v23  ;;  %v17476_v32 = vpop.f32.mrb[30].mxu0  ;;  %v5096_v61 = vadd.f32 %v17466_v37, %v5095_v21  ;;  %14714 = vmatprep.subr.bf16.mxu1 %v14713_v34 }
 0x58f   :  { %v17479_v27 = vpop.f32.mrb[31].mxu0  ;;  %v5169_v62 = vmul.f32 %v17476_v32, %v17476_v32 }
 0x590   :  { %v5097_v51 = vadd.f32 %v5096_v61, %v17479_v27  ;;  %v5168_v41 = vmul.f32 %v17479_v27, %v17479_v27  ;;  %v5230_v44 = vadd.f32 %v5229_v14, %v5167_v3 }
 0x591   :  { %14716 = vmatpush3.bf16.msra.mxu1 %v14713_v34 }
 0x592   :  { %v5231_v55 = vadd.f32 %v5230_v44, %v5168_v41  ;;  %v17486_v56 = vpop.f32.mrb[32].mxu0  ;;  %v5098_v63 = vadd.f32 %v17476_v32, %v5097_v51  ;;  %v240_v51 = vld [vmem:[#allocation8 + $0xe0] sm:$0xff]  ;;  %v241_v41 = vld [vmem:[#allocation8 + $0xe8] sm:$0xff] }
 0x593   :  { %v17489_v4 = vpop.f32.mrb[33].mxu0  ;;  %v5171_v20 = vmul.f32 %v17486_v56, %v17486_v56 }
 0x594   :  { %v5099_v45 = vadd.f32 %v5098_v63, %v17489_v4  ;;  %v5170_v50 = vmul.f32 %v17489_v4, %v17489_v4  ;;  %v5232_v16 = vadd.f32 %v5231_v55, %v5169_v62  ;;  %v14717_v55 = vpack.c.bf16 %v241_v41, %v240_v51 }
 0x596   :  { %v5233_v11 = vadd.f32 %v5232_v16, %v5170_v50  ;;  %v17496_v26 = vpop.f32.mrb[34].mxu0  ;;  %v5100_v30 = vadd.f32 %v17486_v56, %v5099_v45  ;;  %14718 = vmatprep.subr.bf16.mxu1 %v14717_v55  ;;  %v242_v16 = vld [vmem:[#allocation8 + $0xf0] sm:$0xff] }
 0x597   :  { %v17499_v46 = vpop.f32.mrb[35].mxu0  ;;  %v5173_v3 = vmul.f32 %v17496_v26, %v17496_v26  ;;  %14720 = vmatpush3.bf16.msra.mxu1 %v14717_v55  ;;  %v14721_v59 = vpack.c.bf16 %v243_v19, %v242_v16  ;;  %v213_v16 = vld [vmem:[#allocation8 + $0x8] sm:$0xff]  ;;  %v214_v19 = vld [vmem:[#allocation8 + $0x10] sm:$0xff] }
 0x598   :  { %v5101_v21 = vadd.f32 %v5100_v30, %v17499_v46  ;;  %v5172_v23 = vmul.f32 %v17499_v46, %v17499_v46  ;;  %v5234_v42 = vadd.f32 %v5233_v11, %v5171_v20 }
 0x599   :  { %14722 = vmatprep.subr.bf16.mxu1 %v14721_v59 }
 0x59a   :  { %v5235_v14 = vadd.f32 %v5234_v42, %v5172_v23  ;;  %v17506_v61 = vpop.f32.mrb[36].mxu0  ;;  %v5102_v47 = vadd.f32 %v17496_v26, %v5101_v21 }
 0x59b   :  { %v17509_v36 = vpop.f32.mrb[37].mxu0  ;;  %v5175_v63 = vmul.f32 %v17506_v61, %v17506_v61  ;;  %14724 = vmatpush3.bf16.msra.mxu1 %v14721_v59 }
 0x59c   :  { %v5103_v44 = vadd.f32 %v5102_v47, %v17509_v36  ;;  %v5174_v54 = vmul.f32 %v17509_v36, %v17509_v36  ;;  %v5236_v62 = vadd.f32 %v5235_v14, %v5173_v3 }
 0x59e   :  { %v5237_v22 = vadd.f32 %v5236_v62, %v5174_v54  ;;  %v17516_v5 = vpop.f32.mrb[38].mxu0  ;;  %v5104_v45 = vadd.f32 %v17506_v61, %v5103_v44  ;;  %13286 = vmatmul.mubr.f32.vlgmr.msra.gmra.mrb[0].mxu1 %v17289_v38 }
 0x59f   :  { %v17519_v50 = vpop.f32.mrb[39].mxu0  ;;  %v5177_v48 = vmul.f32 %v17516_v5, %v17516_v5 }
 0x5a0   :  { %v5105_v20 = vadd.f32 %v5104_v45, %v17519_v50  ;;  %v5176_v11 = vmul.f32 %v17519_v50, %v17519_v50  ;;  %v5238_v30 = vadd.f32 %v5237_v22, %v5175_v63  ;;  %v212_v45 = vld [vmem:[#allocation8] sm:$0xff] }
 0x5a1   :  { %v14725_v38 = vpack.c.bf16 %v213_v16, %v212_v45 }
 0x5a2   :  { %v5239_v21 = vadd.f32 %v5238_v30, %v5176_v11  ;;  %v17526_v23 = vpop.f32.mrb[40].mxu0  ;;  %v5106_v42 = vadd.f32 %v17516_v5, %v5105_v20 }
 0x5a3   :  { %20800 = vst [vmem:[#allocation27_spill] sm:$0xff] %v17526_v23  ;;  %v17529_v34 = vpop.f32.mrb[41].mxu0  ;;  %v5179_v51 = vmul.f32 %v17526_v23, %v17526_v23  ;;  %14726 = vmatprep.subr.bf16.mxu1 %v14725_v38 }
 0x5a4   :  { %20801 = vst [vmem:[#allocation28_spill] sm:$0xff] %v17529_v34  ;;  %v5107_v3 = vadd.f32 %v5106_v42, %v17529_v34  ;;  %v5178_v14 = vmul.f32 %v17529_v34, %v17529_v34  ;;  %v5240_v47 = vadd.f32 %v5239_v21, %v5177_v48  ;;  %v215_v48 = vld [vmem:[#allocation8 + $0x18] sm:$0xff]  ;;  %14728 = vmatpush3.bf16.msra.mxu1 %v14725_v38 }
 0x5a5   :  { %v14729_v42 = vpack.c.bf16 %v215_v48, %v214_v19 }
 0x5a6   :  { %v5241_v41 = vadd.f32 %v5240_v47, %v5178_v14  ;;  %v17536_v44 = vpop.f32.mrb[42].mxu0  ;;  %v5108_v54 = vadd.f32 %v17526_v23, %v5107_v3 }
 0x5a7   :  { %20802 = vst [vmem:[#allocation29_spill] sm:$0xff] %v17536_v44  ;;  %v17540_v62 = vpop.f32.mrb[43].mxu0  ;;  %v5181_v20 = vmul.f32 %v17536_v44, %v17536_v44  ;;  %14730 = vmatprep.subr.bf16.mxu1 %v14729_v42 }
 0x5a8   :  { %20803 = vst [vmem:[#allocation30_spill] sm:$0xff] %v17540_v62  ;;  %v5109_v55 = vadd.f32 %v5108_v54, %v17540_v62  ;;  %v5180_v63 = vmul.f32 %v17540_v62, %v17540_v62  ;;  %v5242_v22 = vadd.f32 %v5241_v41, %v5179_v51  ;;  %14732 = vmatpush3.bf16.msra.mxu1 %v14729_v42 }
 0x5aa   :  { %v5243_v11 = vadd.f32 %v5242_v22, %v5180_v63  ;;  %v17547_v30 = vpop.f32.mrb[44].mxu0  ;;  %v5110_v59 = vadd.f32 %v17536_v44, %v5109_v55 }
 0x5ab   :  { %20804 = vst [vmem:[#allocation31_spill] sm:$0xff] %v17547_v30  ;;  %v17550_v21 = vpop.f32.mrb[45].mxu0  ;;  %v5183_v51 = vmul.f32 %v17547_v30, %v17547_v30 }
 0x5ac   :  { %20805 = vst [vmem:[#allocation32_spill] sm:$0xff] %v17550_v21  ;;  %v5111_v3 = vadd.f32 %v5110_v59, %v17550_v21  ;;  %v5182_v14 = vmul.f32 %v17550_v21, %v17550_v21  ;;  %v5244_v47 = vadd.f32 %v5243_v11, %v5181_v20  ;;  %v220_v21 = vld [vmem:[#allocation8 + $0x40] sm:$0xff] }
 0x5ae   :  { %v5245_v41 = vadd.f32 %v5244_v47, %v5182_v14  ;;  %v17557_v54 = vpop.f32.mrb[46].mxu0  ;;  %v5112_v55 = vadd.f32 %v17547_v30, %v5111_v3 }
 0x5af   :  { %20806 = vst [vmem:[#allocation33_spill] sm:$0xff] %v17557_v54  ;;  %v17560_v63 = vpop.f32.mrb[47].mxu0  ;;  %v5185_v19 = vmul.f32 %v17557_v54, %v17557_v54 }
 0x5b0   :  { %20807 = vst [vmem:[#allocation34_spill] sm:$0xff] %v17560_v63  ;;  %v5113_v22 = vadd.f32 %v5112_v55, %v17560_v63  ;;  %v5184_v45 = vmul.f32 %v17560_v63, %v17560_v63  ;;  %v5246_v16 = vadd.f32 %v5245_v41, %v5183_v51  ;;  %v216_v55 = vld [vmem:[#allocation8 + $0x20] sm:$0xff] }
 0x5b2   :  { %v5247_v20 = vadd.f32 %v5246_v16, %v5184_v45  ;;  %v17567_v11 = vpop.f32.mrb[48].mxu0  ;;  %v5114_v59 = vadd.f32 %v17557_v54, %v5113_v22  ;;  %v217_v45 = vld [vmem:[#allocation8 + $0x28] sm:$0xff] }
 0x5b3   :  { %20808 = vst [vmem:[#allocation35_spill] sm:$0xff] %v17567_v11  ;;  %v17570_v38 = vpop.f32.mrb[49].mxu0  ;;  %v5187_v47 = vmul.f32 %v17567_v11, %v17567_v11  ;;  %v14733_v22 = vpack.c.bf16 %v217_v45, %v216_v55 }
 0x5b4   :  { %20809 = vst [vmem:[#allocation36_spill] sm:$0xff] %v17570_v38  ;;  %v5115_v48 = vadd.f32 %v5114_v59, %v17570_v38  ;;  %v5186_v3 = vmul.f32 %v17570_v38, %v17570_v38  ;;  %v5248_v14 = vadd.f32 %v5247_v20, %v5185_v19 }
 0x5b5   :  { %14734 = vmatprep.subr.bf16.mxu1 %v14733_v22 }
 0x5b6   :  { %v5249_v42 = vadd.f32 %v5248_v14, %v5186_v3  ;;  %v17577_v51 = vpop.f32.mrb[50].mxu0  ;;  %v5116_v41 = vadd.f32 %v17567_v11, %v5115_v48  ;;  %14736 = vmatpush3.bf16.msra.mxu1 %v14733_v22 }
 0x5b7   :  { %20810 = vst [vmem:[#allocation37_spill] sm:$0xff] %v17577_v51  ;;  %v17580_v16 = vpop.f32.mrb[51].mxu0  ;;  %v5189_v19 = vmul.f32 %v17577_v51, %v17577_v51 }
 0x5b8   :  { %20811 = vst [vmem:[#allocation38_spill] sm:$0xff] %v17580_v16  ;;  %v5117_v54 = vadd.f32 %v5116_v41, %v17580_v16  ;;  %v5188_v59 = vmul.f32 %v17580_v16, %v17580_v16  ;;  %v5250_v38 = vadd.f32 %v5249_v42, %v5187_v47 }
 0x5ba   :  { %v5251_v20 = vadd.f32 %v5250_v38, %v5188_v59  ;;  %v17587_v3 = vpop.f32.mrb[52].mxu0  ;;  %v5118_v48 = vadd.f32 %v17577_v51, %v5117_v54  ;;  %v219_v51 = vld [vmem:[#allocation8 + $0x38] sm:$0xff] }
 0x5bb   :  { %20812 = vst [vmem:[#allocation39_spill] sm:$0xff] %v17587_v3  ;;  %v17590_v14 = vpop.f32.mrb[53].mxu0  ;;  %v5191_v47 = vmul.f32 %v17587_v3, %v17587_v3 }
 0x5bc   :  { %20813 = vst [vmem:[#allocation40_spill] sm:$0xff] %v17590_v14  ;;  %v5119_v55 = vadd.f32 %v5118_v48, %v17590_v14  ;;  %v5190_v41 = vmul.f32 %v17590_v14, %v17590_v14  ;;  %v5252_v45 = vadd.f32 %v5251_v20, %v5189_v19 }
 0x5be   :  { %v5253_v42 = vadd.f32 %v5252_v45, %v5190_v41  ;;  %v17597_v16 = vpop.f32.mrb[54].mxu0  ;;  %v5120_v38 = vadd.f32 %v17587_v3, %v5119_v55 }
 0x5bf   :  { %20814 = vst [vmem:[#allocation41_spill] sm:$0xff] %v17597_v16  ;;  %v17600_v59 = vpop.f32.mrb[55].mxu0  ;;  %v5193_v14 = vmul.f32 %v17597_v16, %v17597_v16 }
 0x5c0   :  { %20815 = vst [vmem:[#allocation42_spill] sm:$0xff] %v17600_v59  ;;  %v5121_v54 = vadd.f32 %v5120_v38, %v17600_v59  ;;  %v5192_v22 = vmul.f32 %v17600_v59, %v17600_v59  ;;  %v5254_v48 = vadd.f32 %v5253_v42, %v5191_v47 }
 0x5c2   :  { %v5255_v19 = vadd.f32 %v5254_v48, %v5192_v22  ;;  %v17607_v20 = vpop.f32.mrb[56].mxu0  ;;  %v5122_v41 = vadd.f32 %v17597_v16, %v5121_v54  ;;  %v218_v48 = vld [vmem:[#allocation8 + $0x30] sm:$0xff] }
 0x5c3   :  { %20816 = vst [vmem:[#allocation43_spill] sm:$0xff] %v17607_v20  ;;  %v17610_v45 = vpop.f32.mrb[57].mxu0  ;;  %v5195_v59 = vmul.f32 %v17607_v20, %v17607_v20  ;;  %v14737_v54 = vpack.c.bf16 %v219_v51, %v218_v48 }
 0x5c4   :  { %20817 = vst [vmem:[#allocation44_spill] sm:$0xff] %v17610_v45  ;;  %v5123_v55 = vadd.f32 %v5122_v41, %v17610_v45  ;;  %v5194_v3 = vmul.f32 %v17610_v45, %v17610_v45  ;;  %v5256_v38 = vadd.f32 %v5255_v19, %v5193_v14 }
 0x5c5   :  { %14738 = vmatprep.subr.bf16.mxu1 %v14737_v54 }
 0x5c6   :  { %v5257_v47 = vadd.f32 %v5256_v38, %v5194_v3  ;;  %v17617_v42 = vpop.f32.mrb[58].mxu0  ;;  %v5124_v22 = vadd.f32 %v17607_v20, %v5123_v55  ;;  %14740 = vmatpush3.bf16.msra.mxu1 %v14737_v54 }
 0x5c7   :  { %20818 = vst [vmem:[#allocation45_spill] sm:$0xff] %v17617_v42  ;;  %v17620_v11 = vpop.f32.mrb[59].mxu0  ;;  %v5197_v14 = vmul.f32 %v17617_v42, %v17617_v42 }
 0x5c8   :  { %20819 = vst [vmem:[#allocation46_spill] sm:$0xff] %v17620_v11  ;;  %v5125_v16 = vadd.f32 %v5124_v22, %v17620_v11  ;;  %v5196_v41 = vmul.f32 %v17620_v11, %v17620_v11  ;;  %v5258_v45 = vadd.f32 %v5257_v47, %v5195_v59 }
 0x5ca   :  { %v5259_v3 = vadd.f32 %v5258_v45, %v5196_v41  ;;  %v17627_v19 = vpop.f32.mrb[60].mxu0  ;;  %v5126_v55 = vadd.f32 %v17617_v42, %v5125_v16 }
 0x5cb   :  { %20820 = vst [vmem:[#allocation47_spill] sm:$0xff] %v17627_v19  ;;  %v17630_v38 = vpop.f32.mrb[61].mxu0  ;;  %v5199_v59 = vmul.f32 %v17627_v19, %v17627_v19 }
 0x5cc   :  { %20821 = vst [vmem:[#allocation48_spill] sm:$0xff] %v17630_v38  ;;  %v5127_v51 = vadd.f32 %v5126_v55, %v17630_v38  ;;  %v5198_v22 = vmul.f32 %v17630_v38, %v17630_v38  ;;  %v5260_v48 = vadd.f32 %v5259_v3, %v5197_v14 }
 0x5ce   :  { %v5261_v47 = vadd.f32 %v5260_v48, %v5198_v22  ;;  %v17637_v11 = vpop.f32.mrb[62].mxu0  ;;  %v5128_v45 = vadd.f32 %v17627_v19, %v5127_v51  ;;  %v221_v22 = vld [vmem:[#allocation8 + $0x48] sm:$0xff] }
 0x5cf   :  { %20822 = vst [vmem:[#allocation49_spill] sm:$0xff] %v17637_v11  ;;  %v4995_v41 = vpop.f32.mrb[63].mxu0  ;;  %v5201_v42 = vmul.f32 %v17637_v11, %v17637_v11  ;;  %v14741_v48 = vpack.c.bf16 %v221_v22, %v220_v21  ;;  %v5280_v21 = vlaneseq }
 0x5d0   :  { %v5129_v20 = vadd.f32 %v5128_v45, %v4995_v41  ;;  %v5200_v16 = vmul.f32 %v4995_v41, %v4995_v41  ;;  %v5262_v54 = vadd.f32 %v5261_v47, %v5199_v59 }
 0x5d1   :  { %14742 = vmatprep.subr.bf16.mxu1 %v14741_v48 }
 0x5d2   :  { %v5130_v55 = vadd.f32 %v17637_v11, %v5129_v20  ;;  %v5263_v63 = vadd.f32 %v5262_v54, %v5200_v16  ;;  %14744 = vmatpush3.bf16.msra.mxu1 %v14741_v48 }
 0x5d4   :  { %v5131_v38 = vrot.slane %v5130_v55, 4  ;;  %v5264_v14 = vadd.f32 %v5263_v63, %v5201_v42 }
 0x5d6   :  { %v5132_v3 = vadd.f32 %v5131_v38, %v5130_v55  ;;  %v5265_v30 = vrot.slane %v5264_v14, 4  ;;  %v222_v38 = vld [vmem:[#allocation8 + $0x50] sm:$0xff]  ;;  %v223_v55 = vld [vmem:[#allocation8 + $0x58] sm:$0xff] }
 0x5d7   :  { %v14745_v11 = vpack.c.bf16 %v223_v55, %v222_v38  ;;  %v20827_v38 = vld [vmem:[#allocation29_spill] sm:$0xff]  ;;  %v20828_v55 = vld [vmem:[#allocation32_spill] sm:$0xff] }
 0x5d8   :  { %v5133_v44 = vrot.slane %v5132_v3, 2  ;;  %v5266_v62 = vadd.f32 %v5265_v30, %v5264_v14  ;;  %v357_v14 = vld [vmem:[%s20329_s3] sm:$0x1] }
 0x5d9   :  { %14746 = vmatprep.subr.bf16.mxu1 %v14745_v11 }
 0x5da   :  { %v5134_v51 = vadd.f32 %v5133_v44, %v5132_v3  ;;  %v5267_v45 = vrot.slane %v5266_v62, 2  ;;  %14748 = vmatpush3.bf16.msra.mxu1 %v14745_v11  ;;  %v5281_v44 = vshrl.u32 %v5280_v21, 7  ;;  %v20829_v21 = vld [vmem:[#allocation31_spill] sm:$0xff] }
 0x5dc   :  { %v5135_v59 = vrot.slane %v5134_v51, 1  ;;  %v5268_v47 = vadd.f32 %v5267_v45, %v5266_v62  ;;  %v356_v62 = vld [vmem:[%s20328_s2] sm:$0x1]  ;;  %v17646_v30 = vsub.s32 0, %v5281_v44 }
 0x5de   :  { %v5136_v19 = vadd.f32 %v5135_v59, %v5134_v51  ;;  %v5269_v23 = vrot.slane %v5268_v47, 1  ;;  %20823 = vst [vmem:[#allocation50_spill] sm:$0xff] %v17646_v30 }
 0x5e0   :  { %v5137_v34 = vmul.f32 0.001953125, %v5136_v19  ;;  %v5270_v20 = vadd.f32 %v5269_v23, %v5268_v47 }
 0x5e2   :  { %v5271_v16 = vmul.f32 0.001953125, %v5270_v20  ;;  %v5272_v54 = vmul.f32 %v5137_v34, %v5137_v34 }
 0x5e4   :  { %v5273_v63 = vsub.f32 %v5271_v16, %v5272_v54  ;;  %v20824_v54 = vld [vmem:[#allocation28_spill] sm:$0xff] }
 0x5e6   :  { %v5274_v42 = vadd.f32 1e-05, %v5273_v63  ;;  %v20825_v63 = vld [vmem:[#allocation27_spill] sm:$0xff] }
 0x5e8   :  { %16012 = vrsqrt.f32 %v5274_v42  ;;  %v20826_v42 = vld [vmem:[#allocation30_spill] sm:$0xff] }
 0x5f2   :  { %v16013_v19 = vpop.eup %16012 }
 0x5f3   :  { %v5276_v23 = vmul.f32 %v16013_v19, %v356_v62  ;;  %v20830_v62 = vld [vmem:[#allocation34_spill] sm:$0xff] }
 0x5f5   :  { %v5277_v3 = vmul.f32 %v5276_v23, %v5137_v34  ;;  %v17652_v22 = vrot.slane %v5276_v23, %v17646_v30  ;;  %v20831_v23 = vld [vmem:[#allocation33_spill] sm:$0xff] }
 0x5f7   :  { %v5278_v48 = vsub.f32 %v357_v14, %v5277_v3  ;;  %v5347_v11 = vmul.f32 %v17652_v22, %v4995_v41  ;;  %v17657_v51 = vmul.f32 %v17652_v22, %v17331_v17  ;;  %v17661_v45 = vmul.f32 %v17327_v13, %v17652_v22  ;;  %v20832_v3 = vld [vmem:[#allocation36_spill] sm:$0xff] }
 0x5f8   :  { %v17665_v59 = vmul.f32 %v17652_v22, %v17339_v25  ;;  %v17669_v34 = vmul.f32 %v17337_v60, %v17652_v22  ;;  %v17673_v47 = vmul.f32 %v17652_v22, %v17349_v40  ;;  %v17677_v17 = vmul.f32 %v17347_v39, %v17652_v22 }
 0x5f9   :  { %v17680_v41 = vrot.slane %v5278_v48, %v17646_v30  ;;  %v17684_v13 = vmul.f32 %v17652_v22, %v17359_v18  ;;  %v17688_v25 = vmul.f32 %v17356_v57, %v17652_v22  ;;  %v17692_v60 = vmul.f32 %v17652_v22, %v17369_v31  ;;  %v20845_v30 = vld [vmem:[#allocation44_spill] sm:$0xff] }
 0x5fa   :  { %v17696_v40 = vmul.f32 %v17366_v24, %v17652_v22  ;;  %v17700_v39 = vmul.f32 %v17652_v22, %v17379_v35  ;;  %v17704_v18 = vmul.f32 %v17376_v28, %v17652_v22  ;;  %v17708_v57 = vmul.f32 %v17652_v22, %v17389_v9 }
 0x5fb   :  { %v5417_v20 = vadd.f32 %v17680_v41, %v5347_v11  ;;  %v17713_v31 = vmul.f32 %v17386_v53, %v17652_v22  ;;  %v17717_v24 = vmul.f32 %v17652_v22, %v17399_v6  ;;  %v17721_v35 = vmul.f32 %v17396_v1, %v17652_v22  ;;  %v20833_v11 = vld [vmem:[#allocation35_spill] sm:$0xff] }
 0x5fc   :  { %v17725_v28 = vmul.f32 %v17652_v22, %v17409_v49  ;;  %v17729_v9 = vmul.f32 %v17406_v12, %v17652_v22  ;;  %v17733_v53 = vmul.f32 %v17652_v22, %v17419_v33  ;;  %v17737_v6 = vmul.f32 %v17416_v29, %v17652_v22 }
 0x5fd   :  { %v5481_v16 = vmax.f32 %v5417_v20, 0.0  ;;  %v17741_v1 = vmul.f32 %v17652_v22, %v17429_v15  ;;  %v17745_v49 = vmul.f32 %v17426_v7, %v17652_v22  ;;  %v17749_v12 = vmul.f32 %v17652_v22, %v17439_v10 }
 0x5fe   :  { %v17753_v33 = vmul.f32 %v17436_v0, %v17652_v22  ;;  %v17757_v29 = vmul.f32 %v17652_v22, %v17449_v43  ;;  %v17761_v15 = vmul.f32 %v17446_v2, %v17652_v22  ;;  %v17765_v7 = vmul.f32 %v17652_v22, %v17459_v8 }
 0x5ff   :  { %v17769_v10 = vmul.f32 %v17456_v58, %v17652_v22  ;;  %v17773_v0 = vmul.f32 %v17652_v22, %v17469_v52  ;;  %v17777_v43 = vmul.f32 %v17466_v37, %v17652_v22  ;;  %v17781_v2 = vmul.f32 %v17652_v22, %v17479_v27  ;;  %5545 = vst [vmem:[#allocation2 + $0x448] sm:$0xff] %v5481_v16  ;;  %v20834_v16 = vld [vmem:[#allocation38_spill] sm:$0xff] }
 0x600   :  { %v17785_v8 = vmul.f32 %v17476_v32, %v17652_v22  ;;  %v17789_v58 = vmul.f32 %v17652_v22, %v17489_v4  ;;  %v17793_v52 = vmul.f32 %v17486_v56, %v17652_v22  ;;  %v17797_v37 = vmul.f32 %v17652_v22, %v17499_v46 }
 0x601   :  { %v17801_v27 = vmul.f32 %v17496_v26, %v17652_v22  ;;  %v17805_v32 = vmul.f32 %v17652_v22, %v17509_v36  ;;  %v17809_v4 = vmul.f32 %v17506_v61, %v17652_v22  ;;  %v17813_v56 = vmul.f32 %v17652_v22, %v17519_v50 }
 0x602   :  { %v17817_v46 = vmul.f32 %v17516_v5, %v17652_v22  ;;  %v17821_v26 = vmul.f32 %v17652_v22, %v20824_v54  ;;  %v17825_v36 = vmul.f32 %v20825_v63, %v17652_v22  ;;  %v17829_v61 = vmul.f32 %v17652_v22, %v20826_v42  ;;  %v20835_v63 = vld [vmem:[#allocation37_spill] sm:$0xff] }
 0x603   :  { %v17833_v50 = vmul.f32 %v20827_v38, %v17652_v22  ;;  %v17837_v5 = vmul.f32 %v17652_v22, %v20828_v55  ;;  %v17841_v44 = vmul.f32 %v20829_v21, %v17652_v22  ;;  %v17845_v19 = vmul.f32 %v17652_v22, %v20830_v62  ;;  %v20837_v38 = vld [vmem:[#allocation40_spill] sm:$0xff]  ;;  %v20839_v21 = vld [vmem:[#allocation39_spill] sm:$0xff] }
 0x604   :  { %v17849_v14 = vmul.f32 %v20831_v23, %v17652_v22  ;;  %v17853_v48 = vmul.f32 %v17652_v22, %v20832_v3  ;;  %v17857_v20 = vmul.f32 %v20833_v11, %v17652_v22  ;;  %v17861_v54 = vmul.f32 %v17652_v22, %v20834_v16  ;;  %v20841_v23 = vld [vmem:[#allocation42_spill] sm:$0xff]  ;;  %v20843_v11 = vld [vmem:[#allocation41_spill] sm:$0xff] }
 0x605   :  { %v17865_v42 = vmul.f32 %v20835_v63, %v17652_v22  ;;  %v17869_v55 = vmul.f32 %v17652_v22, %v20837_v38  ;;  %v17873_v62 = vmul.f32 %v20839_v21, %v17652_v22  ;;  %v17877_v3 = vmul.f32 %v17652_v22, %v20841_v23 }
 0x606   :  { %v17881_v16 = vmul.f32 %v20843_v11, %v17652_v22  ;;  %v17885_v63 = vmul.f32 %v17652_v22, %v20845_v30 }
 0x607   :  { %20836 = vst [vmem:[#allocation51_spill] sm:$0xff] %v17865_v42  ;;  %20838 = vst [vmem:[#allocation52_spill] sm:$0xff] %v17869_v55  ;;  %v20847_v42 = vld [vmem:[#allocation43_spill] sm:$0xff]  ;;  %v20848_v55 = vld [vmem:[#allocation46_spill] sm:$0xff] }
 0x608   :  { %20840 = vst [vmem:[#allocation53_spill] sm:$0xff] %v17873_v62  ;;  %20842 = vst [vmem:[#allocation54_spill] sm:$0xff] %v17877_v3  ;;  %v17889_v38 = vmul.f32 %v20847_v42, %v17652_v22  ;;  %v17893_v21 = vmul.f32 %v17652_v22, %v20848_v55  ;;  %v20849_v62 = vld [vmem:[#allocation45_spill] sm:$0xff]  ;;  %v20850_v3 = vld [vmem:[#allocation48_spill] sm:$0xff]  ;;  %v17913_v55 = vadd.f32 %v17680_v41, %v17657_v51 }
 0x609   :  { %20844 = vst [vmem:[#allocation55_spill] sm:$0xff] %v17881_v16  ;;  %20846 = vst [vmem:[#allocation56_spill] sm:$0xff] %v17885_v63  ;;  %v17897_v23 = vmul.f32 %v20849_v62, %v17652_v22  ;;  %v17901_v11 = vmul.f32 %v17652_v22, %v20850_v3  ;;  %v20851_v16 = vld [vmem:[#allocation47_spill] sm:$0xff]  ;;  %v20852_v63 = vld [vmem:[#allocation49_spill] sm:$0xff]  ;;  %v17917_v62 = vadd.f32 %v17680_v41, %v17661_v45 }
 0x60a   :  { %v17905_v30 = vmul.f32 %v20851_v16, %v17652_v22  ;;  %v17909_v42 = vmul.f32 %v20852_v63, %v17652_v22  ;;  %v17921_v3 = vadd.f32 %v17680_v41, %v17665_v59  ;;  %v17925_v16 = vadd.f32 %v17680_v41, %v17669_v34 }
 0x60b   :  { %v17929_v22 = vadd.f32 %v17680_v41, %v17673_v47  ;;  %v17933_v51 = vadd.f32 %v17680_v41, %v17677_v17  ;;  %v17937_v45 = vadd.f32 %v17680_v41, %v17684_v13  ;;  %v17941_v59 = vadd.f32 %v17680_v41, %v17688_v25 }
 0x60c   :  { %v17945_v34 = vadd.f32 %v17680_v41, %v17692_v60  ;;  %v17949_v47 = vadd.f32 %v17680_v41, %v17696_v40  ;;  %v17953_v17 = vadd.f32 %v17680_v41, %v17700_v39  ;;  %v17957_v13 = vadd.f32 %v17680_v41, %v17704_v18 }
 0x60d   :  { %v17961_v25 = vadd.f32 %v17680_v41, %v17708_v57  ;;  %v17965_v60 = vadd.f32 %v17680_v41, %v17713_v31  ;;  %v17969_v40 = vadd.f32 %v17680_v41, %v17717_v24  ;;  %v17973_v39 = vadd.f32 %v17680_v41, %v17721_v35 }
 0x60e   :  { %v17977_v18 = vadd.f32 %v17680_v41, %v17725_v28  ;;  %v17981_v57 = vadd.f32 %v17680_v41, %v17729_v9  ;;  %v17985_v31 = vadd.f32 %v17680_v41, %v17733_v53  ;;  %v17989_v24 = vadd.f32 %v17680_v41, %v17737_v6  ;;  %v20859_v63 = vld [vmem:[#allocation51_spill] sm:$0xff] }
 0x60f   :  { %v17993_v35 = vadd.f32 %v17680_v41, %v17741_v1  ;;  %v17997_v28 = vadd.f32 %v17680_v41, %v17745_v49  ;;  %v18001_v9 = vadd.f32 %v17680_v41, %v17749_v12  ;;  %v18005_v53 = vadd.f32 %v17680_v41, %v17753_v33 }
 0x610   :  { %v18009_v6 = vadd.f32 %v17680_v41, %v17757_v29  ;;  %v18013_v1 = vadd.f32 %v17680_v41, %v17761_v15  ;;  %v18017_v49 = vadd.f32 %v17680_v41, %v17765_v7  ;;  %v18021_v12 = vadd.f32 %v17680_v41, %v17769_v10 }
 0x611   :  { %v18025_v33 = vadd.f32 %v17680_v41, %v17773_v0  ;;  %v18029_v29 = vadd.f32 %v17680_v41, %v17777_v43  ;;  %v18033_v15 = vadd.f32 %v17680_v41, %v17781_v2  ;;  %v18037_v7 = vadd.f32 %v17680_v41, %v17785_v8 }
 0x612   :  { %v18041_v10 = vadd.f32 %v17680_v41, %v17789_v58  ;;  %v18045_v0 = vadd.f32 %v17680_v41, %v17793_v52  ;;  %v18049_v43 = vadd.f32 %v17680_v41, %v17797_v37  ;;  %v18053_v2 = vadd.f32 %v17680_v41, %v17801_v27 }
 0x613   :  { %v18057_v8 = vadd.f32 %v17680_v41, %v17805_v32  ;;  %v18061_v58 = vadd.f32 %v17680_v41, %v17809_v4  ;;  %v18065_v52 = vadd.f32 %v17680_v41, %v17813_v56  ;;  %v18069_v37 = vadd.f32 %v17680_v41, %v17817_v46 }
 0x614   :  { %v18073_v27 = vadd.f32 %v17680_v41, %v17821_v26  ;;  %v18077_v32 = vadd.f32 %v17680_v41, %v17825_v36  ;;  %v18081_v4 = vadd.f32 %v17680_v41, %v17829_v61  ;;  %v18085_v56 = vadd.f32 %v17680_v41, %v17833_v50 }
 0x615   :  { %v18089_v46 = vadd.f32 %v17680_v41, %v17837_v5  ;;  %v18093_v26 = vadd.f32 %v17680_v41, %v17841_v44  ;;  %v18097_v36 = vadd.f32 %v17680_v41, %v17845_v19  ;;  %v18101_v61 = vadd.f32 %v17680_v41, %v17849_v14 }
 0x616   :  { %v18105_v50 = vadd.f32 %v17680_v41, %v17853_v48  ;;  %v18109_v5 = vadd.f32 %v17680_v41, %v17857_v20  ;;  %v18113_v44 = vadd.f32 %v17680_v41, %v17861_v54  ;;  %v18117_v19 = vadd.f32 %v17680_v41, %v20859_v63 }
 0x617   :  { %20853 = vst [vmem:[#allocation57_spill] sm:$0xff] %v18093_v26  ;;  %20854 = vst [vmem:[#allocation58_spill] sm:$0xff] %v18097_v36  ;;  %v20860_v36 = vld [vmem:[#allocation52_spill] sm:$0xff] }
 0x618   :  { %20855 = vst [vmem:[#allocation59_spill] sm:$0xff] %v18101_v61  ;;  %20856 = vst [vmem:[#allocation60_spill] sm:$0xff] %v18105_v50  ;;  %v18121_v14 = vadd.f32 %v17680_v41, %v20860_v36  ;;  %v20861_v61 = vld [vmem:[#allocation53_spill] sm:$0xff]  ;;  %v20862_v50 = vld [vmem:[#allocation54_spill] sm:$0xff]  ;;  %v18141_v36 = vadd.f32 %v17680_v41, %v17889_v38  ;;  %v18161_v38 = vadd.f32 %v17680_v41, %v17909_v42  ;;  %v20469_v42 = vmax.f32 %v17953_v17, 0.0 }
 0x619   :  { %20857 = vst [vmem:[#allocation61_spill] sm:$0xff] %v18109_v5  ;;  %20858 = vst [vmem:[#allocation62_spill] sm:$0xff] %v18113_v44  ;;  %v18125_v48 = vadd.f32 %v17680_v41, %v20861_v61  ;;  %v18129_v20 = vadd.f32 %v17680_v41, %v20862_v50  ;;  %v20863_v5 = vld [vmem:[#allocation55_spill] sm:$0xff]  ;;  %v20864_v44 = vld [vmem:[#allocation56_spill] sm:$0xff]  ;;  %v18145_v61 = vadd.f32 %v17680_v41, %v17893_v21  ;;  %v5420_v21 = vmax.f32 %v17917_v62, 0.0 }
 0x61a   :  { %v18133_v54 = vadd.f32 %v17680_v41, %v20863_v5  ;;  %v18137_v63 = vadd.f32 %v17680_v41, %v20864_v44  ;;  %20865 = vst [vmem:[#allocation63_spill] sm:$0xff] %v18141_v36  ;;  %v18149_v50 = vadd.f32 %v17680_v41, %v17897_v23  ;;  %v18153_v5 = vadd.f32 %v17680_v41, %v17901_v11 }
 0x61b   :  { %20866 = vst [vmem:[#allocation64_spill] sm:$0xff] %v18145_v61  ;;  %v18157_v44 = vadd.f32 %v17680_v41, %v17905_v30  ;;  %v5419_v36 = vmax.f32 %v17913_v55, 0.0  ;;  %v5421_v61 = vmax.f32 %v17921_v3, 0.0  ;;  %v5422_v23 = vmax.f32 %v17925_v16, 0.0  ;;  %5484 = vst [vmem:[#allocation2 + $0x30] sm:$0xff] %v5420_v21 }
 0x61c   :  { %20867 = vst [vmem:[#allocation65_spill] sm:$0xff] %v18149_v50  ;;  %20868 = vst [vmem:[#allocation66_spill] sm:$0xff] %v18153_v5  ;;  %v5423_v50 = vmax.f32 %v17929_v22, 0.0  ;;  %v20472_v11 = vmax.f32 %v17933_v51, 0.0  ;;  %v20467_v5 = vmax.f32 %v17937_v45, 0.0  ;;  %v20466_v30 = vmax.f32 %v17941_v59, 0.0 }
 0x61d   :  { %20869 = vst [vmem:[#allocation67_spill] sm:$0xff] %v18157_v44  ;;  %v20465_v44 = vmax.f32 %v17945_v34, 0.0  ;;  %5483 = vst [vmem:[#allocation2 + $0x28] sm:$0xff] %v5419_v36  ;;  %13288 = vmatprep.mubr.f32.mxu1 %v5419_v36  ;;  %v20468_v41 = vmax.f32 %v17949_v47, 0.0  ;;  %v20470_v55 = vmax.f32 %v17957_v13, 0.0  ;;  %v20471_v62 = vmax.f32 %v17961_v25, 0.0 }
 0x61e   :  { %5485 = vst [vmem:[#allocation2 + $0x48] sm:$0xff] %v5421_v61  ;;  %5486 = vst [vmem:[#allocation2 + $0x50] sm:$0xff] %v5422_v23  ;;  %13289 = vmatmul.mubr.f32.gmra.mrb[2].mxu1 %v5420_v21  ;;  %v20473_v3 = vmax.f32 %v17965_v60, 0.0  ;;  %v20485_v21 = vmax.f32 %v17981_v57, 0.0  ;;  %v20476_v16 = vmax.f32 %v17985_v31, 0.0  ;;  %v20474_v22 = vmax.f32 %v17989_v24, 0.0 }
 0x61f   :  { %5487 = vst [vmem:[#allocation2 + $0x68] sm:$0xff] %v5423_v50  ;;  %5488 = vst [vmem:[#allocation2 + $0x70] sm:$0xff] %v20472_v11  ;;  %13291 = vmatprep.mubr.f32.mxu1 %v5421_v61  ;;  %v20475_v36 = vmax.f32 %v17993_v35, 0.0  ;;  %v20484_v61 = vmax.f32 %v17997_v28, 0.0  ;;  %v20480_v11 = vmax.f32 %v18017_v49, 0.0 }
 0x620   :  { %5489 = vst [vmem:[#allocation2 + $0x88] sm:$0xff] %v20467_v5  ;;  %5490 = vst [vmem:[#allocation2 + $0x90] sm:$0xff] %v20466_v30  ;;  %v20478_v30 = vmax.f32 %v18021_v12, 0.0  ;;  %v20479_v5 = vmax.f32 %v18025_v33, 0.0 }
 0x621   :  { %5491 = vst [vmem:[#allocation2 + $0xa8] sm:$0xff] %v20465_v44  ;;  %5492 = vst [vmem:[#allocation2 + $0xb0] sm:$0xff] %v20468_v41  ;;  %v20477_v44 = vmax.f32 %v18001_v9, 0.0  ;;  %v20870_v41 = vmax.f32 %v17969_v40, 0.0 }
 0x622   :  { %5493 = vst [vmem:[#allocation2 + $0xc8] sm:$0xff] %v20469_v42  ;;  %5494 = vst [vmem:[#allocation2 + $0xd0] sm:$0xff] %v20470_v55  ;;  %v20871_v42 = vmax.f32 %v17973_v39, 0.0  ;;  %v20872_v55 = vmax.f32 %v17977_v18, 0.0  ;;  %13292 = vmatmul.mubr.f32.gmra.mrb[4].mxu1 %v5422_v23  ;;  %v20486_v23 = vmax.f32 %v18045_v0, 0.0 }
 0x623   :  { %5495 = vst [vmem:[#allocation2 + $0xe8] sm:$0xff] %v20471_v62  ;;  %5496 = vst [vmem:[#allocation2 + $0xf0] sm:$0xff] %v20473_v3  ;;  %v20481_v62 = vmax.f32 %v18013_v1, 0.0  ;;  %v20482_v3 = vmax.f32 %v18041_v10, 0.0  ;;  %13294 = vmatprep.mubr.f32.mxu1 %v5423_v50  ;;  %v20490_v50 = vmax.f32 %v18061_v58, 0.0 }
 0x624   :  { %5497 = vst [vmem:[#allocation2 + $0x108] sm:$0xff] %v20870_v41  ;;  %5498 = vst [vmem:[#allocation2 + $0x110] sm:$0xff] %v20871_v42  ;;  %v20483_v41 = vmax.f32 %v18029_v29, 0.0  ;;  %v5449_v42 = vmax.f32 %v18033_v15, 0.0  ;;  %v20489_v15 = vmax.f32 %v18049_v43, 0.0 }
 0x625   :  { %5499 = vst [vmem:[#allocation2 + $0x128] sm:$0xff] %v20872_v55  ;;  %5500 = vst [vmem:[#allocation2 + $0x130] sm:$0xff] %v20485_v21  ;;  %v5450_v55 = vmax.f32 %v18037_v7, 0.0  ;;  %v20488_v7 = vmax.f32 %v18053_v2, 0.0 }
 0x626   :  { %5501 = vst [vmem:[#allocation2 + $0x148] sm:$0xff] %v20476_v16  ;;  %5502 = vst [vmem:[#allocation2 + $0x150] sm:$0xff] %v20474_v22  ;;  %v20873_v22 = vmax.f32 %v18005_v53, 0.0  ;;  %v20487_v16 = vmax.f32 %v18057_v8, 0.0 }
 0x627   :  { %5503 = vst [vmem:[#allocation2 + $0x168] sm:$0xff] %v20475_v36  ;;  %5504 = vst [vmem:[#allocation2 + $0x170] sm:$0xff] %v20484_v61  ;;  %v20874_v36 = vmax.f32 %v18009_v6, 0.0  ;;  %v20877_v61 = vld [vmem:[#allocation59_spill] sm:$0xff] }
 0x628   :  { %5505 = vst [vmem:[#allocation2 + $0x188] sm:$0xff] %v20477_v44  ;;  %5506 = vst [vmem:[#allocation2 + $0x190] sm:$0xff] %v20873_v22  ;;  %v20493_v22 = vmax.f32 %v18065_v52, 0.0  ;;  %v20491_v44 = vmax.f32 %v18073_v27, 0.0  ;;  %v20500_v21 = vmax.f32 %v20877_v61, 0.0 }
 0x629   :  { %5507 = vst [vmem:[#allocation2 + $0x1a8] sm:$0xff] %v20874_v36  ;;  %5508 = vst [vmem:[#allocation2 + $0x1b0] sm:$0xff] %v20481_v62  ;;  %v20492_v36 = vmax.f32 %v18069_v37, 0.0  ;;  %v20878_v62 = vld [vmem:[#allocation60_spill] sm:$0xff] }
 0x62a   :  { %5509 = vst [vmem:[#allocation2 + $0x1c8] sm:$0xff] %v20480_v11  ;;  %5510 = vst [vmem:[#allocation2 + $0x1d0] sm:$0xff] %v20478_v30  ;;  %v20496_v30 = vmax.f32 %v18077_v32, 0.0  ;;  %v20494_v11 = vmax.f32 %v18085_v56, 0.0 }
 0x62b   :  { %5511 = vst [vmem:[#allocation2 + $0x1e8] sm:$0xff] %v20479_v5  ;;  %5512 = vst [vmem:[#allocation2 + $0x1f0] sm:$0xff] %v20483_v41  ;;  %v20495_v5 = vmax.f32 %v18081_v4, 0.0 }
 0x62c   :  { %5513 = vst [vmem:[#allocation2 + $0x208] sm:$0xff] %v5449_v42  ;;  %5514 = vst [vmem:[#allocation2 + $0x210] sm:$0xff] %v5450_v55  ;;  %v20875_v42 = vmax.f32 %v17933_v51, 0.0  ;;  %v20498_v55 = vmax.f32 %v18093_v26, 0.0  ;;  %v20879_v51 = vmax.f32 %v17937_v45, 0.0  ;;  %v20882_v45 = vmax.f32 %v18089_v46, 0.0 }
 0x62d   :  { %5515 = vst [vmem:[#allocation2 + $0x268] sm:$0xff] %v20482_v3  ;;  %5516 = vst [vmem:[#allocation2 + $0x270] sm:$0xff] %v20486_v23  ;;  %v20876_v3 = vld [vmem:[#allocation58_spill] sm:$0xff]  ;;  %v5482_v23 = vmax.f32 %v18161_v38, 0.0  ;;  %v20894_v26 = vmax.f32 %v18125_v48, 0.0 }
 0x62e   :  { %5517 = vst [vmem:[#allocation2 + $0x288] sm:$0xff] %v20489_v15  ;;  %5518 = vst [vmem:[#allocation2 + $0x290] sm:$0xff] %v20488_v7  ;;  %13295 = vmatmul.mubr.f32.gmra.mrb[6].mxu1 %v20875_v42  ;;  %v20499_v41 = vmax.f32 %v20876_v3, 0.0  ;;  %v20880_v42 = vld [vmem:[#allocation61_spill] sm:$0xff]  ;;  %v20881_v7 = vld [vmem:[#allocation62_spill] sm:$0xff] }
 0x62f   :  { %5519 = vst [vmem:[#allocation2 + $0x2a8] sm:$0xff] %v20487_v16  ;;  %5520 = vst [vmem:[#allocation2 + $0x2b0] sm:$0xff] %v20490_v50  ;;  %13297 = vmatprep.mubr.f32.mxu1 %v20879_v51  ;;  %v224_v51 = vld [vmem:[#allocation8 + $0x60] sm:$0xff]  ;;  %v20887_v16 = vld [vmem:[#allocation66_spill] sm:$0xff] }
 0x630   :  { %5521 = vst [vmem:[#allocation2 + $0x2c8] sm:$0xff] %v20493_v22  ;;  %5522 = vst [vmem:[#allocation2 + $0x2d0] sm:$0xff] %v20492_v36  ;;  %v20885_v36 = vld [vmem:[#allocation64_spill] sm:$0xff]  ;;  %v20886_v15 = vld [vmem:[#allocation65_spill] sm:$0xff]  ;;  %v20892_v22 = vmax.f32 %v17941_v59, 0.0 }
 0x631   :  { %5523 = vst [vmem:[#allocation2 + $0x2e8] sm:$0xff] %v20491_v44  ;;  %5524 = vst [vmem:[#allocation2 + $0x2f0] sm:$0xff] %v20496_v30  ;;  %v225_v44 = vld [vmem:[#allocation8 + $0x68] sm:$0xff]  ;;  %v20884_v30 = vld [vmem:[#allocation63_spill] sm:$0xff]  ;;  %v20900_v38 = vmax.f32 %v20885_v36, 0.0 }
 0x632   :  { %5525 = vst [vmem:[#allocation2 + $0x308] sm:$0xff] %v20495_v5  ;;  %5526 = vst [vmem:[#allocation2 + $0x310] sm:$0xff] %v20494_v11  ;;  %v226_v11 = vld [vmem:[#allocation8 + $0x70] sm:$0xff]  ;;  %v227_v5 = vld [vmem:[#allocation8 + $0x78] sm:$0xff]  ;;  %13298 = vmatmul.mubr.f32.gmra.mrb[8].mxu1 %v20892_v22  ;;  %v14749_v59 = vpack.c.bf16 %v225_v44, %v224_v51  ;;  %v20899_v22 = vmax.f32 %v20884_v30, 0.0  ;;  %v20903_v51 = vmax.f32 %v17949_v47, 0.0 }
 0x633   :  { %5527 = vst [vmem:[#allocation2 + $0x328] sm:$0xff] %v20882_v45  ;;  %5528 = vst [vmem:[#allocation2 + $0x330] sm:$0xff] %v20498_v55  ;;  %v20883_v45 = vmax.f32 %v20878_v62, 0.0  ;;  %v20888_v55 = vmax.f32 %v20880_v42, 0.0  ;;  %v20893_v50 = vld [vmem:[#allocation67_spill] sm:$0xff]  ;;  %v245_v44 = vld [vmem:[#allocation8 + $0x108] sm:$0xff] }
 0x634   :  { %5529 = vst [vmem:[#allocation2 + $0x348] sm:$0xff] %v20499_v41  ;;  %5530 = vst [vmem:[#allocation2 + $0x350] sm:$0xff] %v20500_v21  ;;  %v20889_v41 = vmax.f32 %v20881_v7, 0.0  ;;  %v20890_v21 = vmax.f32 %v18117_v19, 0.0  ;;  %v5480_v62 = vmax.f32 %v20893_v50, 0.0  ;;  %14750 = vmatprep.subr.bf16.mxu1 %v14749_v59  ;;  %v20908_v47 = vmax.f32 %v17969_v40, 0.0 }
 0x635   :  { %5531 = vst [vmem:[#allocation2 + $0x368] sm:$0xff] %v20883_v45  ;;  %5532 = vst [vmem:[#allocation2 + $0x370] sm:$0xff] %v20888_v55  ;;  %v20891_v45 = vmax.f32 %v18121_v14, 0.0  ;;  %v20895_v55 = vmax.f32 %v18129_v20, 0.0  ;;  %14752 = vmatpush3.bf16.msra.mxu1 %v14749_v59  ;;  %v20913_v59 = vmax.f32 %v17989_v24, 0.0  ;;  %v20915_v40 = vmax.f32 %v17997_v28, 0.0 }
 0x636   :  { %5533 = vst [vmem:[#allocation2 + $0x388] sm:$0xff] %v20889_v41  ;;  %5534 = vst [vmem:[#allocation2 + $0x390] sm:$0xff] %v20890_v21  ;;  %v20896_v41 = vmax.f32 %v18133_v54, 0.0  ;;  %v20897_v21 = vmax.f32 %v18137_v63, 0.0  ;;  %v20920_v24 = vmax.f32 %v18017_v49, 0.0  ;;  %v20922_v28 = vmax.f32 %v18025_v33, 0.0 }
 0x637   :  { %5535 = vst [vmem:[#allocation2 + $0x3a8] sm:$0xff] %v20891_v45  ;;  %5536 = vst [vmem:[#allocation2 + $0x3b0] sm:$0xff] %v20894_v26  ;;  %v20898_v45 = vmax.f32 %v17945_v34, 0.0  ;;  %v20901_v26 = vmax.f32 %v20886_v15, 0.0  ;;  %v244_v34 = vld [vmem:[#allocation8 + $0x100] sm:$0xff]  ;;  %v20926_v49 = vmax.f32 %v18049_v43, 0.0 }
 0x638   :  { %5537 = vst [vmem:[#allocation2 + $0x3c8] sm:$0xff] %v20895_v55  ;;  %5538 = vst [vmem:[#allocation2 + $0x3d0] sm:$0xff] %v20896_v41  ;;  %v20902_v55 = vmax.f32 %v20887_v16, 0.0  ;;  %v14753_v41 = vpack.c.bf16 %v227_v5, %v226_v11  ;;  %v20906_v5 = vmax.f32 %v17961_v25, 0.0  ;;  %v20907_v11 = vmax.f32 %v17965_v60, 0.0 }
 0x639   :  { %5539 = vst [vmem:[#allocation2 + $0x3e8] sm:$0xff] %v20897_v21  ;;  %13300 = vmatprep.mubr.f32.mxu1 %v20898_v45  ;;  %5540 = vst [vmem:[#allocation2 + $0x3f0] sm:$0xff] %v20899_v22  ;;  %v20904_v21 = vmax.f32 %v17953_v17, 0.0  ;;  %v18348_v45 = vpack.c.bf16 %v245_v44, %v244_v34  ;;  %v20905_v22 = vmax.f32 %v17957_v13, 0.0  ;;  %v20909_v17 = vmax.f32 %v17973_v39, 0.0  ;;  %v246_v44 = vld [vmem:[#allocation8 + $0x110] sm:$0xff] }
 0x63a   :  { %5541 = vst [vmem:[#allocation2 + $0x408] sm:$0xff] %v20900_v38  ;;  %5542 = vst [vmem:[#allocation2 + $0x410] sm:$0xff] %v20901_v26  ;;  %13301 = vmatmul.mubr.f32.gmra.mrb[10].mxu1 %v20903_v51  ;;  %14754 = vmatprep.subr.bf16.mxu1 %v14753_v41  ;;  %v20911_v13 = vmax.f32 %v17981_v57, 0.0  ;;  %v20912_v25 = vmax.f32 %v17985_v31, 0.0  ;;  %v20914_v60 = vmax.f32 %v17993_v35, 0.0  ;;  %v20916_v39 = vmax.f32 %v18001_v9, 0.0 }
 0x63b   :  { %5543 = vst [vmem:[#allocation2 + $0x428] sm:$0xff] %v20902_v55  ;;  %5544 = vst [vmem:[#allocation2 + $0x430] sm:$0xff] %v5480_v62  ;;  %13303 = vmatprep.mubr.f32.mxu1 %v20904_v21  ;;  %14756 = vmatpush3.bf16.msra.mxu1 %v14753_v41  ;;  %v20918_v57 = vmax.f32 %v18009_v6, 0.0  ;;  %v20919_v31 = vmax.f32 %v18013_v1, 0.0  ;;  %v20921_v35 = vmax.f32 %v18021_v12, 0.0  ;;  %v20923_v9 = vmax.f32 %v18029_v29, 0.0 }
 0x63c   :  { %5546 = vst [vmem:[#allocation2 + $0x450] sm:$0xff] %v5482_v23  ;;  %14758 = vmatprep.subr.bf16.mxu1 %v18348_v45  ;;  %v20910_v23 = vmax.f32 %v17977_v18, 0.0  ;;  %v20917_v18 = vmax.f32 %v18005_v53, 0.0  ;;  %v16017_v53 = vld [vmem:[#allocation2 + $0x8] sm:$0xff]  ;;  %v20924_v6 = vmax.f32 %v18041_v10, 0.0  ;;  %v20925_v1 = vmax.f32 %v18045_v0, 0.0 }
 0x63d   :  { %v20927_v12 = vmax.f32 %v18053_v2, 0.0  ;;  %v20928_v33 = vmax.f32 %v18057_v8, 0.0  ;;  %v20929_v29 = vmax.f32 %v18061_v58, 0.0  ;;  %v20930_v38 = vmax.f32 %v18065_v52, 0.0  ;;  %v20937_v52 = vld [vmem:[#allocation57_spill] sm:$0xff]  ;;  %v247_v51 = vld [vmem:[#allocation8 + $0x118] sm:$0xff] }
 0x63e   :  { %13304 = vmatmul.mubr.f32.gmra.mrb[12].mxu1 %v20905_v22  ;;  %v20931_v10 = vmax.f32 %v18069_v37, 0.0  ;;  %v20932_v0 = vmax.f32 %v18073_v27, 0.0  ;;  %v20933_v43 = vmax.f32 %v18077_v32, 0.0  ;;  %v20934_v2 = vmax.f32 %v18081_v4, 0.0  ;;  %v20941_v32 = vld [vmem:[#allocation60_spill] sm:$0xff]  ;;  %v249_v21 = vld [vmem:[#allocation8 + $0x128] sm:$0xff] }
 0x63f   :  { %13306 = vmatprep.mubr.f32.mxu1 %v20906_v5  ;;  %v20935_v8 = vmax.f32 %v18085_v56, 0.0  ;;  %v20936_v58 = vmax.f32 %v18089_v46, 0.0  ;;  %v20938_v26 = vmax.f32 %v20937_v52, 0.0  ;;  %v20939_v37 = vmax.f32 %v20876_v3, 0.0  ;;  %v250_v22 = vld [vmem:[#allocation8 + $0x130] sm:$0xff]  ;;  %v251_v5 = vld [vmem:[#allocation8 + $0x138] sm:$0xff] }
 0x640   :  { %v20940_v27 = vmax.f32 %v20877_v61, 0.0  ;;  %v20942_v55 = vmax.f32 %v20941_v32, 0.0  ;;  %v20943_v4 = vmax.f32 %v20880_v42, 0.0  ;;  %v20944_v56 = vmax.f32 %v20881_v7, 0.0  ;;  %v18513_v52 = vld [vmem:[#allocation2 + $0x167] sm:$0xff] }
 0x641   :  { %v20945_v46 = vmax.f32 %v18117_v19, 0.0  ;;  %v20946_v41 = vmax.f32 %v18121_v14, 0.0  ;;  %v20947_v3 = vmax.f32 %v18125_v48, 0.0  ;;  %v20948_v61 = vmax.f32 %v18129_v20, 0.0  ;;  %v5547_v20 = vld [vmem:[#allocation2 + $0x7] sm:$0xff] }
 0x642   :  { %13307 = vmatmul.mubr.f32.gmra.mrb[14].mxu1 %v20907_v11  ;;  %v20949_v34 = vmax.f32 %v18133_v54, 0.0  ;;  %v20950_v42 = vmax.f32 %v18137_v63, 0.0  ;;  %v20951_v7 = vmax.f32 %v20884_v30, 0.0  ;;  %v20952_v19 = vmax.f32 %v20885_v36, 0.0  ;;  %v5548_v54 = vld [vmem:[#allocation2 + $0xf] sm:$0xff]  ;;  %v248_v30 = vld [vmem:[#allocation8 + $0x120] sm:$0xff] }
 0x643   :  { %13309 = vmatprep.mubr.f32.mxu1 %v20908_v47  ;;  %v20953_v14 = vmax.f32 %v20886_v15, 0.0  ;;  %v20954_v48 = vmax.f32 %v20887_v16, 0.0  ;;  %v14761_v63 = vpack.c.bf16 %v247_v51, %v246_v44  ;;  %v18449_v36 = vld [vmem:[#allocation2 + $0x27] sm:$0xff]  ;;  %v14765_v16 = vpack.c.bf16 %v249_v21, %v248_v30  ;;  %v18453_v15 = vld [vmem:[#allocation2 + $0x2f] sm:$0xff] }
 0x644   :  { %v14769_v50 = vpack.c.bf16 %v251_v5, %v250_v22  ;;  %v18459_v11 = vld [vmem:[#allocation2 + $0x4f] sm:$0xff]  ;;  %v252_v47 = vld [vmem:[#allocation8 + $0x140] sm:$0xff] }
 0x645   :  { %v18525_v32 = vld [vmem:[#allocation2 + $0x1a7] sm:$0xff]  ;;  %v18564_v44 = vld [vmem:[#allocation2 + $0x2cf] sm:$0xff] }
 0x646   :  { %13310 = vmatmul.mubr.f32.gmra.mrb[16].mxu1 %v20909_v17  ;;  %v253_v17 = vld [vmem:[#allocation8 + $0x148] sm:$0xff] }
 0x647   :  { %13312 = vmatprep.mubr.f32.mxu1 %v20910_v23  ;;  %v14773_v23 = vpack.c.bf16 %v253_v17, %v252_v47  ;;  %v18567_v51 = vld [vmem:[#allocation2 + $0x2e7] sm:$0xff]  ;;  %v18576_v30 = vld [vmem:[#allocation2 + $0x30f] sm:$0xff] }
 0x648   :  { %v18579_v21 = vld [vmem:[#allocation2 + $0x327] sm:$0xff]  ;;  %v18588_v5 = vld [vmem:[#allocation2 + $0x34f] sm:$0xff] }
 0x649   :  { %v18585_v22 = vld [vmem:[#allocation2 + $0x347] sm:$0xff]  ;;  %v18594_v47 = vld [vmem:[#allocation2 + $0x36f] sm:$0xff] }
 0x64a   :  { %13313 = vmatmul.mubr.f32.gmra.mrb[18].mxu1 %v20911_v13  ;;  %v18465_v13 = vld [vmem:[#allocation2 + $0x6f] sm:$0xff]  ;;  %v18597_v17 = vld [vmem:[#allocation2 + $0x387] sm:$0xff] }
 0x64b   :  { %13315 = vmatprep.mubr.f32.mxu1 %v20912_v25  ;;  %v254_v25 = vld [vmem:[#allocation8 + $0x150] sm:$0xff] }
 0x64e   :  { %13316 = vmatmul.mubr.f32.gmra.mrb[20].mxu1 %v20913_v59  ;;  %v255_v59 = vld [vmem:[#allocation8 + $0x158] sm:$0xff] }
 0x64f   :  { %13318 = vmatprep.mubr.f32.mxu1 %v20914_v60  ;;  %v18468_v60 = vld [vmem:[#allocation2 + $0x87] sm:$0xff] }
 0x652   :  { %13319 = vmatmul.mubr.f32.gmra.mrb[22].mxu1 %v20915_v40  ;;  %v14777_v40 = vpack.c.bf16 %v255_v59, %v254_v25  ;;  %v18603_v25 = vld [vmem:[#allocation2 + $0x3a7] sm:$0xff]  ;;  %v18606_v59 = vld [vmem:[#allocation2 + $0x3af] sm:$0xff] }
 0x653   :  { %13321 = vmatprep.mubr.f32.mxu1 %v20916_v39  ;;  %v18471_v39 = vld [vmem:[#allocation2 + $0x8f] sm:$0xff]  ;;  %20955 = vst [vmem:[#allocation68_spill] sm:$0xff] %v18603_v25  ;;  %20956 = vst [vmem:[#allocation69_spill] sm:$0xff] %v18606_v59 }
 0x656   :  { %13322 = vmatmul.mubr.f32.gmra.mrb[24].mxu1 %v20917_v18  ;;  %v256_v18 = vld [vmem:[#allocation8 + $0x160] sm:$0xff] }
 0x657   :  { %13324 = vmatprep.mubr.f32.mxu1 %v20918_v57  ;;  %v257_v57 = vld [vmem:[#allocation8 + $0x168] sm:$0xff] }
 0x65a   :  { %13325 = vmatmul.mubr.f32.gmra.mrb[26].mxu1 %v20919_v31  ;;  %v18474_v31 = vld [vmem:[#allocation2 + $0xa7] sm:$0xff] }
 0x65b   :  { %13327 = vmatprep.mubr.f32.mxu1 %v20920_v24  ;;  %v14781_v24 = vpack.c.bf16 %v257_v57, %v256_v18  ;;  %v18612_v18 = vld [vmem:[#allocation2 + $0x3cf] sm:$0xff]  ;;  %v18615_v57 = vld [vmem:[#allocation2 + $0x3e7] sm:$0xff] }
 0x65c   :  { %20958 = vst [vmem:[#allocation71_spill] sm:$0xff] %v18612_v18  ;;  %20959 = vst [vmem:[#allocation72_spill] sm:$0xff] %v18615_v57 }
 0x65e   :  { %13328 = vmatmul.mubr.f32.gmra.mrb[28].mxu1 %v20921_v35  ;;  %v18477_v35 = vld [vmem:[#allocation2 + $0xaf] sm:$0xff] }
 0x65f   :  { %13330 = vmatprep.mubr.f32.mxu1 %v20922_v28  ;;  %v258_v28 = vld [vmem:[#allocation8 + $0x170] sm:$0xff] }
 0x662   :  { %13331 = vmatmul.mubr.f32.gmra.mrb[30].mxu1 %v20923_v9  ;;  %v259_v9 = vld [vmem:[#allocation8 + $0x178] sm:$0xff] }
 0x663   :  { %13333 = vmatprep.mubr.f32.mxu1 %v16017_v53 }
 0x666   :  { %13334 = vmatmul.mubr.f32.gmra.mrb[32].mxu1 %v16017_v53  ;;  %v18480_v53 = vld [vmem:[#allocation2 + $0xc7] sm:$0xff] }
 0x667   :  { %13336 = vmatprep.mubr.f32.mxu1 %v20924_v6  ;;  %v14785_v6 = vpack.c.bf16 %v259_v9, %v258_v28  ;;  %v18621_v28 = vld [vmem:[#allocation2 + $0x407] sm:$0xff]  ;;  %v18624_v9 = vld [vmem:[#allocation2 + $0x40f] sm:$0xff] }
 0x668   :  { %20961 = vst [vmem:[#allocation74_spill] sm:$0xff] %v18621_v28  ;;  %20962 = vst [vmem:[#allocation75_spill] sm:$0xff] %v18624_v9 }
 0x66a   :  { %13337 = vmatmul.mubr.f32.gmra.mrb[34].mxu1 %v20925_v1  ;;  %v18483_v1 = vld [vmem:[#allocation2 + $0xcf] sm:$0xff] }
 0x66b   :  { %13339 = vmatprep.mubr.f32.mxu1 %v20926_v49  ;;  %v260_v49 = vld [vmem:[#allocation8 + $0x180] sm:$0xff] }
 0x66e   :  { %13340 = vmatmul.mubr.f32.gmra.mrb[36].mxu1 %v20927_v12  ;;  %v261_v12 = vld [vmem:[#allocation8 + $0x188] sm:$0xff] }
 0x66f   :  { %13342 = vmatprep.mubr.f32.mxu1 %v20928_v33  ;;  %v18486_v33 = vld [vmem:[#allocation2 + $0xe7] sm:$0xff] }
 0x672   :  { %13343 = vmatmul.mubr.f32.gmra.mrb[38].mxu1 %v20929_v29  ;;  %v18489_v29 = vpack.c.bf16 %v261_v12, %v260_v49  ;;  %v6445_v49 = vld [vmem:[#allocation2 + $0x9] sm:$0xff] }
 0x673   :  { %13345 = vmatprep.mubr.f32.mxu1 %v20930_v38  ;;  %v18491_v38 = vld [vmem:[#allocation2 + $0xef] sm:$0xff] }
 0x674   :  { %v18630_v12 = vld [vmem:[#allocation2 + $0x42f] sm:$0xff] }
 0x676   :  { %13346 = vmatmul.mubr.f32.gmra.mrb[40].mxu1 %v20931_v10  ;;  %v18494_v10 = vld [vmem:[#allocation2 + $0x107] sm:$0xff] }
 0x677   :  { %13348 = vmatprep.mubr.f32.mxu1 %v20932_v0  ;;  %v18498_v0 = vld [vmem:[#allocation2 + $0x10f] sm:$0xff] }
 0x67a   :  { %13349 = vmatmul.mubr.f32.gmra.mrb[42].mxu1 %v20933_v43  ;;  %v18501_v43 = vld [vmem:[#allocation2 + $0x127] sm:$0xff] }
 0x67b   :  { %13351 = vmatprep.mubr.f32.mxu1 %v20934_v2  ;;  %v18504_v2 = vld [vmem:[#allocation2 + $0x12f] sm:$0xff] }
 0x67e   :  { %13352 = vmatmul.mubr.f32.gmra.mrb[44].mxu1 %v20935_v8  ;;  %v18507_v8 = vld [vmem:[#allocation2 + $0x147] sm:$0xff] }
 0x67f   :  { %13354 = vmatprep.mubr.f32.mxu1 %v20936_v58  ;;  %v18510_v58 = vld [vmem:[#allocation2 + $0x14f] sm:$0xff] }
 0x682   :  { %13355 = vmatmul.mubr.f32.gmra.mrb[46].mxu1 %v20938_v26  ;;  %v18516_v26 = vld [vmem:[#allocation2 + $0x16f] sm:$0xff] }
 0x683   :  { %13357 = vmatprep.mubr.f32.mxu1 %v20939_v37  ;;  %v18519_v37 = vld [vmem:[#allocation2 + $0x187] sm:$0xff] }
 0x686   :  { %13358 = vmatmul.mubr.f32.gmra.mrb[48].mxu1 %v20940_v27  ;;  %v18522_v27 = vld [vmem:[#allocation2 + $0x18f] sm:$0xff] }
 0x687   :  { %13360 = vmatprep.mubr.f32.mxu1 %v20942_v55  ;;  %v18528_v55 = vld [vmem:[#allocation2 + $0x1af] sm:$0xff] }
 0x68a   :  { %13361 = vmatmul.mubr.f32.gmra.mrb[50].mxu1 %v20943_v4  ;;  %v18531_v4 = vld [vmem:[#allocation2 + $0x1c7] sm:$0xff] }
 0x68b   :  { %13363 = vmatprep.mubr.f32.mxu1 %v20944_v56  ;;  %v18534_v56 = vld [vmem:[#allocation2 + $0x1cf] sm:$0xff] }
 0x68e   :  { %13364 = vmatmul.mubr.f32.gmra.mrb[52].mxu1 %v20945_v46  ;;  %v18537_v46 = vld [vmem:[#allocation2 + $0x1e7] sm:$0xff] }
 0x68f   :  { %13366 = vmatprep.mubr.f32.mxu1 %v20946_v41  ;;  %v5579_v41 = vld [vmem:[#allocation2 + $0x247] sm:$0xff] }
 0x692   :  { %13367 = vmatmul.mubr.f32.gmra.mrb[54].mxu1 %v20947_v3  ;;  %v18540_v3 = vld [vmem:[#allocation2 + $0x1ef] sm:$0xff] }
 0x693   :  { %13369 = vmatprep.mubr.f32.mxu1 %v20948_v61  ;;  %v5580_v61 = vld [vmem:[#allocation2 + $0x24f] sm:$0xff] }
 0x696   :  { %13370 = vmatmul.mubr.f32.gmra.mrb[56].mxu1 %v20949_v34  ;;  %v18543_v34 = vld [vmem:[#allocation2 + $0x267] sm:$0xff] }
 0x697   :  { %13372 = vmatprep.mubr.f32.mxu1 %v20950_v42  ;;  %v18546_v42 = vld [vmem:[#allocation2 + $0x26f] sm:$0xff] }
 0x69a   :  { %13373 = vmatmul.mubr.f32.gmra.mrb[58].mxu1 %v20951_v7  ;;  %v18549_v7 = vld [vmem:[#allocation2 + $0x287] sm:$0xff] }
 0x69b   :  { %13375 = vmatprep.mubr.f32.mxu1 %v20952_v19  ;;  %v18552_v19 = vld [vmem:[#allocation2 + $0x28f] sm:$0xff] }
 0x69e   :  { %13376 = vmatmul.mubr.f32.gmra.mrb[60].mxu1 %v20953_v14  ;;  %v18555_v14 = vld [vmem:[#allocation2 + $0x2a7] sm:$0xff] }
 0x69f   :  { %13378 = vmatprep.mubr.f32.mxu1 %v20954_v48  ;;  %v18558_v48 = vld [vmem:[#allocation2 + $0x2af] sm:$0xff] }
 0x6a2   :  { %13379 = vmatmul.mubr.f32.gmra.mrb[62].mxu1 %v5480_v62  ;;  %v18456_v62 = vld [vmem:[#allocation2 + $0x47] sm:$0xff] }
 0x6a3   :  { %13413 = vmatprep.mubr.f32.mxu1 %v5547_v20  ;;  %v18561_v20 = vld [vmem:[#allocation2 + $0x2c7] sm:$0xff] }
 0x6a6   :  { %13414 = vmatmul.mubr.f32.vlgmr.msra.gmra.mrb[0].mxu1 %v5548_v54  ;;  %v18570_v54 = vld [vmem:[#allocation2 + $0x2ef] sm:$0xff] }
 0x6a7   :  { %13416 = vmatprep.mubr.f32.mxu1 %v18449_v36  ;;  %14760 = vmatpush3.bf16.msra.mxu1 %v18348_v45  ;;  %v18462_v45 = vld [vmem:[#allocation2 + $0x67] sm:$0xff] }
 0x6a8   :  { %14762 = vmatprep.subr.bf16.mxu1 %v14761_v63 }
 0x6aa   :  { %13417 = vmatmul.mubr.f32.gmra.mrb[2].mxu1 %v18453_v15 }
 0x6ab   :  { %13419 = vmatprep.mubr.f32.mxu1 %v18456_v62  ;;  %14764 = vmatpush3.bf16.msra.mxu1 %v14761_v63  ;;  %v18573_v63 = vld [vmem:[#allocation2 + $0x307] sm:$0xff] }
 0x6ac   :  { %14766 = vmatprep.subr.bf16.mxu1 %v14765_v16 }
 0x6ae   :  { %13420 = vmatmul.mubr.f32.gmra.mrb[4].mxu1 %v18459_v11 }
 0x6af   :  { %13422 = vmatprep.mubr.f32.mxu1 %v18462_v45  ;;  %14768 = vmatpush3.bf16.msra.mxu1 %v14765_v16  ;;  %v18582_v16 = vld [vmem:[#allocation2 + $0x32f] sm:$0xff] }
 0x6b0   :  { %14770 = vmatprep.subr.bf16.mxu1 %v14769_v50 }
 0x6b2   :  { %13423 = vmatmul.mubr.f32.gmra.mrb[6].mxu1 %v18465_v13 }
 0x6b3   :  { %13425 = vmatprep.mubr.f32.mxu1 %v18468_v60  ;;  %14772 = vmatpush3.bf16.msra.mxu1 %v14769_v50  ;;  %v18591_v50 = vld [vmem:[#allocation2 + $0x367] sm:$0xff] }
 0x6b4   :  { %14774 = vmatprep.subr.bf16.mxu1 %v14773_v23 }
 0x6b6   :  { %13426 = vmatmul.mubr.f32.gmra.mrb[8].mxu1 %v18471_v39 }
 0x6b7   :  { %13428 = vmatprep.mubr.f32.mxu1 %v18474_v31  ;;  %14776 = vmatpush3.bf16.msra.mxu1 %v14773_v23  ;;  %v18600_v23 = vld [vmem:[#allocation2 + $0x38f] sm:$0xff] }
 0x6b8   :  { %14778 = vmatprep.subr.bf16.mxu1 %v14777_v40 }
 0x6ba   :  { %13429 = vmatmul.mubr.f32.gmra.mrb[10].mxu1 %v18477_v35 }
 0x6bb   :  { %13431 = vmatprep.mubr.f32.mxu1 %v18480_v53  ;;  %14780 = vmatpush3.bf16.msra.mxu1 %v14777_v40  ;;  %v18609_v40 = vld [vmem:[#allocation2 + $0x3c7] sm:$0xff] }
 0x6bc   :  { %14782 = vmatprep.subr.bf16.mxu1 %v14781_v24  ;;  %20957 = vst [vmem:[#allocation70_spill] sm:$0xff] %v18609_v40 }
 0x6be   :  { %13432 = vmatmul.mubr.f32.gmra.mrb[12].mxu1 %v18483_v1 }
 0x6bf   :  { %13434 = vmatprep.mubr.f32.mxu1 %v18486_v33  ;;  %14784 = vmatpush3.bf16.msra.mxu1 %v14781_v24  ;;  %v18618_v24 = vld [vmem:[#allocation2 + $0x3ef] sm:$0xff] }
 0x6c0   :  { %14786 = vmatprep.subr.bf16.mxu1 %v14785_v6  ;;  %20960 = vst [vmem:[#allocation73_spill] sm:$0xff] %v18618_v24 }
 0x6c2   :  { %13435 = vmatmul.mubr.f32.gmra.mrb[14].mxu1 %v18491_v38 }
 0x6c3   :  { %13437 = vmatprep.mubr.f32.mxu1 %v18494_v10  ;;  %14788 = vmatpush3.bf16.msra.mxu1 %v14785_v6  ;;  %v18627_v6 = vld [vmem:[#allocation2 + $0x427] sm:$0xff] }
 0x6c4   :  { %14790 = vmatprep.subr.bf16.mxu1 %v18489_v29  ;;  %20963 = vst [vmem:[#allocation76_spill] sm:$0xff] %v18627_v6 }
 0x6c6   :  { %13438 = vmatmul.mubr.f32.gmra.mrb[16].mxu1 %v18498_v0 }
 0x6c7   :  { %13440 = vmatprep.mubr.f32.mxu1 %v18501_v43 }
 0x6ca   :  { %13441 = vmatmul.mubr.f32.gmra.mrb[18].mxu1 %v18504_v2 }
 0x6cb   :  { %13443 = vmatprep.mubr.f32.mxu1 %v18507_v8 }
 0x6ce   :  { %13444 = vmatmul.mubr.f32.gmra.mrb[20].mxu1 %v18510_v58 }
 0x6cf   :  { %13446 = vmatprep.mubr.f32.mxu1 %v18513_v52 }
 0x6d2   :  { %13447 = vmatmul.mubr.f32.gmra.mrb[22].mxu1 %v18516_v26 }
 0x6d3   :  { %13449 = vmatprep.mubr.f32.mxu1 %v18519_v37 }
 0x6d6   :  { %13450 = vmatmul.mubr.f32.gmra.mrb[24].mxu1 %v18522_v27 }
 0x6d7   :  { %13452 = vmatprep.mubr.f32.mxu1 %v18525_v32 }
 0x6da   :  { %13453 = vmatmul.mubr.f32.gmra.mrb[26].mxu1 %v18528_v55 }
 0x6db   :  { %13455 = vmatprep.mubr.f32.mxu1 %v18531_v4 }
 0x6de   :  { %13456 = vmatmul.mubr.f32.gmra.mrb[28].mxu1 %v18534_v56 }
 0x6df   :  { %13458 = vmatprep.mubr.f32.mxu1 %v18537_v46 }
 0x6e2   :  { %13459 = vmatmul.mubr.f32.gmra.mrb[30].mxu1 %v18540_v3 }
 0x6e3   :  { %13461 = vmatprep.mubr.f32.mxu1 %v5579_v41  ;;  %v262_v41 = vld [vmem:[#allocation8 + $0x190] sm:$0xff] }
 0x6e6   :  { %13462 = vmatmul.mubr.f32.gmra.mrb[32].mxu1 %v5580_v61  ;;  %v263_v61 = vld [vmem:[#allocation8 + $0x198] sm:$0xff] }
 0x6e7   :  { %13464 = vmatprep.mubr.f32.mxu1 %v18543_v34 }
 0x6ea   :  { %13465 = vmatmul.mubr.f32.gmra.mrb[34].mxu1 %v18546_v42 }
 0x6eb   :  { %13467 = vmatprep.mubr.f32.mxu1 %v18549_v7 }
 0x6ee   :  { %13468 = vmatmul.mubr.f32.gmra.mrb[36].mxu1 %v18552_v19 }
 0x6ef   :  { %13470 = vmatprep.mubr.f32.mxu1 %v18555_v14 }
 0x6f2   :  { %13471 = vmatmul.mubr.f32.gmra.mrb[38].mxu1 %v18558_v48 }
 0x6f3   :  { %13473 = vmatprep.mubr.f32.mxu1 %v18561_v20 }
 0x6f6   :  { %13474 = vmatmul.mubr.f32.gmra.mrb[40].mxu1 %v18564_v44 }
 0x6f7   :  { %13476 = vmatprep.mubr.f32.mxu1 %v18567_v51 }
 0x6fa   :  { %13477 = vmatmul.mubr.f32.gmra.mrb[42].mxu1 %v18570_v54 }
 0x6fb   :  { %13479 = vmatprep.mubr.f32.mxu1 %v18573_v63 }
 0x6fe   :  { %13480 = vmatmul.mubr.f32.gmra.mrb[44].mxu1 %v18576_v30 }
 0x6ff   :  { %13482 = vmatprep.mubr.f32.mxu1 %v18579_v21 }
 0x702   :  { %13483 = vmatmul.mubr.f32.gmra.mrb[46].mxu1 %v18582_v16 }
 0x703   :  { %13485 = vmatprep.mubr.f32.mxu1 %v18585_v22 }
 0x706   :  { %13486 = vmatmul.mubr.f32.gmra.mrb[48].mxu1 %v18588_v5 }
 0x707   :  { %13488 = vmatprep.mubr.f32.mxu1 %v18591_v50 }
 0x70a   :  { %13489 = vmatmul.mubr.f32.gmra.mrb[50].mxu1 %v18594_v47 }
 0x70b   :  { %13491 = vmatprep.mubr.f32.mxu1 %v18597_v17 }
 0x70e   :  { %13492 = vmatmul.mubr.f32.gmra.mrb[52].mxu1 %v18600_v23 }
 0x70f   :  { %13494 = vmatprep.mubr.f32.mxu1 %v18603_v25  ;;  %v267_v25 = vld [vmem:[#allocation8 + $0x1b8] sm:$0xff] }
 0x712   :  { %13495 = vmatmul.mubr.f32.gmra.mrb[54].mxu1 %v18606_v59  ;;  %v266_v59 = vld [vmem:[#allocation8 + $0x1b0] sm:$0xff] }
 0x713   :  { %13497 = vmatprep.mubr.f32.mxu1 %v18609_v40  ;;  %v18633_v40 = vld [vmem:[#allocation2 + $0x29] sm:$0xff] }
 0x714   :  { %20964 = vst [vmem:[#allocation77_spill] sm:$0xff] %v18633_v40 }
 0x716   :  { %13498 = vmatmul.mubr.f32.gmra.mrb[56].mxu1 %v18612_v18  ;;  %v264_v18 = vld [vmem:[#allocation8 + $0x1a0] sm:$0xff] }
 0x717   :  { %13500 = vmatprep.mubr.f32.mxu1 %v18615_v57  ;;  %v14793_v57 = vpack.c.bf16 %v263_v61, %v262_v41  ;;  %v18643_v41 = vld [vmem:[#allocation2 + $0x51] sm:$0xff]  ;;  %v268_v61 = vld [vmem:[#allocation8 + $0x1c0] sm:$0xff] }
 0x718   :  { %20967 = vst [vmem:[#allocation80_spill] sm:$0xff] %v18643_v41 }
 0x71a   :  { %13501 = vmatmul.mubr.f32.gmra.mrb[58].mxu1 %v18618_v24  ;;  %v6446_v24 = vld [vmem:[#allocation2 + $0x11] sm:$0xff] }
 0x71b   :  { %13503 = vmatprep.mubr.f32.mxu1 %v18621_v28  ;;  %v265_v28 = vld [vmem:[#allocation8 + $0x1a8] sm:$0xff] }
 0x71e   :  { %13504 = vmatmul.mubr.f32.gmra.mrb[60].mxu1 %v18624_v9  ;;  %v18637_v9 = vld [vmem:[#allocation2 + $0x31] sm:$0xff] }
 0x71f   :  { %13506 = vmatprep.mubr.f32.mxu1 %v18627_v6  ;;  %v14797_v6 = vpack.c.bf16 %v265_v28, %v264_v18  ;;  %20965 = vst [vmem:[#allocation78_spill] sm:$0xff] %v18637_v9  ;;  %v18649_v28 = vld [vmem:[#allocation2 + $0x71] sm:$0xff] }
 0x720   :  { %20969 = vst [vmem:[#allocation13_spill] sm:$0xff] %v18649_v28 }
 0x722   :  { %13507 = vmatmul.mubr.f32.gmra.mrb[62].mxu1 %v18630_v12 }
 0x723   :  { %13541 = vmatprep.mubr.f32.mxu1 %v6445_v49  ;;  %v18640_v49 = vld [vmem:[#allocation2 + $0x49] sm:$0xff] }
 0x724   :  { %20966 = vst [vmem:[#allocation79_spill] sm:$0xff] %v18640_v49 }
 0x726   :  { %13542 = vmatmul.mubr.f32.vlgmr.msra.gmra.mrb[0].mxu1 %v6446_v24  ;;  %v14801_v24 = vpack.c.bf16 %v267_v25, %v266_v59  ;;  %v18652_v25 = vld [vmem:[#allocation2 + $0x89] sm:$0xff] }
 0x727   :  { %13544 = vmatprep.mubr.f32.mxu1 %v18633_v40  ;;  %14792 = vmatpush3.bf16.msra.mxu1 %v18489_v29  ;;  %v269_v40 = vld [vmem:[#allocation8 + $0x1c8] sm:$0xff]  ;;  %20970 = vst [vmem:[#allocation14_spill] sm:$0xff] %v18652_v25 }
 0x728   :  { %14794 = vmatprep.subr.bf16.mxu1 %v14793_v57  ;;  %v18646_v29 = vld [vmem:[#allocation2 + $0x69] sm:$0xff]  ;;  %v14805_v18 = vpack.c.bf16 %v269_v40, %v268_v61  ;;  %v18661_v61 = vld [vmem:[#allocation2 + $0xb1] sm:$0xff] }
 0x729   :  { %20968 = vst [vmem:[#allocation81_spill] sm:$0xff] %v18646_v29  ;;  %v18658_v40 = vld [vmem:[#allocation2 + $0xa9] sm:$0xff] }
 0x72a   :  { %13545 = vmatmul.mubr.f32.gmra.mrb[2].mxu1 %v18637_v9  ;;  %v270_v9 = vld [vmem:[#allocation8 + $0x1d0] sm:$0xff]  ;;  %20972 = vst [vmem:[#allocation16_spill] sm:$0xff] %v18658_v40 }
 0x72b   :  { %13547 = vmatprep.mubr.f32.mxu1 %v18640_v49  ;;  %14796 = vmatpush3.bf16.msra.mxu1 %v14793_v57  ;;  %v271_v49 = vld [vmem:[#allocation8 + $0x1d8] sm:$0xff] }
 0x72c   :  { %14798 = vmatprep.subr.bf16.mxu1 %v14797_v6  ;;  %v14809_v59 = vpack.c.bf16 %v271_v49, %v270_v9  ;;  %v18655_v57 = vld [vmem:[#allocation2 + $0x91] sm:$0xff]  ;;  %v18664_v9 = vld [vmem:[#allocation2 + $0xc9] sm:$0xff] }
 0x72d   :  { %20971 = vst [vmem:[#allocation15_spill] sm:$0xff] %v18655_v57 }
 0x72e   :  { %13548 = vmatmul.mubr.f32.gmra.mrb[4].mxu1 %v18643_v41  ;;  %v272_v41 = vld [vmem:[#allocation8 + $0x1e0] sm:$0xff] }
 0x72f   :  { %13550 = vmatprep.mubr.f32.mxu1 %v18646_v29  ;;  %14800 = vmatpush3.bf16.msra.mxu1 %v14797_v6  ;;  %v273_v29 = vld [vmem:[#allocation8 + $0x1e8] sm:$0xff] }
 0x730   :  { %14802 = vmatprep.subr.bf16.mxu1 %v14801_v24  ;;  %v14813_v6 = vpack.c.bf16 %v273_v29, %v272_v41  ;;  %v18670_v41 = vld [vmem:[#allocation2 + $0xe9] sm:$0xff] }
 0x731   :  { %20973 = vst [vmem:[#allocation17_spill] sm:$0xff] %v18670_v41 }
 0x732   :  { %13551 = vmatmul.mubr.f32.gmra.mrb[6].mxu1 %v18649_v28  ;;  %v274_v28 = vld [vmem:[#allocation8 + $0x1f0] sm:$0xff] }
 0x733   :  { %13553 = vmatprep.mubr.f32.mxu1 %v18652_v25  ;;  %14804 = vmatpush3.bf16.msra.mxu1 %v14801_v24  ;;  %v275_v25 = vld [vmem:[#allocation8 + $0x1f8] sm:$0xff] }
 0x734   :  { %14806 = vmatprep.subr.bf16.mxu1 %v14805_v18  ;;  %v14817_v49 = vpack.c.bf16 %v275_v25, %v274_v28  ;;  %v18667_v24 = vld [vmem:[#allocation2 + $0xd1] sm:$0xff]  ;;  %v18685_v25 = vld [vmem:[#allocation2 + $0x129] sm:$0xff] }
 0x735   :  { %v18682_v28 = vld [vmem:[#allocation2 + $0x111] sm:$0xff]  ;;  %20977 = vst [vmem:[#allocation21_spill] sm:$0xff] %v18685_v25 }
 0x736   :  { %13554 = vmatmul.mubr.f32.gmra.mrb[8].mxu1 %v18655_v57  ;;  %v276_v57 = vld [vmem:[#allocation8 + $0x200] sm:$0xff]  ;;  %20976 = vst [vmem:[#allocation20_spill] sm:$0xff] %v18682_v28 }
 0x737   :  { %13556 = vmatprep.mubr.f32.mxu1 %v18658_v40  ;;  %14808 = vmatpush3.bf16.msra.mxu1 %v14805_v18  ;;  %v277_v40 = vld [vmem:[#allocation8 + $0x208] sm:$0xff]  ;;  %v18675_v18 = vld [vmem:[#allocation2 + $0xf1] sm:$0xff] }
 0x738   :  { %14810 = vmatprep.subr.bf16.mxu1 %v14809_v59  ;;  %v18673_v29 = vpack.c.bf16 %v277_v40, %v276_v57  ;;  %20974 = vst [vmem:[#allocation18_spill] sm:$0xff] %v18675_v18  ;;  %v18688_v57 = vld [vmem:[#allocation2 + $0x131] sm:$0xff]  ;;  %v18691_v40 = vld [vmem:[#allocation2 + $0x149] sm:$0xff] }
 0x739   :  { %20978 = vst [vmem:[#allocation22_spill] sm:$0xff] %v18688_v57  ;;  %20979 = vst [vmem:[#allocation82_spill] sm:$0xff] %v18691_v40 }
 0x73a   :  { %13557 = vmatmul.mubr.f32.gmra.mrb[10].mxu1 %v18661_v61 }
 0x73b   :  { %13559 = vmatprep.mubr.f32.mxu1 %v18664_v9  ;;  %14812 = vmatpush3.bf16.msra.mxu1 %v14809_v59  ;;  %v18678_v59 = vld [vmem:[#allocation2 + $0x109] sm:$0xff] }
 0x73c   :  { %14814 = vmatprep.subr.bf16.mxu1 %v14813_v6  ;;  %20975 = vst [vmem:[#allocation19_spill] sm:$0xff] %v18678_v59 }
 0x73e   :  { %13560 = vmatmul.mubr.f32.gmra.mrb[12].mxu1 %v18667_v24 }
 0x73f   :  { %13562 = vmatprep.mubr.f32.mxu1 %v18670_v41  ;;  %14816 = vmatpush3.bf16.msra.mxu1 %v14813_v6  ;;  %v18694_v6 = vld [vmem:[#allocation2 + $0x151] sm:$0xff]  ;;  %v281_v41 = vld [vmem:[#allocation8 + $0x228] sm:$0xff] }
 0x740   :  { %14818 = vmatprep.subr.bf16.mxu1 %v14817_v49  ;;  %20980 = vst [vmem:[#allocation83_spill] sm:$0xff] %v18694_v6 }
 0x742   :  { %13563 = vmatmul.mubr.f32.gmra.mrb[14].mxu1 %v18675_v18  ;;  %v280_v18 = vld [vmem:[#allocation8 + $0x220] sm:$0xff] }
 0x743   :  { %13565 = vmatprep.mubr.f32.mxu1 %v18678_v59  ;;  %14820 = vmatpush3.bf16.msra.mxu1 %v14817_v49  ;;  %v18697_v49 = vld [vmem:[#allocation2 + $0x169] sm:$0xff]  ;;  %v18724_v59 = vld [vmem:[#allocation2 + $0x1f1] sm:$0xff] }
 0x744   :  { %14822 = vmatprep.subr.bf16.mxu1 %v18673_v29  ;;  %20981 = vst [vmem:[#allocation84_spill] sm:$0xff] %v18697_v49  ;;  %20990 = vst [vmem:[#allocation32_spill] sm:$0xff] %v18724_v59 }
 0x746   :  { %13566 = vmatmul.mubr.f32.gmra.mrb[16].mxu1 %v18682_v28  ;;  %v18700_v28 = vld [vmem:[#allocation2 + $0x171] sm:$0xff] }
 0x747   :  { %13568 = vmatprep.mubr.f32.mxu1 %v18685_v25  ;;  %20982 = vst [vmem:[#allocation23_spill] sm:$0xff] %v18700_v28  ;;  %v18703_v25 = vld [vmem:[#allocation2 + $0x189] sm:$0xff] }
 0x748   :  { %20983 = vst [vmem:[#allocation24_spill] sm:$0xff] %v18703_v25 }
 0x74a   :  { %13569 = vmatmul.mubr.f32.gmra.mrb[18].mxu1 %v18688_v57  ;;  %v18706_v57 = vld [vmem:[#allocation2 + $0x191] sm:$0xff] }
 0x74b   :  { %13571 = vmatprep.mubr.f32.mxu1 %v18691_v40  ;;  %20984 = vst [vmem:[#allocation25_spill] sm:$0xff] %v18706_v57  ;;  %v18709_v40 = vld [vmem:[#allocation2 + $0x1a9] sm:$0xff] }
 0x74c   :  { %20985 = vst [vmem:[#allocation26_spill] sm:$0xff] %v18709_v40 }
 0x74e   :  { %13572 = vmatmul.mubr.f32.gmra.mrb[20].mxu1 %v18694_v6  ;;  %v18712_v6 = vld [vmem:[#allocation2 + $0x1b1] sm:$0xff] }
 0x74f   :  { %13574 = vmatprep.mubr.f32.mxu1 %v18697_v49  ;;  %20986 = vst [vmem:[#allocation28_spill] sm:$0xff] %v18712_v6  ;;  %v18715_v49 = vld [vmem:[#allocation2 + $0x1c9] sm:$0xff] }
 0x750   :  { %20987 = vst [vmem:[#allocation27_spill] sm:$0xff] %v18715_v49 }
 0x752   :  { %13575 = vmatmul.mubr.f32.gmra.mrb[22].mxu1 %v18700_v28  ;;  %v18718_v28 = vld [vmem:[#allocation2 + $0x1d1] sm:$0xff] }
 0x753   :  { %13577 = vmatprep.mubr.f32.mxu1 %v18703_v25  ;;  %20988 = vst [vmem:[#allocation30_spill] sm:$0xff] %v18718_v28  ;;  %v18721_v25 = vld [vmem:[#allocation2 + $0x1e9] sm:$0xff] }
 0x754   :  { %20989 = vst [vmem:[#allocation29_spill] sm:$0xff] %v18721_v25 }
 0x756   :  { %13578 = vmatmul.mubr.f32.gmra.mrb[24].mxu1 %v18706_v57  ;;  %v6477_v57 = vld [vmem:[#allocation2 + $0x249] sm:$0xff] }
 0x757   :  { %13580 = vmatprep.mubr.f32.mxu1 %v18709_v40  ;;  %v6478_v40 = vld [vmem:[#allocation2 + $0x251] sm:$0xff] }
 0x75a   :  { %13581 = vmatmul.mubr.f32.gmra.mrb[26].mxu1 %v18712_v6  ;;  %v18727_v6 = vld [vmem:[#allocation2 + $0x269] sm:$0xff] }
 0x75b   :  { %13583 = vmatprep.mubr.f32.mxu1 %v18715_v49  ;;  %20991 = vst [vmem:[#allocation31_spill] sm:$0xff] %v18727_v6  ;;  %v18730_v49 = vld [vmem:[#allocation2 + $0x271] sm:$0xff] }
 0x75c   :  { %20992 = vst [vmem:[#allocation34_spill] sm:$0xff] %v18730_v49 }
 0x75e   :  { %13584 = vmatmul.mubr.f32.gmra.mrb[28].mxu1 %v18718_v28  ;;  %v18733_v28 = vld [vmem:[#allocation2 + $0x289] sm:$0xff] }
 0x75f   :  { %13586 = vmatprep.mubr.f32.mxu1 %v18721_v25  ;;  %20993 = vst [vmem:[#allocation33_spill] sm:$0xff] %v18733_v28  ;;  %v18736_v25 = vld [vmem:[#allocation2 + $0x291] sm:$0xff] }
 0x760   :  { %20994 = vst [vmem:[#allocation36_spill] sm:$0xff] %v18736_v25 }
 0x762   :  { %13587 = vmatmul.mubr.f32.gmra.mrb[30].mxu1 %v18724_v59  ;;  %v18739_v59 = vld [vmem:[#allocation2 + $0x2a9] sm:$0xff] }
 0x763   :  { %13589 = vmatprep.mubr.f32.mxu1 %v6477_v57  ;;  %20995 = vst [vmem:[#allocation35_spill] sm:$0xff] %v18739_v59  ;;  %v18742_v57 = vld [vmem:[#allocation2 + $0x2b1] sm:$0xff] }
 0x764   :  { %20996 = vst [vmem:[#allocation38_spill] sm:$0xff] %v18742_v57 }
 0x766   :  { %13590 = vmatmul.mubr.f32.gmra.mrb[32].mxu1 %v6478_v40  ;;  %v18745_v40 = vld [vmem:[#allocation2 + $0x2c9] sm:$0xff] }
 0x767   :  { %13592 = vmatprep.mubr.f32.mxu1 %v18727_v6  ;;  %20997 = vst [vmem:[#allocation37_spill] sm:$0xff] %v18745_v40  ;;  %v278_v6 = vld [vmem:[#allocation8 + $0x210] sm:$0xff] }
 0x76a   :  { %13593 = vmatmul.mubr.f32.gmra.mrb[34].mxu1 %v18730_v49  ;;  %v18748_v49 = vld [vmem:[#allocation2 + $0x2d1] sm:$0xff] }
 0x76b   :  { %13595 = vmatprep.mubr.f32.mxu1 %v18733_v28  ;;  %20998 = vst [vmem:[#allocation40_spill] sm:$0xff] %v18748_v49  ;;  %v18751_v28 = vld [vmem:[#allocation2 + $0x2e9] sm:$0xff] }
 0x76c   :  { %20999 = vst [vmem:[#allocation39_spill] sm:$0xff] %v18751_v28 }
 0x76e   :  { %13596 = vmatmul.mubr.f32.gmra.mrb[36].mxu1 %v18736_v25  ;;  %v18754_v25 = vld [vmem:[#allocation2 + $0x2f1] sm:$0xff] }
 0x76f   :  { %13598 = vmatprep.mubr.f32.mxu1 %v18739_v59  ;;  %21000 = vst [vmem:[#allocation42_spill] sm:$0xff] %v18754_v25  ;;  %v18757_v59 = vld [vmem:[#allocation2 + $0x309] sm:$0xff] }
 0x770   :  { %21001 = vst [vmem:[#allocation41_spill] sm:$0xff] %v18757_v59 }
 0x772   :  { %13599 = vmatmul.mubr.f32.gmra.mrb[38].mxu1 %v18742_v57  ;;  %v18760_v57 = vld [vmem:[#allocation2 + $0x311] sm:$0xff] }
 0x773   :  { %13601 = vmatprep.mubr.f32.mxu1 %v18745_v40  ;;  %21002 = vst [vmem:[#allocation44_spill] sm:$0xff] %v18760_v57  ;;  %v18763_v40 = vld [vmem:[#allocation2 + $0x329] sm:$0xff] }
 0x774   :  { %21003 = vst [vmem:[#allocation43_spill] sm:$0xff] %v18763_v40 }
 0x776   :  { %13602 = vmatmul.mubr.f32.gmra.mrb[40].mxu1 %v18748_v49  ;;  %v18766_v49 = vld [vmem:[#allocation2 + $0x331] sm:$0xff] }
 0x777   :  { %13604 = vmatprep.mubr.f32.mxu1 %v18751_v28  ;;  %21004 = vst [vmem:[#allocation46_spill] sm:$0xff] %v18766_v49  ;;  %v18769_v28 = vld [vmem:[#allocation2 + $0x349] sm:$0xff] }
 0x778   :  { %21005 = vst [vmem:[#allocation45_spill] sm:$0xff] %v18769_v28 }
 0x77a   :  { %13605 = vmatmul.mubr.f32.gmra.mrb[42].mxu1 %v18754_v25  ;;  %v18772_v25 = vld [vmem:[#allocation2 + $0x351] sm:$0xff] }
 0x77b   :  { %13607 = vmatprep.mubr.f32.mxu1 %v18757_v59  ;;  %21006 = vst [vmem:[#allocation48_spill] sm:$0xff] %v18772_v25  ;;  %v18775_v59 = vld [vmem:[#allocation2 + $0x369] sm:$0xff] }
 0x77c   :  { %21007 = vst [vmem:[#allocation47_spill] sm:$0xff] %v18775_v59 }
 0x77e   :  { %13608 = vmatmul.mubr.f32.gmra.mrb[44].mxu1 %v18760_v57  ;;  %v18778_v57 = vld [vmem:[#allocation2 + $0x371] sm:$0xff] }
 0x77f   :  { %13610 = vmatprep.mubr.f32.mxu1 %v18763_v40  ;;  %21008 = vst [vmem:[#allocation49_spill] sm:$0xff] %v18778_v57  ;;  %v18781_v40 = vld [vmem:[#allocation2 + $0x389] sm:$0xff] }
 0x780   :  { %21009 = vst [vmem:[#allocation51_spill] sm:$0xff] %v18781_v40 }
 0x782   :  { %13611 = vmatmul.mubr.f32.gmra.mrb[46].mxu1 %v18766_v49  ;;  %v18784_v49 = vld [vmem:[#allocation2 + $0x391] sm:$0xff] }
 0x783   :  { %13613 = vmatprep.mubr.f32.mxu1 %v18769_v28  ;;  %21010 = vst [vmem:[#allocation52_spill] sm:$0xff] %v18784_v49  ;;  %v18787_v28 = vld [vmem:[#allocation2 + $0x3a9] sm:$0xff] }
 0x784   :  { %21011 = vst [vmem:[#allocation53_spill] sm:$0xff] %v18787_v28 }
 0x786   :  { %13614 = vmatmul.mubr.f32.gmra.mrb[48].mxu1 %v18772_v25  ;;  %v18790_v25 = vld [vmem:[#allocation2 + $0x3b1] sm:$0xff] }
 0x787   :  { %13616 = vmatprep.mubr.f32.mxu1 %v18775_v59  ;;  %21012 = vst [vmem:[#allocation54_spill] sm:$0xff] %v18790_v25  ;;  %v18793_v59 = vld [vmem:[#allocation2 + $0x3c9] sm:$0xff] }
 0x788   :  { %21013 = vst [vmem:[#allocation55_spill] sm:$0xff] %v18793_v59 }
 0x78a   :  { %13617 = vmatmul.mubr.f32.gmra.mrb[50].mxu1 %v18778_v57  ;;  %v18796_v57 = vld [vmem:[#allocation2 + $0x3d1] sm:$0xff] }
 0x78b   :  { %13619 = vmatprep.mubr.f32.mxu1 %v18781_v40  ;;  %21014 = vst [vmem:[#allocation56_spill] sm:$0xff] %v18796_v57  ;;  %v18799_v40 = vld [vmem:[#allocation2 + $0x3e9] sm:$0xff] }
 0x78c   :  { %21015 = vst [vmem:[#allocation58_spill] sm:$0xff] %v18799_v40 }
 0x78e   :  { %13620 = vmatmul.mubr.f32.gmra.mrb[52].mxu1 %v18784_v49  ;;  %v18802_v49 = vld [vmem:[#allocation2 + $0x3f1] sm:$0xff] }
 0x78f   :  { %13622 = vmatprep.mubr.f32.mxu1 %v18787_v28  ;;  %21016 = vst [vmem:[#allocation59_spill] sm:$0xff] %v18802_v49  ;;  %v18805_v28 = vld [vmem:[#allocation2 + $0x409] sm:$0xff] }
 0x790   :  { %21017 = vst [vmem:[#allocation61_spill] sm:$0xff] %v18805_v28 }
 0x792   :  { %13623 = vmatmul.mubr.f32.gmra.mrb[54].mxu1 %v18790_v25  ;;  %v18808_v25 = vld [vmem:[#allocation2 + $0x411] sm:$0xff] }
 0x793   :  { %13625 = vmatprep.mubr.f32.mxu1 %v18793_v59  ;;  %21018 = vst [vmem:[#allocation62_spill] sm:$0xff] %v18808_v25  ;;  %v18811_v59 = vld [vmem:[#allocation2 + $0x429] sm:$0xff] }
 0x794   :  { %21019 = vst [vmem:[#allocation63_spill] sm:$0xff] %v18811_v59 }
 0x796   :  { %13626 = vmatmul.mubr.f32.gmra.mrb[56].mxu1 %v18796_v57  ;;  %v18814_v57 = vld [vmem:[#allocation2 + $0x431] sm:$0xff] }
 0x797   :  { %13628 = vmatprep.mubr.f32.mxu1 %v18799_v40  ;;  %v279_v40 = vld [vmem:[#allocation8 + $0x218] sm:$0xff] }
 0x79a   :  { %13629 = vmatmul.mubr.f32.gmra.mrb[58].mxu1 %v18802_v49  ;;  %v14825_v49 = vpack.c.bf16 %v279_v40, %v278_v6  ;;  %v284_v6 = vld [vmem:[#allocation8 + $0x240] sm:$0xff]  ;;  %v285_v40 = vld [vmem:[#allocation8 + $0x248] sm:$0xff] }
 0x79b   :  { %13631 = vmatprep.mubr.f32.mxu1 %v18805_v28  ;;  %v283_v28 = vld [vmem:[#allocation8 + $0x238] sm:$0xff] }
 0x79e   :  { %13632 = vmatmul.mubr.f32.gmra.mrb[60].mxu1 %v18808_v25  ;;  %v14829_v25 = vpack.c.bf16 %v281_v41, %v280_v18  ;;  %v287_v41 = vld [vmem:[#allocation8 + $0x258] sm:$0xff] }
 0x79f   :  { %13634 = vmatprep.mubr.f32.mxu1 %v18811_v59  ;;  %v282_v59 = vld [vmem:[#allocation8 + $0x230] sm:$0xff]  ;;  %v291_v18 = vld [vmem:[#allocation8 + $0x278] sm:$0xff] }
 0x7a2   :  { %13635 = vmatmul.mubr.f32.gmra.mrb[62].mxu1 %v18814_v57 }
 0x7a3   :  { %13669 = vmatprep.mubr.f32.mxu1 %v18449_v36  ;;  %v14833_v36 = vpack.c.bf16 %v283_v28, %v282_v59  ;;  %v293_v59 = vld [vmem:[#allocation8 + $0x288] sm:$0xff] }
 0x7a6   :  { %13670 = vmatmul.mubr.f32.vlgmr.msra.gmra.mrb[0].mxu1 %v18453_v15  ;;  %v14837_v15 = vpack.c.bf16 %v285_v40, %v284_v6  ;;  %v18924_v6 = vld [vmem:[#allocation2 + $0xe8] sm:$0xff] }
 0x7a7   :  { %13672 = vmatprep.mubr.f32.mxu1 %v18456_v62  ;;  %14824 = vmatpush3.bf16.msra.mxu1 %v18673_v29  ;;  %v286_v62 = vld [vmem:[#allocation8 + $0x250] sm:$0xff]  ;;  %v289_v29 = vld [vmem:[#allocation8 + $0x268] sm:$0xff] }
 0x7a8   :  { %14826 = vmatprep.subr.bf16.mxu1 %v14825_v49 }
 0x7aa   :  { %13673 = vmatmul.mubr.f32.gmra.mrb[2].mxu1 %v18459_v11  ;;  %v14841_v11 = vpack.c.bf16 %v287_v41, %v286_v62  ;;  %v308_v62 = vld [vmem:[#allocation8 + $0x300] sm:$0xff]  ;;  %v309_v41 = vld [vmem:[#allocation8 + $0x308] sm:$0xff] }
 0x7ab   :  { %13675 = vmatprep.mubr.f32.mxu1 %v18462_v45  ;;  %14828 = vmatpush3.bf16.msra.mxu1 %v14825_v49  ;;  %v288_v45 = vld [vmem:[#allocation8 + $0x260] sm:$0xff]  ;;  %v306_v49 = vld [vmem:[#allocation8 + $0x2f0] sm:$0xff] }
 0x7ac   :  { %14830 = vmatprep.subr.bf16.mxu1 %v14829_v25 }
 0x7ae   :  { %13676 = vmatmul.mubr.f32.gmra.mrb[4].mxu1 %v18465_v13  ;;  %v14845_v13 = vpack.c.bf16 %v289_v29, %v288_v45  ;;  %v18933_v45 = vpack.c.bf16 %v309_v41, %v308_v62  ;;  %v18935_v29 = vld [vmem:[#allocation2 + $0x110] sm:$0xff]  ;;  %v19053_v41 = vld [vmem:[#allocation2 + $0x3e8] sm:$0xff] }
 0x7af   :  { %13678 = vmatprep.mubr.f32.mxu1 %v18468_v60  ;;  %14832 = vmatpush3.bf16.msra.mxu1 %v14829_v25  ;;  %v290_v60 = vld [vmem:[#allocation8 + $0x270] sm:$0xff] }
 0x7b0   :  { %14834 = vmatprep.subr.bf16.mxu1 %v14833_v36  ;;  %v18921_v25 = vld [vmem:[#allocation2 + $0xd0] sm:$0xff] }
 0x7b1   :  { %v19050_v62 = vld [vmem:[#allocation2 + $0x3d0] sm:$0xff] }
 0x7b2   :  { %13679 = vmatmul.mubr.f32.gmra.mrb[6].mxu1 %v18471_v39  ;;  %v14849_v39 = vpack.c.bf16 %v291_v18, %v290_v60  ;;  %v18942_v60 = vld [vmem:[#allocation2 + $0x130] sm:$0xff]  ;;  %v18945_v18 = vld [vmem:[#allocation2 + $0x148] sm:$0xff] }
 0x7b3   :  { %13681 = vmatprep.mubr.f32.mxu1 %v18474_v31  ;;  %14836 = vmatpush3.bf16.msra.mxu1 %v14833_v36  ;;  %v292_v31 = vld [vmem:[#allocation8 + $0x280] sm:$0xff]  ;;  %v307_v36 = vld [vmem:[#allocation8 + $0x2f8] sm:$0xff] }
 0x7b4   :  { %14838 = vmatprep.subr.bf16.mxu1 %v14837_v15  ;;  %v14881_v40 = vpack.c.bf16 %v307_v36, %v306_v49  ;;  %v19041_v49 = vld [vmem:[#allocation2 + $0x3a8] sm:$0xff]  ;;  %v19044_v36 = vld [vmem:[#allocation2 + $0x3b0] sm:$0xff] }
 0x7b6   :  { %13682 = vmatmul.mubr.f32.gmra.mrb[8].mxu1 %v18477_v35  ;;  %v18833_v35 = vpack.c.bf16 %v293_v59, %v292_v31  ;;  %v18951_v31 = vld [vmem:[#allocation2 + $0x168] sm:$0xff]  ;;  %v18954_v59 = vld [vmem:[#allocation2 + $0x170] sm:$0xff] }
 0x7b7   :  { %13684 = vmatprep.mubr.f32.mxu1 %v18480_v53  ;;  %14840 = vmatpush3.bf16.msra.mxu1 %v14837_v15  ;;  %v18851_v53 = vld [vmem:[#allocation2 + $0x207] sm:$0xff]  ;;  %v18927_v15 = vld [vmem:[#allocation2 + $0xf0] sm:$0xff] }
 0x7b8   :  { %14842 = vmatprep.subr.bf16.mxu1 %v14841_v11 }
 0x7ba   :  { %13685 = vmatmul.mubr.f32.gmra.mrb[10].mxu1 %v18483_v1  ;;  %v18854_v1 = vld [vmem:[#allocation2 + $0x20f] sm:$0xff] }
 0x7bb   :  { %13687 = vmatprep.mubr.f32.mxu1 %v18486_v33  ;;  %14844 = vmatpush3.bf16.msra.mxu1 %v14841_v11  ;;  %v21020_v33 = vld [vmem:[#allocation68_spill] sm:$0xff]  ;;  %v18930_v11 = vld [vmem:[#allocation2 + $0x108] sm:$0xff] }
 0x7bc   :  { %14846 = vmatprep.subr.bf16.mxu1 %v14845_v13 }
 0x7be   :  { %13688 = vmatmul.mubr.f32.gmra.mrb[12].mxu1 %v18491_v38  ;;  %v21021_v38 = vld [vmem:[#allocation69_spill] sm:$0xff] }
 0x7bf   :  { %13690 = vmatprep.mubr.f32.mxu1 %v18494_v10  ;;  %14848 = vmatpush3.bf16.msra.mxu1 %v14845_v13  ;;  %v21022_v10 = vld [vmem:[#allocation70_spill] sm:$0xff] }
 0x7c0   :  { %14850 = vmatprep.subr.bf16.mxu1 %v14849_v39  ;;  %v18938_v13 = vld [vmem:[#allocation2 + $0x128] sm:$0xff]  ;;  %21037 = vst [vmem:[#allocation70_spill] sm:$0xff] %v19041_v49 }
 0x7c2   :  { %13691 = vmatmul.mubr.f32.gmra.mrb[14].mxu1 %v18498_v0  ;;  %v21023_v0 = vld [vmem:[#allocation71_spill] sm:$0xff] }
 0x7c3   :  { %13693 = vmatprep.mubr.f32.mxu1 %v18501_v43  ;;  %14852 = vmatpush3.bf16.msra.mxu1 %v14849_v39  ;;  %v21024_v43 = vld [vmem:[#allocation72_spill] sm:$0xff]  ;;  %v18948_v39 = vld [vmem:[#allocation2 + $0x150] sm:$0xff]  ;;  %21038 = vst [vmem:[#allocation71_spill] sm:$0xff] %v19044_v36 }
 0x7c4   :  { %14854 = vmatprep.subr.bf16.mxu1 %v18833_v35 }
 0x7c6   :  { %13694 = vmatmul.mubr.f32.gmra.mrb[16].mxu1 %v18504_v2  ;;  %v21025_v2 = vld [vmem:[#allocation73_spill] sm:$0xff] }
 0x7c7   :  { %13696 = vmatprep.mubr.f32.mxu1 %v18507_v8  ;;  %v21026_v8 = vld [vmem:[#allocation74_spill] sm:$0xff]  ;;  %21040 = vst [vmem:[#allocation73_spill] sm:$0xff] %v19050_v62 }
 0x7c8   :  { %21041 = vst [vmem:[#allocation74_spill] sm:$0xff] %v19053_v41 }
 0x7ca   :  { %13697 = vmatmul.mubr.f32.gmra.mrb[18].mxu1 %v18510_v58  ;;  %v21027_v58 = vld [vmem:[#allocation75_spill] sm:$0xff] }
 0x7cb   :  { %13699 = vmatprep.mubr.f32.mxu1 %v18513_v52  ;;  %v21028_v52 = vld [vmem:[#allocation76_spill] sm:$0xff] }
 0x7ce   :  { %13700 = vmatmul.mubr.f32.gmra.mrb[20].mxu1 %v18516_v26  ;;  %v18887_v26 = vld [vmem:[#allocation2 + $0x447] sm:$0xff] }
 0x7cf   :  { %13702 = vmatprep.mubr.f32.mxu1 %v18519_v37  ;;  %v18890_v37 = vld [vmem:[#allocation2 + $0x44f] sm:$0xff] }
 0x7d2   :  { %13703 = vmatmul.mubr.f32.gmra.mrb[22].mxu1 %v18522_v27  ;;  %v294_v27 = vld [vmem:[#allocation8 + $0x290] sm:$0xff] }
 0x7d3   :  { %13705 = vmatprep.mubr.f32.mxu1 %v18525_v32  ;;  %v295_v32 = vld [vmem:[#allocation8 + $0x298] sm:$0xff] }
 0x7d6   :  { %13706 = vmatmul.mubr.f32.gmra.mrb[24].mxu1 %v18528_v55  ;;  %v7471_v55 = vld [vmem:[#allocation2 + $0x28] sm:$0xff] }
 0x7d7   :  { %13708 = vmatprep.mubr.f32.mxu1 %v18531_v4  ;;  %v14857_v4 = vpack.c.bf16 %v295_v32, %v294_v27  ;;  %v7503_v27 = vld [vmem:[#allocation2 + $0x268] sm:$0xff]  ;;  %v7504_v32 = vld [vmem:[#allocation2 + $0x270] sm:$0xff] }
 0x7da   :  { %13709 = vmatmul.mubr.f32.gmra.mrb[26].mxu1 %v18534_v56  ;;  %v7472_v56 = vld [vmem:[#allocation2 + $0x30] sm:$0xff] }
 0x7db   :  { %13711 = vmatprep.mubr.f32.mxu1 %v18537_v46  ;;  %v296_v46 = vld [vmem:[#allocation8 + $0x2a0] sm:$0xff] }
 0x7de   :  { %13712 = vmatmul.mubr.f32.gmra.mrb[28].mxu1 %v18540_v3  ;;  %v297_v3 = vld [vmem:[#allocation8 + $0x2a8] sm:$0xff] }
 0x7df   :  { %13714 = vmatprep.mubr.f32.mxu1 %v18851_v53 }
 0x7e2   :  { %13715 = vmatmul.mubr.f32.gmra.mrb[30].mxu1 %v18854_v1 }
 0x7e3   :  { %13717 = vmatprep.mubr.f32.mxu1 %v18543_v34  ;;  %v18893_v34 = vld [vmem:[#allocation2 + $0x48] sm:$0xff] }
 0x7e6   :  { %13718 = vmatmul.mubr.f32.gmra.mrb[32].mxu1 %v18546_v42  ;;  %v14861_v42 = vpack.c.bf16 %v297_v3, %v296_v46  ;;  %v18996_v46 = vld [vmem:[#allocation2 + $0x2b0] sm:$0xff]  ;;  %v18999_v3 = vld [vmem:[#allocation2 + $0x2c8] sm:$0xff] }
 0x7e7   :  { %13720 = vmatprep.mubr.f32.mxu1 %v18549_v7  ;;  %v18897_v7 = vld [vmem:[#allocation2 + $0x50] sm:$0xff] }
 0x7ea   :  { %13721 = vmatmul.mubr.f32.gmra.mrb[34].mxu1 %v18552_v19  ;;  %v298_v19 = vld [vmem:[#allocation8 + $0x2b0] sm:$0xff] }
 0x7eb   :  { %13723 = vmatprep.mubr.f32.mxu1 %v18555_v14  ;;  %v299_v14 = vld [vmem:[#allocation8 + $0x2b8] sm:$0xff] }
 0x7ee   :  { %13724 = vmatmul.mubr.f32.gmra.mrb[36].mxu1 %v18558_v48  ;;  %v18900_v48 = vld [vmem:[#allocation2 + $0x68] sm:$0xff] }
 0x7ef   :  { %13726 = vmatprep.mubr.f32.mxu1 %v18561_v20  ;;  %v14865_v20 = vpack.c.bf16 %v299_v14, %v298_v19  ;;  %v19005_v19 = vld [vmem:[#allocation2 + $0x2e8] sm:$0xff]  ;;  %v19008_v14 = vld [vmem:[#allocation2 + $0x2f0] sm:$0xff] }
 0x7f2   :  { %13727 = vmatmul.mubr.f32.gmra.mrb[38].mxu1 %v18564_v44  ;;  %v18903_v44 = vld [vmem:[#allocation2 + $0x70] sm:$0xff] }
 0x7f3   :  { %13729 = vmatprep.mubr.f32.mxu1 %v18567_v51  ;;  %v300_v51 = vld [vmem:[#allocation8 + $0x2c0] sm:$0xff] }
 0x7f6   :  { %13730 = vmatmul.mubr.f32.gmra.mrb[40].mxu1 %v18570_v54  ;;  %v301_v54 = vld [vmem:[#allocation8 + $0x2c8] sm:$0xff] }
 0x7f7   :  { %13732 = vmatprep.mubr.f32.mxu1 %v18573_v63  ;;  %v18906_v63 = vld [vmem:[#allocation2 + $0x88] sm:$0xff] }
 0x7fa   :  { %13733 = vmatmul.mubr.f32.gmra.mrb[42].mxu1 %v18576_v30  ;;  %v14869_v30 = vpack.c.bf16 %v301_v54, %v300_v51  ;;  %v19014_v51 = vld [vmem:[#allocation2 + $0x310] sm:$0xff]  ;;  %v19017_v54 = vld [vmem:[#allocation2 + $0x328] sm:$0xff] }
 0x7fb   :  { %13735 = vmatprep.mubr.f32.mxu1 %v18579_v21  ;;  %v18909_v21 = vld [vmem:[#allocation2 + $0x90] sm:$0xff]  ;;  %21029 = vst [vmem:[#allocation64_spill] sm:$0xff] %v19017_v54 }
 0x7fe   :  { %13736 = vmatmul.mubr.f32.gmra.mrb[44].mxu1 %v18582_v16  ;;  %v302_v16 = vld [vmem:[#allocation8 + $0x2d0] sm:$0xff] }
 0x7ff   :  { %13738 = vmatprep.mubr.f32.mxu1 %v18585_v22  ;;  %v303_v22 = vld [vmem:[#allocation8 + $0x2d8] sm:$0xff] }
 0x802   :  { %13739 = vmatmul.mubr.f32.gmra.mrb[46].mxu1 %v18588_v5  ;;  %v18912_v5 = vld [vmem:[#allocation2 + $0xa8] sm:$0xff] }
 0x803   :  { %13741 = vmatprep.mubr.f32.mxu1 %v18591_v50  ;;  %v14873_v50 = vpack.c.bf16 %v303_v22, %v302_v16  ;;  %v19023_v16 = vld [vmem:[#allocation2 + $0x348] sm:$0xff]  ;;  %v19026_v22 = vld [vmem:[#allocation2 + $0x350] sm:$0xff] }
 0x804   :  { %21031 = vst [vmem:[#allocation66_spill] sm:$0xff] %v19023_v16  ;;  %21032 = vst [vmem:[#allocation67_spill] sm:$0xff] %v19026_v22 }
 0x806   :  { %13742 = vmatmul.mubr.f32.gmra.mrb[48].mxu1 %v18594_v47  ;;  %v18915_v47 = vld [vmem:[#allocation2 + $0xb0] sm:$0xff] }
 0x807   :  { %13744 = vmatprep.mubr.f32.mxu1 %v18597_v17  ;;  %v304_v17 = vld [vmem:[#allocation8 + $0x2e0] sm:$0xff] }
 0x80a   :  { %13745 = vmatmul.mubr.f32.gmra.mrb[50].mxu1 %v18600_v23  ;;  %v305_v23 = vld [vmem:[#allocation8 + $0x2e8] sm:$0xff] }
 0x80b   :  { %13747 = vmatprep.mubr.f32.mxu1 %v21020_v33  ;;  %v14877_v28 = vpack.c.bf16 %v305_v23, %v304_v17  ;;  %v18960_v33 = vld [vmem:[#allocation2 + $0x190] sm:$0xff]  ;;  %v19035_v23 = vld [vmem:[#allocation2 + $0x388] sm:$0xff] }
 0x80c   :  { %v19032_v17 = vld [vmem:[#allocation2 + $0x370] sm:$0xff]  ;;  %21035 = vst [vmem:[#allocation68_spill] sm:$0xff] %v19035_v23 }
 0x80d   :  { %21034 = vst [vmem:[#allocation60_spill] sm:$0xff] %v19032_v17 }
 0x80e   :  { %13748 = vmatmul.mubr.f32.gmra.mrb[52].mxu1 %v21021_v38  ;;  %v18963_v38 = vld [vmem:[#allocation2 + $0x1a8] sm:$0xff] }
 0x80f   :  { %13750 = vmatprep.mubr.f32.mxu1 %v21022_v10  ;;  %v18966_v10 = vld [vmem:[#allocation2 + $0x1b0] sm:$0xff] }
 0x812   :  { %13751 = vmatmul.mubr.f32.gmra.mrb[54].mxu1 %v21023_v0  ;;  %v18969_v0 = vld [vmem:[#allocation2 + $0x1c8] sm:$0xff] }
 0x813   :  { %13753 = vmatprep.mubr.f32.mxu1 %v21024_v43  ;;  %v18972_v43 = vld [vmem:[#allocation2 + $0x1d0] sm:$0xff] }
 0x816   :  { %13754 = vmatmul.mubr.f32.gmra.mrb[56].mxu1 %v21025_v2  ;;  %v18975_v2 = vld [vmem:[#allocation2 + $0x1e8] sm:$0xff] }
 0x817   :  { %13756 = vmatprep.mubr.f32.mxu1 %v21026_v8  ;;  %v18978_v8 = vld [vmem:[#allocation2 + $0x1f0] sm:$0xff] }
 0x81a   :  { %13757 = vmatmul.mubr.f32.gmra.mrb[58].mxu1 %v21027_v58  ;;  %v18981_v58 = vld [vmem:[#allocation2 + $0x208] sm:$0xff] }
 0x81b   :  { %13759 = vmatprep.mubr.f32.mxu1 %v21028_v52  ;;  %v18984_v52 = vld [vmem:[#allocation2 + $0x210] sm:$0xff] }
 0x81e   :  { %13760 = vmatmul.mubr.f32.gmra.mrb[60].mxu1 %v18630_v12  ;;  %v18918_v12 = vld [vmem:[#allocation2 + $0xc8] sm:$0xff] }
 0x81f   :  { %13762 = vmatprep.mubr.f32.mxu1 %v18887_v26 }
 0x822   :  { %13763 = vmatmul.mubr.f32.gmra.mrb[62].mxu1 %v18890_v37 }
 0x823   :  { %13797 = vmatprep.mubr.f32.mxu1 %v7471_v55  ;;  %v18987_v55 = vld [vmem:[#allocation2 + $0x288] sm:$0xff] }
 0x826   :  { %13798 = vmatmul.mubr.f32.vlgmr.msra.gmra.mrb[0].mxu1 %v7472_v56  ;;  %v18993_v56 = vld [vmem:[#allocation2 + $0x2a8] sm:$0xff] }
 0x827   :  { %13800 = vmatprep.mubr.f32.mxu1 %v18893_v34  ;;  %14856 = vmatpush3.bf16.msra.mxu1 %v18833_v35  ;;  %v18957_v35 = vld [vmem:[#allocation2 + $0x188] sm:$0xff] }
 0x828   :  { %14858 = vmatprep.subr.bf16.mxu1 %v14857_v4 }
 0x82a   :  { %13801 = vmatmul.mubr.f32.gmra.mrb[2].mxu1 %v18897_v7 }
 0x82b   :  { %13803 = vmatprep.mubr.f32.mxu1 %v18900_v48  ;;  %14860 = vmatpush3.bf16.msra.mxu1 %v14857_v4  ;;  %v18990_v4 = vld [vmem:[#allocation2 + $0x290] sm:$0xff] }
 0x82c   :  { %14862 = vmatprep.subr.bf16.mxu1 %v14861_v42 }
 0x82e   :  { %13804 = vmatmul.mubr.f32.gmra.mrb[4].mxu1 %v18903_v44 }
 0x82f   :  { %13806 = vmatprep.mubr.f32.mxu1 %v18906_v63  ;;  %14864 = vmatpush3.bf16.msra.mxu1 %v14861_v42  ;;  %v19002_v42 = vld [vmem:[#allocation2 + $0x2d0] sm:$0xff] }
 0x830   :  { %14866 = vmatprep.subr.bf16.mxu1 %v14865_v20 }
 0x832   :  { %13807 = vmatmul.mubr.f32.gmra.mrb[6].mxu1 %v18909_v21 }
 0x833   :  { %13809 = vmatprep.mubr.f32.mxu1 %v18912_v5  ;;  %14868 = vmatpush3.bf16.msra.mxu1 %v14865_v20  ;;  %v19011_v20 = vld [vmem:[#allocation2 + $0x308] sm:$0xff] }
 0x834   :  { %14870 = vmatprep.subr.bf16.mxu1 %v14869_v30 }
 0x836   :  { %13810 = vmatmul.mubr.f32.gmra.mrb[8].mxu1 %v18915_v47 }
 0x837   :  { %13812 = vmatprep.mubr.f32.mxu1 %v18918_v12  ;;  %14872 = vmatpush3.bf16.msra.mxu1 %v14869_v30  ;;  %v19020_v30 = vld [vmem:[#allocation2 + $0x330] sm:$0xff] }
 0x838   :  { %14874 = vmatprep.subr.bf16.mxu1 %v14873_v50  ;;  %21030 = vst [vmem:[#allocation65_spill] sm:$0xff] %v19020_v30 }
 0x83a   :  { %13813 = vmatmul.mubr.f32.gmra.mrb[10].mxu1 %v18921_v25 }
 0x83b   :  { %13815 = vmatprep.mubr.f32.mxu1 %v18924_v6  ;;  %14876 = vmatpush3.bf16.msra.mxu1 %v14873_v50  ;;  %v19029_v50 = vld [vmem:[#allocation2 + $0x368] sm:$0xff] }
 0x83c   :  { %14878 = vmatprep.subr.bf16.mxu1 %v14877_v28  ;;  %21033 = vst [vmem:[#allocation57_spill] sm:$0xff] %v19029_v50 }
 0x83e   :  { %13816 = vmatmul.mubr.f32.gmra.mrb[12].mxu1 %v18927_v15 }
 0x83f   :  { %13818 = vmatprep.mubr.f32.mxu1 %v18930_v11  ;;  %14880 = vmatpush3.bf16.msra.mxu1 %v14877_v28  ;;  %v19038_v28 = vld [vmem:[#allocation2 + $0x390] sm:$0xff] }
 0x840   :  { %14882 = vmatprep.subr.bf16.mxu1 %v14881_v40  ;;  %21036 = vst [vmem:[#allocation69_spill] sm:$0xff] %v19038_v28 }
 0x842   :  { %13819 = vmatmul.mubr.f32.gmra.mrb[14].mxu1 %v18935_v29 }
 0x843   :  { %13821 = vmatprep.mubr.f32.mxu1 %v18938_v13  ;;  %14884 = vmatpush3.bf16.msra.mxu1 %v14881_v40  ;;  %v19047_v40 = vld [vmem:[#allocation2 + $0x3c8] sm:$0xff] }
 0x844   :  { %14886 = vmatprep.subr.bf16.mxu1 %v18933_v45  ;;  %21039 = vst [vmem:[#allocation72_spill] sm:$0xff] %v19047_v40 }
 0x846   :  { %13822 = vmatmul.mubr.f32.gmra.mrb[16].mxu1 %v18942_v60 }
 0x847   :  { %13824 = vmatprep.mubr.f32.mxu1 %v18945_v18 }
 0x84a   :  { %13825 = vmatmul.mubr.f32.gmra.mrb[18].mxu1 %v18948_v39 }
 0x84b   :  { %13827 = vmatprep.mubr.f32.mxu1 %v18951_v31 }
 0x84e   :  { %13828 = vmatmul.mubr.f32.gmra.mrb[20].mxu1 %v18954_v59 }
 0x84f   :  { %13830 = vmatprep.mubr.f32.mxu1 %v18957_v35 }
 0x852   :  { %13831 = vmatmul.mubr.f32.gmra.mrb[22].mxu1 %v18960_v33 }
 0x853   :  { %13833 = vmatprep.mubr.f32.mxu1 %v18963_v38 }
 0x856   :  { %13834 = vmatmul.mubr.f32.gmra.mrb[24].mxu1 %v18966_v10 }
 0x857   :  { %13836 = vmatprep.mubr.f32.mxu1 %v18969_v0 }
 0x85a   :  { %13837 = vmatmul.mubr.f32.gmra.mrb[26].mxu1 %v18972_v43 }
 0x85b   :  { %13839 = vmatprep.mubr.f32.mxu1 %v18975_v2 }
 0x85e   :  { %13840 = vmatmul.mubr.f32.gmra.mrb[28].mxu1 %v18978_v8 }
 0x85f   :  { %13842 = vmatprep.mubr.f32.mxu1 %v18981_v58 }
 0x862   :  { %13843 = vmatmul.mubr.f32.gmra.mrb[30].mxu1 %v18984_v52 }
 0x863   :  { %13845 = vmatprep.mubr.f32.mxu1 %v7503_v27  ;;  %v19056_v27 = vld [vmem:[#allocation2 + $0x3f0] sm:$0xff] }
 0x864   :  { %21042 = vst [vmem:[#allocation75_spill] sm:$0xff] %v19056_v27 }
 0x866   :  { %13846 = vmatmul.mubr.f32.gmra.mrb[32].mxu1 %v7504_v32  ;;  %v19059_v32 = vld [vmem:[#allocation2 + $0x408] sm:$0xff] }
 0x867   :  { %13848 = vmatprep.mubr.f32.mxu1 %v18987_v55  ;;  %21043 = vst [vmem:[#allocation76_spill] sm:$0xff] %v19059_v32 }
 0x86a   :  { %13849 = vmatmul.mubr.f32.gmra.mrb[34].mxu1 %v18990_v4 }
 0x86b   :  { %13851 = vmatprep.mubr.f32.mxu1 %v18993_v56 }
 0x86e   :  { %13852 = vmatmul.mubr.f32.gmra.mrb[36].mxu1 %v18996_v46 }
 0x86f   :  { %13854 = vmatprep.mubr.f32.mxu1 %v18999_v3 }
 0x872   :  { %13855 = vmatmul.mubr.f32.gmra.mrb[38].mxu1 %v19002_v42 }
 0x873   :  { %13857 = vmatprep.mubr.f32.mxu1 %v19005_v19 }
 0x876   :  { %13858 = vmatmul.mubr.f32.gmra.mrb[40].mxu1 %v19008_v14 }
 0x877   :  { %13860 = vmatprep.mubr.f32.mxu1 %v19011_v20 }
 0x87a   :  { %13861 = vmatmul.mubr.f32.gmra.mrb[42].mxu1 %v19014_v51 }
 0x87b   :  { %13863 = vmatprep.mubr.f32.mxu1 %v19017_v54  ;;  %v21057_v54 = vld [vmem:[#allocation16_spill] sm:$0xff] }
 0x87e   :  { %13864 = vmatmul.mubr.f32.gmra.mrb[44].mxu1 %v19020_v30  ;;  %v21053_v30 = vld [vmem:[#allocation81_spill] sm:$0xff] }
 0x87f   :  { %13866 = vmatprep.mubr.f32.mxu1 %v19023_v16  ;;  %v21052_v16 = vld [vmem:[#allocation80_spill] sm:$0xff] }
 0x882   :  { %13867 = vmatmul.mubr.f32.gmra.mrb[46].mxu1 %v19026_v22  ;;  %v315_v22 = vld [vmem:[#allocation8 + $0x338] sm:$0xff] }
 0x883   :  { %13869 = vmatprep.mubr.f32.mxu1 %v19029_v50  ;;  %v21051_v50 = vld [vmem:[#allocation79_spill] sm:$0xff] }
 0x886   :  { %13870 = vmatmul.mubr.f32.gmra.mrb[48].mxu1 %v19032_v17  ;;  %v313_v17 = vld [vmem:[#allocation8 + $0x328] sm:$0xff] }
 0x887   :  { %13872 = vmatprep.mubr.f32.mxu1 %v19035_v23  ;;  %v312_v23 = vld [vmem:[#allocation8 + $0x320] sm:$0xff] }
 0x88a   :  { %13873 = vmatmul.mubr.f32.gmra.mrb[50].mxu1 %v19038_v28  ;;  %v21049_v28 = vld [vmem:[#allocation77_spill] sm:$0xff] }
 0x88b   :  { %13875 = vmatprep.mubr.f32.mxu1 %v19041_v49  ;;  %v310_v49 = vld [vmem:[#allocation8 + $0x310] sm:$0xff] }
 0x88e   :  { %13876 = vmatmul.mubr.f32.gmra.mrb[52].mxu1 %v19044_v36  ;;  %v19062_v36 = vld [vmem:[#allocation2 + $0x410] sm:$0xff] }
 0x88f   :  { %13878 = vmatprep.mubr.f32.mxu1 %v19047_v40  ;;  %21044 = vst [vmem:[#allocation85_spill] sm:$0xff] %v19062_v36  ;;  %v19065_v40 = vld [vmem:[#allocation2 + $0x428] sm:$0xff] }
 0x890   :  { %21045 = vst [vmem:[#allocation86_spill] sm:$0xff] %v19065_v40 }
 0x892   :  { %13879 = vmatmul.mubr.f32.gmra.mrb[54].mxu1 %v19050_v62  ;;  %v19068_v62 = vld [vmem:[#allocation2 + $0x430] sm:$0xff] }
 0x893   :  { %13881 = vmatprep.mubr.f32.mxu1 %v19053_v41  ;;  %21046 = vst [vmem:[#allocation87_spill] sm:$0xff] %v19068_v62  ;;  %v19071_v41 = vld [vmem:[#allocation2 + $0x448] sm:$0xff] }
 0x894   :  { %21047 = vst [vmem:[#allocation88_spill] sm:$0xff] %v19071_v41 }
 0x896   :  { %13882 = vmatmul.mubr.f32.gmra.mrb[56].mxu1 %v19056_v27  ;;  %v19074_v27 = vld [vmem:[#allocation2 + $0x450] sm:$0xff] }
 0x897   :  { %13884 = vmatprep.mubr.f32.mxu1 %v19059_v32  ;;  %21048 = vst [vmem:[#allocation89_spill] sm:$0xff] %v19074_v27  ;;  %v311_v32 = vld [vmem:[#allocation8 + $0x318] sm:$0xff] }
 0x89a   :  { %13885 = vmatmul.mubr.f32.gmra.mrb[58].mxu1 %v19062_v36  ;;  %v14889_v36 = vpack.c.bf16 %v311_v32, %v310_v49  ;;  %v316_v49 = vld [vmem:[#allocation8 + $0x340] sm:$0xff]  ;;  %v317_v32 = vld [vmem:[#allocation8 + $0x348] sm:$0xff] }
 0x89b   :  { %13887 = vmatprep.mubr.f32.mxu1 %v19065_v40  ;;  %v21050_v40 = vld [vmem:[#allocation78_spill] sm:$0xff] }
 0x89e   :  { %13888 = vmatmul.mubr.f32.gmra.mrb[60].mxu1 %v19068_v62  ;;  %v14893_v62 = vpack.c.bf16 %v313_v17, %v312_v23  ;;  %v319_v17 = vld [vmem:[#allocation8 + $0x358] sm:$0xff]  ;;  %v21056_v23 = vld [vmem:[#allocation15_spill] sm:$0xff] }
 0x89f   :  { %13890 = vmatprep.mubr.f32.mxu1 %v19071_v41  ;;  %v314_v41 = vld [vmem:[#allocation8 + $0x330] sm:$0xff] }
 0x8a2   :  { %13891 = vmatmul.mubr.f32.gmra.mrb[62].mxu1 %v19074_v27  ;;  %v21054_v27 = vld [vmem:[#allocation13_spill] sm:$0xff] }
 0x8a3   :  { %13925 = vmatprep.mubr.f32.mxu1 %v21049_v28  ;;  %v14897_v28 = vpack.c.bf16 %v315_v22, %v314_v41  ;;  %v321_v22 = vld [vmem:[#allocation8 + $0x368] sm:$0xff]  ;;  %v323_v41 = vld [vmem:[#allocation8 + $0x378] sm:$0xff] }
 0x8a6   :  { %13926 = vmatmul.mubr.f32.vlgmr.msra.gmra.mrb[0].mxu1 %v21050_v40  ;;  %v21055_v40 = vld [vmem:[#allocation14_spill] sm:$0xff] }
 0x8a7   :  { %13928 = vmatprep.mubr.f32.mxu1 %v21051_v50  ;;  %14888 = vmatpush3.bf16.msra.mxu1 %v18933_v45  ;;  %v14901_v45 = vpack.c.bf16 %v317_v32, %v316_v49  ;;  %v318_v50 = vld [vmem:[#allocation8 + $0x350] sm:$0xff]  ;;  %v325_v49 = vld [vmem:[#allocation8 + $0x388] sm:$0xff] }
 0x8a8   :  { %14890 = vmatprep.subr.bf16.mxu1 %v14889_v36  ;;  %v21059_v32 = vld [vmem:[#allocation18_spill] sm:$0xff] }
 0x8aa   :  { %13929 = vmatmul.mubr.f32.gmra.mrb[2].mxu1 %v21052_v16  ;;  %v320_v16 = vld [vmem:[#allocation8 + $0x360] sm:$0xff] }
 0x8ab   :  { %13931 = vmatprep.mubr.f32.mxu1 %v21053_v30  ;;  %14892 = vmatpush3.bf16.msra.mxu1 %v14889_v36  ;;  %v14905_v30 = vpack.c.bf16 %v319_v17, %v318_v50  ;;  %v14909_v36 = vpack.c.bf16 %v321_v22, %v320_v16  ;;  %v21064_v50 = vld [vmem:[#allocation82_spill] sm:$0xff]  ;;  %v21065_v17 = vld [vmem:[#allocation83_spill] sm:$0xff]  ;;  %v21068_v16 = vld [vmem:[#allocation24_spill] sm:$0xff] }
 0x8ac   :  { %14894 = vmatprep.subr.bf16.mxu1 %v14893_v62  ;;  %v21069_v22 = vld [vmem:[#allocation25_spill] sm:$0xff] }
 0x8ae   :  { %13932 = vmatmul.mubr.f32.gmra.mrb[4].mxu1 %v21054_v27  ;;  %v21058_v27 = vld [vmem:[#allocation17_spill] sm:$0xff] }
 0x8af   :  { %13934 = vmatprep.mubr.f32.mxu1 %v21055_v40  ;;  %14896 = vmatpush3.bf16.msra.mxu1 %v14893_v62  ;;  %v322_v62 = vld [vmem:[#allocation8 + $0x370] sm:$0xff] }
 0x8b0   :  { %14898 = vmatprep.subr.bf16.mxu1 %v14897_v28  ;;  %v21060_v40 = vld [vmem:[#allocation19_spill] sm:$0xff] }
 0x8b2   :  { %13935 = vmatmul.mubr.f32.gmra.mrb[6].mxu1 %v21056_v23  ;;  %v21066_v23 = vld [vmem:[#allocation84_spill] sm:$0xff] }
 0x8b3   :  { %13937 = vmatprep.mubr.f32.mxu1 %v21057_v54  ;;  %14900 = vmatpush3.bf16.msra.mxu1 %v14897_v28  ;;  %v14913_v54 = vpack.c.bf16 %v323_v41, %v322_v62  ;;  %v324_v28 = vld [vmem:[#allocation8 + $0x380] sm:$0xff]  ;;  %v21071_v62 = vld [vmem:[#allocation28_spill] sm:$0xff]  ;;  %v21072_v41 = vld [vmem:[#allocation27_spill] sm:$0xff] }
 0x8b4   :  { %14902 = vmatprep.subr.bf16.mxu1 %v14901_v45 }
 0x8b6   :  { %13938 = vmatmul.mubr.f32.gmra.mrb[8].mxu1 %v18661_v61  ;;  %v19093_v61 = vpack.c.bf16 %v325_v49, %v324_v28  ;;  %v21075_v28 = vld [vmem:[#allocation32_spill] sm:$0xff]  ;;  %v19111_v49 = vld [vmem:[#allocation2 + $0x209] sm:$0xff] }
 0x8b7   :  { %13940 = vmatprep.mubr.f32.mxu1 %v18664_v9  ;;  %14904 = vmatpush3.bf16.msra.mxu1 %v14901_v45  ;;  %v21061_v9 = vld [vmem:[#allocation20_spill] sm:$0xff]  ;;  %v21062_v45 = vld [vmem:[#allocation21_spill] sm:$0xff] }
 0x8b8   :  { %14906 = vmatprep.subr.bf16.mxu1 %v14905_v30 }
 0x8ba   :  { %13941 = vmatmul.mubr.f32.gmra.mrb[10].mxu1 %v18667_v24  ;;  %v21063_v24 = vld [vmem:[#allocation22_spill] sm:$0xff] }
 0x8bb   :  { %13943 = vmatprep.mubr.f32.mxu1 %v21058_v27  ;;  %14908 = vmatpush3.bf16.msra.mxu1 %v14905_v30  ;;  %v21067_v30 = vld [vmem:[#allocation23_spill] sm:$0xff]  ;;  %v21073_v27 = vld [vmem:[#allocation30_spill] sm:$0xff] }
 0x8bc   :  { %14910 = vmatprep.subr.bf16.mxu1 %v14909_v36 }
 0x8be   :  { %13944 = vmatmul.mubr.f32.gmra.mrb[12].mxu1 %v21059_v32  ;;  %v19114_v32 = vld [vmem:[#allocation2 + $0x211] sm:$0xff] }
 0x8bf   :  { %13946 = vmatprep.mubr.f32.mxu1 %v21060_v40  ;;  %14912 = vmatpush3.bf16.msra.mxu1 %v14909_v36  ;;  %v21070_v36 = vld [vmem:[#allocation26_spill] sm:$0xff]  ;;  %v21076_v40 = vld [vmem:[#allocation31_spill] sm:$0xff] }
 0x8c0   :  { %14914 = vmatprep.subr.bf16.mxu1 %v14913_v54 }
 0x8c2   :  { %13947 = vmatmul.mubr.f32.gmra.mrb[14].mxu1 %v21061_v9  ;;  %v21077_v9 = vld [vmem:[#allocation34_spill] sm:$0xff] }
 0x8c3   :  { %13949 = vmatprep.mubr.f32.mxu1 %v21062_v45  ;;  %14916 = vmatpush3.bf16.msra.mxu1 %v14913_v54  ;;  %v21074_v54 = vld [vmem:[#allocation29_spill] sm:$0xff] }
 0x8c4   :  { %14918 = vmatprep.subr.bf16.mxu1 %v19093_v61  ;;  %v21078_v45 = vld [vmem:[#allocation33_spill] sm:$0xff] }
 0x8c6   :  { %13950 = vmatmul.mubr.f32.gmra.mrb[16].mxu1 %v21063_v24  ;;  %v21079_v24 = vld [vmem:[#allocation36_spill] sm:$0xff] }
 0x8c7   :  { %13952 = vmatprep.mubr.f32.mxu1 %v21064_v50  ;;  %v21080_v50 = vld [vmem:[#allocation35_spill] sm:$0xff] }
 0x8ca   :  { %13953 = vmatmul.mubr.f32.gmra.mrb[18].mxu1 %v21065_v17  ;;  %v21081_v17 = vld [vmem:[#allocation38_spill] sm:$0xff] }
 0x8cb   :  { %13955 = vmatprep.mubr.f32.mxu1 %v21066_v23  ;;  %v21082_v23 = vld [vmem:[#allocation37_spill] sm:$0xff] }
 0x8ce   :  { %13956 = vmatmul.mubr.f32.gmra.mrb[20].mxu1 %v21067_v30  ;;  %v21083_v30 = vld [vmem:[#allocation40_spill] sm:$0xff] }
 0x8cf   :  { %13958 = vmatprep.mubr.f32.mxu1 %v21068_v16  ;;  %v21084_v16 = vld [vmem:[#allocation39_spill] sm:$0xff] }
 0x8d2   :  { %13959 = vmatmul.mubr.f32.gmra.mrb[22].mxu1 %v21069_v22  ;;  %v21085_v22 = vld [vmem:[#allocation42_spill] sm:$0xff] }
 0x8d3   :  { %13961 = vmatprep.mubr.f32.mxu1 %v21070_v36  ;;  %v21086_v36 = vld [vmem:[#allocation41_spill] sm:$0xff] }
 0x8d6   :  { %13962 = vmatmul.mubr.f32.gmra.mrb[24].mxu1 %v21071_v62  ;;  %v21087_v62 = vld [vmem:[#allocation44_spill] sm:$0xff] }
 0x8d7   :  { %13964 = vmatprep.mubr.f32.mxu1 %v21072_v41  ;;  %v21088_v41 = vld [vmem:[#allocation43_spill] sm:$0xff] }
 0x8da   :  { %13965 = vmatmul.mubr.f32.gmra.mrb[26].mxu1 %v21073_v27  ;;  %v21089_v27 = vld [vmem:[#allocation46_spill] sm:$0xff] }
 0x8db   :  { %13967 = vmatprep.mubr.f32.mxu1 %v21074_v54  ;;  %v21090_v54 = vld [vmem:[#allocation45_spill] sm:$0xff] }
 0x8de   :  { %13968 = vmatmul.mubr.f32.gmra.mrb[28].mxu1 %v21075_v28  ;;  %v21091_v28 = vld [vmem:[#allocation48_spill] sm:$0xff] }
 0x8df   :  { %13970 = vmatprep.mubr.f32.mxu1 %v19111_v49 }
 0x8e2   :  { %13971 = vmatmul.mubr.f32.gmra.mrb[30].mxu1 %v19114_v32 }
 0x8e3   :  { %13973 = vmatprep.mubr.f32.mxu1 %v21076_v40  ;;  %v21092_v40 = vld [vmem:[#allocation47_spill] sm:$0xff] }
 0x8e6   :  { %13974 = vmatmul.mubr.f32.gmra.mrb[32].mxu1 %v21077_v9  ;;  %v21093_v9 = vld [vmem:[#allocation49_spill] sm:$0xff] }
 0x8e7   :  { %13976 = vmatprep.mubr.f32.mxu1 %v21078_v45  ;;  %v21094_v45 = vld [vmem:[#allocation51_spill] sm:$0xff] }
 0x8ea   :  { %13977 = vmatmul.mubr.f32.gmra.mrb[34].mxu1 %v21079_v24  ;;  %v21095_v24 = vld [vmem:[#allocation52_spill] sm:$0xff] }
 0x8eb   :  { %13979 = vmatprep.mubr.f32.mxu1 %v21080_v50  ;;  %v21096_v50 = vld [vmem:[#allocation53_spill] sm:$0xff] }
 0x8ee   :  { %13980 = vmatmul.mubr.f32.gmra.mrb[36].mxu1 %v21081_v17  ;;  %v21097_v17 = vld [vmem:[#allocation54_spill] sm:$0xff] }
 0x8ef   :  { %13982 = vmatprep.mubr.f32.mxu1 %v21082_v23  ;;  %v21098_v23 = vld [vmem:[#allocation55_spill] sm:$0xff] }
 0x8f2   :  { %13983 = vmatmul.mubr.f32.gmra.mrb[38].mxu1 %v21083_v30  ;;  %v21099_v30 = vld [vmem:[#allocation56_spill] sm:$0xff] }
 0x8f3   :  { %13985 = vmatprep.mubr.f32.mxu1 %v21084_v16  ;;  %v21100_v16 = vld [vmem:[#allocation58_spill] sm:$0xff] }
 0x8f6   :  { %13986 = vmatmul.mubr.f32.gmra.mrb[40].mxu1 %v21085_v22  ;;  %v21101_v22 = vld [vmem:[#allocation59_spill] sm:$0xff] }
 0x8f7   :  { %13988 = vmatprep.mubr.f32.mxu1 %v21086_v36  ;;  %v21102_v36 = vld [vmem:[#allocation61_spill] sm:$0xff] }
 0x8fa   :  { %13989 = vmatmul.mubr.f32.gmra.mrb[42].mxu1 %v21087_v62  ;;  %v21103_v62 = vld [vmem:[#allocation62_spill] sm:$0xff] }
 0x8fb   :  { %13991 = vmatprep.mubr.f32.mxu1 %v21088_v41  ;;  %v21104_v41 = vld [vmem:[#allocation63_spill] sm:$0xff] }
 0x8fe   :  { %13992 = vmatmul.mubr.f32.gmra.mrb[44].mxu1 %v21089_v27  ;;  %v19147_v27 = vld [vmem:[#allocation2 + $0x449] sm:$0xff] }
 0x8ff   :  { %13994 = vmatprep.mubr.f32.mxu1 %v21090_v54  ;;  %v19150_v54 = vld [vmem:[#allocation2 + $0x451] sm:$0xff] }
 0x902   :  { %13995 = vmatmul.mubr.f32.gmra.mrb[46].mxu1 %v21091_v28  ;;  %v326_v28 = vld [vmem:[#allocation8 + $0x390] sm:$0xff] }
 0x903   :  { %13997 = vmatprep.mubr.f32.mxu1 %v21092_v40  ;;  %v327_v40 = vld [vmem:[#allocation8 + $0x398] sm:$0xff] }
 0x906   :  { %13998 = vmatmul.mubr.f32.gmra.mrb[48].mxu1 %v21093_v9  ;;  %v8497_v9 = vld [vmem:[#allocation2 + $0x47] sm:$0xff] }
 0x907   :  { %14000 = vmatprep.mubr.f32.mxu1 %v21094_v45  ;;  %v14921_v45 = vpack.c.bf16 %v327_v40, %v326_v28  ;;  %v332_v28 = vld [vmem:[#allocation8 + $0x3c0] sm:$0xff]  ;;  %v333_v40 = vld [vmem:[#allocation8 + $0x3c8] sm:$0xff] }
 0x90a   :  { %14001 = vmatmul.mubr.f32.gmra.mrb[50].mxu1 %v21095_v24  ;;  %v8498_v24 = vld [vmem:[#allocation2 + $0x4f] sm:$0xff] }
 0x90b   :  { %14003 = vmatprep.mubr.f32.mxu1 %v21096_v50  ;;  %v328_v50 = vld [vmem:[#allocation8 + $0x3a0] sm:$0xff] }
 0x90e   :  { %14004 = vmatmul.mubr.f32.gmra.mrb[52].mxu1 %v21097_v17  ;;  %v329_v17 = vld [vmem:[#allocation8 + $0x3a8] sm:$0xff] }
 0x90f   :  { %14006 = vmatprep.mubr.f32.mxu1 %v21098_v23  ;;  %v8499_v23 = vld [vmem:[#allocation2 + $0x67] sm:$0xff] }
 0x912   :  { %14007 = vmatmul.mubr.f32.gmra.mrb[54].mxu1 %v21099_v30  ;;  %v8500_v30 = vld [vmem:[#allocation2 + $0x6f] sm:$0xff] }
 0x913   :  { %14009 = vmatprep.mubr.f32.mxu1 %v21100_v16  ;;  %v330_v16 = vld [vmem:[#allocation8 + $0x3b0] sm:$0xff] }
 0x916   :  { %14010 = vmatmul.mubr.f32.gmra.mrb[56].mxu1 %v21101_v22  ;;  %v331_v22 = vld [vmem:[#allocation8 + $0x3b8] sm:$0xff] }
 0x917   :  { %14012 = vmatprep.mubr.f32.mxu1 %v21102_v36  ;;  %v8501_v36 = vld [vmem:[#allocation2 + $0x87] sm:$0xff] }
 0x91a   :  { %14013 = vmatmul.mubr.f32.gmra.mrb[58].mxu1 %v21103_v62  ;;  %v14929_v62 = vpack.c.bf16 %v331_v22, %v330_v16  ;;  %v336_v16 = vld [vmem:[#allocation8 + $0x3e0] sm:$0xff]  ;;  %v337_v22 = vld [vmem:[#allocation8 + $0x3e8] sm:$0xff] }
 0x91b   :  { %14015 = vmatprep.mubr.f32.mxu1 %v21104_v41  ;;  %v8502_v41 = vld [vmem:[#allocation2 + $0x8f] sm:$0xff] }
 0x91e   :  { %14016 = vmatmul.mubr.f32.gmra.mrb[60].mxu1 %v18814_v57  ;;  %v14925_v57 = vpack.c.bf16 %v329_v17, %v328_v50  ;;  %v334_v50 = vld [vmem:[#allocation8 + $0x3d0] sm:$0xff]  ;;  %v335_v17 = vld [vmem:[#allocation8 + $0x3d8] sm:$0xff] }
 0x91f   :  { %14018 = vmatprep.mubr.f32.mxu1 %v19147_v27 }
 0x922   :  { %14019 = vmatmul.mubr.f32.gmra.mrb[62].mxu1 %v19150_v54 }
 0x923   :  { %14053 = vmatprep.mubr.f32.mxu1 %v8497_v9  ;;  %v8503_v9 = vld [vmem:[#allocation2 + $0xa7] sm:$0xff] }
 0x926   :  { %14054 = vmatmul.mubr.f32.vlgmr.msra.gmra.mrb[0].mxu1 %v8498_v24  ;;  %v8504_v24 = vld [vmem:[#allocation2 + $0xaf] sm:$0xff] }
 0x927   :  { %14056 = vmatprep.mubr.f32.mxu1 %v8499_v23  ;;  %14920 = vmatpush3.bf16.msra.mxu1 %v19093_v61  ;;  %v14933_v61 = vpack.c.bf16 %v333_v40, %v332_v28  ;;  %v8505_v23 = vld [vmem:[#allocation2 + $0xc7] sm:$0xff]  ;;  %v338_v28 = vld [vmem:[#allocation8 + $0x3f0] sm:$0xff]  ;;  %v339_v40 = vld [vmem:[#allocation8 + $0x3f8] sm:$0xff] }
 0x928   :  { %14922 = vmatprep.subr.bf16.mxu1 %v14921_v45 }
 0x92a   :  { %14057 = vmatmul.mubr.f32.gmra.mrb[2].mxu1 %v8500_v30  ;;  %v8506_v30 = vld [vmem:[#allocation2 + $0xcf] sm:$0xff] }
 0x92b   :  { %14059 = vmatprep.mubr.f32.mxu1 %v8501_v36  ;;  %14924 = vmatpush3.bf16.msra.mxu1 %v14921_v45  ;;  %v14937_v45 = vpack.c.bf16 %v335_v17, %v334_v50  ;;  %v8507_v36 = vld [vmem:[#allocation2 + $0xe7] sm:$0xff] }
 0x92c   :  { %14926 = vmatprep.subr.bf16.mxu1 %v14925_v57  ;;  %v340_v50 = vld [vmem:[#allocation8 + $0x400] sm:$0xff]  ;;  %v341_v17 = vld [vmem:[#allocation8 + $0x408] sm:$0xff] }
 0x92e   :  { %14060 = vmatmul.mubr.f32.gmra.mrb[4].mxu1 %v8502_v41  ;;  %v8508_v41 = vld [vmem:[#allocation2 + $0xef] sm:$0xff] }
 0x92f   :  { %14062 = vmatprep.mubr.f32.mxu1 %v8503_v9  ;;  %14928 = vmatpush3.bf16.msra.mxu1 %v14925_v57  ;;  %v14941_v57 = vpack.c.bf16 %v337_v22, %v336_v16  ;;  %v8509_v9 = vld [vmem:[#allocation2 + $0x107] sm:$0xff] }
 0x930   :  { %14930 = vmatprep.subr.bf16.mxu1 %v14929_v62  ;;  %v8513_v16 = vld [vmem:[#allocation2 + $0x147] sm:$0xff] }
 0x931   :  { %v8515_v22 = vld [vmem:[#allocation2 + $0x167] sm:$0xff] }
 0x932   :  { %14063 = vmatmul.mubr.f32.gmra.mrb[6].mxu1 %v8504_v24  ;;  %v8510_v24 = vld [vmem:[#allocation2 + $0x10f] sm:$0xff] }
 0x933   :  { %14065 = vmatprep.mubr.f32.mxu1 %v8505_v23  ;;  %14932 = vmatpush3.bf16.msra.mxu1 %v14929_v62  ;;  %v14945_v62 = vpack.c.bf16 %v339_v40, %v338_v28  ;;  %v8511_v23 = vld [vmem:[#allocation2 + $0x127] sm:$0xff]  ;;  %v8518_v28 = vld [vmem:[#allocation2 + $0x18f] sm:$0xff] }
 0x934   :  { %14934 = vmatprep.subr.bf16.mxu1 %v14933_v61  ;;  %v8520_v40 = vld [vmem:[#allocation2 + $0x1af] sm:$0xff] }
 0x936   :  { %14066 = vmatmul.mubr.f32.gmra.mrb[8].mxu1 %v8506_v30  ;;  %v8512_v30 = vld [vmem:[#allocation2 + $0x12f] sm:$0xff] }
 0x937   :  { %14068 = vmatprep.mubr.f32.mxu1 %v8507_v36  ;;  %14936 = vmatpush3.bf16.msra.mxu1 %v14933_v61  ;;  %v19154_v61 = vpack.c.bf16 %v341_v17, %v340_v50  ;;  %v8516_v36 = vld [vmem:[#allocation2 + $0x16f] sm:$0xff]  ;;  %v8527_v17 = vld [vmem:[#allocation2 + $0x227] sm:$0xff] }
 0x938   :  { %14938 = vmatprep.subr.bf16.mxu1 %v14937_v45  ;;  %v8524_v50 = vld [vmem:[#allocation2 + $0x1ef] sm:$0xff] }
 0x93a   :  { %14069 = vmatmul.mubr.f32.gmra.mrb[10].mxu1 %v8508_v41  ;;  %v8517_v41 = vld [vmem:[#allocation2 + $0x187] sm:$0xff] }
 0x93b   :  { %14071 = vmatprep.mubr.f32.mxu1 %v8509_v9  ;;  %14940 = vmatpush3.bf16.msra.mxu1 %v14937_v45  ;;  %v8514_v45 = vld [vmem:[#allocation2 + $0x14f] sm:$0xff]  ;;  %v8521_v9 = vld [vmem:[#allocation2 + $0x1c7] sm:$0xff] }
 0x93c   :  { %14942 = vmatprep.subr.bf16.mxu1 %v14941_v57 }
 0x93e   :  { %14072 = vmatmul.mubr.f32.gmra.mrb[12].mxu1 %v8510_v24  ;;  %v8522_v24 = vld [vmem:[#allocation2 + $0x1cf] sm:$0xff] }
 0x93f   :  { %14074 = vmatprep.mubr.f32.mxu1 %v8511_v23  ;;  %14944 = vmatpush3.bf16.msra.mxu1 %v14941_v57  ;;  %v8519_v57 = vld [vmem:[#allocation2 + $0x1a7] sm:$0xff]  ;;  %v8528_v23 = vld [vmem:[#allocation2 + $0x22f] sm:$0xff] }
 0x940   :  { %14946 = vmatprep.subr.bf16.mxu1 %v14945_v62 }
 0x942   :  { %14075 = vmatmul.mubr.f32.gmra.mrb[14].mxu1 %v8512_v30  ;;  %v8529_v30 = vld [vmem:[#allocation2 + $0x287] sm:$0xff] }
 0x943   :  { %14077 = vmatprep.mubr.f32.mxu1 %v8513_v16  ;;  %14948 = vmatpush3.bf16.msra.mxu1 %v14945_v62  ;;  %v8523_v62 = vld [vmem:[#allocation2 + $0x1e7] sm:$0xff]  ;;  %v8530_v16 = vld [vmem:[#allocation2 + $0x28f] sm:$0xff] }
 0x944   :  { %14950 = vmatprep.subr.bf16.mxu1 %v19154_v61 }
 0x946   :  { %14078 = vmatmul.mubr.f32.gmra.mrb[16].mxu1 %v8514_v45  ;;  %v8531_v45 = vld [vmem:[#allocation2 + $0x2a7] sm:$0xff] }
 0x947   :  { %14080 = vmatprep.mubr.f32.mxu1 %v8515_v22  ;;  %v8532_v22 = vld [vmem:[#allocation2 + $0x2af] sm:$0xff] }
 0x94a   :  { %14081 = vmatmul.mubr.f32.gmra.mrb[18].mxu1 %v8516_v36  ;;  %v8533_v36 = vld [vmem:[#allocation2 + $0x2c7] sm:$0xff] }
 0x94b   :  { %14083 = vmatprep.mubr.f32.mxu1 %v8517_v41  ;;  %v8534_v41 = vld [vmem:[#allocation2 + $0x2cf] sm:$0xff] }
 0x94e   :  { %14084 = vmatmul.mubr.f32.gmra.mrb[20].mxu1 %v8518_v28  ;;  %v8535_v28 = vld [vmem:[#allocation2 + $0x2e7] sm:$0xff] }
 0x94f   :  { %14086 = vmatprep.mubr.f32.mxu1 %v8519_v57  ;;  %v8538_v57 = vld [vmem:[#allocation2 + $0x30f] sm:$0xff] }
 0x952   :  { %14087 = vmatmul.mubr.f32.gmra.mrb[22].mxu1 %v8520_v40  ;;  %v8539_v40 = vld [vmem:[#allocation2 + $0x327] sm:$0xff] }
 0x953   :  { %14089 = vmatprep.mubr.f32.mxu1 %v8521_v9  ;;  %v8540_v9 = vld [vmem:[#allocation2 + $0x32f] sm:$0xff] }
 0x956   :  { %14090 = vmatmul.mubr.f32.gmra.mrb[24].mxu1 %v8522_v24  ;;  %v8541_v24 = vld [vmem:[#allocation2 + $0x347] sm:$0xff] }
 0x957   :  { %14092 = vmatprep.mubr.f32.mxu1 %v8523_v62  ;;  %v8542_v62 = vld [vmem:[#allocation2 + $0x34f] sm:$0xff] }
 0x95a   :  { %14093 = vmatmul.mubr.f32.gmra.mrb[26].mxu1 %v8524_v50  ;;  %v8543_v50 = vld [vmem:[#allocation2 + $0x367] sm:$0xff] }
 0x95b   :  { %14095 = vmatprep.mubr.f32.mxu1 %v18851_v53  ;;  %v8536_v53 = vld [vmem:[#allocation2 + $0x2ef] sm:$0xff] }
 0x95e   :  { %14096 = vmatmul.mubr.f32.gmra.mrb[28].mxu1 %v18854_v1  ;;  %v8537_v1 = vld [vmem:[#allocation2 + $0x307] sm:$0xff] }
 0x95f   :  { %14098 = vmatprep.mubr.f32.mxu1 %v8527_v17  ;;  %v8544_v17 = vld [vmem:[#allocation2 + $0x36f] sm:$0xff] }
 0x962   :  { %14099 = vmatmul.mubr.f32.gmra.mrb[30].mxu1 %v8528_v23  ;;  %v8545_v23 = vld [vmem:[#allocation2 + $0x387] sm:$0xff] }
 0x963   :  { %14101 = vmatprep.mubr.f32.mxu1 %v8529_v30  ;;  %v8546_v30 = vld [vmem:[#allocation2 + $0x38f] sm:$0xff] }
 0x966   :  { %14102 = vmatmul.mubr.f32.gmra.mrb[32].mxu1 %v8530_v16  ;;  %v8547_v16 = vld [vmem:[#allocation2 + $0x3a7] sm:$0xff] }
 0x967   :  { %14104 = vmatprep.mubr.f32.mxu1 %v8531_v45  ;;  %v8548_v45 = vld [vmem:[#allocation2 + $0x3af] sm:$0xff] }
 0x96a   :  { %14105 = vmatmul.mubr.f32.gmra.mrb[34].mxu1 %v8532_v22  ;;  %v8549_v22 = vld [vmem:[#allocation2 + $0x3c7] sm:$0xff] }
 0x96b   :  { %14107 = vmatprep.mubr.f32.mxu1 %v8533_v36  ;;  %v8550_v36 = vld [vmem:[#allocation2 + $0x3cf] sm:$0xff] }
 0x96e   :  { %14108 = vmatmul.mubr.f32.gmra.mrb[36].mxu1 %v8534_v41  ;;  %v8551_v41 = vld [vmem:[#allocation2 + $0x3e7] sm:$0xff] }
 0x96f   :  { %14110 = vmatprep.mubr.f32.mxu1 %v8535_v28  ;;  %v8552_v28 = vld [vmem:[#allocation2 + $0x3ef] sm:$0xff] }
 0x972   :  { %14111 = vmatmul.mubr.f32.gmra.mrb[38].mxu1 %v8536_v53  ;;  %v8553_v53 = vld [vmem:[#allocation2 + $0x407] sm:$0xff] }
 0x973   :  { %14113 = vmatprep.mubr.f32.mxu1 %v8537_v1  ;;  %v8554_v1 = vld [vmem:[#allocation2 + $0x40f] sm:$0xff] }
 0x976   :  { %14114 = vmatmul.mubr.f32.gmra.mrb[40].mxu1 %v8538_v57  ;;  %v8555_v57 = vld [vmem:[#allocation2 + $0x427] sm:$0xff] }
 0x977   :  { %14116 = vmatprep.mubr.f32.mxu1 %v8539_v40  ;;  %v8556_v40 = vld [vmem:[#allocation2 + $0x42f] sm:$0xff] }
 0x97a   :  { %14117 = vmatmul.mubr.f32.gmra.mrb[42].mxu1 %v8540_v9  ;;  %v8559_v9 = vld [vmem:[#allocation2 + $0x467] sm:$0xff] }
 0x97b   :  { %14119 = vmatprep.mubr.f32.mxu1 %v8541_v24  ;;  %v8560_v24 = vld [vmem:[#allocation2 + $0x46f] sm:$0xff] }
 0x97e   :  { %14120 = vmatmul.mubr.f32.gmra.mrb[44].mxu1 %v8542_v62  ;;  %v342_v62 = vld [vmem:[#allocation8 + $0x410] sm:$0xff] }
 0x97f   :  { %14122 = vmatprep.mubr.f32.mxu1 %v8543_v50  ;;  %v343_v50 = vld [vmem:[#allocation8 + $0x418] sm:$0xff] }
 0x982   :  { %14123 = vmatmul.mubr.f32.gmra.mrb[46].mxu1 %v8544_v17  ;;  %v14953_v17 = vpack.c.bf16 %v343_v50, %v342_v62  ;;  %v9541_v62 = vld [vmem:[#allocation2 + $0x169] sm:$0xff]  ;;  %v9542_v50 = vld [vmem:[#allocation2 + $0x171] sm:$0xff] }
 0x983   :  { %14125 = vmatprep.mubr.f32.mxu1 %v8545_v23  ;;  %v344_v23 = vld [vmem:[#allocation8 + $0x420] sm:$0xff] }
 0x986   :  { %14126 = vmatmul.mubr.f32.gmra.mrb[48].mxu1 %v8546_v30  ;;  %v345_v30 = vld [vmem:[#allocation8 + $0x428] sm:$0xff] }
 0x987   :  { %14128 = vmatprep.mubr.f32.mxu1 %v8547_v16  ;;  %v346_v16 = vld [vmem:[#allocation8 + $0x430] sm:$0xff] }
 0x98a   :  { %14129 = vmatmul.mubr.f32.gmra.mrb[50].mxu1 %v8548_v45  ;;  %v348_v45 = vld [vmem:[#allocation8 + $0x440] sm:$0xff] }
 0x98b   :  { %14131 = vmatprep.mubr.f32.mxu1 %v8549_v22  ;;  %v349_v22 = vld [vmem:[#allocation8 + $0x448] sm:$0xff] }
 0x98e   :  { %14132 = vmatmul.mubr.f32.gmra.mrb[52].mxu1 %v8550_v36  ;;  %v353_v36 = vld [vmem:[#allocation8 + $0x468] sm:$0xff] }
 0x98f   :  { %14134 = vmatprep.mubr.f32.mxu1 %v8551_v41  ;;  %v355_v41 = vld [vmem:[#allocation8 + $0x478] sm:$0xff] }
 0x992   :  { %14135 = vmatmul.mubr.f32.gmra.mrb[54].mxu1 %v8552_v28  ;;  %v9534_v28 = vld [vmem:[#allocation2 + $0xf1] sm:$0xff] }
 0x993   :  { %14137 = vmatprep.mubr.f32.mxu1 %v8553_v53  ;;  %v9535_v53 = vld [vmem:[#allocation2 + $0x109] sm:$0xff] }
 0x996   :  { %14138 = vmatmul.mubr.f32.gmra.mrb[56].mxu1 %v8554_v1  ;;  %v9536_v1 = vld [vmem:[#allocation2 + $0x111] sm:$0xff] }
 0x997   :  { %14140 = vmatprep.mubr.f32.mxu1 %v8555_v57  ;;  %v9537_v57 = vld [vmem:[#allocation2 + $0x129] sm:$0xff] }
 0x99a   :  { %14141 = vmatmul.mubr.f32.gmra.mrb[58].mxu1 %v8556_v40  ;;  %v9538_v40 = vld [vmem:[#allocation2 + $0x131] sm:$0xff] }
 0x99b   :  { %14143 = vmatprep.mubr.f32.mxu1 %v18887_v26  ;;  %v14957_v26 = vpack.c.bf16 %v345_v30, %v344_v23  ;;  %v9544_v23 = vld [vmem:[#allocation2 + $0x191] sm:$0xff]  ;;  %v9545_v30 = vld [vmem:[#allocation2 + $0x1a9] sm:$0xff] }
 0x99e   :  { %14144 = vmatmul.mubr.f32.gmra.mrb[60].mxu1 %v18890_v37  ;;  %v347_v37 = vld [vmem:[#allocation8 + $0x438] sm:$0xff] }
 0x99f   :  { %14146 = vmatprep.mubr.f32.mxu1 %v8559_v9  ;;  %v9539_v9 = vld [vmem:[#allocation2 + $0x149] sm:$0xff] }
 0x9a2   :  { %14147 = vmatmul.mubr.f32.gmra.mrb[62].mxu1 %v8560_v24  ;;  %v9540_v24 = vld [vmem:[#allocation2 + $0x151] sm:$0xff] }
 0x9a3   :  { %14181 = vmatprep.mubr.f32.mxu1 %v18893_v34  ;;  %v14961_v34 = vpack.c.bf16 %v347_v37, %v346_v16  ;;  %v9547_v16 = vld [vmem:[#allocation2 + $0x1c9] sm:$0xff]  ;;  %v9548_v37 = vld [vmem:[#allocation2 + $0x1d1] sm:$0xff] }
 0x9a6   :  { %14182 = vmatmul.mubr.f32.vlgmr.msra.gmra.mrb[0].mxu1 %v18897_v7  ;;  %v14965_v7 = vpack.c.bf16 %v349_v22, %v348_v45  ;;  %v9550_v45 = vld [vmem:[#allocation2 + $0x1f1] sm:$0xff]  ;;  %v9553_v22 = vld [vmem:[#allocation2 + $0x229] sm:$0xff] }
 0x9a7   :  { %14184 = vmatprep.mubr.f32.mxu1 %v18900_v48  ;;  %14952 = vmatpush3.bf16.msra.mxu1 %v19154_v61  ;;  %v350_v48 = vld [vmem:[#allocation8 + $0x450] sm:$0xff]  ;;  %v351_v61 = vld [vmem:[#allocation8 + $0x458] sm:$0xff] }
 0x9a8   :  { %14954 = vmatprep.subr.bf16.mxu1 %v14953_v17 }
 0x9aa   :  { %14185 = vmatmul.mubr.f32.gmra.mrb[2].mxu1 %v18903_v44  ;;  %v14969_v44 = vpack.c.bf16 %v351_v61, %v350_v48  ;;  %v9555_v48 = vld [vmem:[#allocation2 + $0x289] sm:$0xff]  ;;  %v9556_v61 = vld [vmem:[#allocation2 + $0x291] sm:$0xff] }
 0x9ab   :  { %14187 = vmatprep.mubr.f32.mxu1 %v18906_v63  ;;  %14956 = vmatpush3.bf16.msra.mxu1 %v14953_v17  ;;  %v352_v63 = vld [vmem:[#allocation8 + $0x460] sm:$0xff]  ;;  %v9543_v17 = vld [vmem:[#allocation2 + $0x189] sm:$0xff] }
 0x9ac   :  { %14958 = vmatprep.subr.bf16.mxu1 %v14957_v26 }
 0x9ae   :  { %14188 = vmatmul.mubr.f32.gmra.mrb[4].mxu1 %v18909_v21  ;;  %v14973_v21 = vpack.c.bf16 %v353_v36, %v352_v63  ;;  %v9558_v63 = vld [vmem:[#allocation2 + $0x2b1] sm:$0xff]  ;;  %v9559_v36 = vld [vmem:[#allocation2 + $0x2c9] sm:$0xff] }
 0x9af   :  { %14190 = vmatprep.mubr.f32.mxu1 %v18912_v5  ;;  %14960 = vmatpush3.bf16.msra.mxu1 %v14957_v26  ;;  %v354_v5 = vld [vmem:[#allocation8 + $0x470] sm:$0xff] }
 0x9b0   :  { %14962 = vmatprep.subr.bf16.mxu1 %v14961_v34  ;;  %v9546_v26 = vld [vmem:[#allocation2 + $0x1b1] sm:$0xff] }
 0x9b2   :  { %14191 = vmatmul.mubr.f32.gmra.mrb[6].mxu1 %v18915_v47  ;;  %v14977_v47 = vpack.c.bf16 %v355_v41, %v354_v5  ;;  %v9561_v5 = vld [vmem:[#allocation2 + $0x2e9] sm:$0xff]  ;;  %v9564_v41 = vld [vmem:[#allocation2 + $0x311] sm:$0xff] }
 0x9b3   :  { %14193 = vmatprep.mubr.f32.mxu1 %v18918_v12  ;;  %14964 = vmatpush3.bf16.msra.mxu1 %v14961_v34  ;;  %v16018_v12 = vld [vmem:[#allocation2 + $0x8] sm:$0xff] }
 0x9b4   :  { %14966 = vmatprep.subr.bf16.mxu1 %v14965_v7  ;;  %v9549_v34 = vld [vmem:[#allocation2 + $0x1e9] sm:$0xff] }
 0x9b6   :  { %14194 = vmatmul.mubr.f32.gmra.mrb[8].mxu1 %v18921_v25  ;;  %v21105_v25 = vld [vmem:[#allocation64_spill] sm:$0xff] }
 0x9b7   :  { %14196 = vmatprep.mubr.f32.mxu1 %v18924_v6  ;;  %14968 = vmatpush3.bf16.msra.mxu1 %v14965_v7  ;;  %v21106_v6 = vld [vmem:[#allocation65_spill] sm:$0xff]  ;;  %v9554_v7 = vld [vmem:[#allocation2 + $0x231] sm:$0xff] }
 0x9b8   :  { %14970 = vmatprep.subr.bf16.mxu1 %v14969_v44 }
 0x9ba   :  { %14197 = vmatmul.mubr.f32.gmra.mrb[10].mxu1 %v18927_v15  ;;  %v21107_v15 = vld [vmem:[#allocation66_spill] sm:$0xff] }
 0x9bb   :  { %14199 = vmatprep.mubr.f32.mxu1 %v18930_v11  ;;  %14972 = vmatpush3.bf16.msra.mxu1 %v14969_v44  ;;  %v21108_v11 = vld [vmem:[#allocation67_spill] sm:$0xff] }
 0x9bc   :  { %14974 = vmatprep.subr.bf16.mxu1 %v14973_v21  ;;  %v9557_v44 = vld [vmem:[#allocation2 + $0x2a9] sm:$0xff] }
 0x9be   :  { %14200 = vmatmul.mubr.f32.gmra.mrb[12].mxu1 %v18935_v29  ;;  %v21109_v29 = vld [vmem:[#allocation57_spill] sm:$0xff] }
 0x9bf   :  { %14202 = vmatprep.mubr.f32.mxu1 %v18938_v13  ;;  %14976 = vmatpush3.bf16.msra.mxu1 %v14973_v21  ;;  %v21110_v13 = vld [vmem:[#allocation60_spill] sm:$0xff] }
 0x9c0   :  { %14978 = vmatprep.subr.bf16.mxu1 %v14977_v47  ;;  %v9560_v21 = vld [vmem:[#allocation2 + $0x2d1] sm:$0xff] }
 0x9c2   :  { %14203 = vmatmul.mubr.f32.gmra.mrb[14].mxu1 %v18942_v60  ;;  %v21111_v60 = vld [vmem:[#allocation68_spill] sm:$0xff] }
 0x9c3   :  { %14205 = vmatprep.mubr.f32.mxu1 %v18945_v18  ;;  %14980 = vmatpush3.bf16.msra.mxu1 %v14977_v47  ;;  %v21112_v18 = vld [vmem:[#allocation69_spill] sm:$0xff]  ;;  %v9565_v47 = vld [vmem:[#allocation2 + $0x329] sm:$0xff] }
 0x9c6   :  { %14206 = vmatmul.mubr.f32.gmra.mrb[16].mxu1 %v18948_v39  ;;  %v21113_v39 = vld [vmem:[#allocation70_spill] sm:$0xff] }
 0x9c7   :  { %14208 = vmatprep.mubr.f32.mxu1 %v18951_v31  ;;  %v21114_v31 = vld [vmem:[#allocation71_spill] sm:$0xff] }
 0x9ca   :  { %14209 = vmatmul.mubr.f32.gmra.mrb[18].mxu1 %v18954_v59  ;;  %v21115_v59 = vld [vmem:[#allocation72_spill] sm:$0xff] }
 0x9cb   :  { %14211 = vmatprep.mubr.f32.mxu1 %v18957_v35  ;;  %v21116_v35 = vld [vmem:[#allocation73_spill] sm:$0xff] }
 0x9ce   :  { %14212 = vmatmul.mubr.f32.gmra.mrb[20].mxu1 %v18960_v33  ;;  %v21117_v33 = vld [vmem:[#allocation74_spill] sm:$0xff] }
 0x9cf   :  { %14214 = vmatprep.mubr.f32.mxu1 %v18963_v38  ;;  %v21118_v38 = vld [vmem:[#allocation75_spill] sm:$0xff] }
 0x9d2   :  { %14215 = vmatmul.mubr.f32.gmra.mrb[22].mxu1 %v18966_v10  ;;  %v21119_v10 = vld [vmem:[#allocation76_spill] sm:$0xff] }
 0x9d3   :  { %14217 = vmatprep.mubr.f32.mxu1 %v18969_v0  ;;  %v21120_v0 = vld [vmem:[#allocation85_spill] sm:$0xff] }
 0x9d6   :  { %14218 = vmatmul.mubr.f32.gmra.mrb[24].mxu1 %v18972_v43  ;;  %v21121_v43 = vld [vmem:[#allocation86_spill] sm:$0xff] }
 0x9d7   :  { %14220 = vmatprep.mubr.f32.mxu1 %v18975_v2  ;;  %v21122_v2 = vld [vmem:[#allocation87_spill] sm:$0xff] }
 0x9da   :  { %14221 = vmatmul.mubr.f32.gmra.mrb[26].mxu1 %v18978_v8  ;;  %v21123_v8 = vld [vmem:[#allocation88_spill] sm:$0xff] }
 0x9db   :  { %14223 = vmatprep.mubr.f32.mxu1 %v18981_v58  ;;  %v21124_v58 = vld [vmem:[#allocation89_spill] sm:$0xff] }
 0x9de   :  { %14224 = vmatmul.mubr.f32.gmra.mrb[28].mxu1 %v18984_v52  ;;  %v9523_v52 = vld [vmem:[#allocation2 + $0x49] sm:$0xff] }
 0x9df   :  { %14226 = vmatprep.mubr.f32.mxu1 %v16018_v12 }
 0x9e2   :  { %14227 = vmatmul.mubr.f32.gmra.mrb[30].mxu1 %v16018_v12 }
 0x9e3   :  { %14229 = vmatprep.mubr.f32.mxu1 %v18987_v55  ;;  %v9524_v55 = vld [vmem:[#allocation2 + $0x51] sm:$0xff] }
 0x9e6   :  { %14230 = vmatmul.mubr.f32.gmra.mrb[32].mxu1 %v18990_v4  ;;  %v9525_v4 = vld [vmem:[#allocation2 + $0x69] sm:$0xff] }
 0x9e7   :  { %14232 = vmatprep.mubr.f32.mxu1 %v18993_v56  ;;  %v9526_v56 = vld [vmem:[#allocation2 + $0x71] sm:$0xff] }
 0x9ea   :  { %14233 = vmatmul.mubr.f32.gmra.mrb[34].mxu1 %v18996_v46  ;;  %v9527_v46 = vld [vmem:[#allocation2 + $0x89] sm:$0xff] }
 0x9eb   :  { %14235 = vmatprep.mubr.f32.mxu1 %v18999_v3  ;;  %v9528_v3 = vld [vmem:[#allocation2 + $0x91] sm:$0xff] }
 0x9ee   :  { %14236 = vmatmul.mubr.f32.gmra.mrb[36].mxu1 %v19002_v42  ;;  %v9529_v42 = vld [vmem:[#allocation2 + $0xa9] sm:$0xff] }
 0x9ef   :  { %14238 = vmatprep.mubr.f32.mxu1 %v19005_v19  ;;  %v9530_v19 = vld [vmem:[#allocation2 + $0xb1] sm:$0xff] }
 0x9f2   :  { %14239 = vmatmul.mubr.f32.gmra.mrb[38].mxu1 %v19008_v14  ;;  %v9531_v14 = vld [vmem:[#allocation2 + $0xc9] sm:$0xff] }
 0x9f3   :  { %14241 = vmatprep.mubr.f32.mxu1 %v19011_v20  ;;  %v9532_v20 = vld [vmem:[#allocation2 + $0xd1] sm:$0xff] }
 0x9f6   :  { %14242 = vmatmul.mubr.f32.gmra.mrb[40].mxu1 %v19014_v51  ;;  %v9533_v51 = vld [vmem:[#allocation2 + $0xe9] sm:$0xff] }
 0x9f7   :  { %14244 = vmatprep.mubr.f32.mxu1 %v21105_v25  ;;  %v9567_v25 = vld [vmem:[#allocation2 + $0x349] sm:$0xff] }
 0x9fa   :  { %14245 = vmatmul.mubr.f32.gmra.mrb[42].mxu1 %v21106_v6  ;;  %v9568_v6 = vld [vmem:[#allocation2 + $0x351] sm:$0xff] }
 0x9fb   :  { %14247 = vmatprep.mubr.f32.mxu1 %v21107_v15  ;;  %v9569_v15 = vld [vmem:[#allocation2 + $0x369] sm:$0xff] }
 0x9fe   :  { %14248 = vmatmul.mubr.f32.gmra.mrb[44].mxu1 %v21108_v11  ;;  %v9570_v11 = vld [vmem:[#allocation2 + $0x371] sm:$0xff] }
 0x9ff   :  { %14250 = vmatprep.mubr.f32.mxu1 %v21109_v29  ;;  %v9571_v29 = vld [vmem:[#allocation2 + $0x389] sm:$0xff] }
 0xa02   :  { %14251 = vmatmul.mubr.f32.gmra.mrb[46].mxu1 %v21110_v13  ;;  %v9572_v13 = vld [vmem:[#allocation2 + $0x391] sm:$0xff] }
 0xa03   :  { %14253 = vmatprep.mubr.f32.mxu1 %v21111_v60  ;;  %v9573_v60 = vld [vmem:[#allocation2 + $0x3a9] sm:$0xff] }
 0xa06   :  { %14254 = vmatmul.mubr.f32.gmra.mrb[48].mxu1 %v21112_v18  ;;  %v9574_v18 = vld [vmem:[#allocation2 + $0x3b1] sm:$0xff] }
 0xa07   :  { %14256 = vmatprep.mubr.f32.mxu1 %v21113_v39  ;;  %v9575_v39 = vld [vmem:[#allocation2 + $0x3c9] sm:$0xff] }
 0xa0a   :  { %14257 = vmatmul.mubr.f32.gmra.mrb[50].mxu1 %v21114_v31  ;;  %v9576_v31 = vld [vmem:[#allocation2 + $0x3d1] sm:$0xff] }
 0xa0b   :  { %14259 = vmatprep.mubr.f32.mxu1 %v21115_v59  ;;  %v9577_v59 = vld [vmem:[#allocation2 + $0x3e9] sm:$0xff] }
 0xa0e   :  { %14260 = vmatmul.mubr.f32.gmra.mrb[52].mxu1 %v21116_v35  ;;  %v9578_v35 = vld [vmem:[#allocation2 + $0x3f1] sm:$0xff] }
 0xa0f   :  { %14262 = vmatprep.mubr.f32.mxu1 %v21117_v33  ;;  %v9579_v33 = vld [vmem:[#allocation2 + $0x409] sm:$0xff] }
 0xa12   :  { %14263 = vmatmul.mubr.f32.gmra.mrb[54].mxu1 %v21118_v38  ;;  %v9580_v38 = vld [vmem:[#allocation2 + $0x411] sm:$0xff] }
 0xa13   :  { %14265 = vmatprep.mubr.f32.mxu1 %v21119_v10  ;;  %v9581_v10 = vld [vmem:[#allocation2 + $0x429] sm:$0xff] }
 0xa16   :  { %14266 = vmatmul.mubr.f32.gmra.mrb[56].mxu1 %v21120_v0  ;;  %v9582_v0 = vld [vmem:[#allocation2 + $0x431] sm:$0xff] }
 0xa17   :  { %14268 = vmatprep.mubr.f32.mxu1 %v21121_v43  ;;  %v9585_v43 = vld [vmem:[#allocation2 + $0x469] sm:$0xff] }
 0xa1a   :  { %14269 = vmatmul.mubr.f32.gmra.mrb[58].mxu1 %v21122_v2  ;;  %v9586_v2 = vld [vmem:[#allocation2 + $0x471] sm:$0xff] }
 0xa1b   :  { %14271 = vmatprep.mubr.f32.mxu1 %v21123_v8 }
 0xa1e   :  { %14272 = vmatmul.mubr.f32.gmra.mrb[60].mxu1 %v21124_v58 }
 0xa1f   :  { %14274 = vmatprep.mubr.f32.mxu1 %v16018_v12 }
 0xa22   :  { %14275 = vmatmul.mubr.f32.gmra.mrb[62].mxu1 %v16018_v12  ;;  %v9566_v12 = vld [vmem:[#allocation2 + $0x331] sm:$0xff] }
 0xa23   :  { %14309 = vmatprep.mubr.f32.mxu1 %v9523_v52 }
 0xa26   :  { %14310 = vmatmul.mubr.f32.vlgmr.msra.gmra.mrb[0].mxu1 %v9524_v55 }
 0xa27   :  { %14312 = vmatprep.mubr.f32.mxu1 %v9525_v4 }
 0xa2a   :  { %14313 = vmatmul.mubr.f32.gmra.mrb[2].mxu1 %v9526_v56 }
 0xa2b   :  { %14315 = vmatprep.mubr.f32.mxu1 %v9527_v46 }
 0xa2e   :  { %14316 = vmatmul.mubr.f32.gmra.mrb[4].mxu1 %v9528_v3 }
 0xa2f   :  { %14318 = vmatprep.mubr.f32.mxu1 %v9529_v42 }
 0xa32   :  { %14319 = vmatmul.mubr.f32.gmra.mrb[6].mxu1 %v9530_v19 }
 0xa33   :  { %14321 = vmatprep.mubr.f32.mxu1 %v9531_v14 }
 0xa36   :  { %14322 = vmatmul.mubr.f32.gmra.mrb[8].mxu1 %v9532_v20 }
 0xa37   :  { %14324 = vmatprep.mubr.f32.mxu1 %v9533_v51 }
 0xa3a   :  { %14325 = vmatmul.mubr.f32.gmra.mrb[10].mxu1 %v9534_v28 }
 0xa3b   :  { %14327 = vmatprep.mubr.f32.mxu1 %v9535_v53 }
 0xa3e   :  { %14328 = vmatmul.mubr.f32.gmra.mrb[12].mxu1 %v9536_v1 }
 0xa3f   :  { %14330 = vmatprep.mubr.f32.mxu1 %v9537_v57 }
 0xa42   :  { %14331 = vmatmul.mubr.f32.gmra.mrb[14].mxu1 %v9538_v40 }
 0xa43   :  { %14333 = vmatprep.mubr.f32.mxu1 %v9539_v9 }
 0xa46   :  { %14334 = vmatmul.mubr.f32.gmra.mrb[16].mxu1 %v9540_v24 }
 0xa47   :  { %14336 = vmatprep.mubr.f32.mxu1 %v9541_v62 }
 0xa4a   :  { %14337 = vmatmul.mubr.f32.gmra.mrb[18].mxu1 %v9542_v50 }
 0xa4b   :  { %14339 = vmatprep.mubr.f32.mxu1 %v9543_v17 }
 0xa4e   :  { %14340 = vmatmul.mubr.f32.gmra.mrb[20].mxu1 %v9544_v23 }
 0xa4f   :  { %14342 = vmatprep.mubr.f32.mxu1 %v9545_v30 }
 0xa52   :  { %14343 = vmatmul.mubr.f32.gmra.mrb[22].mxu1 %v9546_v26 }
 0xa53   :  { %14345 = vmatprep.mubr.f32.mxu1 %v9547_v16 }
 0xa56   :  { %14346 = vmatmul.mubr.f32.gmra.mrb[24].mxu1 %v9548_v37 }
 0xa57   :  { %14348 = vmatprep.mubr.f32.mxu1 %v9549_v34 }
 0xa5a   :  { %14349 = vmatmul.mubr.f32.gmra.mrb[26].mxu1 %v9550_v45 }
 0xa5b   :  { %14351 = vmatprep.mubr.f32.mxu1 %v19111_v49  ;;  %v9562_v49 = vld [vmem:[#allocation2 + $0x2f1] sm:$0xff] }
 0xa5e   :  { %14352 = vmatmul.mubr.f32.gmra.mrb[28].mxu1 %v19114_v32  ;;  %v9563_v32 = vld [vmem:[#allocation2 + $0x309] sm:$0xff] }
 0xa5f   :  { %14354 = vmatprep.mubr.f32.mxu1 %v9553_v22 }
 0xa62   :  { %14355 = vmatmul.mubr.f32.gmra.mrb[30].mxu1 %v9554_v7 }
 0xa63   :  { %14357 = vmatprep.mubr.f32.mxu1 %v9555_v48 }
 0xa66   :  { %14358 = vmatmul.mubr.f32.gmra.mrb[32].mxu1 %v9556_v61 }
 0xa67   :  { %14360 = vmatprep.mubr.f32.mxu1 %v9557_v44 }
 0xa6a   :  { %14361 = vmatmul.mubr.f32.gmra.mrb[34].mxu1 %v9558_v63 }
 0xa6b   :  { %14363 = vmatprep.mubr.f32.mxu1 %v9559_v36 }
 0xa6e   :  { %14364 = vmatmul.mubr.f32.gmra.mrb[36].mxu1 %v9560_v21 }
 0xa6f   :  { %14366 = vmatprep.mubr.f32.mxu1 %v9561_v5 }
 0xa72   :  { %14367 = vmatmul.mubr.f32.gmra.mrb[38].mxu1 %v9562_v49 }
 0xa73   :  { %14369 = vmatprep.mubr.f32.mxu1 %v9563_v32 }
 0xa76   :  { %14370 = vmatmul.mubr.f32.gmra.mrb[40].mxu1 %v9564_v41 }
 0xa77   :  { %14372 = vmatprep.mubr.f32.mxu1 %v9565_v47 }
 0xa7a   :  { %14373 = vmatmul.mubr.f32.gmra.mrb[42].mxu1 %v9566_v12 }
 0xa7b   :  { %14375 = vmatprep.mubr.f32.mxu1 %v9567_v25 }
 0xa7e   :  { %14376 = vmatmul.mubr.f32.gmra.mrb[44].mxu1 %v9568_v6 }
 0xa7f   :  { %14378 = vmatprep.mubr.f32.mxu1 %v9569_v15 }
 0xa82   :  { %14379 = vmatmul.mubr.f32.gmra.mrb[46].mxu1 %v9570_v11 }
 0xa83   :  { %14381 = vmatprep.mubr.f32.mxu1 %v9571_v29 }
 0xa86   :  { %14382 = vmatmul.mubr.f32.gmra.mrb[48].mxu1 %v9572_v13 }
 0xa87   :  { %14384 = vmatprep.mubr.f32.mxu1 %v9573_v60 }
 0xa8a   :  { %14385 = vmatmul.mubr.f32.gmra.mrb[50].mxu1 %v9574_v18 }
 0xa8b   :  { %14387 = vmatprep.mubr.f32.mxu1 %v9575_v39 }
 0xa8e   :  { %14388 = vmatmul.mubr.f32.gmra.mrb[52].mxu1 %v9576_v31 }
 0xa8f   :  { %14390 = vmatprep.mubr.f32.mxu1 %v9577_v59 }
 0xa92   :  { %14391 = vmatmul.mubr.f32.gmra.mrb[54].mxu1 %v9578_v35 }
 0xa93   :  { %14393 = vmatprep.mubr.f32.mxu1 %v9579_v33 }
 0xa96   :  { %14394 = vmatmul.mubr.f32.gmra.mrb[56].mxu1 %v9580_v38 }
 0xa97   :  { %14396 = vmatprep.mubr.f32.mxu1 %v9581_v10 }
 0xa9a   :  { %14397 = vmatmul.mubr.f32.gmra.mrb[58].mxu1 %v9582_v0 }
 0xa9b   :  { %14399 = vmatprep.mubr.f32.mxu1 %v19147_v27 }
 0xa9e   :  { %14400 = vmatmul.mubr.f32.gmra.mrb[60].mxu1 %v19150_v54 }
 0xa9f   :  { %14402 = vmatprep.mubr.f32.mxu1 %v9585_v43 }
 0xaa2   :  { %14403 = vmatmul.mubr.f32.gmra.mrb[62].mxu1 %v9586_v2 }
 0xaf9   :  { %v19226_v8 = vpop.f32.mrb[0].mxu1 }
 0xafa   :  { %v10107_v58 = vmul.f32 %v19226_v8, %v19226_v8  ;;  %v19230_v52 = vpop.f32.mrb[1].mxu1 }
 0xafb   :  { %v10036_v55 = vadd.f32 %v19226_v8, %v19230_v52  ;;  %v10106_v4 = vmul.f32 %v19230_v52, %v19230_v52 }
 0xafd   :  { %v10170_v27 = vadd.f32 %v10107_v58, %v10106_v4  ;;  %v19236_v56 = vpop.f32.mrb[2].mxu1 }
 0xafe   :  { %v19238_v54 = vpop.f32.mrb[3].mxu1  ;;  %v10109_v42 = vmul.f32 %v19236_v56, %v19236_v56 }
 0xaff   :  { %v10037_v46 = vadd.f32 %v10036_v55, %v19238_v54  ;;  %v10108_v3 = vmul.f32 %v19238_v54, %v19238_v54 }
 0xb01   :  { %v10038_v19 = vadd.f32 %v19236_v56, %v10037_v46  ;;  %v10171_v14 = vadd.f32 %v10170_v27, %v10108_v3  ;;  %v19246_v20 = vpop.f32.mrb[4].mxu1 }
 0xb02   :  { %v19248_v51 = vpop.f32.mrb[5].mxu1  ;;  %v10111_v57 = vmul.f32 %v19246_v20, %v19246_v20 }
 0xb03   :  { %v10172_v28 = vadd.f32 %v10171_v14, %v10109_v42  ;;  %v10039_v53 = vadd.f32 %v10038_v19, %v19248_v51  ;;  %v10110_v1 = vmul.f32 %v19248_v51, %v19248_v51 }
 0xb05   :  { %v10173_v40 = vadd.f32 %v10172_v28, %v10110_v1  ;;  %v19255_v9 = vpop.f32.mrb[6].mxu1  ;;  %v10040_v24 = vadd.f32 %v19246_v20, %v10039_v53 }
 0xb06   :  { %v19258_v62 = vpop.f32.mrb[7].mxu1  ;;  %v10113_v30 = vmul.f32 %v19255_v9, %v19255_v9 }
 0xb07   :  { %v10041_v50 = vadd.f32 %v10040_v24, %v19258_v62  ;;  %v10112_v17 = vmul.f32 %v19258_v62, %v19258_v62  ;;  %v10174_v23 = vadd.f32 %v10173_v40, %v10111_v57 }
 0xb09   :  { %v10175_v26 = vadd.f32 %v10174_v23, %v10112_v17  ;;  %v19265_v16 = vpop.f32.mrb[8].mxu1  ;;  %v10042_v37 = vadd.f32 %v19255_v9, %v10041_v50 }
 0xb0a   :  { %v19268_v34 = vpop.f32.mrb[9].mxu1  ;;  %v10115_v48 = vmul.f32 %v19265_v16, %v19265_v16 }
 0xb0b   :  { %v10043_v45 = vadd.f32 %v10042_v37, %v19268_v34  ;;  %v10114_v22 = vmul.f32 %v19268_v34, %v19268_v34  ;;  %v10176_v7 = vadd.f32 %v10175_v26, %v10113_v30 }
 0xb0d   :  { %v10177_v61 = vadd.f32 %v10176_v7, %v10114_v22  ;;  %v19275_v44 = vpop.f32.mrb[10].mxu1  ;;  %v10044_v63 = vadd.f32 %v19265_v16, %v10043_v45 }
 0xb0e   :  { %v19278_v36 = vpop.f32.mrb[11].mxu1  ;;  %v10117_v32 = vmul.f32 %v19275_v44, %v19275_v44 }
 0xb0f   :  { %v10045_v21 = vadd.f32 %v10044_v63, %v19278_v36  ;;  %v10116_v5 = vmul.f32 %v19278_v36, %v19278_v36  ;;  %v10178_v49 = vadd.f32 %v10177_v61, %v10115_v48 }
 0xb11   :  { %v10179_v41 = vadd.f32 %v10178_v49, %v10116_v5  ;;  %v19285_v47 = vpop.f32.mrb[12].mxu1  ;;  %v10046_v12 = vadd.f32 %v19275_v44, %v10045_v21 }
 0xb12   :  { %v19288_v25 = vpop.f32.mrb[13].mxu1  ;;  %v10119_v29 = vmul.f32 %v19285_v47, %v19285_v47 }
 0xb13   :  { %v10047_v6 = vadd.f32 %v10046_v12, %v19288_v25  ;;  %v10118_v15 = vmul.f32 %v19288_v25, %v19288_v25  ;;  %v10180_v11 = vadd.f32 %v10179_v41, %v10117_v32 }
 0xb15   :  { %v10181_v13 = vadd.f32 %v10180_v11, %v10118_v15  ;;  %v19295_v60 = vpop.f32.mrb[14].mxu1  ;;  %v10048_v18 = vadd.f32 %v19285_v47, %v10047_v6 }
 0xb16   :  { %v19298_v39 = vpop.f32.mrb[15].mxu1  ;;  %v10121_v33 = vmul.f32 %v19295_v60, %v19295_v60 }
 0xb17   :  { %v10049_v31 = vadd.f32 %v10048_v18, %v19298_v39  ;;  %v10120_v59 = vmul.f32 %v19298_v39, %v19298_v39  ;;  %v10182_v35 = vadd.f32 %v10181_v13, %v10119_v29 }
 0xb19   :  { %v10183_v38 = vadd.f32 %v10182_v35, %v10120_v59  ;;  %v19305_v10 = vpop.f32.mrb[16].mxu1  ;;  %v10050_v0 = vadd.f32 %v19295_v60, %v10049_v31 }
 0xb1a   :  { %v19308_v43 = vpop.f32.mrb[17].mxu1  ;;  %v10123_v4 = vmul.f32 %v19305_v10, %v19305_v10 }
 0xb1b   :  { %v10051_v2 = vadd.f32 %v10050_v0, %v19308_v43  ;;  %v10122_v58 = vmul.f32 %v19308_v43, %v19308_v43  ;;  %v10184_v55 = vadd.f32 %v10183_v38, %v10121_v33 }
 0xb1d   :  { %v10185_v27 = vadd.f32 %v10184_v55, %v10122_v58  ;;  %v19315_v46 = vpop.f32.mrb[18].mxu1  ;;  %v10052_v3 = vadd.f32 %v19305_v10, %v10051_v2 }
 0xb1e   :  { %v19318_v42 = vpop.f32.mrb[19].mxu1  ;;  %v10125_v53 = vmul.f32 %v19315_v46, %v19315_v46 }
 0xb1f   :  { %v10053_v19 = vadd.f32 %v10052_v3, %v19318_v42  ;;  %v10124_v14 = vmul.f32 %v19318_v42, %v19318_v42  ;;  %v10186_v28 = vadd.f32 %v10185_v27, %v10123_v4 }
 0xb21   :  { %v10187_v1 = vadd.f32 %v10186_v28, %v10124_v14  ;;  %v19325_v57 = vpop.f32.mrb[20].mxu1  ;;  %v10054_v40 = vadd.f32 %v19315_v46, %v10053_v19 }
 0xb22   :  { %v19328_v24 = vpop.f32.mrb[21].mxu1  ;;  %v10127_v30 = vmul.f32 %v19325_v57, %v19325_v57 }
 0xb23   :  { %v10055_v50 = vadd.f32 %v10054_v40, %v19328_v24  ;;  %v10126_v17 = vmul.f32 %v19328_v24, %v19328_v24  ;;  %v10188_v23 = vadd.f32 %v10187_v1, %v10125_v53 }
 0xb25   :  { %v10189_v26 = vadd.f32 %v10188_v23, %v10126_v17  ;;  %v19335_v37 = vpop.f32.mrb[22].mxu1  ;;  %v10056_v45 = vadd.f32 %v19325_v57, %v10055_v50 }
 0xb26   :  { %v19338_v22 = vpop.f32.mrb[23].mxu1  ;;  %v10129_v63 = vmul.f32 %v19335_v37, %v19335_v37 }
 0xb27   :  { %v10057_v7 = vadd.f32 %v10056_v45, %v19338_v22  ;;  %v10128_v48 = vmul.f32 %v19338_v22, %v19338_v22  ;;  %v10190_v61 = vadd.f32 %v10189_v26, %v10127_v30 }
 0xb29   :  { %v10191_v21 = vadd.f32 %v10190_v61, %v10128_v48  ;;  %v19345_v5 = vpop.f32.mrb[24].mxu1  ;;  %v10058_v49 = vadd.f32 %v19335_v37, %v10057_v7 }
 0xb2a   :  { %v19348_v32 = vpop.f32.mrb[25].mxu1  ;;  %v10131_v15 = vmul.f32 %v19345_v5, %v19345_v5 }
 0xb2b   :  { %v10059_v41 = vadd.f32 %v10058_v49, %v19348_v32  ;;  %v10130_v12 = vmul.f32 %v19348_v32, %v19348_v32  ;;  %v10192_v6 = vadd.f32 %v10191_v21, %v10129_v63 }
 0xb2d   :  { %v10193_v11 = vadd.f32 %v10192_v6, %v10130_v12  ;;  %v19355_v29 = vpop.f32.mrb[26].mxu1  ;;  %v10060_v13 = vadd.f32 %v19345_v5, %v10059_v41 }
 0xb2e   :  { %v19358_v18 = vpop.f32.mrb[27].mxu1  ;;  %v10133_v33 = vmul.f32 %v19355_v29, %v19355_v29 }
 0xb2f   :  { %v10061_v31 = vadd.f32 %v10060_v13, %v19358_v18  ;;  %v10132_v59 = vmul.f32 %v19358_v18, %v19358_v18  ;;  %v10194_v35 = vadd.f32 %v10193_v11, %v10131_v15 }
 0xb31   :  { %v10195_v38 = vadd.f32 %v10194_v35, %v10132_v59  ;;  %v19365_v0 = vpop.f32.mrb[28].mxu1  ;;  %v10062_v2 = vadd.f32 %v19355_v29, %v10061_v31 }
 0xb32   :  { %v19368_v58 = vpop.f32.mrb[29].mxu1  ;;  %v10135_v3 = vmul.f32 %v19365_v0, %v19365_v0 }
 0xb33   :  { %v10063_v55 = vadd.f32 %v10062_v2, %v19368_v58  ;;  %v10134_v4 = vmul.f32 %v19368_v58, %v19368_v58  ;;  %v10196_v27 = vadd.f32 %v10195_v38, %v10133_v33 }
 0xb35   :  { %v10197_v19 = vadd.f32 %v10196_v27, %v10134_v4  ;;  %v19375_v14 = vpop.f32.mrb[30].mxu1  ;;  %v10064_v28 = vadd.f32 %v19365_v0, %v10063_v55 }
 0xb36   :  { %v19378_v53 = vpop.f32.mrb[31].mxu1  ;;  %v10137_v17 = vmul.f32 %v19375_v14, %v19375_v14 }
 0xb37   :  { %v10065_v1 = vadd.f32 %v10064_v28, %v19378_v53  ;;  %v10136_v40 = vmul.f32 %v19378_v53, %v19378_v53  ;;  %v10198_v50 = vadd.f32 %v10197_v19, %v10135_v3 }
 0xb39   :  { %v10199_v23 = vadd.f32 %v10198_v50, %v10136_v40  ;;  %v19385_v30 = vpop.f32.mrb[32].mxu1  ;;  %v10066_v26 = vadd.f32 %v19375_v14, %v10065_v1 }
 0xb3a   :  { %v19388_v45 = vpop.f32.mrb[33].mxu1  ;;  %v10139_v63 = vmul.f32 %v19385_v30, %v19385_v30 }
 0xb3b   :  { %v10067_v7 = vadd.f32 %v10066_v26, %v19388_v45  ;;  %v10138_v48 = vmul.f32 %v19388_v45, %v19388_v45  ;;  %v10200_v61 = vadd.f32 %v10199_v23, %v10137_v17 }
 0xb3d   :  { %v10201_v21 = vadd.f32 %v10200_v61, %v10138_v48  ;;  %v19395_v49 = vpop.f32.mrb[34].mxu1  ;;  %v10068_v41 = vadd.f32 %v19385_v30, %v10067_v7 }
 0xb3e   :  { %v19398_v12 = vpop.f32.mrb[35].mxu1  ;;  %v10141_v13 = vmul.f32 %v19395_v49, %v19395_v49 }
 0xb3f   :  { %v10069_v6 = vadd.f32 %v10068_v41, %v19398_v12  ;;  %v10140_v15 = vmul.f32 %v19398_v12, %v19398_v12  ;;  %v10202_v11 = vadd.f32 %v10201_v21, %v10139_v63 }
 0xb41   :  { %v10203_v31 = vadd.f32 %v10202_v11, %v10140_v15  ;;  %v19405_v59 = vpop.f32.mrb[36].mxu1  ;;  %v10070_v35 = vadd.f32 %v19395_v49, %v10069_v6 }
 0xb42   :  { %v19408_v33 = vpop.f32.mrb[37].mxu1  ;;  %v10143_v4 = vmul.f32 %v19405_v59, %v19405_v59 }
 0xb43   :  { %v10071_v38 = vadd.f32 %v10070_v35, %v19408_v33  ;;  %v10142_v2 = vmul.f32 %v19408_v33, %v19408_v33  ;;  %v10204_v55 = vadd.f32 %v10203_v31, %v10141_v13 }
 0xb45   :  { %v10205_v27 = vadd.f32 %v10204_v55, %v10142_v2  ;;  %v19415_v3 = vpop.f32.mrb[38].mxu1  ;;  %v10072_v19 = vadd.f32 %v19405_v59, %v10071_v38 }
 0xb46   :  { %21125 = vst [vmem:[#allocation77_spill] sm:$0xff] %v19415_v3  ;;  %v19418_v28 = vpop.f32.mrb[39].mxu1  ;;  %v10145_v17 = vmul.f32 %v19415_v3, %v19415_v3 }
 0xb47   :  { %21126 = vst [vmem:[#allocation78_spill] sm:$0xff] %v19418_v28  ;;  %v10073_v1 = vadd.f32 %v10072_v19, %v19418_v28  ;;  %v10144_v40 = vmul.f32 %v19418_v28, %v19418_v28  ;;  %v10206_v50 = vadd.f32 %v10205_v27, %v10143_v4 }
 0xb49   :  { %v10207_v23 = vadd.f32 %v10206_v50, %v10144_v40  ;;  %v19425_v26 = vpop.f32.mrb[40].mxu1  ;;  %v10074_v7 = vadd.f32 %v19415_v3, %v10073_v1 }
 0xb4a   :  { %21127 = vst [vmem:[#allocation79_spill] sm:$0xff] %v19425_v26  ;;  %v19428_v48 = vpop.f32.mrb[41].mxu1  ;;  %v10147_v41 = vmul.f32 %v19425_v26, %v19425_v26 }
 0xb4b   :  { %21128 = vst [vmem:[#allocation80_spill] sm:$0xff] %v19428_v48  ;;  %v10075_v61 = vadd.f32 %v10074_v7, %v19428_v48  ;;  %v10146_v63 = vmul.f32 %v19428_v48, %v19428_v48  ;;  %v10208_v21 = vadd.f32 %v10207_v23, %v10145_v17 }
 0xb4d   :  { %v10209_v6 = vadd.f32 %v10208_v21, %v10146_v63  ;;  %v19435_v15 = vpop.f32.mrb[42].mxu1  ;;  %v10076_v11 = vadd.f32 %v19425_v26, %v10075_v61 }
 0xb4e   :  { %21129 = vst [vmem:[#allocation81_spill] sm:$0xff] %v19435_v15  ;;  %v19438_v13 = vpop.f32.mrb[43].mxu1  ;;  %v10149_v2 = vmul.f32 %v19435_v15, %v19435_v15 }
 0xb4f   :  { %21130 = vst [vmem:[#allocation13_spill] sm:$0xff] %v19438_v13  ;;  %v10077_v31 = vadd.f32 %v10076_v11, %v19438_v13  ;;  %v10148_v35 = vmul.f32 %v19438_v13, %v19438_v13  ;;  %v10210_v38 = vadd.f32 %v10209_v6, %v10147_v41 }
 0xb51   :  { %v10211_v55 = vadd.f32 %v10210_v38, %v10148_v35  ;;  %v19445_v4 = vpop.f32.mrb[44].mxu1  ;;  %v10078_v27 = vadd.f32 %v19435_v15, %v10077_v31 }
 0xb52   :  { %21131 = vst [vmem:[#allocation14_spill] sm:$0xff] %v19445_v4  ;;  %v19448_v19 = vpop.f32.mrb[45].mxu1  ;;  %v10151_v17 = vmul.f32 %v19445_v4, %v19445_v4 }
 0xb53   :  { %21132 = vst [vmem:[#allocation15_spill] sm:$0xff] %v19448_v19  ;;  %v10079_v1 = vadd.f32 %v10078_v27, %v19448_v19  ;;  %v10150_v40 = vmul.f32 %v19448_v19, %v19448_v19  ;;  %v10212_v50 = vadd.f32 %v10211_v55, %v10149_v2 }
 0xb55   :  { %v10213_v23 = vadd.f32 %v10212_v50, %v10150_v40  ;;  %v19455_v7 = vpop.f32.mrb[46].mxu1  ;;  %v10080_v61 = vadd.f32 %v19445_v4, %v10079_v1 }
 0xb56   :  { %21133 = vst [vmem:[#allocation16_spill] sm:$0xff] %v19455_v7  ;;  %v19458_v63 = vpop.f32.mrb[47].mxu1  ;;  %v10153_v11 = vmul.f32 %v19455_v7, %v19455_v7 }
 0xb57   :  { %21134 = vst [vmem:[#allocation17_spill] sm:$0xff] %v19458_v63  ;;  %v10081_v21 = vadd.f32 %v10080_v61, %v19458_v63  ;;  %v10152_v41 = vmul.f32 %v19458_v63, %v19458_v63  ;;  %v10214_v6 = vadd.f32 %v10213_v23, %v10151_v17 }
 0xb59   :  { %v10215_v31 = vadd.f32 %v10214_v6, %v10152_v41  ;;  %v19465_v35 = vpop.f32.mrb[48].mxu1  ;;  %v10082_v38 = vadd.f32 %v19455_v7, %v10081_v21 }
 0xb5a   :  { %21135 = vst [vmem:[#allocation18_spill] sm:$0xff] %v19465_v35  ;;  %v19468_v2 = vpop.f32.mrb[49].mxu1  ;;  %v10155_v40 = vmul.f32 %v19465_v35, %v19465_v35 }
 0xb5b   :  { %21136 = vst [vmem:[#allocation19_spill] sm:$0xff] %v19468_v2  ;;  %v10083_v55 = vadd.f32 %v10082_v38, %v19468_v2  ;;  %v10154_v27 = vmul.f32 %v19468_v2, %v19468_v2  ;;  %v10216_v1 = vadd.f32 %v10215_v31, %v10153_v11 }
 0xb5d   :  { %v10217_v50 = vadd.f32 %v10216_v1, %v10154_v27  ;;  %v19475_v17 = vpop.f32.mrb[50].mxu1  ;;  %v10084_v23 = vadd.f32 %v19465_v35, %v10083_v55 }
 0xb5e   :  { %21137 = vst [vmem:[#allocation20_spill] sm:$0xff] %v19475_v17  ;;  %v19478_v61 = vpop.f32.mrb[51].mxu1  ;;  %v10157_v38 = vmul.f32 %v19475_v17, %v19475_v17 }
 0xb5f   :  { %21138 = vst [vmem:[#allocation21_spill] sm:$0xff] %v19478_v61  ;;  %v10085_v21 = vadd.f32 %v10084_v23, %v19478_v61  ;;  %v10156_v41 = vmul.f32 %v19478_v61, %v19478_v61  ;;  %v10218_v6 = vadd.f32 %v10217_v50, %v10155_v40 }
 0xb61   :  { %v10219_v11 = vadd.f32 %v10218_v6, %v10156_v41  ;;  %v19485_v31 = vpop.f32.mrb[52].mxu1  ;;  %v10086_v27 = vadd.f32 %v19475_v17, %v10085_v21 }
 0xb62   :  { %21139 = vst [vmem:[#allocation22_spill] sm:$0xff] %v19485_v31  ;;  %v19488_v1 = vpop.f32.mrb[53].mxu1  ;;  %v10159_v61 = vmul.f32 %v19485_v31, %v19485_v31 }
 0xb63   :  { %21140 = vst [vmem:[#allocation82_spill] sm:$0xff] %v19488_v1  ;;  %v10087_v55 = vadd.f32 %v10086_v27, %v19488_v1  ;;  %v10158_v35 = vmul.f32 %v19488_v1, %v19488_v1  ;;  %v10220_v23 = vadd.f32 %v10219_v11, %v10157_v38 }
 0xb65   :  { %v10221_v40 = vadd.f32 %v10220_v23, %v10158_v35  ;;  %v19495_v50 = vpop.f32.mrb[54].mxu1  ;;  %v10088_v41 = vadd.f32 %v19485_v31, %v10087_v55 }
 0xb66   :  { %21141 = vst [vmem:[#allocation83_spill] sm:$0xff] %v19495_v50  ;;  %v19498_v6 = vpop.f32.mrb[55].mxu1  ;;  %v10161_v1 = vmul.f32 %v19495_v50, %v19495_v50 }
 0xb67   :  { %21142 = vst [vmem:[#allocation84_spill] sm:$0xff] %v19498_v6  ;;  %v10089_v21 = vadd.f32 %v10088_v41, %v19498_v6  ;;  %v10160_v17 = vmul.f32 %v19498_v6, %v19498_v6  ;;  %v10222_v27 = vadd.f32 %v10221_v40, %v10159_v61 }
 0xb69   :  { %v10223_v38 = vadd.f32 %v10222_v27, %v10160_v17  ;;  %v19505_v11 = vpop.f32.mrb[56].mxu1  ;;  %v10090_v35 = vadd.f32 %v19495_v50, %v10089_v21 }
 0xb6a   :  { %21143 = vst [vmem:[#allocation23_spill] sm:$0xff] %v19505_v11  ;;  %v19508_v23 = vpop.f32.mrb[57].mxu1  ;;  %v10163_v6 = vmul.f32 %v19505_v11, %v19505_v11 }
 0xb6b   :  { %21144 = vst [vmem:[#allocation24_spill] sm:$0xff] %v19508_v23  ;;  %v10091_v55 = vadd.f32 %v10090_v35, %v19508_v23  ;;  %v10162_v31 = vmul.f32 %v19508_v23, %v19508_v23  ;;  %v10224_v41 = vadd.f32 %v10223_v38, %v10161_v1 }
 0xb6d   :  { %v10225_v61 = vadd.f32 %v10224_v41, %v10162_v31  ;;  %v19515_v40 = vpop.f32.mrb[58].mxu1  ;;  %v10092_v17 = vadd.f32 %v19505_v11, %v10091_v55 }
 0xb6e   :  { %21145 = vst [vmem:[#allocation25_spill] sm:$0xff] %v19515_v40  ;;  %v19518_v27 = vpop.f32.mrb[59].mxu1  ;;  %v10165_v23 = vmul.f32 %v19515_v40, %v19515_v40 }
 0xb6f   :  { %21146 = vst [vmem:[#allocation26_spill] sm:$0xff] %v19518_v27  ;;  %v10093_v21 = vadd.f32 %v10092_v17, %v19518_v27  ;;  %v10164_v50 = vmul.f32 %v19518_v27, %v19518_v27  ;;  %v10226_v35 = vadd.f32 %v10225_v61, %v10163_v6 }
 0xb71   :  { %v10227_v1 = vadd.f32 %v10226_v35, %v10164_v50  ;;  %v19525_v38 = vpop.f32.mrb[60].mxu1  ;;  %v10094_v31 = vadd.f32 %v19515_v40, %v10093_v21 }
 0xb72   :  { %21147 = vst [vmem:[#allocation28_spill] sm:$0xff] %v19525_v38  ;;  %v19528_v41 = vpop.f32.mrb[61].mxu1  ;;  %v10167_v27 = vmul.f32 %v19525_v38, %v19525_v38 }
 0xb73   :  { %21148 = vst [vmem:[#allocation27_spill] sm:$0xff] %v19528_v41  ;;  %v10095_v55 = vadd.f32 %v10094_v31, %v19528_v41  ;;  %v10166_v11 = vmul.f32 %v19528_v41, %v19528_v41  ;;  %v10228_v17 = vadd.f32 %v10227_v1, %v10165_v23 }
 0xb75   :  { %v10229_v6 = vadd.f32 %v10228_v17, %v10166_v11  ;;  %v19535_v61 = vpop.f32.mrb[62].mxu1  ;;  %v10096_v50 = vadd.f32 %v19525_v38, %v10095_v55 }
 0xb76   :  { %v9963_v35 = vpop.f32.mrb[63].mxu1  ;;  %v10169_v40 = vmul.f32 %v19535_v61, %v19535_v61 }
 0xb77   :  { %v10097_v2 = vadd.f32 %v10096_v50, %v9963_v35  ;;  %v10168_v7 = vmul.f32 %v9963_v35, %v9963_v35  ;;  %v10230_v21 = vadd.f32 %v10229_v6, %v10167_v27 }
 0xb79   :  { %v10098_v31 = vadd.f32 %v19535_v61, %v10097_v2  ;;  %v10231_v63 = vadd.f32 %v10230_v21, %v10168_v7  ;;  %v358_v7 = vld [vmem:[%s20331_s5] sm:$0x1]  ;;  %s16119_s5 = smov [#allocation9]  }
 0xb7b   :  { %v10099_v41 = vrot.slane %v10098_v31, 4  ;;  %v10232_v23 = vadd.f32 %v10231_v63, %v10169_v40 }
 0xb7d   :  { %v10100_v1 = vadd.f32 %v10099_v41, %v10098_v31  ;;  %v10233_v4 = vrot.slane %v10232_v23, 4 }
 0xb7f   :  { %v10101_v19 = vrot.slane %v10100_v1, 2  ;;  %v10234_v11 = vadd.f32 %v10233_v4, %v10232_v23  ;;  %v359_v4 = vld [vmem:[%s20332_s6] sm:$0x1]  ;;  %s10648_s6 = sshll.u32 %s16119_s5, 4  ;;  %s10649_s6 = int_to_ptr.vmem [resolvable:$true] %s10648_s6 }
 0xb80   :  { %s16085_s21 = scalar_lea.vmem %s10649_s6, 8192  ;;  %p16090_p11 = scmp.lt.s32.totalorder %s10649_s6, %s10649_s6 }
 0xb81   :  { %v10102_v17 = vadd.f32 %v10101_v19, %v10100_v1  ;;  %v10235_v15 = vrot.slane %v10234_v11, 2  ;;  %p16086_p10 = scmp.ne.s32.totalorder %s10649_s6, %s16085_s21  ;;  %p16091_p12 = scmp.lt.s32.totalorder %s16085_s21, %s16085_s21 }
 0xb83   :  { %v10103_v13 = vrot.slane %v10102_v17, 1  ;;  %v10236_v55 = vadd.f32 %v10235_v15, %v10234_v11  ;;  %v21150_v11 = vld [vmem:[#allocation78_spill] sm:$0xff]  ;;  %p16092_p13 = por %p16091_p12, %p16090_p11 }
 0xb85   :  { %v10104_v38 = vadd.f32 %v10103_v13, %v10102_v17  ;;  %v10237_v50 = vrot.slane %v10236_v55, 1  ;;  %v21149_v13 = vld [vmem:[#allocation50_spill] sm:$0xff]  ;;  %v21151_v17 = vld [vmem:[#allocation77_spill] sm:$0xff]  ;;  %p16093_p0 = pnand %p16092_p13, %p16086_p10 }
 0xb87   :  { %v10105_v26 = vmul.f32 0.001953125, %v10104_v38  ;;  %v10238_v27 = vadd.f32 %v10237_v50, %v10236_v55  ;;  %v21152_v55 = vld [vmem:[#allocation80_spill] sm:$0xff]  ;;  %v21153_v50 = vld [vmem:[#allocation79_spill] sm:$0xff] }
 0xb89   :  { %v10239_v6 = vmul.f32 0.001953125, %v10238_v27  ;;  %v10240_v48 = vmul.f32 %v10105_v26, %v10105_v26  ;;  %v21154_v27 = vld [vmem:[#allocation13_spill] sm:$0xff] }
 0xb8b   :  { %v10241_v3 = vsub.f32 %v10239_v6, %v10240_v48  ;;  %v21155_v6 = vld [vmem:[#allocation81_spill] sm:$0xff] }
 0xb8d   :  { %v10242_v28 = vadd.f32 1e-05, %v10241_v3 }
 0xb8f   :  { %16014 = vrsqrt.f32 %v10242_v28 }
 0xb99   :  { %v16015_v63 = vpop.eup %16014 }
 0xb9a   :  { %v10244_v2 = vmul.f32 %v16015_v63, %v358_v7  ;;  %v21156_v63 = vld [vmem:[#allocation15_spill] sm:$0xff] }
 0xb9c   :  { %v10245_v15 = vmul.f32 %v10244_v2, %v10105_v26  ;;  %v19548_v19 = vrot.slane %v10244_v2, %v21149_v13 }
 0xb9e   :  { %v10246_v40 = vsub.f32 %v359_v4, %v10245_v15  ;;  %v10315_v38 = vmul.f32 %v19548_v19, %v9963_v35  ;;  %v19553_v3 = vmul.f32 %v19548_v19, %v19230_v52  ;;  %v19557_v28 = vmul.f32 %v19226_v8, %v19548_v19  ;;  %v21157_v4 = vld [vmem:[#allocation14_spill] sm:$0xff] }
 0xb9f   :  { %v19561_v48 = vmul.f32 %v19548_v19, %v19238_v54  ;;  %v19565_v26 = vmul.f32 %v19236_v56, %v19548_v19  ;;  %v19569_v41 = vmul.f32 %v19548_v19, %v19248_v51  ;;  %v19573_v52 = vmul.f32 %v19246_v20, %v19548_v19  ;;  %v10449_v51 = vld [vmem:[#allocation3 + $0x1f0] sm:$0xff] }
 0xba0   :  { %v19576_v35 = vrot.slane %v10246_v40, %v21149_v13  ;;  %v19580_v8 = vmul.f32 %v19548_v19, %v19258_v62  ;;  %v19584_v54 = vmul.f32 %v19255_v9, %v19548_v19  ;;  %v19588_v56 = vmul.f32 %v19548_v19, %v19268_v34  ;;  %v21158_v13 = vld [vmem:[#allocation17_spill] sm:$0xff] }
 0xba1   :  { %v19592_v20 = vmul.f32 %v19265_v16, %v19548_v19  ;;  %v19596_v21 = vmul.f32 %v19548_v19, %v19278_v36  ;;  %v19600_v62 = vmul.f32 %v19275_v44, %v19548_v19  ;;  %v19604_v9 = vmul.f32 %v19548_v19, %v19288_v25 }
 0xba2   :  { %v10385_v34 = vadd.f32 %v19576_v35, %v10315_v38  ;;  %v19609_v31 = vmul.f32 %v19285_v47, %v19548_v19  ;;  %v19613_v16 = vmul.f32 %v19548_v19, %v19298_v39  ;;  %v19617_v36 = vmul.f32 %v19295_v60, %v19548_v19  ;;  %v21159_v38 = vld [vmem:[#allocation16_spill] sm:$0xff] }
 0xba3   :  { %v19621_v44 = vmul.f32 %v19548_v19, %v19308_v43  ;;  %v19625_v25 = vmul.f32 %v19305_v10, %v19548_v19  ;;  %v19629_v47 = vmul.f32 %v19548_v19, %v19318_v42  ;;  %v19633_v39 = vmul.f32 %v19315_v46, %v19548_v19 }
 0xba4   :  { %v10513_v23 = vadd.f32 %v10449_v51, %v10385_v34  ;;  %v19637_v60 = vmul.f32 %v19548_v19, %v19328_v24  ;;  %v19641_v43 = vmul.f32 %v19325_v57, %v19548_v19  ;;  %v19645_v10 = vmul.f32 %v19548_v19, %v19338_v22  ;;  %v21160_v34 = vld [vmem:[#allocation19_spill] sm:$0xff] }
 0xba5   :  { %v19649_v42 = vmul.f32 %v19335_v37, %v19548_v19  ;;  %v19653_v46 = vmul.f32 %v19548_v19, %v19348_v32  ;;  %v19657_v24 = vmul.f32 %v19345_v5, %v19548_v19  ;;  %v19661_v57 = vmul.f32 %v19548_v19, %v19358_v18 }
 0xba6   :  { %v10577_v1 = vmax.f32 %v10513_v23, 0.0  ;;  %v19665_v22 = vmul.f32 %v19355_v29, %v19548_v19  ;;  %v19669_v37 = vmul.f32 %v19548_v19, %v19368_v58  ;;  %v19673_v32 = vmul.f32 %v19365_v0, %v19548_v19 }
 0xba7   :  { %v19677_v5 = vmul.f32 %v19548_v19, %v19378_v53  ;;  %v19681_v18 = vmul.f32 %v19375_v14, %v19548_v19  ;;  %v19685_v29 = vmul.f32 %v19548_v19, %v19388_v45  ;;  %v19689_v58 = vmul.f32 %v19385_v30, %v19548_v19 }
 0xba8   :  { %10641 = vst [vmem:[#allocation9 + $0x1f0] sm:$0xff] %v10577_v1  ;;  %v19693_v0 = vmul.f32 %v19548_v19, %v19398_v12  ;;  %v19697_v53 = vmul.f32 %v19395_v49, %v19548_v19  ;;  %v19701_v14 = vmul.f32 %v19548_v19, %v19408_v33  ;;  %v19705_v45 = vmul.f32 %v19405_v59, %v19548_v19  ;;  %v21161_v1 = vld [vmem:[#allocation18_spill] sm:$0xff] }
 0xba9   :  { %v19709_v30 = vmul.f32 %v19548_v19, %v21150_v11  ;;  %v19713_v12 = vmul.f32 %v21151_v17, %v19548_v19  ;;  %v19717_v49 = vmul.f32 %v19548_v19, %v21152_v55  ;;  %v19721_v33 = vmul.f32 %v21153_v50, %v19548_v19  ;;  %v21162_v17 = vld [vmem:[#allocation21_spill] sm:$0xff]  ;;  %v21164_v50 = vld [vmem:[#allocation20_spill] sm:$0xff] }
 0xbaa   :  { %v19725_v59 = vmul.f32 %v19548_v19, %v21154_v27  ;;  %v19729_v7 = vmul.f32 %v21155_v6, %v19548_v19  ;;  %v19733_v2 = vmul.f32 %v19548_v19, %v21156_v63  ;;  %v19737_v15 = vmul.f32 %v21157_v4, %v19548_v19  ;;  %v21166_v6 = vld [vmem:[#allocation82_spill] sm:$0xff] }
 0xbab   :  { %v19741_v40 = vmul.f32 %v19548_v19, %v21158_v13  ;;  %v19745_v51 = vmul.f32 %v21159_v38, %v19548_v19  ;;  %v19749_v23 = vmul.f32 %v19548_v19, %v21160_v34  ;;  %v19753_v11 = vmul.f32 %v21161_v1, %v19548_v19  ;;  %v21168_v4 = vld [vmem:[#allocation22_spill] sm:$0xff]  ;;  %v21170_v38 = vld [vmem:[#allocation84_spill] sm:$0xff]  ;;  %v21172_v1 = vld [vmem:[#allocation83_spill] sm:$0xff] }
 0xbac   :  { %v19757_v55 = vmul.f32 %v19548_v19, %v21162_v17  ;;  %v19761_v27 = vmul.f32 %v21164_v50, %v19548_v19  ;;  %v19765_v63 = vmul.f32 %v19548_v19, %v21166_v6  ;;  %v19769_v13 = vmul.f32 %v21168_v4, %v19548_v19 }
 0xbad   :  { %v19773_v34 = vmul.f32 %v19548_v19, %v21170_v38  ;;  %v19777_v17 = vmul.f32 %v21172_v1, %v19548_v19 }
 0xbae   :  { %21163 = vst [vmem:[#allocation30_spill] sm:$0xff] %v19757_v55  ;;  %21165 = vst [vmem:[#allocation29_spill] sm:$0xff] %v19761_v27  ;;  %v21174_v55 = vld [vmem:[#allocation24_spill] sm:$0xff]  ;;  %v21175_v27 = vld [vmem:[#allocation23_spill] sm:$0xff] }
 0xbaf   :  { %21167 = vst [vmem:[#allocation32_spill] sm:$0xff] %v19765_v63  ;;  %21169 = vst [vmem:[#allocation31_spill] sm:$0xff] %v19769_v13  ;;  %v19781_v50 = vmul.f32 %v19548_v19, %v21174_v55  ;;  %v19785_v6 = vmul.f32 %v21175_v27, %v19548_v19  ;;  %v21176_v63 = vld [vmem:[#allocation26_spill] sm:$0xff]  ;;  %v21177_v13 = vld [vmem:[#allocation25_spill] sm:$0xff]  ;;  %v19805_v27 = vmul.f32 %v19535_v61, %v19548_v19 }
 0xbb0   :  { %21171 = vst [vmem:[#allocation34_spill] sm:$0xff] %v19773_v34  ;;  %21173 = vst [vmem:[#allocation33_spill] sm:$0xff] %v19777_v17  ;;  %v19789_v4 = vmul.f32 %v19548_v19, %v21176_v63  ;;  %v19793_v38 = vmul.f32 %v21177_v13, %v19548_v19  ;;  %v21178_v34 = vld [vmem:[#allocation27_spill] sm:$0xff]  ;;  %v21179_v17 = vld [vmem:[#allocation28_spill] sm:$0xff]  ;;  %v19809_v63 = vadd.f32 %v19576_v35, %v19553_v3 }
 0xbb1   :  { %v19797_v1 = vmul.f32 %v19548_v19, %v21178_v34  ;;  %v19801_v55 = vmul.f32 %v21179_v17, %v19548_v19  ;;  %v19813_v13 = vadd.f32 %v19576_v35, %v19557_v28  ;;  %v19817_v34 = vadd.f32 %v19576_v35, %v19561_v48 }
 0xbb2   :  { %v19821_v17 = vadd.f32 %v19576_v35, %v19565_v26  ;;  %v19825_v61 = vadd.f32 %v19576_v35, %v19569_v41  ;;  %v19829_v19 = vadd.f32 %v19576_v35, %v19573_v52  ;;  %v19833_v3 = vadd.f32 %v19576_v35, %v19580_v8 }
 0xbb3   :  { %v19837_v28 = vadd.f32 %v19576_v35, %v19584_v54  ;;  %v19841_v48 = vadd.f32 %v19576_v35, %v19588_v56  ;;  %v19845_v26 = vadd.f32 %v19576_v35, %v19592_v20  ;;  %v19849_v41 = vadd.f32 %v19576_v35, %v19596_v21 }
 0xbb4   :  { %v19853_v52 = vadd.f32 %v19576_v35, %v19600_v62  ;;  %v19857_v8 = vadd.f32 %v19576_v35, %v19604_v9  ;;  %v19861_v54 = vadd.f32 %v19576_v35, %v19609_v31  ;;  %v19865_v56 = vadd.f32 %v19576_v35, %v19613_v16 }
 0xbb5   :  { %v19869_v20 = vadd.f32 %v19576_v35, %v19617_v36  ;;  %v19873_v21 = vadd.f32 %v19576_v35, %v19621_v44  ;;  %v19877_v62 = vadd.f32 %v19576_v35, %v19625_v25  ;;  %v19881_v9 = vadd.f32 %v19576_v35, %v19629_v47 }
 0xbb6   :  { %v19885_v31 = vadd.f32 %v19576_v35, %v19633_v39  ;;  %v19889_v16 = vadd.f32 %v19576_v35, %v19637_v60  ;;  %v19893_v36 = vadd.f32 %v19576_v35, %v19641_v43  ;;  %v19897_v44 = vadd.f32 %v19576_v35, %v19645_v10 }
 0xbb7   :  { %v19901_v25 = vadd.f32 %v19576_v35, %v19649_v42  ;;  %v19905_v47 = vadd.f32 %v19576_v35, %v19653_v46  ;;  %v19909_v39 = vadd.f32 %v19576_v35, %v19657_v24  ;;  %v19913_v60 = vadd.f32 %v19576_v35, %v19661_v57 }
 0xbb8   :  { %v19917_v43 = vadd.f32 %v19576_v35, %v19665_v22  ;;  %v19921_v10 = vadd.f32 %v19576_v35, %v19669_v37  ;;  %v19925_v42 = vadd.f32 %v19576_v35, %v19673_v32  ;;  %v19929_v46 = vadd.f32 %v19576_v35, %v19677_v5 }
 0xbb9   :  { %v19933_v24 = vadd.f32 %v19576_v35, %v19681_v18  ;;  %v19937_v57 = vadd.f32 %v19576_v35, %v19685_v29  ;;  %v19941_v22 = vadd.f32 %v19576_v35, %v19689_v58  ;;  %v19945_v37 = vadd.f32 %v19576_v35, %v19693_v0 }
 0xbba   :  { %21180 = vst [vmem:[#allocation36_spill] sm:$0xff] %v19929_v46  ;;  %v19949_v32 = vadd.f32 %v19576_v35, %v19697_v53  ;;  %v19953_v5 = vadd.f32 %v19576_v35, %v19701_v14  ;;  %v19957_v18 = vadd.f32 %v19576_v35, %v19705_v45  ;;  %v19961_v29 = vadd.f32 %v19576_v35, %v19709_v30  ;;  %v10388_v45 = vld [vmem:[#allocation3 + $0x8] sm:$0xff]  ;;  %v10390_v30 = vld [vmem:[#allocation3 + $0x18] sm:$0xff] }
 0xbbb   :  { %21181 = vst [vmem:[#allocation35_spill] sm:$0xff] %v19933_v24  ;;  %21182 = vst [vmem:[#allocation38_spill] sm:$0xff] %v19937_v57  ;;  %v19965_v58 = vadd.f32 %v19576_v35, %v19713_v12  ;;  %v19969_v0 = vadd.f32 %v19576_v35, %v19717_v49  ;;  %v19973_v53 = vadd.f32 %v19576_v35, %v19721_v33  ;;  %v10401_v57 = vld [vmem:[#allocation3 + $0x70] sm:$0xff]  ;;  %v21210_v24 = vld [vmem:[#allocation33_spill] sm:$0xff] }
 0xbbc   :  { %21183 = vst [vmem:[#allocation37_spill] sm:$0xff] %v19941_v22  ;;  %21184 = vst [vmem:[#allocation40_spill] sm:$0xff] %v19945_v37  ;;  %v19977_v14 = vadd.f32 %v19576_v35, %v19725_v59  ;;  %v19981_v12 = vadd.f32 %v19576_v35, %v19729_v7  ;;  %v19985_v49 = vadd.f32 %v19576_v35, %v19733_v2  ;;  %v10399_v37 = vld [vmem:[#allocation3 + $0x60] sm:$0xff]  ;;  %v10402_v22 = vld [vmem:[#allocation3 + $0x78] sm:$0xff] }
 0xbbd   :  { %21185 = vst [vmem:[#allocation39_spill] sm:$0xff] %v19949_v32  ;;  %21186 = vst [vmem:[#allocation42_spill] sm:$0xff] %v19953_v5  ;;  %v19989_v33 = vadd.f32 %v19576_v35, %v19737_v15  ;;  %v19993_v59 = vadd.f32 %v19576_v35, %v19741_v40  ;;  %v19997_v7 = vadd.f32 %v19576_v35, %v19745_v51  ;;  %v10397_v5 = vld [vmem:[#allocation3 + $0x50] sm:$0xff]  ;;  %v21202_v32 = vld [vmem:[#allocation29_spill] sm:$0xff] }
 0xbbe   :  { %21187 = vst [vmem:[#allocation41_spill] sm:$0xff] %v19957_v18  ;;  %21188 = vst [vmem:[#allocation44_spill] sm:$0xff] %v19961_v29  ;;  %v10387_v18 = vld [vmem:[#allocation3] sm:$0xff]  ;;  %v10389_v29 = vld [vmem:[#allocation3 + $0x10] sm:$0xff]  ;;  %v20001_v2 = vadd.f32 %v19576_v35, %v19749_v23  ;;  %v20005_v15 = vadd.f32 %v19576_v35, %v19753_v11  ;;  %v20013_v51 = vadd.f32 %v19576_v35, %v21202_v32 }
 0xbbf   :  { %21189 = vst [vmem:[#allocation43_spill] sm:$0xff] %v19965_v58  ;;  %21190 = vst [vmem:[#allocation46_spill] sm:$0xff] %v19969_v0  ;;  %v10394_v0 = vld [vmem:[#allocation3 + $0x38] sm:$0xff]  ;;  %v10393_v58 = vld [vmem:[#allocation3 + $0x30] sm:$0xff]  ;;  %v20029_v32 = vadd.f32 %v19576_v35, %v21210_v24  ;;  %v20045_v24 = vadd.f32 %v19576_v35, %v19793_v38  ;;  %v20060_v46 = vadd.f32 %v10387_v18, %v19809_v63 }
 0xbc0   :  { %21191 = vst [vmem:[#allocation45_spill] sm:$0xff] %v19973_v53  ;;  %21192 = vst [vmem:[#allocation48_spill] sm:$0xff] %v19977_v14  ;;  %v10392_v14 = vld [vmem:[#allocation3 + $0x28] sm:$0xff]  ;;  %v10391_v53 = vld [vmem:[#allocation3 + $0x20] sm:$0xff]  ;;  %v20063_v38 = vadd.f32 %v10388_v45, %v19813_v13  ;;  %v20078_v63 = vadd.f32 %v10393_v58, %v19833_v3  ;;  %v20081_v13 = vadd.f32 %v10394_v0, %v19837_v28 }
 0xbc1   :  { %21193 = vst [vmem:[#allocation47_spill] sm:$0xff] %v19981_v12  ;;  %21194 = vst [vmem:[#allocation49_spill] sm:$0xff] %v19985_v49  ;;  %v10395_v49 = vld [vmem:[#allocation3 + $0x40] sm:$0xff]  ;;  %v10398_v12 = vld [vmem:[#allocation3 + $0x58] sm:$0xff] }
 0xbc2   :  { %21195 = vst [vmem:[#allocation51_spill] sm:$0xff] %v19989_v33  ;;  %21196 = vst [vmem:[#allocation52_spill] sm:$0xff] %v19993_v59  ;;  %v21200_v33 = vld [vmem:[#allocation30_spill] sm:$0xff]  ;;  %v10415_v18 = vld [vmem:[#allocation3 + $0xe0] sm:$0xff]  ;;  %v20084_v45 = vadd.f32 %v10395_v49, %v19841_v48  ;;  %v20102_v48 = vadd.f32 %v10401_v57, %v19865_v56 }
 0xbc3   :  { %21197 = vst [vmem:[#allocation53_spill] sm:$0xff] %v19997_v7  ;;  %21198 = vst [vmem:[#allocation54_spill] sm:$0xff] %v20001_v2  ;;  %v20009_v40 = vadd.f32 %v19576_v35, %v21200_v33  ;;  %v10396_v59 = vld [vmem:[#allocation3 + $0x48] sm:$0xff]  ;;  %v21204_v7 = vld [vmem:[#allocation32_spill] sm:$0xff] }
 0xbc4   :  { %21199 = vst [vmem:[#allocation55_spill] sm:$0xff] %v20005_v15  ;;  %21203 = vst [vmem:[#allocation58_spill] sm:$0xff] %v20013_v51  ;;  %v20017_v23 = vadd.f32 %v19576_v35, %v21204_v7  ;;  %v21206_v2 = vld [vmem:[#allocation31_spill] sm:$0xff]  ;;  %v21208_v15 = vld [vmem:[#allocation34_spill] sm:$0xff]  ;;  %v20033_v7 = vadd.f32 %v19576_v35, %v19781_v50  ;;  %v20049_v50 = vadd.f32 %v19576_v35, %v19797_v1 }
 0xbc5   :  { %21201 = vst [vmem:[#allocation56_spill] sm:$0xff] %v20009_v40  ;;  %v20021_v11 = vadd.f32 %v19576_v35, %v21206_v2  ;;  %v20025_v33 = vadd.f32 %v19576_v35, %v21208_v15  ;;  %v10400_v40 = vld [vmem:[#allocation3 + $0x68] sm:$0xff]  ;;  %21211 = vst [vmem:[#allocation63_spill] sm:$0xff] %v20029_v32  ;;  %v20037_v2 = vadd.f32 %v19576_v35, %v19785_v6  ;;  %v10405_v51 = vld [vmem:[#allocation3 + $0x90] sm:$0xff] }
 0xbc6   :  { %21205 = vst [vmem:[#allocation59_spill] sm:$0xff] %v20017_v23  ;;  %21212 = vst [vmem:[#allocation64_spill] sm:$0xff] %v20033_v7  ;;  %v20041_v15 = vadd.f32 %v19576_v35, %v19789_v4  ;;  %v10406_v23 = vld [vmem:[#allocation3 + $0x98] sm:$0xff]  ;;  %v20053_v6 = vadd.f32 %v19576_v35, %v19801_v55  ;;  %v20057_v4 = vadd.f32 %v19576_v35, %v19805_v27  ;;  %v10409_v32 = vld [vmem:[#allocation3 + $0xb0] sm:$0xff] }
 0xbc7   :  { %21207 = vst [vmem:[#allocation61_spill] sm:$0xff] %v20021_v11  ;;  %21209 = vst [vmem:[#allocation62_spill] sm:$0xff] %v20025_v33  ;;  %v10404_v33 = vld [vmem:[#allocation3 + $0x88] sm:$0xff]  ;;  %v10403_v11 = vld [vmem:[#allocation3 + $0x80] sm:$0xff]  ;;  %v20066_v1 = vadd.f32 %v10389_v29, %v19817_v34  ;;  %v20069_v55 = vadd.f32 %v10390_v30, %v19821_v17  ;;  %v20087_v30 = vadd.f32 %v10396_v59, %v19845_v26 }
 0xbc8   :  { %21213 = vst [vmem:[#allocation65_spill] sm:$0xff] %v20037_v2  ;;  %21214 = vst [vmem:[#allocation66_spill] sm:$0xff] %v20041_v15  ;;  %v10408_v15 = vld [vmem:[#allocation3 + $0xa8] sm:$0xff]  ;;  %v10407_v2 = vld [vmem:[#allocation3 + $0xa0] sm:$0xff]  ;;  %v20105_v26 = vadd.f32 %v10402_v22, %v19869_v20  ;;  %v20111_v49 = vadd.f32 %v10404_v33, %v19877_v62 }
 0xbc9   :  { %21215 = vst [vmem:[#allocation67_spill] sm:$0xff] %v20045_v24  ;;  %21216 = vst [vmem:[#allocation57_spill] sm:$0xff] %v20049_v50  ;;  %v10410_v7 = vld [vmem:[#allocation3 + $0xb8] sm:$0xff]  ;;  %v10411_v50 = vld [vmem:[#allocation3 + $0xc0] sm:$0xff]  ;;  %v20075_v24 = vadd.f32 %v10392_v14, %v19829_v19  ;;  %v20093_v19 = vadd.f32 %v10398_v12, %v19853_v52  ;;  %v20099_v14 = vadd.f32 %v10400_v40, %v19861_v54 }
 0xbca   :  { %21217 = vst [vmem:[#allocation60_spill] sm:$0xff] %v20053_v6  ;;  %21218 = vst [vmem:[#allocation68_spill] sm:$0xff] %v20057_v4  ;;  %v10412_v6 = vld [vmem:[#allocation3 + $0xc8] sm:$0xff]  ;;  %v10414_v35 = vld [vmem:[#allocation3 + $0xd8] sm:$0xff]  ;;  %v20072_v4 = vadd.f32 %v10391_v53, %v19825_v61  ;;  %v20090_v61 = vadd.f32 %v10397_v5, %v19849_v41  ;;  %v20096_v53 = vadd.f32 %v10399_v37, %v19857_v8 }
 0xbcb   :  { %v10413_v27 = vld [vmem:[#allocation3 + $0xd0] sm:$0xff]  ;;  %v10416_v34 = vld [vmem:[#allocation3 + $0xe8] sm:$0xff]  ;;  %v10418_v17 = vld [vmem:[#allocation3 + $0xf8] sm:$0xff]  ;;  %v20108_v12 = vadd.f32 %v10403_v11, %v19873_v21  ;;  %v20114_v8 = vadd.f32 %v10405_v51, %v19881_v9  ;;  %v20117_v54 = vadd.f32 %v10406_v23, %v19885_v31  ;;  %v20120_v20 = vadd.f32 %v10407_v2, %v19889_v16 }
 0xbcc   :  { %v10417_v29 = vld [vmem:[#allocation3 + $0xf0] sm:$0xff]  ;;  %v10420_v3 = vld [vmem:[#allocation3 + $0x108] sm:$0xff]  ;;  %v10419_v58 = vld [vmem:[#allocation3 + $0x100] sm:$0xff]  ;;  %v20123_v22 = vadd.f32 %v10408_v15, %v19893_v36  ;;  %v20126_v21 = vadd.f32 %v10409_v32, %v19897_v44  ;;  %v20129_v62 = vadd.f32 %v10410_v7, %v19901_v25  ;;  %v20132_v31 = vadd.f32 %v10411_v50, %v19905_v47 }
 0xbcd   :  { %v10422_v28 = vld [vmem:[#allocation3 + $0x118] sm:$0xff]  ;;  %v10421_v0 = vld [vmem:[#allocation3 + $0x110] sm:$0xff]  ;;  %v10424_v41 = vld [vmem:[#allocation3 + $0x128] sm:$0xff]  ;;  %v20135_v51 = vadd.f32 %v10412_v6, %v19909_v39  ;;  %v20138_v16 = vadd.f32 %v10413_v27, %v19913_v60  ;;  %v20141_v36 = vadd.f32 %v10414_v35, %v19917_v43  ;;  %v20144_v25 = vadd.f32 %v10415_v18, %v19921_v10 }
 0xbce   :  { %v10423_v5 = vld [vmem:[#allocation3 + $0x120] sm:$0xff]  ;;  %v10426_v52 = vld [vmem:[#allocation3 + $0x138] sm:$0xff]  ;;  %v10425_v56 = vld [vmem:[#allocation3 + $0x130] sm:$0xff]  ;;  %v20147_v33 = vadd.f32 %v10416_v34, %v19925_v42 }
 0xbcf   :  { %v10428_v57 = vld [vmem:[#allocation3 + $0x148] sm:$0xff]  ;;  %v10427_v37 = vld [vmem:[#allocation3 + $0x140] sm:$0xff]  ;;  %v10430_v9 = vld [vmem:[#allocation3 + $0x158] sm:$0xff] }
 0xbd0   :  { %v10429_v59 = vld [vmem:[#allocation3 + $0x150] sm:$0xff]  ;;  %v10432_v40 = vld [vmem:[#allocation3 + $0x168] sm:$0xff]  ;;  %v10431_v44 = vld [vmem:[#allocation3 + $0x160] sm:$0xff] }
 0xbd1   :  { %v10434_v23 = vld [vmem:[#allocation3 + $0x178] sm:$0xff]  ;;  %v10433_v11 = vld [vmem:[#allocation3 + $0x170] sm:$0xff]  ;;  %v10436_v60 = vld [vmem:[#allocation3 + $0x188] sm:$0xff] }
 0xbd2   :  { %v21219_v47 = vld [vmem:[#allocation36_spill] sm:$0xff]  ;;  %v21221_v39 = vld [vmem:[#allocation35_spill] sm:$0xff]  ;;  %v10435_v2 = vld [vmem:[#allocation3 + $0x180] sm:$0xff] }
 0xbd3   :  { %v20150_v32 = vadd.f32 %v10417_v29, %v21219_v47  ;;  %v20153_v7 = vadd.f32 %v10418_v17, %v21221_v39  ;;  %v10438_v15 = vld [vmem:[#allocation3 + $0x198] sm:$0xff]  ;;  %v21223_v43 = vld [vmem:[#allocation38_spill] sm:$0xff]  ;;  %v21224_v6 = vld [vmem:[#allocation37_spill] sm:$0xff] }
 0xbd4   :  { %v20156_v50 = vadd.f32 %v10419_v58, %v21223_v43  ;;  %v20159_v35 = vadd.f32 %v10420_v3, %v21224_v6  ;;  %v21226_v10 = vld [vmem:[#allocation40_spill] sm:$0xff]  ;;  %v21228_v42 = vld [vmem:[#allocation39_spill] sm:$0xff]  ;;  %v10440_v29 = vld [vmem:[#allocation3 + $0x1a8] sm:$0xff] }
 0xbd5   :  { %21220 = vst [vmem:[#allocation69_spill] sm:$0xff] %v20150_v32  ;;  %21222 = vst [vmem:[#allocation70_spill] sm:$0xff] %v20153_v7  ;;  %v20162_v27 = vadd.f32 %v10421_v0, %v21226_v10  ;;  %v20165_v34 = vadd.f32 %v10422_v28, %v21228_v42  ;;  %v10437_v18 = vld [vmem:[#allocation3 + $0x190] sm:$0xff]  ;;  %v10439_v47 = vld [vmem:[#allocation3 + $0x1a0] sm:$0xff] }
 0xbd6   :  { %21225 = vst [vmem:[#allocation71_spill] sm:$0xff] %v20159_v35  ;;  %v21230_v17 = vld [vmem:[#allocation42_spill] sm:$0xff]  ;;  %v21231_v7 = vld [vmem:[#allocation41_spill] sm:$0xff]  ;;  %v21233_v58 = vld [vmem:[#allocation44_spill] sm:$0xff] }
 0xbd7   :  { %21227 = vst [vmem:[#allocation72_spill] sm:$0xff] %v20162_v27  ;;  %21229 = vst [vmem:[#allocation73_spill] sm:$0xff] %v20165_v34  ;;  %v20168_v39 = vadd.f32 %v10423_v5, %v21230_v17  ;;  %v20171_v32 = vadd.f32 %v10424_v41, %v21231_v7  ;;  %v20174_v43 = vadd.f32 %v10425_v56, %v21233_v58  ;;  %v21235_v3 = vld [vmem:[#allocation43_spill] sm:$0xff]  ;;  %v10442_v0 = vld [vmem:[#allocation3 + $0x1b8] sm:$0xff] }
 0xbd8   :  { %v20177_v6 = vadd.f32 %v10426_v52, %v21235_v3  ;;  %v10441_v10 = vld [vmem:[#allocation3 + $0x1b0] sm:$0xff]  ;;  %v10444_v27 = vld [vmem:[#allocation3 + $0x1c8] sm:$0xff]  ;;  %v21238_v34 = vld [vmem:[#allocation45_spill] sm:$0xff] }
 0xbd9   :  { %21232 = vst [vmem:[#allocation74_spill] sm:$0xff] %v20171_v32  ;;  %21234 = vst [vmem:[#allocation75_spill] sm:$0xff] %v20174_v43  ;;  %v21237_v28 = vld [vmem:[#allocation46_spill] sm:$0xff]  ;;  %v20183_v35 = vadd.f32 %v10428_v57, %v21238_v34  ;;  %v21240_v5 = vld [vmem:[#allocation48_spill] sm:$0xff] }
 0xbda   :  { %21236 = vst [vmem:[#allocation76_spill] sm:$0xff] %v20177_v6  ;;  %v20180_v42 = vadd.f32 %v10427_v37, %v21237_v28  ;;  %v20186_v17 = vadd.f32 %v10429_v59, %v21240_v5  ;;  %v21242_v41 = vld [vmem:[#allocation47_spill] sm:$0xff]  ;;  %v10443_v56 = vld [vmem:[#allocation3 + $0x1c0] sm:$0xff]  ;;  %v10446_v58 = vld [vmem:[#allocation3 + $0x1d8] sm:$0xff] }
 0xbdb   :  { %21239 = vst [vmem:[#allocation85_spill] sm:$0xff] %v20183_v35  ;;  %v20189_v7 = vadd.f32 %v10430_v9, %v21242_v41  ;;  %v10445_v43 = vld [vmem:[#allocation3 + $0x1d0] sm:$0xff]  ;;  %v21244_v52 = vld [vmem:[#allocation49_spill] sm:$0xff]  ;;  %v21246_v37 = vld [vmem:[#allocation52_spill] sm:$0xff] }
 0xbdc   :  { %21241 = vst [vmem:[#allocation86_spill] sm:$0xff] %v20186_v17  ;;  %v20192_v3 = vadd.f32 %v10431_v44, %v21244_v52  ;;  %v21245_v6 = vld [vmem:[#allocation51_spill] sm:$0xff]  ;;  %v20198_v28 = vadd.f32 %v10433_v11, %v21246_v37  ;;  %v21248_v57 = vld [vmem:[#allocation53_spill] sm:$0xff]  ;;  %v10448_v59 = vld [vmem:[#allocation3 + $0x1e8] sm:$0xff] }
 0xbdd   :  { %21243 = vst [vmem:[#allocation87_spill] sm:$0xff] %v20189_v7  ;;  %v20195_v32 = vadd.f32 %v10432_v40, %v21245_v6  ;;  %v20201_v34 = vadd.f32 %v10434_v23, %v21248_v57  ;;  %v10447_v5 = vld [vmem:[#allocation3 + $0x1e0] sm:$0xff]  ;;  %v10450_v17 = vld [vmem:[#allocation3 + $0x1f8] sm:$0xff]  ;;  %v21250_v9 = vld [vmem:[#allocation54_spill] sm:$0xff] }
 0xbde   :  { %21247 = vst [vmem:[#allocation88_spill] sm:$0xff] %v20198_v28  ;;  %v20204_v41 = vadd.f32 %v10435_v2, %v21250_v9  ;;  %v21251_v7 = vld [vmem:[#allocation55_spill] sm:$0xff]  ;;  %v21252_v44 = vld [vmem:[#allocation56_spill] sm:$0xff]  ;;  %v21253_v40 = vld [vmem:[#allocation58_spill] sm:$0xff] }
 0xbdf   :  { %21249 = vst [vmem:[#allocation89_spill] sm:$0xff] %v20201_v34  ;;  %v20207_v35 = vadd.f32 %v10436_v60, %v21251_v7  ;;  %v20210_v52 = vadd.f32 %v10437_v18, %v21252_v44  ;;  %v20213_v6 = vadd.f32 %v10438_v15, %v21253_v40  ;;  %v21254_v11 = vld [vmem:[#allocation59_spill] sm:$0xff]  ;;  %v21255_v23 = vld [vmem:[#allocation61_spill] sm:$0xff]  ;;  %v21256_v34 = vld [vmem:[#allocation62_spill] sm:$0xff] }
 0xbe0   :  { %v20216_v37 = vadd.f32 %v10439_v47, %v21254_v11  ;;  %v20219_v57 = vadd.f32 %v10440_v29, %v21255_v23  ;;  %v20222_v28 = vadd.f32 %v10441_v10, %v21256_v34  ;;  %v21257_v2 = vld [vmem:[#allocation63_spill] sm:$0xff]  ;;  %v21258_v60 = vld [vmem:[#allocation64_spill] sm:$0xff]  ;;  %v21259_v18 = vld [vmem:[#allocation65_spill] sm:$0xff] }
 0xbe1   :  { %v20225_v9 = vadd.f32 %v10442_v0, %v21257_v2  ;;  %v20228_v7 = vadd.f32 %v10443_v56, %v21258_v60  ;;  %v20231_v44 = vadd.f32 %v10444_v27, %v21259_v18  ;;  %v21260_v15 = vld [vmem:[#allocation66_spill] sm:$0xff]  ;;  %v21261_v47 = vld [vmem:[#allocation67_spill] sm:$0xff]  ;;  %v21262_v29 = vld [vmem:[#allocation57_spill] sm:$0xff]  ;;  %v10515_v56 = vmax.f32 %v20060_v46, 0.0 }
 0xbe2   :  { %v20234_v40 = vadd.f32 %v10445_v43, %v21260_v15  ;;  %v20237_v11 = vadd.f32 %v10446_v58, %v21261_v47  ;;  %v20240_v23 = vadd.f32 %v10447_v5, %v21262_v29  ;;  %v21263_v10 = vld [vmem:[#allocation60_spill] sm:$0xff]  ;;  %v10516_v27 = vmax.f32 %v20063_v38, 0.0  ;;  %v21269_v47 = vld [vmem:[#allocation73_spill] sm:$0xff] }
 0xbe3   :  { %v20243_v34 = vadd.f32 %v10448_v59, %v21263_v10  ;;  %v21264_v0 = vld [vmem:[#allocation68_spill] sm:$0xff]  ;;  %v10517_v60 = vmax.f32 %v20066_v1, 0.0  ;;  %v10518_v43 = vmax.f32 %v20069_v55, 0.0  ;;  %v10519_v58 = vmax.f32 %v20072_v4, 0.0  ;;  %10579 = vst [vmem:[#allocation9] sm:$0xff] %v10515_v56  ;;  %v21271_v56 = vld [vmem:[#allocation75_spill] sm:$0xff] }
 0xbe4   :  { %v20246_v2 = vadd.f32 %v10450_v17, %v21264_v0  ;;  %v10520_v18 = vmax.f32 %v20075_v24, 0.0  ;;  %v10521_v5 = vmax.f32 %v20078_v63, 0.0  ;;  %v10522_v59 = vmax.f32 %v20081_v13, 0.0  ;;  %10580 = vst [vmem:[#allocation9 + $0x8] sm:$0xff] %v10516_v27  ;;  %v21272_v27 = vld [vmem:[#allocation76_spill] sm:$0xff] }
 0xbe5   :  { %v10523_v15 = vmax.f32 %v20084_v45, 0.0  ;;  %v10524_v17 = vmax.f32 %v20087_v30, 0.0  ;;  %v10525_v46 = vmax.f32 %v20090_v61, 0.0  ;;  %v10526_v38 = vmax.f32 %v20093_v19, 0.0  ;;  %10581 = vst [vmem:[#allocation9 + $0x10] sm:$0xff] %v10517_v60  ;;  %10582 = vst [vmem:[#allocation9 + $0x18] sm:$0xff] %v10518_v43 }
 0xbe6   :  { %v10527_v1 = vmax.f32 %v20096_v53, 0.0  ;;  %10583 = vst [vmem:[#allocation9 + $0x20] sm:$0xff] %v10519_v58  ;;  %v10528_v24 = vmax.f32 %v20099_v14, 0.0  ;;  %v10529_v4 = vmax.f32 %v20102_v48, 0.0  ;;  %v10530_v55 = vmax.f32 %v20105_v26, 0.0  ;;  %10584 = vst [vmem:[#allocation9 + $0x28] sm:$0xff] %v10520_v18 }
 0xbe7   :  { %v10531_v63 = vmax.f32 %v20108_v12, 0.0  ;;  %10585 = vst [vmem:[#allocation9 + $0x30] sm:$0xff] %v10521_v5  ;;  %10586 = vst [vmem:[#allocation9 + $0x38] sm:$0xff] %v10522_v59  ;;  %v10532_v13 = vmax.f32 %v20111_v49, 0.0  ;;  %v10533_v45 = vmax.f32 %v20114_v8, 0.0  ;;  %v10534_v30 = vmax.f32 %v20117_v54, 0.0 }
 0xbe8   :  { %10587 = vst [vmem:[#allocation9 + $0x40] sm:$0xff] %v10523_v15  ;;  %v10535_v61 = vmax.f32 %v20120_v20, 0.0  ;;  %10588 = vst [vmem:[#allocation9 + $0x48] sm:$0xff] %v10524_v17  ;;  %v10536_v19 = vmax.f32 %v20123_v22, 0.0  ;;  %v10537_v53 = vmax.f32 %v20126_v21, 0.0  ;;  %v10538_v14 = vmax.f32 %v20129_v62, 0.0 }
 0xbe9   :  { %10589 = vst [vmem:[#allocation9 + $0x50] sm:$0xff] %v10525_v46  ;;  %10590 = vst [vmem:[#allocation9 + $0x58] sm:$0xff] %v10526_v38  ;;  %v10539_v48 = vmax.f32 %v20132_v31, 0.0  ;;  %v10540_v26 = vmax.f32 %v20135_v51, 0.0  ;;  %v10541_v12 = vmax.f32 %v20138_v16, 0.0  ;;  %v10542_v49 = vmax.f32 %v20141_v36, 0.0 }
 0xbea   :  { %10591 = vst [vmem:[#allocation9 + $0x60] sm:$0xff] %v10527_v1  ;;  %10592 = vst [vmem:[#allocation9 + $0x68] sm:$0xff] %v10528_v24  ;;  %v10543_v8 = vmax.f32 %v20144_v25, 0.0  ;;  %v10544_v54 = vmax.f32 %v20147_v33, 0.0  ;;  %v21265_v20 = vld [vmem:[#allocation69_spill] sm:$0xff]  ;;  %v21266_v21 = vld [vmem:[#allocation70_spill] sm:$0xff] }
 0xbeb   :  { %10593 = vst [vmem:[#allocation9 + $0x70] sm:$0xff] %v10529_v4  ;;  %10594 = vst [vmem:[#allocation9 + $0x78] sm:$0xff] %v10530_v55  ;;  %v10545_v22 = vmax.f32 %v21265_v20, 0.0  ;;  %v10546_v62 = vmax.f32 %v21266_v21, 0.0  ;;  %v10547_v31 = vmax.f32 %v20156_v50, 0.0  ;;  %v21267_v51 = vld [vmem:[#allocation71_spill] sm:$0xff] }
 0xbec   :  { %10595 = vst [vmem:[#allocation9 + $0x80] sm:$0xff] %v10531_v63  ;;  %10596 = vst [vmem:[#allocation9 + $0x88] sm:$0xff] %v10532_v13  ;;  %v10548_v16 = vmax.f32 %v21267_v51, 0.0  ;;  %v21268_v36 = vld [vmem:[#allocation72_spill] sm:$0xff]  ;;  %v10550_v29 = vmax.f32 %v21269_v47, 0.0  ;;  %v10551_v10 = vmax.f32 %v20168_v39, 0.0 }
 0xbed   :  { %10597 = vst [vmem:[#allocation9 + $0x90] sm:$0xff] %v10533_v45  ;;  %10598 = vst [vmem:[#allocation9 + $0x98] sm:$0xff] %v10534_v30  ;;  %v10549_v25 = vmax.f32 %v21268_v36, 0.0  ;;  %v21270_v33 = vld [vmem:[#allocation74_spill] sm:$0xff]  ;;  %v10553_v50 = vmax.f32 %v21271_v56, 0.0  ;;  %v10554_v60 = vmax.f32 %v21272_v27, 0.0 }
 0xbee   :  { %10599 = vst [vmem:[#allocation9 + $0xa0] sm:$0xff] %v10535_v61  ;;  %10600 = vst [vmem:[#allocation9 + $0xa8] sm:$0xff] %v10536_v19  ;;  %v10552_v0 = vmax.f32 %v21270_v33, 0.0  ;;  %v10555_v43 = vmax.f32 %v20180_v42, 0.0  ;;  %v21273_v58 = vld [vmem:[#allocation85_spill] sm:$0xff]  ;;  %v21274_v5 = vld [vmem:[#allocation86_spill] sm:$0xff] }
 0xbef   :  { %10601 = vst [vmem:[#allocation9 + $0xb0] sm:$0xff] %v10537_v53  ;;  %10602 = vst [vmem:[#allocation9 + $0xb8] sm:$0xff] %v10538_v14  ;;  %v10556_v18 = vmax.f32 %v21273_v58, 0.0  ;;  %v10557_v39 = vmax.f32 %v21274_v5, 0.0  ;;  %v21275_v59 = vld [vmem:[#allocation87_spill] sm:$0xff]  ;;  %v10559_v17 = vmax.f32 %v20192_v3, 0.0 }
 0xbf0   :  { %10603 = vst [vmem:[#allocation9 + $0xc0] sm:$0xff] %v10539_v48  ;;  %10604 = vst [vmem:[#allocation9 + $0xc8] sm:$0xff] %v10540_v26  ;;  %v10558_v15 = vmax.f32 %v21275_v59, 0.0  ;;  %v10560_v46 = vmax.f32 %v20195_v32, 0.0  ;;  %v21276_v38 = vld [vmem:[#allocation88_spill] sm:$0xff]  ;;  %v21277_v1 = vld [vmem:[#allocation89_spill] sm:$0xff] }
 0xbf1   :  { %10605 = vst [vmem:[#allocation9 + $0xd0] sm:$0xff] %v10541_v12  ;;  %10606 = vst [vmem:[#allocation9 + $0xd8] sm:$0xff] %v10542_v49  ;;  %v10561_v42 = vmax.f32 %v21276_v38, 0.0  ;;  %v10562_v24 = vmax.f32 %v21277_v1, 0.0  ;;  %v10563_v4 = vmax.f32 %v20204_v41, 0.0  ;;  %v10564_v55 = vmax.f32 %v20207_v35, 0.0 }
 0xbf2   :  { %10607 = vst [vmem:[#allocation9 + $0xe0] sm:$0xff] %v10543_v8  ;;  %10608 = vst [vmem:[#allocation9 + $0xe8] sm:$0xff] %v10544_v54  ;;  %v10565_v3 = vmax.f32 %v20210_v52, 0.0  ;;  %v10566_v63 = vmax.f32 %v20213_v6, 0.0  ;;  %v10567_v13 = vmax.f32 %v20216_v37, 0.0  ;;  %v10568_v32 = vmax.f32 %v20219_v57, 0.0 }
 0xbf3   :  { %10609 = vst [vmem:[#allocation9 + $0xf0] sm:$0xff] %v10545_v22  ;;  %10610 = vst [vmem:[#allocation9 + $0xf8] sm:$0xff] %v10546_v62  ;;  %v10569_v41 = vmax.f32 %v20222_v28, 0.0  ;;  %v10570_v45 = vmax.f32 %v20225_v9, 0.0  ;;  %v10571_v35 = vmax.f32 %v20228_v7, 0.0  ;;  %v10572_v52 = vmax.f32 %v20231_v44, 0.0 }
 0xbf4   :  { %10611 = vst [vmem:[#allocation9 + $0x100] sm:$0xff] %v10547_v31  ;;  %10612 = vst [vmem:[#allocation9 + $0x108] sm:$0xff] %v10548_v16  ;;  %v10573_v6 = vmax.f32 %v20234_v40, 0.0  ;;  %v10574_v37 = vmax.f32 %v20237_v11, 0.0  ;;  %v10575_v30 = vmax.f32 %v20240_v23, 0.0  ;;  %v10576_v28 = vmax.f32 %v20243_v34, 0.0 }
 0xbf5   :  { %10613 = vst [vmem:[#allocation9 + $0x110] sm:$0xff] %v10549_v25  ;;  %10614 = vst [vmem:[#allocation9 + $0x118] sm:$0xff] %v10550_v29  ;;  %v10578_v57 = vmax.f32 %v20246_v2, 0.0 }
 0xbf6   :  { %10615 = vst [vmem:[#allocation9 + $0x120] sm:$0xff] %v10551_v10  ;;  %10616 = vst [vmem:[#allocation9 + $0x128] sm:$0xff] %v10552_v0 }
 0xbf7   :  { %10617 = vst [vmem:[#allocation9 + $0x130] sm:$0xff] %v10553_v50  ;;  %10618 = vst [vmem:[#allocation9 + $0x138] sm:$0xff] %v10554_v60 }
 0xbf8   :  { %10619 = vst [vmem:[#allocation9 + $0x140] sm:$0xff] %v10555_v43  ;;  %10620 = vst [vmem:[#allocation9 + $0x148] sm:$0xff] %v10556_v18 }
 0xbf9   :  { %10621 = vst [vmem:[#allocation9 + $0x150] sm:$0xff] %v10557_v39  ;;  %10622 = vst [vmem:[#allocation9 + $0x158] sm:$0xff] %v10558_v15 }
 0xbfa   :  { %10623 = vst [vmem:[#allocation9 + $0x160] sm:$0xff] %v10559_v17  ;;  %10624 = vst [vmem:[#allocation9 + $0x168] sm:$0xff] %v10560_v46 }
 0xbfb   :  { %10625 = vst [vmem:[#allocation9 + $0x170] sm:$0xff] %v10561_v42  ;;  %10626 = vst [vmem:[#allocation9 + $0x178] sm:$0xff] %v10562_v24 }
 0xbfc   :  { %10627 = vst [vmem:[#allocation9 + $0x180] sm:$0xff] %v10563_v4  ;;  %10628 = vst [vmem:[#allocation9 + $0x188] sm:$0xff] %v10564_v55 }
 0xbfd   :  { %10629 = vst [vmem:[#allocation9 + $0x190] sm:$0xff] %v10565_v3  ;;  %10630 = vst [vmem:[#allocation9 + $0x198] sm:$0xff] %v10566_v63 }
 0xbfe   :  { %10631 = vst [vmem:[#allocation9 + $0x1a0] sm:$0xff] %v10567_v13  ;;  %10632 = vst [vmem:[#allocation9 + $0x1a8] sm:$0xff] %v10568_v32 }
 0xbff   :  { %10633 = vst [vmem:[#allocation9 + $0x1b0] sm:$0xff] %v10569_v41  ;;  %10634 = vst [vmem:[#allocation9 + $0x1b8] sm:$0xff] %v10570_v45 }
 0xc00   :  { %10635 = vst [vmem:[#allocation9 + $0x1c0] sm:$0xff] %v10571_v35  ;;  %10636 = vst [vmem:[#allocation9 + $0x1c8] sm:$0xff] %v10572_v52 }
 0xc01   :  { %10637 = vst [vmem:[#allocation9 + $0x1d0] sm:$0xff] %v10573_v6  ;;  %10638 = vst [vmem:[#allocation9 + $0x1d8] sm:$0xff] %v10574_v37 }
 0xc02   :  { %10639 = vst [vmem:[#allocation9 + $0x1e0] sm:$0xff] %v10575_v30  ;;  %10640 = vst [vmem:[#allocation9 + $0x1e8] sm:$0xff] %v10576_v28 }
 0xc03   :  { %10642 = vst [vmem:[#allocation9 + $0x1f8] sm:$0xff] %v10578_v57 }
 0xc04   :  { %16096 = shalt.err (!%p16093_p0)
}
 0xc05   :  { %s16097_s24 = scalar_lea.hbm %s20333_s7, 8192 }
 0xc06   :  { %p16098_p1 = scmp.ne.s32.totalorder %s20333_s7, %s16097_s24  ;;  %p16101_p2 = scmp.lt.u32.totalorder %s16097_s24, %s20333_s7 }
 0xc08   :  { %p16103_p3 = pnand %p16101_p2, %p16098_p1 }
 0xc0a   :  { %16106 = shalt.err (!%p16103_p3)
}
 0xc0b   :  { %10654 = dma.vmem_to_hbm [thread:$0]  %s10649_s6, 8192, %s20333_s7, [#allocation5], %s16115_s13, %s16115_s13, %s16116_s14  }
 0xc0c   :  { %16111 = dma.done.wait [#allocation5], 8192  }
 0xc0d   :  { %16112 = vsyncadd [#allocation5], 4294959104 }
 0xc0e   :  { %10658 = vsyncpa [#allocation4], 1 }
 0xc0f   :  { %10659 = vsyncpa [#allocation7], 1 }
 0xc10   :  { %10660 = vsyncpa [#allocation5], 1 }

</bundles_post_ra>
